<compile_context>
chip_gen: v7x
topology: tpu7x:2x2x1
jax: 0.10.0
libtpu: 0.0.40
codegen_flags: <defaults>
</compile_context>

<pallas_src>
import functools

import jax
import jax.numpy as jnp
from jax.experimental import pallas as pl
from jax.experimental.pallas import tpu as pltpu


def stn3d_fused_kernel(x_ref, w1_ref, b1_ref, w2_ref, b2_ref, w3_ref, b3_ref,
                       w4_ref, b4_ref, w5_ref, b5_ref, w6_ref, b6_ref,
                       out_ref, feat_ref, *, tile_n, n_channels, batch_block):
    """Point MLP (conv1..3) + global max-pool + FC head, fused in one kernel.

    x_ref    : (Bb, TN, C) f32     one point tile for Bb batch elements
    w1/b1    : (C, 64) f32 / (1, 64) f32
    w2/b2    : (64, 128) bf16 / (1, 128) f32
    w3/b3    : (128, 1024) bf16 / (1, 1024) f32
    w4/b4    : (1024, 512) bf16 / (1, 512) f32
    w5/b5    : (512, 256) bf16 / (1, 256) f32
    w6/b6    : (256, 9) f32 / (1, 9) f32 (3x3 identity folded into b6)
    out_ref  : (1, Bb, 9) f32      flattened 3x3 transform per batch element
    feat_ref : (Bb, 1024) f32 VMEM scratch: running max of conv3 PRE-bias/ReLU
    """
    nt = pl.program_id(1)
    last = pl.num_programs(1) - 1

    # Stack the Bb batch elements along the row (sublane) axis -> one big MXU M.
    if batch_block == 1:
        x = x_ref[0]                                               # (TN, C)
    else:
        x = jnp.concatenate([x_ref[i] for i in range(batch_block)], axis=0)

    # conv1: contraction depth is tiny (K = channel) -> VPU broadcast FMAs,
    # keeping the MXU free for the big layers.
    if n_channels <= 8:
        h1 = x[:, 0:1] * w1_ref[0:1, :] + b1_ref[...]
        for c in range(1, n_channels):
            h1 = h1 + x[:, c:c + 1] * w1_ref[c:c + 1, :]
    else:
        h1 = jnp.dot(x, w1_ref[...],
                     preferred_element_type=jnp.float32) + b1_ref[...]
    h1 = jnp.maximum(h1, 0.0)                                      # (rows, 64)

    # conv2: bf16 operands on the MXU, f32 accumulation, f32 bias + ReLU.
    h2 = jnp.maximum(
        jnp.dot(h1.astype(jnp.bfloat16), w2_ref[...],
                preferred_element_type=jnp.float32) + b2_ref[...], 0.0)

    # conv3 WITHOUT bias / ReLU: both are hoisted past the max-pool (exact).
    h3 = jnp.dot(h2.astype(jnp.bfloat16), w3_ref[...],
                 preferred_element_type=jnp.float32)               # (rows, 1024)

    # Per-batch-element max over this point tile (static sublane slices).
    rows = [jnp.max(h3[b * tile_n:(b + 1) * tile_n, :], axis=0, keepdims=True)
            for b in range(batch_block)]
    tile_max = rows[0] if batch_block == 1 else jnp.concatenate(rows, axis=0)

    # Running max across point tiles (pre-ReLU maxima may be negative -> -inf).
    @pl.when(nt == 0)
    def _init():
        feat_ref[...] = jnp.full(feat_ref.shape, -jnp.inf, feat_ref.dtype)

    feat_ref[...] = jnp.maximum(feat_ref[...], tile_max)

    # FC head runs once per batch block, after the last point tile.
    @pl.when(nt == last)
    def _head():
        f = jnp.maximum(feat_ref[...] + b3_ref[...], 0.0)          # hoisted bias+ReLU
        g = jnp.maximum(
            jnp.dot(f.astype(jnp.bfloat16), w4_ref[...],
                    preferred_element_type=jnp.float32) + b4_ref[...], 0.0)
        g = jnp.maximum(
            jnp.dot(g.astype(jnp.bfloat16), w5_ref[...],
                    preferred_element_type=jnp.float32) + b5_ref[...], 0.0)
        # fc3 bias already contains the flattened 3x3 identity (folded in wrapper).
        out_ref[0] = (jnp.dot(g, w6_ref[...], preferred_element_type=jnp.float32)
                      + b6_ref[...]).astype(out_ref.dtype)


def _fold_bn(W, b, gamma, beta, mean, var, eps=1e-5):
    """Fold eval-mode BatchNorm1d into the preceding (W, b). W: (in, out)."""
    s = gamma / jnp.sqrt(var + eps)
    return W * s[None, :], (b - mean) * s + beta


def stn3d_forward(x_ncw, params, *, tile_n=1024, max_rows_per_step=2048):
    """x_ncw: (B, C, N) float32 (PyTorch Conv1d layout). Returns (B, 3, 3)."""
    B, C, N = x_ncw.shape
    (w1, b1), (w2, b2), (w3, b3), (w4, b4), (w5, b5), (w6, b6) = params

    # (B, C, N) -> (B, N, C): Conv1d(k=1) becomes a matmul over the channel axis.
    x = jnp.transpose(x_ncw, (0, 2, 1))

    # Points tile: multiple of 8 (sublane-aligned), capped so total rows per
    # step stay <= max_rows_per_step (keeps the f32 (rows,1024) intermediate
    # around 8 MiB -- fits comfortably in v7x's smaller VMEM).
    TN = min(int(tile_n), N)
    TN = max(8, -(-TN // 8) * 8)
    TN = min(TN, max_rows_per_step)
    # Pad the points axis to a multiple of TN by replicating the last point
    # (exactly max-pool preserving -> no in-kernel tail mask needed).
    N_pad = -(-N // TN) * TN
    if N_pad != N:
        x = jnp.concatenate(
            [x, jnp.repeat(x[:, N - 1:N, :], N_pad - N, axis=1)], axis=1)
    NT = N_pad // TN

    # Batch block: largest divisor of B with Bb*TN <= max_rows_per_step, while
    # keeping >= 2 blocks on the "parallel" axis (v7x has 2 TensorCores).
    Bb = 1
    for cand in range(2, B + 1):
        if B % cand != 0 or cand * TN > max_rows_per_step:
            continue
        if B >= 2 and B // cand < 2:
            continue
        Bb = cand
    NB = B // Bb

    # bf16 MXU operands for the big layers; biases as (1, K) rows.
    w2b, w3b = w2.astype(jnp.bfloat16), w3.astype(jnp.bfloat16)
    w4b, w5b = w4.astype(jnp.bfloat16), w5.astype(jnp.bfloat16)
    b1r, b2r, b3r = b1.reshape(1, -1), b2.reshape(1, -1), b3.reshape(1, -1)
    b4r, b5r = b4.reshape(1, -1), b5.reshape(1, -1)
    iden = jnp.eye(3, dtype=jnp.float32).reshape(9)
    b6r = (b6 + iden).reshape(1, -1)                 # fold identity into fc3 bias

    const = lambda arr: pl.BlockSpec(arr.shape, lambda bb, nt: (0, 0))

    flops = (2 * B * N_pad * (C * 64 + 64 * 128 + 128 * 1024)
             + 2 * B * (1024 * 512 + 512 * 256 + 256 * 9))
    bytes_accessed = (x.size * 4 + w1.size * 4 + w6.size * 4
                      + (w2b.size + w3b.size + w4b.size + w5b.size) * 2
                      + (b1r.size + b2r.size + b3r.size + b4r.size
                         + b5r.size + b6r.size) * 4
                      + B * 9 * 4)

    out3 = pl.pallas_call(
        functools.partial(stn3d_fused_kernel, tile_n=TN, n_channels=C,
                          batch_block=Bb),
        out_shape=jax.ShapeDtypeStruct((NB, Bb, 9), jnp.float32),
        grid=(NB, NT),
        in_specs=[
            pl.BlockSpec((Bb, TN, C), lambda bb, nt: (bb, nt, 0)),
            const(w1), const(b1r), const(w2b), const(b2r), const(w3b),
            const(b3r), const(w4b), const(b4r), const(w5b), const(b5r),
            const(w6), const(b6r),
        ],
        out_specs=pl.BlockSpec((1, Bb, 9), lambda bb, nt: (bb, 0, 0)),
        scratch_shapes=[pltpu.VMEM((Bb, 1024), jnp.float32)],
        compiler_params=pltpu.CompilerParams(
            dimension_semantics=("parallel", "arbitrary"),
            vmem_limit_bytes=40 * 1024 * 1024),
        cost_estimate=pl.CostEstimate(flops=int(flops), transcendentals=0,
                                      bytes_accessed=int(bytes_accessed)),
    )(x, w1, b1r, w2b, b2r, w3b, b3r, w4b, b4r, w5b, b5r, w6, b6r)

    return out3.reshape(B, 9).reshape(B, 3, 3)


def make_params(key, channel):
    """Deterministic synthetic parameters. Weights are (in, out) = W_torch.T."""
    dims = [(channel, 64), (64, 128), (128, 1024),      # conv1..3 (k=1)
            (1024, 512), (512, 256), (256, 9)]          # fc1..3
    bn_for = [True, True, True, True, True, False]      # bn1..5, fc3 has no BN
    params = []
    for i, ((din, dout), has_bn) in enumerate(zip(dims, bn_for)):
        k = jax.random.fold_in(key, i)
        kw, kb, kg, kbe, km, kv = jax.random.split(k, 6)
        W = 0.1 * jax.random.normal(kw, (din, dout), jnp.float32)
        b = 0.05 * jax.random.normal(kb, (dout,), jnp.float32)
        if has_bn:
            gamma = jax.random.uniform(kg, (dout,), jnp.float32, 0.5, 1.5)
            beta = 0.1 * jax.random.normal(kbe, (dout,), jnp.float32)
            mean = 0.1 * jax.random.normal(km, (dout,), jnp.float32)
            var = jax.random.uniform(kv, (dout,), jnp.float32, 0.5, 1.5)
            W, b = _fold_bn(W, b, gamma, beta, mean, var)
        params.append((W, b))
    return params


def stn3d_reference(x_ncw, params):
    """Pure-JAX reference mirroring the kernel's eval-mode numerics (bf16 MXU ops)."""
    (w1, b1), (w2, b2), (w3, b3), (w4, b4), (w5, b5), (w6, b6) = params
    x = jnp.transpose(x_ncw, (0, 2, 1))                              # (B, N, C)
    h = jax.nn.relu(x @ w1 + b1)
    h = jax.nn.relu(jnp.dot(h.astype(jnp.bfloat16), w2.astype(jnp.bfloat16),
                            preferred_element_type=jnp.float32) + b2)
    h = jax.nn.relu(jnp.dot(h.astype(jnp.bfloat16), w3.astype(jnp.bfloat16),
                            preferred_element_type=jnp.float32) + b3)
    feat = jnp.max(h, axis=1)                                        # (B, 1024)
    g = jax.nn.relu(jnp.dot(feat.astype(jnp.bfloat16), w4.astype(jnp.bfloat16),
                            preferred_element_type=jnp.float32) + b4)
    g = jax.nn.relu(jnp.dot(g.astype(jnp.bfloat16), w5.astype(jnp.bfloat16),
                            preferred_element_type=jnp.float32) + b5)
    y = g @ w6 + b6
    iden = jnp.eye(3, dtype=jnp.float32).reshape(1, 9)
    return (y + iden).reshape(-1, 3, 3)


if __name__ == "__main__":
    key = jax.random.PRNGKey(0)
    B, C, N = 4, 3, 500                                  # (batch, channel, n_points)
    kx, kp = jax.random.split(key)
    x = jax.random.normal(kx, (B, C, N), jnp.float32)    # PyTorch NCW input layout
    params = make_params(kp, C)

    # tile_n=256 with N=500 -> edge-padded to 512, 2 point tiles, 2 batch
    # elements per step: exercises the running max, padding, and batch blocking.
    out = stn3d_forward(x, params, tile_n=256)
    out = jax.block_until_ready(out)

    ref = stn3d_reference(x, params)
    assert out.shape == (B, 3, 3)
    assert jnp.allclose(out, ref, atol=5e-3, rtol=5e-3), "mismatch vs reference"

    print("KERNEL_OK")
</pallas_src>

<mosaic_0001>
module attributes {stable_mosaic.version = 11 : i64} {
  func.func @stn3d_fused_kernel(%arg0: i32, %arg1: i32, %arg2: memref<2x256x3xf32, #tpu.memory_space<vmem>>, %arg3: memref<3x64xf32, #tpu.memory_space<vmem>>, %arg4: memref<1x64xf32, #tpu.memory_space<vmem>>, %arg5: memref<64x128xbf16, #tpu.memory_space<vmem>>, %arg6: memref<1x128xf32, #tpu.memory_space<vmem>>, %arg7: memref<128x1024xbf16, #tpu.memory_space<vmem>>, %arg8: memref<1x1024xf32, #tpu.memory_space<vmem>>, %arg9: memref<1024x512xbf16, #tpu.memory_space<vmem>>, %arg10: memref<1x512xf32, #tpu.memory_space<vmem>>, %arg11: memref<512x256xbf16, #tpu.memory_space<vmem>>, %arg12: memref<1x256xf32, #tpu.memory_space<vmem>>, %arg13: memref<256x9xf32, #tpu.memory_space<vmem>>, %arg14: memref<1x9xf32, #tpu.memory_space<vmem>>, %arg15: memref<1x2x9xf32, #tpu.memory_space<vmem>>, %arg16: memref<2x1024xf32, #tpu.memory_space<vmem>>) attributes {dimension_semantics = [#tpu.dimension_semantics<parallel>, #tpu.dimension_semantics<arbitrary>], iteration_bounds = array<i64: 2, 2>, scalar_prefetch = 0 : i64, scratch_operands = 1 : i64, tpu.core_type = #tpu.core_type<tc>, window_params = [{transform_indices = @transform_0, window_bounds = array<i64: 2, 256, 3>}, {pipeline_mode = #tpu.pipeline_mode<synchronous>, transform_indices = @transform_1, window_bounds = array<i64: 3, 64>}, {pipeline_mode = #tpu.pipeline_mode<synchronous>, transform_indices = @transform_2, window_bounds = array<i64: 1, 64>}, {pipeline_mode = #tpu.pipeline_mode<synchronous>, transform_indices = @transform_3, window_bounds = array<i64: 64, 128>}, {pipeline_mode = #tpu.pipeline_mode<synchronous>, transform_indices = @transform_4, window_bounds = array<i64: 1, 128>}, {pipeline_mode = #tpu.pipeline_mode<synchronous>, transform_indices = @transform_5, window_bounds = array<i64: 128, 1024>}, {pipeline_mode = #tpu.pipeline_mode<synchronous>, transform_indices = @transform_6, window_bounds = array<i64: 1, 1024>}, {pipeline_mode = #tpu.pipeline_mode<synchronous>, transform_indices = @transform_7, window_bounds = array<i64: 1024, 512>}, {pipeline_mode = #tpu.pipeline_mode<synchronous>, transform_indices = @transform_8, window_bounds = array<i64: 1, 512>}, {pipeline_mode = #tpu.pipeline_mode<synchronous>, transform_indices = @transform_9, window_bounds = array<i64: 512, 256>}, {pipeline_mode = #tpu.pipeline_mode<synchronous>, transform_indices = @transform_10, window_bounds = array<i64: 1, 256>}, {pipeline_mode = #tpu.pipeline_mode<synchronous>, transform_indices = @transform_11, window_bounds = array<i64: 256, 9>}, {pipeline_mode = #tpu.pipeline_mode<synchronous>, transform_indices = @transform_12, window_bounds = array<i64: 1, 9>}, {transform_indices = @transform_13, window_bounds = array<i64: 1, 2, 9>}]} {
    %c0 = arith.constant 0 : index
    %c0_0 = arith.constant 0 : index
    %c0_1 = arith.constant 0 : index
    %0 = vector.load %arg2[%c0, %c0_0, %c0_1] : memref<2x256x3xf32, #tpu.memory_space<vmem>>, vector<1x256x3xf32>
    %1 = vector.shape_cast %0 : vector<1x256x3xf32> to vector<256x3xf32>
    %c1 = arith.constant 1 : index
    %c0_2 = arith.constant 0 : index
    %c0_3 = arith.constant 0 : index
    %2 = vector.load %arg2[%c1, %c0_2, %c0_3] : memref<2x256x3xf32, #tpu.memory_space<vmem>>, vector<1x256x3xf32>
    %3 = vector.shape_cast %2 : vector<1x256x3xf32> to vector<256x3xf32>
    %4 = tpu.concatenate %1, %3 in 0 : vector<256x3xf32>, vector<256x3xf32> -> vector<512x3xf32>
    %5 = vector.extract_strided_slice %4 {offsets = [0, 0], sizes = [512, 1], strides = [1, 1]} : vector<512x3xf32> to vector<512x1xf32>
    %c0_4 = arith.constant 0 : index
    %c0_5 = arith.constant 0 : index
    %6 = vector.load %arg3[%c0_4, %c0_5] : memref<3x64xf32, #tpu.memory_space<vmem>>, vector<1x64xf32>
    %7 = vector.broadcast %5 : vector<512x1xf32> to vector<512x64xf32>
    %8 = vector.broadcast %6 : vector<1x64xf32> to vector<512x64xf32>
    %9 = arith.mulf %7, %8 : vector<512x64xf32>
    %c0_6 = arith.constant 0 : index
    %c0_7 = arith.constant 0 : index
    %10 = vector.load %arg4[%c0_6, %c0_7] : memref<1x64xf32, #tpu.memory_space<vmem>>, vector<1x64xf32>
    %11 = vector.broadcast %10 : vector<1x64xf32> to vector<512x64xf32>
    %12 = arith.addf %9, %11 : vector<512x64xf32>
    %13 = vector.extract_strided_slice %4 {offsets = [0, 1], sizes = [512, 1], strides = [1, 1]} : vector<512x3xf32> to vector<512x1xf32>
    %c1_8 = arith.constant 1 : index
    %c0_9 = arith.constant 0 : index
    %14 = vector.load %arg3[%c1_8, %c0_9] : memref<3x64xf32, #tpu.memory_space<vmem>>, vector<1x64xf32>
    %15 = vector.broadcast %13 : vector<512x1xf32> to vector<512x64xf32>
    %16 = vector.broadcast %14 : vector<1x64xf32> to vector<512x64xf32>
    %17 = arith.mulf %15, %16 : vector<512x64xf32>
    %18 = arith.addf %12, %17 : vector<512x64xf32>
    %19 = vector.extract_strided_slice %4 {offsets = [0, 2], sizes = [512, 1], strides = [1, 1]} : vector<512x3xf32> to vector<512x1xf32>
    %c2 = arith.constant 2 : index
    %c0_10 = arith.constant 0 : index
    %20 = vector.load %arg3[%c2, %c0_10] : memref<3x64xf32, #tpu.memory_space<vmem>>, vector<1x64xf32>
    %21 = vector.broadcast %19 : vector<512x1xf32> to vector<512x64xf32>
    %22 = vector.broadcast %20 : vector<1x64xf32> to vector<512x64xf32>
    %23 = arith.mulf %21, %22 : vector<512x64xf32>
    %24 = arith.addf %18, %23 : vector<512x64xf32>
    %cst = arith.constant 0.000000e+00 : f32
    %25 = vector.broadcast %cst : f32 to vector<512x64xf32>
    %26 = arith.maximumf %24, %25 : vector<512x64xf32>
    %27 = arith.truncf %26 : vector<512x64xf32> to vector<512x64xbf16>
    %c0_11 = arith.constant 0 : index
    %c0_12 = arith.constant 0 : index
    %28 = vector.load %arg5[%c0_11, %c0_12] : memref<64x128xbf16, #tpu.memory_space<vmem>>, vector<64x128xbf16>
    %cst_13 = arith.constant dense<0.000000e+00> : vector<512x128xf32>
    %29 = tpu.matmul %27, %28, %cst_13 {dimension_numbers = #tpu.dot_dimension_numbers<[1], [0], [0], [1], [0, 0, 1, 1], [], []>} : vector<512x64xbf16>, vector<64x128xbf16>, vector<512x128xf32> -> vector<512x128xf32>
    %c0_14 = arith.constant 0 : index
    %c0_15 = arith.constant 0 : index
    %30 = vector.load %arg6[%c0_14, %c0_15] : memref<1x128xf32, #tpu.memory_space<vmem>>, vector<1x128xf32>
    %31 = vector.broadcast %30 : vector<1x128xf32> to vector<512x128xf32>
    %32 = arith.addf %29, %31 : vector<512x128xf32>
    %cst_16 = arith.constant 0.000000e+00 : f32
    %33 = vector.broadcast %cst_16 : f32 to vector<512x128xf32>
    %34 = arith.maximumf %32, %33 : vector<512x128xf32>
    %35 = arith.truncf %34 : vector<512x128xf32> to vector<512x128xbf16>
    %c0_17 = arith.constant 0 : index
    %c0_18 = arith.constant 0 : index
    %36 = vector.load %arg7[%c0_17, %c0_18] : memref<128x1024xbf16, #tpu.memory_space<vmem>>, vector<128x1024xbf16>
    %cst_19 = arith.constant dense<0.000000e+00> : vector<512x1024xf32>
    %37 = tpu.matmul %35, %36, %cst_19 {dimension_numbers = #tpu.dot_dimension_numbers<[1], [0], [0], [1], [0, 0, 1, 1], [], []>} : vector<512x128xbf16>, vector<128x1024xbf16>, vector<512x1024xf32> -> vector<512x1024xf32>
    %38 = vector.extract_strided_slice %37 {offsets = [0, 0], sizes = [256, 1024], strides = [1, 1]} : vector<512x1024xf32> to vector<256x1024xf32>
    %cst_20 = arith.constant dense<0xFF800000> : vector<1024xf32>
    %39 = vector.multi_reduction <maximumf>, %38, %cst_20 [0] : vector<256x1024xf32> to vector<1024xf32>
    %40 = vector.shape_cast %39 : vector<1024xf32> to vector<1x1024xf32>
    %41 = vector.extract_strided_slice %37 {offsets = [256, 0], sizes = [256, 1024], strides = [1, 1]} : vector<512x1024xf32> to vector<256x1024xf32>
    %cst_21 = arith.constant dense<0xFF800000> : vector<1024xf32>
    %42 = vector.multi_reduction <maximumf>, %41, %cst_21 [0] : vector<256x1024xf32> to vector<1024xf32>
    %43 = vector.shape_cast %42 : vector<1024xf32> to vector<1x1024xf32>
    %44 = tpu.concatenate %40, %43 in 0 : vector<1x1024xf32>, vector<1x1024xf32> -> vector<2x1024xf32>
    %c0_i32 = arith.constant 0 : i32
    %45 = arith.cmpi eq, %arg1, %c0_i32 : i32
    %46 = arith.extui %45 : i1 to i32
    %c0_i32_22 = arith.constant 0 : i32
    %47 = arith.cmpi ne, %46, %c0_i32_22 : i32
    scf.if %47 {
      %cst_28 = arith.constant 0xFF800000 : f32
      %54 = vector.broadcast %cst_28 : f32 to vector<2x1024xf32>
      %c0_29 = arith.constant 0 : index
      %c0_30 = arith.constant 0 : index
      %55 = vector.load %arg16[%c0_29, %c0_30] : memref<2x1024xf32, #tpu.memory_space<vmem>>, vector<2x1024xf32>
      tpu.vector_store %arg16[%c0_29, %c0_30], %54 {strides = array<i32>} : memref<2x1024xf32, #tpu.memory_space<vmem>>, vector<2x1024xf32>,
    } else {
    }
    %c0_23 = arith.constant 0 : index
    %c0_24 = arith.constant 0 : index
    %48 = vector.load %arg16[%c0_23, %c0_24] : memref<2x1024xf32, #tpu.memory_space<vmem>>, vector<2x1024xf32>
    %49 = arith.maximumf %48, %44 : vector<2x1024xf32>
    %c0_25 = arith.constant 0 : index
    %c0_26 = arith.constant 0 : index
    %50 = vector.load %arg16[%c0_25, %c0_26] : memref<2x1024xf32, #tpu.memory_space<vmem>>, vector<2x1024xf32>
    tpu.vector_store %arg16[%c0_25, %c0_26], %49 {strides = array<i32>} : memref<2x1024xf32, #tpu.memory_space<vmem>>, vector<2x1024xf32>,
    %c1_i32 = arith.constant 1 : i32
    %51 = arith.cmpi eq, %arg1, %c1_i32 : i32
    %52 = arith.extui %51 : i1 to i32
    %c0_i32_27 = arith.constant 0 : i32
    %53 = arith.cmpi ne, %52, %c0_i32_27 : i32
    scf.if %53 {
      %c0_28 = arith.constant 0 : index
      %c0_29 = arith.constant 0 : index
      %54 = vector.load %arg16[%c0_28, %c0_29] : memref<2x1024xf32, #tpu.memory_space<vmem>>, vector<2x1024xf32>
      %c0_30 = arith.constant 0 : index
      %c0_31 = arith.constant 0 : index
      %55 = vector.load %arg8[%c0_30, %c0_31] : memref<1x1024xf32, #tpu.memory_space<vmem>>, vector<1x1024xf32>
      %56 = vector.broadcast %55 : vector<1x1024xf32> to vector<2x1024xf32>
      %57 = arith.addf %54, %56 : vector<2x1024xf32>
      %cst_32 = arith.constant 0.000000e+00 : f32
      %58 = vector.broadcast %cst_32 : f32 to vector<2x1024xf32>
      %59 = arith.maximumf %57, %58 : vector<2x1024xf32>
      %60 = arith.truncf %59 : vector<2x1024xf32> to vector<2x1024xbf16>
      %c0_33 = arith.constant 0 : index
      %c0_34 = arith.constant 0 : index
      %61 = vector.load %arg9[%c0_33, %c0_34] : memref<1024x512xbf16, #tpu.memory_space<vmem>>, vector<1024x512xbf16>
      %cst_35 = arith.constant dense<0.000000e+00> : vector<2x512xf32>
      %62 = tpu.matmul %60, %61, %cst_35 {dimension_numbers = #tpu.dot_dimension_numbers<[1], [0], [0], [1], [0, 0, 1, 1], [], []>} : vector<2x1024xbf16>, vector<1024x512xbf16>, vector<2x512xf32> -> vector<2x512xf32>
      %c0_36 = arith.constant 0 : index
      %c0_37 = arith.constant 0 : index
      %63 = vector.load %arg10[%c0_36, %c0_37] : memref<1x512xf32, #tpu.memory_space<vmem>>, vector<1x512xf32>
      %64 = vector.broadcast %63 : vector<1x512xf32> to vector<2x512xf32>
      %65 = arith.addf %62, %64 : vector<2x512xf32>
      %cst_38 = arith.constant 0.000000e+00 : f32
      %66 = vector.broadcast %cst_38 : f32 to vector<2x512xf32>
      %67 = arith.maximumf %65, %66 : vector<2x512xf32>
      %68 = arith.truncf %67 : vector<2x512xf32> to vector<2x512xbf16>
      %c0_39 = arith.constant 0 : index
      %c0_40 = arith.constant 0 : index
      %69 = vector.load %arg11[%c0_39, %c0_40] : memref<512x256xbf16, #tpu.memory_space<vmem>>, vector<512x256xbf16>
      %cst_41 = arith.constant dense<0.000000e+00> : vector<2x256xf32>
      %70 = tpu.matmul %68, %69, %cst_41 {dimension_numbers = #tpu.dot_dimension_numbers<[1], [0], [0], [1], [0, 0, 1, 1], [], []>} : vector<2x512xbf16>, vector<512x256xbf16>, vector<2x256xf32> -> vector<2x256xf32>
      %c0_42 = arith.constant 0 : index
      %c0_43 = arith.constant 0 : index
      %71 = vector.load %arg12[%c0_42, %c0_43] : memref<1x256xf32, #tpu.memory_space<vmem>>, vector<1x256xf32>
      %72 = vector.broadcast %71 : vector<1x256xf32> to vector<2x256xf32>
      %73 = arith.addf %70, %72 : vector<2x256xf32>
      %cst_44 = arith.constant 0.000000e+00 : f32
      %74 = vector.broadcast %cst_44 : f32 to vector<2x256xf32>
      %75 = arith.maximumf %73, %74 : vector<2x256xf32>
      %c0_45 = arith.constant 0 : index
      %c0_46 = arith.constant 0 : index
      %76 = vector.load %arg13[%c0_45, %c0_46] : memref<256x9xf32, #tpu.memory_space<vmem>>, vector<256x9xf32>
      %cst_47 = arith.constant dense<0.000000e+00> : vector<2x9xf32>
      %77 = tpu.matmul %75, %76, %cst_47 {dimension_numbers = #tpu.dot_dimension_numbers<[1], [0], [0], [1], [0, 0, 1, 1], [], []>} : vector<2x256xf32>, vector<256x9xf32>, vector<2x9xf32> -> vector<2x9xf32>
      %c0_48 = arith.constant 0 : index
      %c0_49 = arith.constant 0 : index
      %78 = vector.load %arg14[%c0_48, %c0_49] : memref<1x9xf32, #tpu.memory_space<vmem>>, vector<1x9xf32>
      %79 = vector.broadcast %78 : vector<1x9xf32> to vector<2x9xf32>
      %80 = arith.addf %77, %79 : vector<2x9xf32>
      %c0_50 = arith.constant 0 : index
      %c0_51 = arith.constant 0 : index
      %c0_52 = arith.constant 0 : index
      %81 = vector.load %arg15[%c0_50, %c0_51, %c0_52] : memref<1x2x9xf32, #tpu.memory_space<vmem>>, vector<1x2x9xf32>
      %82 = vector.shape_cast %81 : vector<1x2x9xf32> to vector<2x9xf32>
      %83 = vector.shape_cast %80 : vector<2x9xf32> to vector<1x2x9xf32>
      tpu.vector_store %arg15[%c0_50, %c0_51, %c0_52], %83 {strides = array<i32>} : memref<1x2x9xf32, #tpu.memory_space<vmem>>, vector<1x2x9xf32>,
    } else {
    }
    return
  }
  func.func @transform_0(%arg0: i32, %arg1: i32) -> (i32, i32, i32) {
    %c0_i32 = arith.constant 0 : i32
    %c0_i32_0 = arith.constant 0 : i32
    return %arg0, %arg1, %c0_i32 : i32, i32, i32
  }
  func.func @transform_1(%arg0: i32, %arg1: i32) -> (i32, i32) {
    %c0_i32 = arith.constant 0 : i32
    %c0_i32_0 = arith.constant 0 : i32
    %c0_i32_1 = arith.constant 0 : i32
    return %c0_i32, %c0_i32_0 : i32, i32
  }
  func.func @transform_2(%arg0: i32, %arg1: i32) -> (i32, i32) {
    %c0_i32 = arith.constant 0 : i32
    %c0_i32_0 = arith.constant 0 : i32
    %c0_i32_1 = arith.constant 0 : i32
    return %c0_i32, %c0_i32_0 : i32, i32
  }
  func.func @transform_3(%arg0: i32, %arg1: i32) -> (i32, i32) {
    %c0_i32 = arith.constant 0 : i32
    %c0_i32_0 = arith.constant 0 : i32
    %c0_i32_1 = arith.constant 0 : i32
    return %c0_i32, %c0_i32_0 : i32, i32
  }
  func.func @transform_4(%arg0: i32, %arg1: i32) -> (i32, i32) {
    %c0_i32 = arith.constant 0 : i32
    %c0_i32_0 = arith.constant 0 : i32
    %c0_i32_1 = arith.constant 0 : i32
    return %c0_i32, %c0_i32_0 : i32, i32
  }
  func.func @transform_5(%arg0: i32, %arg1: i32) -> (i32, i32) {
    %c0_i32 = arith.constant 0 : i32
    %c0_i32_0 = arith.constant 0 : i32
    %c0_i32_1 = arith.constant 0 : i32
    return %c0_i32, %c0_i32_0 : i32, i32
  }
  func.func @transform_6(%arg0: i32, %arg1: i32) -> (i32, i32) {
    %c0_i32 = arith.constant 0 : i32
    %c0_i32_0 = arith.constant 0 : i32
    %c0_i32_1 = arith.constant 0 : i32
    return %c0_i32, %c0_i32_0 : i32, i32
  }
  func.func @transform_7(%arg0: i32, %arg1: i32) -> (i32, i32) {
    %c0_i32 = arith.constant 0 : i32
    %c0_i32_0 = arith.constant 0 : i32
    %c0_i32_1 = arith.constant 0 : i32
    return %c0_i32, %c0_i32_0 : i32, i32
  }
  func.func @transform_8(%arg0: i32, %arg1: i32) -> (i32, i32) {
    %c0_i32 = arith.constant 0 : i32
    %c0_i32_0 = arith.constant 0 : i32
    %c0_i32_1 = arith.constant 0 : i32
    return %c0_i32, %c0_i32_0 : i32, i32
  }
  func.func @transform_9(%arg0: i32, %arg1: i32) -> (i32, i32) {
    %c0_i32 = arith.constant 0 : i32
    %c0_i32_0 = arith.constant 0 : i32
    %c0_i32_1 = arith.constant 0 : i32
    return %c0_i32, %c0_i32_0 : i32, i32
  }
  func.func @transform_10(%arg0: i32, %arg1: i32) -> (i32, i32) {
    %c0_i32 = arith.constant 0 : i32
    %c0_i32_0 = arith.constant 0 : i32
    %c0_i32_1 = arith.constant 0 : i32
    return %c0_i32, %c0_i32_0 : i32, i32
  }
  func.func @transform_11(%arg0: i32, %arg1: i32) -> (i32, i32) {
    %c0_i32 = arith.constant 0 : i32
    %c0_i32_0 = arith.constant 0 : i32
    %c0_i32_1 = arith.constant 0 : i32
    return %c0_i32, %c0_i32_0 : i32, i32
  }
  func.func @transform_12(%arg0: i32, %arg1: i32) -> (i32, i32) {
    %c0_i32 = arith.constant 0 : i32
    %c0_i32_0 = arith.constant 0 : i32
    %c0_i32_1 = arith.constant 0 : i32
    return %c0_i32, %c0_i32_0 : i32, i32
  }
  func.func @transform_13(%arg0: i32, %arg1: i32) -> (i32, i32, i32) {
    %c0_i32 = arith.constant 0 : i32
    %c0_i32_0 = arith.constant 0 : i32
    %c0_i32_1 = arith.constant 0 : i32
    return %arg0, %c0_i32, %c0_i32_0 : i32, i32, i32
  }
}

</mosaic_0001>

<bundles_post_ra>
// kernel: tpu_custom_call.1
= control target key start
LH: loop header
LB: loop body
LE: loop exit
PB: predicated region body
PF: predicated region fallthrough
CT: control target
= control target key end

     0   :  { %s12217_s0 = inlined_call_operand.vmem [shape: f32[4,512,3], index: 0, kind: input, shape index: {}]   ;;  %s12218_s1 = inlined_call_operand.vmem [shape: f32[3,64], index: 1, kind: input, shape index: {}]   ;;  %s12219_s2 = inlined_call_operand.vmem [shape: f32[1,64], index: 2, kind: input, shape index: {}]   ;;  %s12220_s3 = inlined_call_operand.vmem [shape: bf16[64,128], index: 3, kind: input, shape index: {}]   ;;  %s12221_s4 = inlined_call_operand.vmem [shape: f32[1,128], index: 4, kind: input, shape index: {}]   ;;  %s12222_s5 = inlined_call_operand.hbm [shape: bf16[128,1024], index: 5, kind: input, shape index: {}]   ;;  %s12223_s6 = inlined_call_operand.vmem [shape: f32[1,1024], index: 6, kind: input, shape index: {}]   ;;  %s12224_s7 = inlined_call_operand.vmem [shape: bf16[1024,512], index: 7, kind: input, shape index: {}]   ;;  %s12225_s8 = inlined_call_operand.vmem [shape: f32[1,512], index: 8, kind: input, shape index: {}]   ;;  %s12226_s9 = inlined_call_operand.hbm [shape: bf16[512,256], index: 9, kind: input, shape index: {}]   ;;  %s12227_s10 = inlined_call_operand.vmem [shape: f32[1,256], index: 10, kind: input, shape index: {}]   ;;  %s12228_s11 = inlined_call_operand.vmem [shape: f32[256,9], index: 11, kind: input, shape index: {}]   ;;  %s12229_s12 = inlined_call_operand.vmem [shape: f32[1,9], index: 12, kind: input, shape index: {}]   ;;  %s12230_s13 = inlined_call_operand.hbm [shape: f32[2,2,9], index: 13, kind: output, shape index: {}]  }
   0x1   :  { %12261 = sst [smem:[#allocation35_spill]] %s12223_s6 }
   0x2   :  { %12262 = sst [smem:[#allocation36_spill]] %s12224_s7 }
   0x3   :  { %12263 = sst [smem:[#allocation37_spill]] %s12225_s8 }
   0x4   :  { %12264 = sst [smem:[#allocation38_spill]] %s12227_s10 }
   0x5   :  { %12265 = sst [smem:[#allocation39_spill]] %s12228_s11 }
   0x6   :  { %12266 = sst [smem:[#allocation40_spill]] %s12229_s12 }
   0x7   :  { %12267 = sst [smem:[#allocation41_spill]] %s12230_s13 }
   0x8   :  { %18 = vsyncpa [#allocation5], 0 }
   0x9   :  { %19 = vsyncpa [#allocation8], 0 }
   0xa   :  { %20 = vsyncpa [#allocation6], 0 }
   0xb   :  { %22 = vsyncpa [#allocation6 + $0x1], 0  ;;  %s9506_s25 = smov 0   ;;  %s9508_s26 = smov 0  }
   0xc   :  { %s9510_s27 = smov 0   ;;  %s9512_s28 = smov 0  }
   0xd   :  { %s9514_s29 = smov 0   ;;  %s9516_s30 = smov 0  }
   0xe   :  { %s9518_s14 = smov 0   ;;  %s9520_s15 = smov 0  }
   0xf   :  { %s9522_s16 = smov 0   ;;  %s9524_s17 = smov 0  }
  0x10 LB: > { %12268 = sst [smem:[#allocation13_spill]] %s9386_s25  ;;  %s7881_s18 = sadd.s32 4294967295, %s9422_s17   ;;  %s9422_s17 = sphi %s9524_s17, %s28_s17   ;;  %s9418_s16 = sphi %s9522_s16, %s12340_s16   ;;  %s9414_s15 = sphi %s9520_s15, %s12339_s15   ;;  %s9410_s14 = sphi %s9518_s14, %s12338_s14   ;;  %s9406_s30 = sphi %s9516_s30, %s12337_s30   ;;  %s9402_s29 = sphi %s9514_s29, %s12336_s29   ;;  %s9398_s28 = sphi %s9512_s28, %s12335_s28   ;;  %s9394_s27 = sphi %s9510_s27, %s12329_s27   ;;  %s9390_s26 = sphi %s9508_s26, %s12334_s26   ;;  %s9386_s25 = sphi %s9506_s25, %s12333_s25  }
  0x11   : > { %12269 = sst [smem:[#allocation14_spill]] %s9394_s27  ;;  %s7882_s19 = sadd.s32 4294967294, %s9422_s17  }
  0x12   : > { %12270 = sst [smem:[#allocation15_spill]] %s9410_s14  ;;  %s37_s20 = sadd.s32 1, %s9414_s15 }
  0x13   : > { %s40_s21 = sadd.s32 1, %s9418_s16  ;;  %p38_p0 = scmp.ge.s32.totalorder %s37_s20, 2 }
  0x14   : > { %s49_s22 = sadd.s32 1, %s9402_s29  ;;  %p56_p1 = scmp.ne.s32.totalorder %s9402_s29, %s9398_s28 }
  0x15   : > { %p57_p2 = scmp.eq.s32.totalorder %s9422_s17, 0  ;;  %s12342_s20 = smov (%p38_p0, %s37_s20), 0 }
  0x16   : > { %12271 = sst [smem:[#allocation16_spill]] %s12342_s20  ;;  %s12344_s21 = smov (!%p38_p0, %s40_s21), %s9418_s16 }
  0x17   : > { %s45_s23 = ssub.s32 %s9414_s15, %s12342_s20  ;;  %p9569_p3 = por %p57_p2, %p56_p1 }
  0x18   : > { %p42_p4 = scmp.ge.s32.totalorder %s12344_s21, 2  ;;  %s327_s13 = sadd.s32 1, %s9394_s27 }
  0x19   : > { %s12272_s24 = scalar_select %p9569_p3, 1, 0 }
  0x1a   : > { %p337_p5 = scmp.ne.s32.totalorder %s9394_s27, %s9390_s26  ;;  %p338_p6 = scmp.eq.s32.totalorder %s7881_s18, 3 }
  0x1b   : > { %s12346_s21 = smov (%p42_p4, %s12344_s21), 0  ;;  %p343_p8 = scmp.ne.s32.totalorder %s9390_s26, %s9386_s25 }
  0x1c   : > { %12273 = sst [smem:[#allocation17_spill]] %s12346_s21  ;;  %p9578_p7 = por %p338_p6, %p337_p5 }
  0x1d   : > { %s44_s20 = ssub.s32 %s9418_s16, %s12346_s21  ;;  %p344_p9 = scmp.eq.s32.totalorder %s7882_s19, 3 }
  0x1e   : > { %s12274_s14 = scalar_select %p9578_p7, 1, 0 }
  0x1f   : > { %s46_s12 = sor.u32 %s45_s23, %s44_s20  ;;  %p325_p10 = scmp.eq.s32.totalorder %s44_s20, 0 }
  0x20   : > { %12275 = sst [smem:[#allocation18_spill]] %s12274_s14  ;;  %p47_p11 = scmp.eq.s32.totalorder %s46_s12, 0 }
  0x21   : > { %p9586_p12 = por %p344_p9, %p343_p8  ;;  %p7883_p13 = scmp.ge.s32.totalorder %s9422_s17, 1 }
  0x22   : > { %s9591_s11 = scalar_select %p325_p10, %s9394_s27, %s327_s13  }
  0x23   : > { %s12276_s10 = scalar_select %p9586_p12, 1, 0 }
  0x24   : > { %12278 = sst [smem:[#allocation20_spill]] %s9591_s11  ;;  %p351_p0 = scmp.lt.s32.totalorder %s9422_s17, 5 }
  0x25   : > { %12277 = sst [smem:[#allocation19_spill]] %s12276_s10  ;;  %p9598_p1 = scmp.eq.s32.totalorder %s7881_s18, 0 }
  0x26   : > { %s9594_s8 = scalar_select %p47_p11, %s9402_s29, %s49_s22  }
  0x27   : > { %s12280_s6 = scalar_select %p9598_p1, 1, 0 }
  0x28   : > { %12279 = sst [smem:[#allocation21_spill]] %s9594_s8  ;;  %p9602_p2 = pnand %p7883_p13, %p351_p0 }
  0x29   : > { %s9424_s12 = smov [#allocation4]   ;;  %s9425_s18 = smov [#allocation7]  }
  0x2a   : > { %s12281_s19 = scalar_select %p9602_p2, 1, 0 }
  0x2b   : > { %s375_s20 = sshll.u32 %s9424_s12, 4  ;;  %p8587_p4 = pneg %p9602_p2  ;;  %s376_s20 = int_to_ptr.vmem [resolvable:$true] %s375_s20 }
  0x2c   : > { %s397_s22 = sshll.u32 %s9425_s18, 4  ;;  %s9248_s8 = scalar_lea.hbm %s12222_s5, 8192  ;;  %s9614_s22 = int_to_ptr.vmem [resolvable:$true] %s397_s22 }
  0x2d   : > { %p9610_p5 = pnand %p9598_p1, %p8587_p4  ;;  %p9249_p6 = scmp.ne.s32.totalorder %s12222_s5, %s9248_s8 }
  0x2e   : > { %p9255_p11 = scmp.lt.u32.totalorder %s9248_s8, %s12222_s5 }
  0x2f   : > { %p9250_p8 = pneg %p9610_p5 }
  0x31   : > { %p9251_p9 = pnand %p9250_p8, %p9249_p6 }
  0x33   : > { %p9252_p10 = pneg %p9251_p9 }
  0x35   : > { %p9257_p13 = pnand %p9255_p11, %p9252_p10 }
  0x37   : > { %9260 = shalt.err (!%p9257_p13)
}
  0x38   : > { %s9261_s18 = scalar_lea.vmem %s376_s20, 8192  ;;  %p9269_p7 = scmp.lt.s32.totalorder %s376_s20, %s376_s20 }
  0x39   : > { %p9262_p0 = scmp.ne.s32.totalorder %s376_s20, %s9261_s18  ;;  %p9270_p1 = scmp.lt.s32.totalorder %s9261_s18, %s9261_s18 }
  0x3b   : > { %p9264_p4 = pnand %p9262_p0, %p9250_p8  ;;  %p9271_p2 = por %p9270_p1, %p9269_p7 }
  0x3d   : > { %p9265_p12 = pneg %p9264_p4 }
  0x3f   : > { %p9272_p3 = pnand %p9271_p2, %p9265_p12 }
  0x41   : > { %9275 = shalt.err (!%p9272_p3)
}
  0x42   : > { %s9426_s11 = smov 512   ;;  %s9427_s21 = smov 32  }
  0x43   : > { %8590 = dma.hbm_to_vmem [thread:$0]  (!%p9610_p5), %s12222_s5, 8192, %s376_s20, [#allocation5], %s9426_s11, %s9426_s11, %s9427_s21  }
  0x44   : > { %s9276_s12 = scalar_lea.hbm %s12226_s9, 8192 }
  0x45   : > { %p9277_p6 = scmp.ne.s32.totalorder %s12226_s9, %s9276_s12  ;;  %p9283_p12 = scmp.lt.u32.totalorder %s9276_s12, %s12226_s9 }
  0x47   : > { %p9279_p3 = pnand %p9277_p6, %p9250_p8 }
  0x49   : > { %p9280_p7 = pneg %p9279_p3 }
  0x4b   : > { %p9285_p1 = pnand %p9283_p12, %p9280_p7 }
  0x4d   : > { %9288 = shalt.err (!%p9285_p1)
}
  0x4e   : > { %s9289_s20 = scalar_lea.vmem %s9614_s22, 8192  ;;  %p9297_p11 = scmp.lt.s32.totalorder %s9614_s22, %s9614_s22 }
  0x4f   : > { %p9290_p2 = scmp.ne.s32.totalorder %s9614_s22, %s9289_s20  ;;  %p9298_p13 = scmp.lt.s32.totalorder %s9289_s20, %s9289_s20 }
  0x51   : > { %p9292_p9 = pnand %p9290_p2, %p9250_p8  ;;  %p9299_p0 = por %p9298_p13, %p9297_p11 }
  0x53   : > { %p9293_p10 = pneg %p9292_p9 }
  0x55   : > { %p9300_p4 = pnand %p9299_p0, %p9293_p10 }
  0x57   : > { %9303 = shalt.err (!%p9300_p4)
}
  0x58   : > { %s9428_s7 = smov 128   ;;  %s9429_s25 = smov 8  }
  0x59   : > { %8593 = dma.hbm_to_vmem [thread:$0]  (!%p9610_p5), %s12226_s9, 8192, %s9614_s22, [#allocation8], %s9428_s7, %s9428_s7, %s9429_s25  }
  0x5a   : > { %p7886_p6 = scmp.ge.s32.totalorder %s9422_s17, 4 }
  0x5b   : > { %p12283_p8 = scmp.ne.s32.totalorder (!%p7886_p6), %s12272_s24, 0 }
  0x5c   : > { %416 = sbr.rel (%p7886_p6) target bundleno = 138 (0x8a), region = 64 }
  0x63   : > { %419 = sbr.rel (!%p12283_p8) target bundleno = 138 (0x8a), region = 68  ;;  %s421_s21 = sand.u32 (%p12283_p8), 1, %s9402_s29  }
  0x64   : > { %s7889_s8 = sshll.u32 (%p12283_p8), %s9414_s15, 5  ;;  %s7887_s10 = sshll.u32 (%p12283_p8), %s421_s21, 9 }
  0x65   : > { %s8361_s27 = sshll.u32 (%p12283_p8), %s9418_s16, 7  ;;  %s9677_s24 = scalar_lea.vmem (%p12283_p8), [#allocation3], %s7887_s10 }
  0x66   : > { %s427_s23 = sadd.s32 (%p12283_p8), %s8361_s27, %s7889_s8 }
  0x67   : > { %s7891_s12 = sshll.u32 (%p12283_p8), %s427_s23, 3 }
  0x68   : > { %s9672_s20 = scalar_lea.vmem (%p12283_p8), %s12217_s0, %s7891_s12 }
  0x69   : > { %v583_v0 = vld [vmem:[%s9672_s20] sm:$0xff] (%p12283_p8)  ;;  %v585_v1 = vld [vmem:[%s9672_s20 + $0x8] sm:$0xff] (%p12283_p8)  ;;  %v587_v2 = vld [vmem:[%s9672_s20 + $0x10] sm:$0xff] (%p12283_p8) }
  0x6a   : > { %584 = vst [vmem:[%s9677_s24] sm:$0xff] %v583_v0  ;;  %586 = vst [vmem:[%s9677_s24 + $0x8] sm:$0xff] %v585_v1  ;;  %v589_v3 = vld [vmem:[%s9672_s20 + $0x18] sm:$0xff]  ;;  %v591_v4 = vld [vmem:[%s9672_s20 + $0x20] sm:$0xff] }
  0x6b   : > { %588 = vst [vmem:[%s9677_s24 + $0x10] sm:$0xff] %v587_v2  ;;  %v593_v5 = vld [vmem:[%s9672_s20 + $0x28] sm:$0xff]  ;;  %590 = vst [vmem:[%s9677_s24 + $0x18] sm:$0xff] %v589_v3  ;;  %v595_v6 = vld [vmem:[%s9672_s20 + $0x30] sm:$0xff] }
  0x6c   : > { %592 = vst [vmem:[%s9677_s24 + $0x20] sm:$0xff] %v591_v4  ;;  %594 = vst [vmem:[%s9677_s24 + $0x28] sm:$0xff] %v593_v5  ;;  %v597_v7 = vld [vmem:[%s9672_s20 + $0x38] sm:$0xff]  ;;  %v599_v8 = vld [vmem:[%s9672_s20 + $0x40] sm:$0xff] }
  0x6d   : > { %596 = vst [vmem:[%s9677_s24 + $0x30] sm:$0xff] %v595_v6  ;;  %598 = vst [vmem:[%s9677_s24 + $0x38] sm:$0xff] %v597_v7  ;;  %v601_v9 = vld [vmem:[%s9672_s20 + $0x48] sm:$0xff]  ;;  %v603_v10 = vld [vmem:[%s9672_s20 + $0x50] sm:$0xff] }
  0x6e   : > { %600 = vst [vmem:[%s9677_s24 + $0x40] sm:$0xff] %v599_v8  ;;  %v605_v11 = vld [vmem:[%s9672_s20 + $0x58] sm:$0xff]  ;;  %602 = vst [vmem:[%s9677_s24 + $0x48] sm:$0xff] %v601_v9  ;;  %v607_v12 = vld [vmem:[%s9672_s20 + $0x60] sm:$0xff] }
  0x6f   : > { %604 = vst [vmem:[%s9677_s24 + $0x50] sm:$0xff] %v603_v10  ;;  %606 = vst [vmem:[%s9677_s24 + $0x58] sm:$0xff] %v605_v11  ;;  %v609_v13 = vld [vmem:[%s9672_s20 + $0x68] sm:$0xff]  ;;  %v611_v14 = vld [vmem:[%s9672_s20 + $0x70] sm:$0xff] }
  0x70   : > { %608 = vst [vmem:[%s9677_s24 + $0x60] sm:$0xff] %v607_v12  ;;  %610 = vst [vmem:[%s9677_s24 + $0x68] sm:$0xff] %v609_v13  ;;  %v613_v15 = vld [vmem:[%s9672_s20 + $0x78] sm:$0xff]  ;;  %v615_v16 = vld [vmem:[%s9672_s20 + $0x80] sm:$0xff] }
  0x71   : > { %612 = vst [vmem:[%s9677_s24 + $0x70] sm:$0xff] %v611_v14  ;;  %v617_v17 = vld [vmem:[%s9672_s20 + $0x88] sm:$0xff]  ;;  %614 = vst [vmem:[%s9677_s24 + $0x78] sm:$0xff] %v613_v15  ;;  %v619_v18 = vld [vmem:[%s9672_s20 + $0x90] sm:$0xff] }
  0x72   : > { %616 = vst [vmem:[%s9677_s24 + $0x80] sm:$0xff] %v615_v16  ;;  %618 = vst [vmem:[%s9677_s24 + $0x88] sm:$0xff] %v617_v17  ;;  %v621_v19 = vld [vmem:[%s9672_s20 + $0x98] sm:$0xff]  ;;  %v623_v20 = vld [vmem:[%s9672_s20 + $0xa0] sm:$0xff] }
  0x73   : > { %620 = vst [vmem:[%s9677_s24 + $0x90] sm:$0xff] %v619_v18  ;;  %622 = vst [vmem:[%s9677_s24 + $0x98] sm:$0xff] %v621_v19  ;;  %v625_v21 = vld [vmem:[%s9672_s20 + $0xa8] sm:$0xff]  ;;  %v627_v22 = vld [vmem:[%s9672_s20 + $0xb0] sm:$0xff] }
  0x74   : > { %624 = vst [vmem:[%s9677_s24 + $0xa0] sm:$0xff] %v623_v20  ;;  %v629_v23 = vld [vmem:[%s9672_s20 + $0xb8] sm:$0xff]  ;;  %626 = vst [vmem:[%s9677_s24 + $0xa8] sm:$0xff] %v625_v21  ;;  %v631_v24 = vld [vmem:[%s9672_s20 + $0xc0] sm:$0xff] }
  0x75   : > { %628 = vst [vmem:[%s9677_s24 + $0xb0] sm:$0xff] %v627_v22  ;;  %630 = vst [vmem:[%s9677_s24 + $0xb8] sm:$0xff] %v629_v23  ;;  %v633_v25 = vld [vmem:[%s9672_s20 + $0xc8] sm:$0xff]  ;;  %v635_v26 = vld [vmem:[%s9672_s20 + $0xd0] sm:$0xff] }
  0x76   : > { %632 = vst [vmem:[%s9677_s24 + $0xc0] sm:$0xff] %v631_v24  ;;  %634 = vst [vmem:[%s9677_s24 + $0xc8] sm:$0xff] %v633_v25  ;;  %v637_v27 = vld [vmem:[%s9672_s20 + $0xd8] sm:$0xff]  ;;  %v639_v28 = vld [vmem:[%s9672_s20 + $0xe0] sm:$0xff] }
  0x77   : > { %636 = vst [vmem:[%s9677_s24 + $0xd0] sm:$0xff] %v635_v26  ;;  %v641_v29 = vld [vmem:[%s9672_s20 + $0xe8] sm:$0xff]  ;;  %638 = vst [vmem:[%s9677_s24 + $0xd8] sm:$0xff] %v637_v27  ;;  %v643_v30 = vld [vmem:[%s9672_s20 + $0xf0] sm:$0xff] }
  0x78   : > { %640 = vst [vmem:[%s9677_s24 + $0xe0] sm:$0xff] %v639_v28  ;;  %642 = vst [vmem:[%s9677_s24 + $0xe8] sm:$0xff] %v641_v29  ;;  %v645_v31 = vld [vmem:[%s9672_s20 + $0xf8] sm:$0xff]  ;;  %v647_v32 = vld [vmem:[%s9672_s20 + $0x200] sm:$0xff] }
  0x79   : > { %644 = vst [vmem:[%s9677_s24 + $0xf0] sm:$0xff] %v643_v30  ;;  %646 = vst [vmem:[%s9677_s24 + $0xf8] sm:$0xff] %v645_v31  ;;  %v649_v33 = vld [vmem:[%s9672_s20 + $0x208] sm:$0xff]  ;;  %v651_v34 = vld [vmem:[%s9672_s20 + $0x210] sm:$0xff] }
  0x7a   : > { %648 = vst [vmem:[%s9677_s24 + $0x100] sm:$0xff] %v647_v32  ;;  %v653_v35 = vld [vmem:[%s9672_s20 + $0x218] sm:$0xff]  ;;  %650 = vst [vmem:[%s9677_s24 + $0x108] sm:$0xff] %v649_v33  ;;  %v655_v36 = vld [vmem:[%s9672_s20 + $0x220] sm:$0xff] }
  0x7b   : > { %652 = vst [vmem:[%s9677_s24 + $0x110] sm:$0xff] %v651_v34  ;;  %654 = vst [vmem:[%s9677_s24 + $0x118] sm:$0xff] %v653_v35  ;;  %v657_v37 = vld [vmem:[%s9672_s20 + $0x228] sm:$0xff]  ;;  %v659_v38 = vld [vmem:[%s9672_s20 + $0x230] sm:$0xff] }
  0x7c   : > { %656 = vst [vmem:[%s9677_s24 + $0x120] sm:$0xff] %v655_v36  ;;  %658 = vst [vmem:[%s9677_s24 + $0x128] sm:$0xff] %v657_v37  ;;  %v661_v39 = vld [vmem:[%s9672_s20 + $0x238] sm:$0xff]  ;;  %v663_v40 = vld [vmem:[%s9672_s20 + $0x240] sm:$0xff] }
  0x7d   : > { %660 = vst [vmem:[%s9677_s24 + $0x130] sm:$0xff] %v659_v38  ;;  %v665_v41 = vld [vmem:[%s9672_s20 + $0x248] sm:$0xff]  ;;  %662 = vst [vmem:[%s9677_s24 + $0x138] sm:$0xff] %v661_v39  ;;  %v667_v42 = vld [vmem:[%s9672_s20 + $0x250] sm:$0xff] }
  0x7e   : > { %664 = vst [vmem:[%s9677_s24 + $0x140] sm:$0xff] %v663_v40  ;;  %666 = vst [vmem:[%s9677_s24 + $0x148] sm:$0xff] %v665_v41  ;;  %v669_v43 = vld [vmem:[%s9672_s20 + $0x258] sm:$0xff]  ;;  %v671_v44 = vld [vmem:[%s9672_s20 + $0x260] sm:$0xff] }
  0x7f   : > { %668 = vst [vmem:[%s9677_s24 + $0x150] sm:$0xff] %v667_v42  ;;  %670 = vst [vmem:[%s9677_s24 + $0x158] sm:$0xff] %v669_v43  ;;  %v673_v45 = vld [vmem:[%s9672_s20 + $0x268] sm:$0xff]  ;;  %v675_v46 = vld [vmem:[%s9672_s20 + $0x270] sm:$0xff] }
  0x80   : > { %672 = vst [vmem:[%s9677_s24 + $0x160] sm:$0xff] %v671_v44  ;;  %v677_v47 = vld [vmem:[%s9672_s20 + $0x278] sm:$0xff]  ;;  %674 = vst [vmem:[%s9677_s24 + $0x168] sm:$0xff] %v673_v45  ;;  %v679_v48 = vld [vmem:[%s9672_s20 + $0x280] sm:$0xff] }
  0x81   : > { %676 = vst [vmem:[%s9677_s24 + $0x170] sm:$0xff] %v675_v46  ;;  %678 = vst [vmem:[%s9677_s24 + $0x178] sm:$0xff] %v677_v47  ;;  %v681_v49 = vld [vmem:[%s9672_s20 + $0x288] sm:$0xff]  ;;  %v683_v50 = vld [vmem:[%s9672_s20 + $0x290] sm:$0xff] }
  0x82   : > { %680 = vst [vmem:[%s9677_s24 + $0x180] sm:$0xff] %v679_v48  ;;  %682 = vst [vmem:[%s9677_s24 + $0x188] sm:$0xff] %v681_v49  ;;  %v685_v51 = vld [vmem:[%s9672_s20 + $0x298] sm:$0xff]  ;;  %v687_v52 = vld [vmem:[%s9672_s20 + $0x2a0] sm:$0xff] }
  0x83   : > { %684 = vst [vmem:[%s9677_s24 + $0x190] sm:$0xff] %v683_v50  ;;  %v689_v53 = vld [vmem:[%s9672_s20 + $0x2a8] sm:$0xff]  ;;  %686 = vst [vmem:[%s9677_s24 + $0x198] sm:$0xff] %v685_v51  ;;  %v691_v54 = vld [vmem:[%s9672_s20 + $0x2b0] sm:$0xff] }
  0x84   : > { %688 = vst [vmem:[%s9677_s24 + $0x1a0] sm:$0xff] %v687_v52  ;;  %690 = vst [vmem:[%s9677_s24 + $0x1a8] sm:$0xff] %v689_v53  ;;  %v693_v55 = vld [vmem:[%s9672_s20 + $0x2b8] sm:$0xff]  ;;  %v695_v56 = vld [vmem:[%s9672_s20 + $0x2c0] sm:$0xff] }
  0x85   : > { %692 = vst [vmem:[%s9677_s24 + $0x1b0] sm:$0xff] %v691_v54  ;;  %694 = vst [vmem:[%s9677_s24 + $0x1b8] sm:$0xff] %v693_v55  ;;  %v697_v57 = vld [vmem:[%s9672_s20 + $0x2c8] sm:$0xff]  ;;  %v699_v58 = vld [vmem:[%s9672_s20 + $0x2d0] sm:$0xff] }
  0x86   : > { %696 = vst [vmem:[%s9677_s24 + $0x1c0] sm:$0xff] %v695_v56  ;;  %v701_v59 = vld [vmem:[%s9672_s20 + $0x2d8] sm:$0xff]  ;;  %698 = vst [vmem:[%s9677_s24 + $0x1c8] sm:$0xff] %v697_v57  ;;  %v703_v60 = vld [vmem:[%s9672_s20 + $0x2e0] sm:$0xff] }
  0x87   : > { %700 = vst [vmem:[%s9677_s24 + $0x1d0] sm:$0xff] %v699_v58  ;;  %702 = vst [vmem:[%s9677_s24 + $0x1d8] sm:$0xff] %v701_v59  ;;  %v705_v61 = vld [vmem:[%s9672_s20 + $0x2e8] sm:$0xff]  ;;  %v707_v62 = vld [vmem:[%s9672_s20 + $0x2f0] sm:$0xff] }
  0x88   : > { %704 = vst [vmem:[%s9677_s24 + $0x1e0] sm:$0xff] %v703_v60  ;;  %706 = vst [vmem:[%s9677_s24 + $0x1e8] sm:$0xff] %v705_v61  ;;  %v709_v63 = vld [vmem:[%s9672_s20 + $0x2f8] sm:$0xff] }
  0x89   : > { %708 = vst [vmem:[%s9677_s24 + $0x1f0] sm:$0xff] %v707_v62  ;;  %710 = vst [vmem:[%s9677_s24 + $0x1f8] sm:$0xff] %v709_v63 }
  0x8a PF: > { %p12284_p5 = scmp.ne.s32.totalorder %s12281_s19, 0 }
  0x8c   : > { %719 = sbr.rel (%p12284_p5) target bundleno = 2563 (0xa03), region = 106 }
  0x93   : > { %s722_s22 = sand.u32 1, %s9398_s28   ;;  %p12285_p3 = scmp.ne.s32.totalorder %s12280_s6, 0 }
  0x94   : > { %s7893_s7 = sshll.u32 %s722_s22, 9 }
  0x95   : > { %s9807_s25 = scalar_lea.vmem [#allocation3], %s7893_s7 }
  0x96   : > { %9373 = dma.done.wait (%p12285_p3), [#allocation5], 8192  }
  0x97   : > { %9375 = vsyncadd (%p12285_p3), [#allocation5], 4294959104 }
  0x98   : > { %9377 = dma.done.wait (%p12285_p3), [#allocation8], 8192  }
  0x99   : > { %9379 = vsyncadd (%p12285_p3), [#allocation8], 4294959104  ;;  %v12247_v0 = vmov 2   ;;  %v12245_v1 = vmov 0   ;;  %v778_v2 = vld [vmem:[%s9807_s25 + $0x10] sm:$0xff]  ;;  %v777_v3 = vld [vmem:[%s9807_s25 + $0x8] sm:$0xff] }
  0x9a   : > { %8697 = vset.pattern.permute.xlu0 %v12247_v0  ;;  %8694 = vset.pattern.permute.xlu1 %v12245_v1  ;;  %v9822_v4 = vld [vmem:[%s9807_s25 + $0x18] sm:$0xff]  ;;  %v780_v5 = vld [vmem:[%s9807_s25 + $0x20] sm:$0xff]  ;;  %v12249_v7 = vmov 1   ;;  %v785_v8 = vld [vmem:[%s9807_s25 + $0x48] sm:$0xff]  ;;  %s770_s19 = sand.u32 1, %s9390_s26   ;;  %vm2214_vm0 = vcmask 523264  }
  0x9b   : > { %854 = vperm.xlu1 %8694, %v778_v2   ;;  %1696 = vperm.xlu0 %8697, %v777_v3   ;;  %v783_v6 = vld [vmem:[%s9807_s25 + $0x38] sm:$0xff]  ;;  %v9830_v9 = vld [vmem:[%s9807_s25 + $0x60] sm:$0xff]  ;;  %v9840_v12 = vld [vmem:[%s9807_s25 + $0x88] sm:$0xff]  ;;  %s9894_s14 = sshll.u32 %s770_s19, 1  ;;  %vm5084_vm1 = vcmask 1040384   ;;  %p8034_p7 = scmp.ne.s32.totalorder %s9406_s30, 0 }
  0x9c   : > { %v776_v10 = vld [vmem:[%s9807_s25] sm:$0xff]  ;;  %v9836_v11 = vld [vmem:[%s9807_s25 + $0x78] sm:$0xff]  ;;  %v9846_v13 = vld [vmem:[%s9807_s25 + $0x28] sm:$0xff]  ;;  %s772_s10 = scalar_lea.vmem [#allocation9], %s9894_s14 }
  0x9d   : > { %v782_v14 = vld [vmem:[%s9807_s25 + $0x30] sm:$0xff]  ;;  %v9858_v15 = vld [vmem:[%s9807_s25 + $0xa0] sm:$0xff]  ;;  %v9864_v17 = vld [vmem:[%s9807_s25 + $0xb8] sm:$0xff] }
  0x9e   : > { %v784_v16 = vld [vmem:[%s9807_s25 + $0x40] sm:$0xff]  ;;  %v786_v18 = vld [vmem:[%s9807_s25 + $0x50] sm:$0xff]  ;;  %v9869_v19 = vld [vmem:[%s9807_s25 + $0xc8] sm:$0xff] }
  0x9f   : > { %859 = vperm.xlu1 %8694, %v9822_v4   ;;  %1708 = vperm.xlu0 %8697, %v780_v5   ;;  %v787_v20 = vld [vmem:[%s9807_s25 + $0x58] sm:$0xff]  ;;  %v9874_v21 = vld [vmem:[%s9807_s25 + $0xe0] sm:$0xff]  ;;  %v9883_v23 = vld [vmem:[%s9807_s25 + $0x108] sm:$0xff] }
  0xa0   : > { %v9879_v22 = vld [vmem:[%s9807_s25 + $0xf8] sm:$0xff]  ;;  %12286 = vst [vmem:[#allocation22_spill] sm:$0xff] %v9883_v23  ;;  %v8749_v24 = vld [vmem:[%s12220_s3] sm:$0xff]   ;;  %v8751_v26 = vld [vmem:[%s12220_s3 + $0x10] sm:$0xff]  }
  0xa1   : > { %8433 = vmatprep.subr.bf16.mxu0 %v8749_v24  ;;  %v8750_v25 = vld [vmem:[%s12220_s3 + $0x8] sm:$0xff]   ;;  %8537 = vmatprep.subr.bf16.mxu1 %v8749_v24  ;;  %v789_v27 = vld [vmem:[%s9807_s25 + $0x68] sm:$0xff]  ;;  %v790_v29 = vld [vmem:[%s9807_s25 + $0x70] sm:$0xff] }
  0xa2   : > { %8434 = vmatpush3.bf16.msra.mxu0 %v8749_v24  ;;  %8541 = vmatpush3.bf16.msra.mxu1 %v8749_v24  ;;  %v8752_v28 = vld [vmem:[%s12220_s3 + $0x18] sm:$0xff]   ;;  %v792_v30 = vld [vmem:[%s9807_s25 + $0x80] sm:$0xff]  ;;  %v795_v31 = vld [vmem:[%s9807_s25 + $0x98] sm:$0xff] }
  0xa3   : > { %8695 = vset.pattern.permute.xlu1 %v12249_v7  ;;  %1720 = vperm.xlu0 %8697, %v783_v6   ;;  %v9916_v32 = vld [vmem:[%s9807_s25 + $0xa8] sm:$0xff]  ;;  %v9921_v33 = vld [vmem:[%s9807_s25 + $0xc0] sm:$0xff]  ;;  %v9925_v34 = vld [vmem:[%s9807_s25 + $0xd8] sm:$0xff] }
  0xa4   : > { %1307 = vperm.xlu1 %8695, %v777_v3   ;;  %8435 = vmatprep.subr.bf16.mxu0 %v8750_v25  ;;  %v9934_v37 = vld [vmem:[%s9807_s25 + $0xe8] sm:$0xff]  ;;  %v794_v38 = vld [vmem:[%s9807_s25 + $0x90] sm:$0xff]  ;;  %v9943_v41 = vld [vmem:[%s9807_s25 + $0x100] sm:$0xff] }
  0xa5   : > { %8538 = vmatprep.subr.bf16.mxu1 %v8750_v25  ;;  %v9949_v43 = vld [vmem:[%s9807_s25 + $0x118] sm:$0xff]  ;;  %v9957_v46 = vld [vmem:[%s9807_s25 + $0x128] sm:$0xff]  ;;  %v9967_v49 = vld [vmem:[%s9807_s25 + $0x140] sm:$0xff] }
  0xa6   : > { %8436 = vmatpush3.bf16.msra.mxu0 %v8750_v25  ;;  %8542 = vmatpush3.bf16.msra.mxu1 %v8750_v25  ;;  %12287 = vst [vmem:[#allocation23_spill] sm:$0xff] %v9949_v43  ;;  %12288 = vst [vmem:[#allocation24_spill] sm:$0xff] %v9957_v46  ;;  %v9975_v52 = vld [vmem:[%s9807_s25 + $0x158] sm:$0xff]  ;;  %v9984_v55 = vld [vmem:[%s9807_s25 + $0x168] sm:$0xff] }
  0xa7   : > { %1728 = vperm.xlu0 %8697, %v785_v8   ;;  %8437 = vmatprep.subr.bf16.mxu0 %v8751_v26  ;;  %12289 = vst [vmem:[#allocation25_spill] sm:$0xff] %v9967_v49  ;;  %12290 = vst [vmem:[#allocation26_spill] sm:$0xff] %v9975_v52  ;;  %v798_v62 = vld [vmem:[%s9807_s25 + $0xb0] sm:$0xff] }
  0xa8   : > { %1311 = vperm.xlu1 %8695, %v778_v2   ;;  %8539 = vmatprep.subr.bf16.mxu1 %v8751_v26  ;;  %12292 = vst [vmem:[#allocation28_spill] sm:$0xff] %v9984_v55  ;;  %v10058_v24 = vld [vmem:[%s9807_s25 + $0xd0] sm:$0xff] }
  0xaa   : > { %8438 = vmatpush3.bf16.msra.mxu0 %v8751_v26  ;;  %8543 = vmatpush3.bf16.msra.mxu1 %v8751_v26  ;;  %v10064_v26 = vld [vmem:[%s9807_s25 + $0x178] sm:$0xff] }
  0xab   : > { %1740 = vperm.xlu0 %8697, %v9830_v9   ;;  %8439 = vmatprep.subr.bf16.mxu0 %v8752_v28 }
  0xac   : > { %8696 = vset.pattern.permute.xlu1 %v12247_v0  ;;  %8540 = vmatprep.subr.bf16.mxu1 %v8752_v28 }
  0xad   : > { %1692 = vperm.xlu1 %8696, %v776_v10  }
  0xae   : > { %8440 = vmatpush3.bf16.msra.mxu0 %v8752_v28  ;;  %8544 = vmatpush3.bf16.msra.mxu1 %v8752_v28 }
  0xaf   : > { %1752 = vperm.xlu0 %8697, %v9836_v11  }
  0xb1   : > { %1700 = vperm.xlu1 %8696, %v778_v2  }
  0xb3   : > { %1760 = vperm.xlu0 %8697, %v9840_v12  }
  0xb5   : > { %1704 = vperm.xlu1 %8696, %v9822_v4  }
  0xb7   : > { %8710 = vset.pattern.permute.xlu0 %v12245_v1 }
  0xb8   : > { %844 = vperm.xlu0 %8710, %v776_v10  }
  0xb9   : > { %8698 = vset.pattern.permute.xlu1 %v12245_v1 }
  0xba   : > { %869 = vperm.xlu1 %8698, %v9846_v13  }
  0xbc   : > { %849 = vperm.xlu0 %8710, %v777_v3  }
  0xbe   : > { %874 = vperm.xlu1 %8698, %v782_v14  }
  0xc0   : > { %864 = vperm.xlu0 %8710, %v780_v5  }
  0xc2   : > { %8699 = vset.pattern.permute.xlu1 %v12249_v7 }
  0xc3   : > { %1319 = vperm.xlu1 %8699, %v780_v5  }
  0xc4   : > { %879 = vperm.xlu0 %8710, %v783_v6  }
  0xc7   : > { %1327 = vperm.xlu1 %8699, %v782_v14  }
  0xc8   : > { %889 = vperm.xlu0 %8710, %v785_v8  }
  0xcb   : > { %1331 = vperm.xlu1 %8699, %v783_v6  }
  0xcc   : > { %904 = vperm.xlu0 %8710, %v9830_v9  }
  0xcf   : > { %8700 = vset.pattern.permute.xlu1 %v12247_v0 }
  0xd0   : > { %919 = vperm.xlu0 %8710, %v9836_v11   ;;  %1712 = vperm.xlu1 %8700, %v9846_v13  }
  0xd4   : > { %929 = vperm.xlu0 %8710, %v9840_v12   ;;  %1716 = vperm.xlu1 %8700, %v782_v14  }
  0xd8   : > { %944 = vperm.xlu0 %8710, %v9858_v15   ;;  %8701 = vset.pattern.permute.xlu1 %v12245_v1 }
  0xd9   : > { %884 = vperm.xlu1 %8701, %v784_v16  }
  0xdc   : > { %959 = vperm.xlu0 %8710, %v9864_v17  }
  0xdd   : > { %894 = vperm.xlu1 %8701, %v786_v18  }
  0xe0   : > { %969 = vperm.xlu0 %8710, %v9869_v19  }
  0xe1   : > { %899 = vperm.xlu1 %8701, %v787_v20  }
  0xe4   : > { %984 = vperm.xlu0 %8710, %v9874_v21  }
  0xe5   : > { %8702 = vset.pattern.permute.xlu1 %v12249_v7 }
  0xe6   : > { %1339 = vperm.xlu1 %8702, %v785_v8  }
  0xe8   : > { %999 = vperm.xlu0 %8710, %v9879_v22  }
  0xea   : > { %1343 = vperm.xlu1 %8702, %v786_v18  }
  0xec   : > { %1009 = vperm.xlu0 %8710, %v9883_v23  }
  0xee   : > { %8703 = vset.pattern.permute.xlu1 %v12247_v0 }
  0xef   : > { %1724 = vperm.xlu1 %8703, %v784_v16  }
  0xf0   : > { %8721 = vset.pattern.permute.xlu0 %v12249_v7 }
  0xf1   : > { %1303 = vperm.xlu0 %8721, %v776_v10   ;;  %v10027_v10 = vld [vmem:[%s9807_s25 + $0x120] sm:$0xff] }
  0xf3   : > { %1732 = vperm.xlu1 %8703, %v786_v18   ;;  %v10051_v18 = vld [vmem:[%s9807_s25 + $0x160] sm:$0xff] }
  0xf5   : > { %1315 = vperm.xlu0 %8721, %v9822_v4  }
  0xf7   : > { %1736 = vperm.xlu1 %8703, %v787_v20  }
  0xf9   : > { %1323 = vperm.xlu0 %8721, %v9846_v13   ;;  %v10036_v13 = vld [vmem:[%s9807_s25 + $0x138] sm:$0xff] }
  0xfb   : > { %8704 = vset.pattern.permute.xlu1 %v12245_v1 }
  0xfc   : > { %909 = vperm.xlu1 %8704, %v789_v27  }
  0xfd   : > { %1335 = vperm.xlu0 %8721, %v784_v16  }
 0x100   : > { %914 = vperm.xlu1 %8704, %v790_v29  }
 0x101   : > { %1347 = vperm.xlu0 %8721, %v787_v20  }
 0x104   : > { %8705 = vset.pattern.permute.xlu1 %v12249_v7 }
 0x105   : > { %1355 = vperm.xlu0 %8721, %v789_v27   ;;  %1351 = vperm.xlu1 %8705, %v9830_v9  }
 0x109   : > { %1359 = vperm.xlu1 %8705, %v790_v29   ;;  %1367 = vperm.xlu0 %8721, %v792_v30  }
 0x10d   : > { %1363 = vperm.xlu1 %8705, %v9836_v11   ;;  %1379 = vperm.xlu0 %8721, %v795_v31  }
 0x111   : > { %8706 = vset.pattern.permute.xlu1 %v12247_v0  ;;  %1387 = vperm.xlu0 %8721, %v9916_v32  }
 0x112   : > { %1744 = vperm.xlu1 %8706, %v789_v27  }
 0x115   : > { %1399 = vperm.xlu0 %8721, %v9921_v33  }
 0x116   : > { %1748 = vperm.xlu1 %8706, %v790_v29   ;;  %v10073_v29 = vld [vmem:[%s9807_s25 + $0x188] sm:$0xff] }
 0x119   : > { %1411 = vperm.xlu0 %8721, %v9925_v34  }
 0x11a   : > { %v9928_v35 = vpop.permute.xlu1 %854  ;;  %8707 = vset.pattern.permute.xlu1 %v12245_v1  ;;  %v9931_v36 = vpop.permute.xlu0 %1696 }
 0x11b   : > { %924 = vperm.xlu1 %8707, %v792_v30  }
 0x11d   : > { %1419 = vperm.xlu0 %8721, %v9934_v37  }
 0x11e   : > { %v9938_v39 = vpop.permute.xlu1 %859  ;;  %v9940_v40 = vpop.permute.xlu0 %1708 }
 0x11f   : > { %934 = vperm.xlu1 %8707, %v794_v38  }
 0x121   : > { %1431 = vperm.xlu0 %8721, %v9943_v41  }
 0x122   : > { %v9946_v42 = vpop.permute.xlu0 %1720 }
 0x123   : > { %v9951_v44 = vpop.permute.xlu1 %1307  ;;  %939 = vperm.xlu1 %8707, %v795_v31  }
 0x125   : > { %1443 = vperm.xlu0 %8721, %v9949_v43  }
 0x126   : > { %v9954_v45 = vpop.permute.xlu0 %1728 }
 0x127   : > { %v9959_v47 = vpop.permute.xlu1 %1311  ;;  %8708 = vset.pattern.permute.xlu1 %v12249_v7 }
 0x128   : > { %1371 = vperm.xlu1 %8708, %v9840_v12  }
 0x129   : > { %1451 = vperm.xlu0 %8721, %v9957_v46  }
 0x12a   : > { %v9964_v48 = vpop.permute.xlu0 %1740 }
 0x12c   : > { %1375 = vperm.xlu1 %8708, %v794_v38   ;;  %v9969_v50 = vpop.permute.xlu1 %1692 }
 0x12d   : > { %1463 = vperm.xlu0 %8721, %v9967_v49  }
 0x12e   : > { %v9972_v51 = vpop.permute.xlu0 %1752 }
 0x130   : > { %8709 = vset.pattern.permute.xlu1 %v12247_v0  ;;  %v9978_v53 = vpop.permute.xlu1 %1700 }
 0x131   : > { %1756 = vperm.xlu1 %8709, %v792_v30   ;;  %1475 = vperm.xlu0 %8721, %v9975_v52  }
 0x132   : > { %v9981_v54 = vpop.permute.xlu0 %1760 }
 0x133   : > { %12291 = vst [vmem:[#allocation27_spill] sm:$0xff] %v9981_v54 }
 0x134   : > { %v9986_v56 = vpop.permute.xlu1 %1704 }
 0x135   : > { %1764 = vperm.xlu1 %8709, %v794_v38   ;;  %1483 = vperm.xlu0 %8721, %v9984_v55   ;;  %v10109_v55 = vld [vmem:[%s9807_s25 + $0x1b8] sm:$0xff] }
 0x137   : > { %v9989_v57 = vpop.permute.xlu0 %844 }
 0x139   : > { %1768 = vperm.xlu1 %8709, %v795_v31   ;;  %v9991_v58 = vpop.permute.xlu1 %869  ;;  %8732 = vset.pattern.permute.xlu0 %v12247_v0  ;;  %v10079_v31 = vld [vmem:[%s12218_s1] ss:$0 sm:$0xff] }
 0x13a   : > { %1772 = vperm.xlu0 %8732, %v9858_v15   ;;  %v1168_v52 = vmul.f32 %v10079_v31, %v9928_v35 }
 0x13b   : > { %v850_v59 = vpop.permute.xlu0 %849 }
 0x13d   : > { %8711 = vset.pattern.permute.xlu1 %v12245_v1  ;;  %v9996_v60 = vpop.permute.xlu1 %874 }
 0x13e   : > { %949 = vperm.xlu1 %8711, %v9916_v32   ;;  %1784 = vperm.xlu0 %8732, %v9864_v17  }
 0x13f   : > { %v10000_v61 = vpop.permute.xlu0 %864 }
 0x140   : > { %v1170_v49 = vmul.f32 %v10079_v31, %v10000_v61 }
 0x142   : > { %954 = vperm.xlu1 %8711, %v798_v62   ;;  %v10003_v63 = vpop.permute.xlu1 %1319  ;;  %1792 = vperm.xlu0 %8732, %v9869_v19  }
 0x143   : > { %v10006_v2 = vpop.permute.xlu0 %879 }
 0x146   : > { %8712 = vset.pattern.permute.xlu1 %v12249_v7  ;;  %v10009_v3 = vpop.permute.xlu1 %1327  ;;  %1804 = vperm.xlu0 %8732, %v9874_v21  }
 0x147   : > { %1383 = vperm.xlu1 %8712, %v9858_v15   ;;  %v10013_v4 = vpop.permute.xlu0 %889  ;;  %v10043_v15 = vld [vmem:[%s9807_s25 + $0x148] sm:$0xff] }
 0x14a   : > { %v10015_v5 = vpop.permute.xlu1 %1331  ;;  %1816 = vperm.xlu0 %8732, %v9879_v22  }
 0x14b   : > { %1391 = vperm.xlu1 %8712, %v798_v62   ;;  %v10018_v6 = vpop.permute.xlu0 %904 }
 0x14e   : > { %1824 = vperm.xlu0 %8732, %v9883_v23  }
 0x14f   : > { %1395 = vperm.xlu1 %8712, %v9864_v17   ;;  %v10022_v8 = vpop.permute.xlu1 %1712  ;;  %v10024_v9 = vpop.permute.xlu0 %919 }
 0x152   : > { %1836 = vperm.xlu0 %8732, %v10027_v10  }
 0x153   : > { %8713 = vset.pattern.permute.xlu1 %v12247_v0  ;;  %v10031_v11 = vpop.permute.xlu1 %1716  ;;  %v10033_v12 = vpop.permute.xlu0 %929  ;;  %v10094_v0 = vld [vmem:[%s12219_s2] ss:$0 sm:$0xff] }
 0x154   : > { %1776 = vperm.xlu1 %8713, %v9916_v32   ;;  %v1167_v32 = vmul.f32 %v10079_v31, %v850_v59  ;;  %v1166_v59 = vmul.f32 %v10079_v31, %v9989_v57  ;;  %v10120_v57 = vld [vmem:[%s12218_s1 + $0x2] ss:$0 sm:$0xff] }
 0x155   : > { %v1952_v35 = vmul.f32 %v10120_v57, %v9931_v36  ;;  %v1955_v23 = vmul.f32 %v10120_v57, %v9940_v40  ;;  %v1173_v36 = vmul.f32 %v10079_v31, %v10006_v2  ;;  %v1951_v61 = vmul.f32 %v10120_v57, %v9969_v50 }
 0x156   : > { %1848 = vperm.xlu0 %8732, %v10036_v13   ;;  %v1241_v40 = vadd.f32 %v10094_v0, %v1170_v49  ;;  %v1958_v50 = vmul.f32 %v10120_v57, %v9946_v42  ;;  %v1954_v49 = vmul.f32 %v10120_v57, %v9986_v56 }
 0x157   : > { %v10040_v14 = vpop.permute.xlu0 %944 }
 0x158   : > { %12293 = vst [vmem:[#allocation29_spill] sm:$0xff] %v10040_v14  ;;  %1780 = vperm.xlu1 %8713, %v798_v62   ;;  %v10045_v16 = vpop.permute.xlu1 %884  ;;  %v10086_v62 = vld [vmem:[%s9807_s25 + $0x1a0] sm:$0xff]  ;;  %v1239_v14 = vadd.f32 %v10094_v0, %v1168_v52  ;;  %v1175_v52 = vmul.f32 %v10079_v31, %v10013_v4 }
 0x15a   : > { %1856 = vperm.xlu0 %8732, %v10043_v15   ;;  %v1246_v42 = vadd.f32 %v10094_v0, %v1175_v52 }
 0x15b   : > { %v10048_v17 = vpop.permute.xlu0 %959 }
 0x15c   : > { %12294 = vst [vmem:[#allocation30_spill] sm:$0xff] %v10048_v17  ;;  %8714 = vset.pattern.permute.xlu1 %v12245_v1  ;;  %v10054_v20 = vpop.permute.xlu1 %894  ;;  %v10134_v17 = vld [vmem:[%s9807_s25 + $0x1c8] sm:$0xff] }
 0x15d   : > { %964 = vperm.xlu1 %8714, %v9921_v33  }
 0x15e   : > { %1868 = vperm.xlu0 %8732, %v10051_v18  }
 0x15f   : > { %v10061_v25 = vpop.permute.xlu0 %969 }
 0x160   : > { %12295 = vst [vmem:[#allocation31_spill] sm:$0xff] %v10061_v25  ;;  %v10066_v27 = vpop.permute.xlu1 %899  ;;  %v1169_v25 = vmul.f32 %v10079_v31, %v9938_v39  ;;  %v1237_v39 = vadd.f32 %v10094_v0, %v1166_v59 }
 0x161   : > { %974 = vperm.xlu1 %8714, %v10058_v24  }
 0x162   : > { %1880 = vperm.xlu0 %8732, %v10064_v26   ;;  %v1240_v54 = vadd.f32 %v10094_v0, %v1169_v25  ;;  %v1171_v25 = vmul.f32 %v10079_v31, %v9991_v58 }
 0x163   : > { %v10070_v28 = vpop.permute.xlu0 %984 }
 0x164   : > { %12296 = vst [vmem:[#allocation32_spill] sm:$0xff] %v10070_v28  ;;  %v10099_v28 = vld [vmem:[%s12218_s1 + $0x1] ss:$0 sm:$0xff] }
 0x165   : > { %979 = vperm.xlu1 %8714, %v9925_v34   ;;  %v1340_v30 = vpop.permute.xlu1 %1339  ;;  %v1566_v2 = vmul.f32 %v10099_v28, %v10003_v63  ;;  %v1244_v63 = vadd.f32 %v10094_v0, %v1173_v36  ;;  %v1569_v58 = vmul.f32 %v10099_v28, %v10015_v5 }
 0x166   : > { %1888 = vperm.xlu0 %8732, %v10073_v29  }
 0x167   : > { %v10083_v38 = vpop.permute.xlu0 %999 }
 0x168   : > { %12297 = vst [vmem:[#allocation33_spill] sm:$0xff] %v10083_v38 }
 0x169   : > { %8715 = vset.pattern.permute.xlu1 %v12249_v7  ;;  %v10089_v1 = vpop.permute.xlu1 %1343  ;;  %v1238_v7 = vadd.f32 %v10094_v0, %v1167_v32  ;;  %v1564_v32 = vmul.f32 %v10099_v28, %v9959_v47  ;;  %v1953_v47 = vmul.f32 %v10120_v57, %v9978_v53 }
 0x16a   : > { %1403 = vperm.xlu1 %8715, %v9869_v19   ;;  %1900 = vperm.xlu0 %8732, %v10086_v62   ;;  %v1563_v19 = vmul.f32 %v10099_v28, %v9951_v44 }
 0x16b   : > { %v10106_v38 = vpop.permute.xlu0 %1009  ;;  %v1628_v59 = vadd.f32 %v1564_v32, %v1239_v14  ;;  %v1172_v32 = vmul.f32 %v10079_v31, %v9996_v60 }
 0x16c   : > { %12298 = vst [vmem:[#allocation34_spill] sm:$0xff] %v10106_v38  ;;  %v1627_v44 = vadd.f32 %v1563_v19, %v1238_v7  ;;  %v12299_v19 = vmov 2  }
 0x16d   : > { %v2017_v4 = vadd.f32 %v1953_v47, %v1628_v59  ;;  %v12300_v47 = vmov 0   ;;  %v1242_v59 = vadd.f32 %v10094_v0, %v1171_v25  ;;  %v1243_v5 = vadd.f32 %v10094_v0, %v1172_v32 }
 0x16e   : > { %1407 = vperm.xlu1 %8715, %v10058_v24   ;;  %v10125_v38 = vpop.permute.xlu1 %1724  ;;  %1912 = vperm.xlu0 %8732, %v10109_v55   ;;  %v2016_v14 = vadd.f32 %v1952_v35, %v1627_v44  ;;  %v1568_v35 = vmul.f32 %v10099_v28, %v10009_v3  ;;  %v1571_v44 = vmul.f32 %v10099_v28, %v1340_v30 }
 0x16f   : > { %v1960_v3 = vmul.f32 %v10120_v57, %v9954_v45  ;;  %v1957_v30 = vmul.f32 %v10120_v57, %v10031_v11  ;;  %v1956_v25 = vmul.f32 %v10120_v57, %v10022_v8 }
 0x170   : > { %v1304_v46 = vpop.permute.xlu0 %1303 }
 0x171   : > { %v1562_v7 = vmul.f32 %v10099_v28, %v1304_v46 }
 0x172   : > { %8716 = vset.pattern.permute.xlu1 %v12299_v19  ;;  %v10150_v53 = vpop.permute.xlu1 %1732  ;;  %1920 = vperm.xlu0 %8732, %v10134_v17  }
 0x173   : > { %v1626_v46 = vadd.f32 %v1562_v7, %v1237_v39  ;;  %1788 = vperm.xlu1 %8716, %v9921_v33   ;;  %v1630_v7 = vadd.f32 %v1566_v2, %v1241_v40  ;;  %v2081_v2 = vmax.f32 %v2017_v4, 0.0 }
 0x174   : > { %v1316_v43 = vpop.permute.xlu0 %1315 }
 0x175   : > { %v1565_v39 = vmul.f32 %v10099_v28, %v1316_v43  ;;  %v2015_v33 = vadd.f32 %v1951_v61, %v1626_v46  ;;  %v2080_v43 = vmax.f32 %v2016_v14, 0.0  ;;  %v1632_v46 = vadd.f32 %v1568_v35, %v1243_v5 }
 0x176   : > { %v1737_v60 = vpop.permute.xlu1 %1736  ;;  %8743 = vset.pattern.permute.xlu0 %v12300_v47  ;;  %v1633_v14 = vadd.f32 %v1569_v58, %v1244_v63  ;;  %v2019_v45 = vadd.f32 %v1955_v23, %v1630_v7 }
 0x177   : > { %v1629_v56 = vadd.f32 %v1565_v39, %v1240_v54  ;;  %1796 = vperm.xlu1 %8716, %v10058_v24   ;;  %v2079_v36 = vmax.f32 %v2015_v33, 0.0  ;;  %1024 = vperm.xlu0 %8743, %v10027_v10   ;;  %v1174_v54 = vmul.f32 %v10079_v31, %v10045_v16  ;;  %v1635_v39 = vadd.f32 %v1571_v44, %v1246_v42 }
 0x178   : > { %v1324_v61 = vpop.permute.xlu0 %1323  ;;  %v2021_v16 = vadd.f32 %v1957_v30, %v1632_v46  ;;  %v2022_v35 = vadd.f32 %v1958_v50, %v1633_v14  ;;  %v2083_v58 = vmax.f32 %v2019_v45, 0.0  ;;  %v1959_v44 = vmul.f32 %v10120_v57, %v10125_v38  ;;  %v10207_v30 = vld [vmem:[%s9807_s25 + $0xf0] sm:$0xff] }
 0x179   : > { %v2018_v52 = vadd.f32 %v1954_v49, %v1629_v56  ;;  %v1567_v24 = vmul.f32 %v10099_v28, %v1324_v61  ;;  %v2143_v40 = vpack.c.bf16 %v2080_v43, %v2079_v36  ;;  %v1177_v49 = vmul.f32 %v10079_v31, %v10066_v27 }
 0x17a   : > { %v1245_v4 = vadd.f32 %v10094_v0, %v1174_v54  ;;  %v2024_v42 = vadd.f32 %v1960_v3, %v1635_v39  ;;  %v2085_v43 = vmax.f32 %v2021_v16, 0.0  ;;  %v2086_v61 = vmax.f32 %v2022_v35, 0.0 }
 0x17b   : > { %v2082_v32 = vmax.f32 %v2018_v52, 0.0  ;;  %v1631_v33 = vadd.f32 %v1567_v24, %v1242_v59  ;;  %1800 = vperm.xlu1 %8716, %v9925_v34   ;;  %8441 = vmatprep.mubr.msk.bf16.mxu0 %vm2214_vm0, %v2143_v40  ;;  %v910_v11 = vpop.permute.xlu1 %909  ;;  %v1176_v34 = vmul.f32 %v10079_v31, %v10054_v20  ;;  %v1248_v59 = vadd.f32 %v10094_v0, %v1177_v49 }
 0x17c   : > { %v1336_v56 = vpop.permute.xlu0 %1335  ;;  %1039 = vperm.xlu0 %8743, %v10036_v13   ;;  %v1572_v20 = vmul.f32 %v10099_v28, %v10089_v1  ;;  %v2088_v52 = vmax.f32 %v2024_v42, 0.0  ;;  %v1961_v24 = vmul.f32 %v10120_v57, %v10150_v53  ;;  %v1962_v40 = vmul.f32 %v10120_v57, %v1737_v60 }
 0x17d   : > { %v2020_v23 = vadd.f32 %v1956_v25, %v1631_v33  ;;  %v1570_v63 = vmul.f32 %v10099_v28, %v1336_v56  ;;  %v2144_v8 = vpack.c.bf16 %v2082_v32, %v2081_v2  ;;  %v1247_v54 = vadd.f32 %v10094_v0, %v1176_v34 }
 0x17e   : > { %v1178_v1 = vmul.f32 %v10079_v31, %v10018_v6  ;;  %v2146_v45 = vpack.c.bf16 %v2086_v61, %v2085_v43  ;;  %v12301_v60 = vmov 1   ;;  %v1963_v42 = vmul.f32 %v10120_v57, %v9964_v48 }
 0x17f   : > { %v2084_v27 = vmax.f32 %v2020_v23, 0.0  ;;  %v1634_v7 = vadd.f32 %v1570_v63, %v1245_v4  ;;  %8717 = vset.pattern.permute.xlu1 %v12300_v47  ;;  %8442 = vmatmul.mubr.msk.bf16.vlgmr.msra.gmra.mrb[0].mxu0 %vm2214_vm0, %v2144_v8  ;;  %v915_v36 = vpop.permute.xlu1 %914  ;;  %v1636_v25 = vadd.f32 %v1572_v20, %v1247_v54  ;;  %v1181_v23 = vmul.f32 %v10079_v31, %v10024_v9 }
 0x180   : > { %v1348_v50 = vpop.permute.xlu0 %1347  ;;  %989 = vperm.xlu1 %8717, %v9934_v37   ;;  %1049 = vperm.xlu0 %8743, %v10043_v15   ;;  %v1249_v6 = vadd.f32 %v10094_v0, %v1178_v1  ;;  %v1179_v8 = vmul.f32 %v10079_v31, %v910_v11  ;;  %v1966_v48 = vmul.f32 %v10120_v57, %v9972_v51 }
 0x181   : > { %v2023_v3 = vadd.f32 %v1959_v44, %v1634_v7  ;;  %v1573_v38 = vmul.f32 %v10099_v28, %v1348_v50  ;;  %v2145_v5 = vpack.c.bf16 %v2084_v27, %v2083_v58  ;;  %v2025_v53 = vadd.f32 %v1961_v24, %v1636_v25 }
 0x182   : > { %v1250_v11 = vadd.f32 %v10094_v0, %v1179_v8  ;;  %v1180_v7 = vmul.f32 %v10079_v31, %v915_v36 }
 0x183   : > { %v2087_v2 = vmax.f32 %v2023_v3, 0.0  ;;  %v1637_v46 = vadd.f32 %v1573_v38, %v1248_v59  ;;  %8445 = vmatprep.mubr.msk.bf16.mxu0 %vm2214_vm0, %v2145_v5  ;;  %v2089_v63 = vmax.f32 %v2025_v53, 0.0  ;;  %v1183_v53 = vmul.f32 %v10079_v31, %v10033_v12 }
 0x184   : > { %v1356_v14 = vpop.permute.xlu0 %1355  ;;  %994 = vperm.xlu1 %8717, %v10207_v30   ;;  %v1352_v39 = vpop.permute.xlu1 %1351  ;;  %1064 = vperm.xlu0 %8743, %v10051_v18   ;;  %v1251_v61 = vadd.f32 %v10094_v0, %v1180_v7 }
 0x185   : > { %v2147_v32 = vpack.c.bf16 %v2088_v52, %v2087_v2  ;;  %v2026_v33 = vadd.f32 %v1962_v40, %v1637_v46  ;;  %v1574_v4 = vmul.f32 %v10099_v28, %v1352_v39  ;;  %v1575_v27 = vmul.f32 %v10099_v28, %v1356_v14 }
 0x187   : > { %8446 = vmatmul.mubr.msk.bf16.gmra.mrb[4].mxu0 %vm2214_vm0, %v2146_v45  ;;  %v2090_v56 = vmax.f32 %v2026_v33, 0.0  ;;  %v1638_v44 = vadd.f32 %v1574_v4, %v1249_v6  ;;  %v1639_v20 = vadd.f32 %v1575_v27, %v1250_v11 }
 0x188   : > { %8718 = vset.pattern.permute.xlu1 %v12301_v60  ;;  %8449 = vmatprep.mubr.msk.bf16.mxu0 %vm2214_vm0, %v2147_v32  ;;  %v1360_v16 = vpop.permute.xlu1 %1359  ;;  %v10221_v49 = vpop.permute.xlu0 %1367  ;;  %v10271_v32 = vld [vmem:[%s9807_s25 + $0x1f8] sm:$0xff] }
 0x189   : > { %1415 = vperm.xlu1 %8718, %v9874_v21   ;;  %1079 = vperm.xlu0 %8743, %v10064_v26   ;;  %v2148_v58 = vpack.c.bf16 %v2090_v56, %v2089_v63  ;;  %v1252_v21 = vadd.f32 %v10094_v0, %v1181_v23  ;;  %v2027_v59 = vadd.f32 %v1963_v42, %v1638_v44  ;;  %v10280_v56 = vld [vmem:[%s9807_s25 + $0x180] sm:$0xff] }
 0x18a   : > { %v1576_v3 = vmul.f32 %v10099_v28, %v1360_v16  ;;  %v12302_v16 = vld [vmem:[#allocation23_spill] sm:$0xff]  ;;  %v1254_v23 = vadd.f32 %v10094_v0, %v1183_v53  ;;  %v12303_v42 = vld [vmem:[#allocation22_spill] sm:$0xff] }
 0x18b   : > { %v2091_v54 = vmax.f32 %v2027_v59, 0.0 }
 0x18c   : > { %v1364_v35 = vpop.permute.xlu1 %1363  ;;  %v10230_v34 = vpop.permute.xlu0 %1379  ;;  %v1640_v51 = vadd.f32 %v1576_v3, %v1251_v61 }
 0x18d   : > { %1423 = vperm.xlu1 %8718, %v10207_v30   ;;  %v1577_v9 = vmul.f32 %v10099_v28, %v1364_v35  ;;  %1089 = vperm.xlu0 %8743, %v10073_v29   ;;  %v10291_v35 = vld [vmem:[%s9807_s25 + $0x198] sm:$0xff] }
 0x18f   : > { %8450 = vmatmul.mubr.msk.bf16.gmra.mrb[8].mxu0 %vm2214_vm0, %v2148_v58  ;;  %v1641_v38 = vadd.f32 %v1577_v9, %v1252_v21  ;;  %v12304_v58 = vld [vmem:[#allocation27_spill] sm:$0xff]  ;;  %v1578_v21 = vmul.f32 %v10099_v28, %v10221_v49  ;;  %v1581_v49 = vmul.f32 %v10099_v28, %v10230_v34 }
 0x190   : > { %v10242_v43 = vpop.permute.xlu0 %1387  ;;  %v1968_v44 = vmul.f32 %v10120_v57, %v12304_v58 }
 0x191   : > { %1427 = vperm.xlu1 %8718, %v9879_v22   ;;  %v1745_v50 = vpop.permute.xlu1 %1744  ;;  %1104 = vperm.xlu0 %8743, %v10086_v62   ;;  %v2030_v24 = vadd.f32 %v1966_v48, %v1641_v38 }
 0x192   : > { %v1964_v5 = vmul.f32 %v10120_v57, %v1745_v50 }
 0x193   : > { %v2094_v1 = vmax.f32 %v2030_v24, 0.0 }
 0x194   : > { %v2028_v36 = vadd.f32 %v1964_v5, %v1639_v20  ;;  %v10254_v2 = vpop.permute.xlu0 %1399 }
 0x195   : > { %8719 = vset.pattern.permute.xlu1 %v12299_v19  ;;  %v1749_v52 = vpop.permute.xlu1 %1748  ;;  %1119 = vperm.xlu0 %8743, %v10109_v55  }
 0x196   : > { %v2092_v22 = vmax.f32 %v2028_v36, 0.0  ;;  %v1965_v40 = vmul.f32 %v10120_v57, %v1749_v52  ;;  %1808 = vperm.xlu1 %8719, %v9934_v37   ;;  %v10263_v37 = vld [vmem:[%s9807_s25 + $0x1e0] sm:$0xff] }
 0x198   : > { %v2149_v62 = vpack.c.bf16 %v2092_v22, %v2091_v54  ;;  %v2029_v46 = vadd.f32 %v1965_v40, %v1640_v51  ;;  %v10260_v25 = vpop.permute.xlu0 %1411 }
 0x199   : > { %1129 = vperm.xlu0 %8743, %v10134_v17  }
 0x19a   : > { %v2093_v14 = vmax.f32 %v2029_v46, 0.0  ;;  %1812 = vperm.xlu1 %8719, %v10207_v30   ;;  %8453 = vmatprep.mubr.msk.bf16.mxu0 %vm2214_vm0, %v2149_v62  ;;  %v925_v39 = vpop.permute.xlu1 %924  ;;  %v7899_v30 = vld [vmem:[%s9807_s25 + $0x110] sm:$0xff] }
 0x19b   : > { %v1182_v63 = vmul.f32 %v10079_v31, %v925_v39  ;;  %v2697_v39 = vld [vmem:[#allocation4 + $0x8] sm:$0xff] }
 0x19c   : > { %v2150_v45 = vpack.c.bf16 %v2094_v1, %v2093_v14  ;;  %v10273_v17 = vpop.permute.xlu0 %1419 }
 0x19d   : > { %1144 = vperm.xlu0 %8743, %v10263_v37   ;;  %v1253_v27 = vadd.f32 %v10094_v0, %v1182_v63 }
 0x19e   : > { %8720 = vset.pattern.permute.xlu1 %v12300_v47  ;;  %8454 = vmatmul.mubr.msk.bf16.gmra.mrb[12].mxu0 %vm2214_vm0, %v2150_v45  ;;  %v935_v55 = vpop.permute.xlu1 %934  ;;  %v2701_v45 = vld [vmem:[#allocation4 + $0x28] sm:$0xff] }
 0x19f   : > { %1004 = vperm.xlu1 %8720, %v9943_v41   ;;  %v1184_v7 = vmul.f32 %v10079_v31, %v935_v55  ;;  %v1642_v20 = vadd.f32 %v1578_v21, %v1253_v27  ;;  %v2713_v27 = vld [vmem:[#allocation4 + $0x88] sm:$0xff] }
 0x1a0   : > { %v10283_v4 = vpop.permute.xlu0 %1431 }
 0x1a1   : > { %1159 = vperm.xlu0 %8743, %v10271_v32   ;;  %v1255_v61 = vadd.f32 %v10094_v0, %v1184_v7  ;;  %v10326_v7 = vld [vmem:[%s9807_s25 + $0x130] sm:$0xff] }
 0x1a2   : > { %v940_v33 = vpop.permute.xlu1 %939 }
 0x1a3   : > { %1014 = vperm.xlu1 %8720, %v7899_v30   ;;  %v1185_v59 = vmul.f32 %v10079_v31, %v940_v33  ;;  %v7973_v33 = vcombine.high %v2697_v39, %v2701_v45 }
 0x1a4   : > { %v10300_v11 = vpop.permute.xlu0 %1443 }
 0x1a5   : > { %8745 = vset.pattern.permute.xlu0 %v12301_v60  ;;  %v1256_v52 = vadd.f32 %v10094_v0, %v1185_v59  ;;  %3433 = vmatprep.subr.bf16.mxu0 %v7973_v33  ;;  %v2737_v33 = vld [vmem:[#allocation4 + $0x148] sm:$0xff] }
 0x1a6   : > { %1495 = vperm.xlu0 %8745, %v10280_v56  }
 0x1a7   : > { %1019 = vperm.xlu1 %8720, %v12302_v16   ;;  %v1372_v6 = vpop.permute.xlu1 %1371  ;;  %v1645_v34 = vadd.f32 %v1581_v49, %v1256_v52 }
 0x1a8   : > { %v1579_v8 = vmul.f32 %v10099_v28, %v1372_v6  ;;  %v10310_v54 = vpop.permute.xlu0 %1451  ;;  %v7972_v6 = vcombine.low %v2697_v39, %v2701_v45 }
 0x1aa   : > { %1507 = vperm.xlu0 %8745, %v10291_v35   ;;  %v1643_v9 = vadd.f32 %v1579_v8, %v1254_v23  ;;  %3434 = vmatpush1.bf16.msra.mxu0 %v7972_v6  ;;  %v2705_v8 = vld [vmem:[#allocation4 + $0x48] sm:$0xff] }
 0x1ab   : > { %8722 = vset.pattern.permute.xlu1 %v12301_v60  ;;  %v1376_v12 = vpop.permute.xlu1 %1375 }
 0x1ac   : > { %1435 = vperm.xlu1 %8722, %v12303_v42   ;;  %v2032_v50 = vadd.f32 %v1968_v44, %v1643_v9  ;;  %v1580_v38 = vmul.f32 %v10099_v28, %v1376_v12  ;;  %v10317_v55 = vpop.permute.xlu0 %1463  ;;  %v2709_v12 = vld [vmem:[#allocation4 + $0x68] sm:$0xff] }
 0x1ad   : > { %v7980_v58 = vcombine.low %v2705_v8, %v2709_v12  ;;  %v2717_v9 = vld [vmem:[#allocation4 + $0xa8] sm:$0xff] }
 0x1ae   : > { %v2096_v51 = vmax.f32 %v2032_v50, 0.0  ;;  %v1644_v40 = vadd.f32 %v1580_v38, %v1255_v61  ;;  %v7989_v59 = vcombine.high %v2713_v27, %v2717_v9  ;;  %v2721_v50 = vld [vmem:[#allocation4 + $0xc8] sm:$0xff]  ;;  %v12306_v61 = vld [vmem:[#allocation29_spill] sm:$0xff] }
 0x1b0   : > { %1439 = vperm.xlu1 %8722, %v7899_v30   ;;  %v1757_v48 = vpop.permute.xlu1 %1756  ;;  %v10320_v44 = vpop.permute.xlu0 %1475 }
 0x1b1   : > { %v1967_v3 = vmul.f32 %v10120_v57, %v1757_v48  ;;  %v7988_v48 = vcombine.low %v2713_v27, %v2717_v9  ;;  %v2745_v27 = vld [vmem:[#allocation4 + $0x188] sm:$0xff] }
 0x1b2   : > { %v2749_v9 = vld [vmem:[#allocation4 + $0x1a8] sm:$0xff] }
 0x1b3   : > { %v2031_v5 = vadd.f32 %v1967_v3, %v1642_v20  ;;  %v2725_v20 = vld [vmem:[#allocation4 + $0xe8] sm:$0xff] }
 0x1b4   : > { %8723 = vset.pattern.permute.xlu1 %v12299_v19  ;;  %v1765_v36 = vpop.permute.xlu1 %1764  ;;  %v10328_v3 = vpop.permute.xlu0 %1483  ;;  %v7997_v49 = vcombine.high %v2721_v50, %v2725_v20  ;;  %v7996_v52 = vcombine.low %v2721_v50, %v2725_v20 }
 0x1b5   : > { %v2095_v24 = vmax.f32 %v2031_v5, 0.0  ;;  %v1969_v22 = vmul.f32 %v10120_v57, %v1765_v36  ;;  %1820 = vperm.xlu1 %8723, %v9943_v41   ;;  %v10332_v5 = vld [vmem:[%s9807_s25 + $0x1a8] sm:$0xff]  ;;  %v1186_v36 = vmul.f32 %v10079_v31, %v12306_v61 }
 0x1b6   : > { %1515 = vperm.xlu0 %8745, %v10332_v5  }
 0x1b7   : > { %v2151_v62 = vpack.c.bf16 %v2096_v51, %v2095_v24  ;;  %v2033_v1 = vadd.f32 %v1969_v22, %v1644_v40  ;;  %v2729_v51 = vld [vmem:[#allocation4 + $0x108] sm:$0xff] }
 0x1b8   : > { %v1769_v46 = vpop.permute.xlu1 %1768  ;;  %v2733_v24 = vld [vmem:[#allocation4 + $0x128] sm:$0xff] }
 0x1b9   : > { %v1970_v14 = vmul.f32 %v10120_v57, %v1769_v46  ;;  %1828 = vperm.xlu1 %8723, %v7899_v30   ;;  %8457 = vmatprep.mubr.msk.bf16.mxu0 %vm2214_vm0, %v2151_v62  ;;  %v2097_v23 = vmax.f32 %v2033_v1, 0.0  ;;  %v7981_v30 = vcombine.high %v2705_v8, %v2709_v12  ;;  %v8005_v40 = vcombine.high %v2729_v51, %v2733_v24  ;;  %v1773_v45 = vpop.permute.xlu0 %1772 }
 0x1ba   : > { %v1257_v62 = vadd.f32 %v10094_v0, %v1186_v36  ;;  %v8004_v1 = vcombine.low %v2729_v51, %v2733_v24  ;;  %v1971_v8 = vmul.f32 %v10120_v57, %v1773_v45  ;;  %v2753_v51 = vld [vmem:[#allocation4 + $0x1c8] sm:$0xff] }
 0x1bb   : > { %v2034_v53 = vadd.f32 %v1970_v14, %v1645_v34  ;;  %3435 = vmatprep.subr.bf16.mxu0 %v7981_v30  ;;  %v12307_v34 = vld [vmem:[#allocation30_spill] sm:$0xff]  ;;  %v1583_v30 = vmul.f32 %v10099_v28, %v10242_v43 }
 0x1bc   : > { %3436 = vmatpush1.bf16.msra.mxu0 %v7980_v58  ;;  %v1189_v14 = vmul.f32 %v10079_v31, %v12307_v34  ;;  %v2757_v24 = vld [vmem:[#allocation4 + $0x1e8] sm:$0xff] }
 0x1bd   : > { %v2098_v41 = vmax.f32 %v2034_v53, 0.0  ;;  %1832 = vperm.xlu1 %8723, %v12302_v16   ;;  %v950_v63 = vpop.permute.xlu1 %949  ;;  %v12305_v16 = vld [vmem:[#allocation24_spill] sm:$0xff]  ;;  %3437 = vmatprep.subr.bf16.mxu0 %v7989_v59  ;;  %v2741_v53 = vld [vmem:[#allocation4 + $0x168] sm:$0xff]  ;;  %v1785_v58 = vpop.permute.xlu0 %1784  ;;  %v8021_v59 = vcombine.high %v2745_v27, %v2749_v9 }
 0x1be   : > { %v1187_v39 = vmul.f32 %v10079_v31, %v950_v63  ;;  %v8012_v12 = vcombine.low %v2737_v33, %v2741_v53  ;;  %v1974_v20 = vmul.f32 %v10120_v57, %v1785_v58 }
 0x1bf   : > { %v2152_v42 = vpack.c.bf16 %v2098_v41, %v2097_v23  ;;  %v8013_v23 = vcombine.high %v2737_v33, %v2741_v53 }
 0x1c0   : > { %3438 = vmatpush1.bf16.msra.mxu0 %v7988_v48  ;;  %v1258_v63 = vadd.f32 %v10094_v0, %v1187_v39 }
 0x1c1   : > { %8724 = vset.pattern.permute.xlu1 %v12300_v47  ;;  %8458 = vmatmul.mubr.msk.bf16.gmra.mrb[16].mxu0 %vm2214_vm0, %v2152_v42  ;;  %v955_v21 = vpop.permute.xlu1 %954 }
 0x1c2   : > { %1029 = vperm.xlu1 %8724, %v12305_v16   ;;  %3439 = vmatprep.subr.bf16.mxu0 %v7997_v49  ;;  %v1188_v48 = vmul.f32 %v10079_v31, %v955_v21  ;;  %v8020_v49 = vcombine.low %v2745_v27, %v2749_v9  ;;  %v1647_v36 = vadd.f32 %v1583_v30, %v1258_v63  ;;  %v10367_v30 = vld [vmem:[%s9807_s25 + $0x1c0] sm:$0xff] }
 0x1c3   : > { %1527 = vperm.xlu0 %8745, %v10367_v30  }
 0x1c4   : > { %3440 = vmatpush1.bf16.msra.mxu0 %v7996_v52  ;;  %v1259_v21 = vadd.f32 %v10094_v0, %v1188_v48 }
 0x1c5   : > { %3441 = vmatprep.subr.bf16.mxu0 %v8005_v40 }
 0x1c6   : > { %1034 = vperm.xlu1 %8724, %v10326_v7   ;;  %v1384_v38 = vpop.permute.xlu1 %1383 }
 0x1c7   : > { %v1582_v46 = vmul.f32 %v10099_v28, %v1384_v38 }
 0x1c8   : > { %3442 = vmatpush1.bf16.msra.mxu0 %v8004_v1  ;;  %v8028_v1 = vcombine.low %v2753_v51, %v2757_v24 }
 0x1c9   : > { %v1646_v41 = vadd.f32 %v1582_v46, %v1257_v62  ;;  %3443 = vmatprep.subr.bf16.mxu0 %v8013_v23  ;;  %v8029_v62 = vcombine.high %v2753_v51, %v2757_v24 }
 0x1ca   : > { %8725 = vset.pattern.permute.xlu1 %v12301_v60  ;;  %v1392_v22 = vpop.permute.xlu1 %1391 }
 0x1cb   : > { %1447 = vperm.xlu1 %8725, %v10027_v10   ;;  %v1260_v10 = vadd.f32 %v10094_v0, %v1189_v14  ;;  %v2035_v50 = vadd.f32 %v1971_v8, %v1646_v41  ;;  %v1584_v43 = vmul.f32 %v10099_v28, %v1392_v22 }
 0x1cc   : > { %3444 = vmatpush1.bf16.msra.mxu0 %v8012_v12  ;;  %v12308_v12 = vld [vmem:[#allocation25_spill] sm:$0xff] }
 0x1cd   : > { %3445 = vmatprep.subr.bf16.mxu0 %v8021_v59  ;;  %v2099_v46 = vmax.f32 %v2035_v50, 0.0  ;;  %v1648_v34 = vadd.f32 %v1584_v43, %v1259_v21  ;;  %v1793_v59 = vpop.permute.xlu0 %1792 }
 0x1ce   : > { %v1396_v6 = vpop.permute.xlu1 %1395 }
 0x1cf   : > { %1455 = vperm.xlu1 %8725, %v10326_v7   ;;  %v1585_v42 = vmul.f32 %v10099_v28, %v1396_v6 }
 0x1d0   : > { %3446 = vmatpush1.bf16.msra.mxu0 %v8020_v49 }
 0x1d1   : > { %v1649_v61 = vadd.f32 %v1585_v42, %v1260_v10  ;;  %3447 = vmatprep.subr.bf16.mxu0 %v8029_v62  ;;  %v12310_v42 = vld [vmem:[#allocation26_spill] sm:$0xff] }
 0x1d3   : > { %1459 = vperm.xlu1 %8725, %v10036_v13   ;;  %v1777_v38 = vpop.permute.xlu1 %1776  ;;  %v2038_v14 = vadd.f32 %v1974_v20, %v1649_v61  ;;  %v10378_v20 = vld [vmem:[%s9807_s25 + $0x1d8] sm:$0xff]  ;;  %v1976_v61 = vmul.f32 %v10120_v57, %v1793_v59 }
 0x1d4   : > { %v1972_v52 = vmul.f32 %v10120_v57, %v1777_v38  ;;  %3448 = vmatpush1.bf16.msra.mxu0 %v8028_v1  ;;  %1539 = vperm.xlu0 %8745, %v10378_v20   ;;  %v1586_v38 = vmul.f32 %v10099_v28, %v10254_v2  ;;  %v1589_v2 = vmul.f32 %v10099_v28, %v10260_v25  ;;  %v12312_v59 = vld [vmem:[#allocation32_spill] sm:$0xff] }
 0x1d5   : > { %v2102_v53 = vmax.f32 %v2038_v14, 0.0 }
 0x1d6   : > { %v2036_v40 = vadd.f32 %v1972_v52, %v1647_v36 }
 0x1d7   : > { %8726 = vset.pattern.permute.xlu1 %v12299_v19  ;;  %v1781_v13 = vpop.permute.xlu1 %1780 }
 0x1d8   : > { %v2100_v22 = vmax.f32 %v2036_v40, 0.0  ;;  %v1973_v39 = vmul.f32 %v10120_v57, %v1781_v13  ;;  %1840 = vperm.xlu1 %8726, %v12305_v16   ;;  %v7907_v16 = vld [vmem:[%s9807_s25 + $0x150] sm:$0xff] }
 0x1da   : > { %v2153_v45 = vpack.c.bf16 %v2100_v22, %v2099_v46  ;;  %v2037_v33 = vadd.f32 %v1973_v39, %v1648_v34 }
 0x1dc   : > { %v2101_v6 = vmax.f32 %v2037_v33, 0.0  ;;  %1844 = vperm.xlu1 %8726, %v10326_v7   ;;  %8461 = vmatprep.mubr.msk.bf16.mxu0 %vm2214_vm0, %v2153_v45  ;;  %v965_v23 = vpop.permute.xlu1 %964  ;;  %v12309_v7 = vld [vmem:[#allocation31_spill] sm:$0xff] }
 0x1dd   : > { %v1191_v63 = vmul.f32 %v10079_v31, %v12309_v7  ;;  %v1190_v9 = vmul.f32 %v10079_v31, %v965_v23 }
 0x1de   : > { %v2154_v41 = vpack.c.bf16 %v2102_v53, %v2101_v6 }
 0x1df   : > { %v1262_v27 = vadd.f32 %v10094_v0, %v1191_v63  ;;  %v1261_v49 = vadd.f32 %v10094_v0, %v1190_v9  ;;  %v12311_v63 = vld [vmem:[#allocation28_spill] sm:$0xff] }
 0x1e0   : > { %8727 = vset.pattern.permute.xlu1 %v12300_v47  ;;  %8462 = vmatmul.mubr.msk.bf16.gmra.mrb[20].mxu0 %vm2214_vm0, %v2154_v41  ;;  %v975_v8 = vpop.permute.xlu1 %974 }
 0x1e1   : > { %1044 = vperm.xlu1 %8727, %v12308_v12   ;;  %v1192_v36 = vmul.f32 %v10079_v31, %v975_v8  ;;  %v1650_v21 = vadd.f32 %v1586_v38, %v1261_v49 }
 0x1e3   : > { %v1263_v46 = vadd.f32 %v10094_v0, %v1192_v36 }
 0x1e4   : > { %v980_v10 = vpop.permute.xlu1 %979 }
 0x1e5   : > { %1054 = vperm.xlu1 %8727, %v7907_v16   ;;  %v1193_v51 = vmul.f32 %v10079_v31, %v980_v10 }
 0x1e7   : > { %v1264_v1 = vadd.f32 %v10094_v0, %v1193_v51 }
 0x1e9   : > { %1059 = vperm.xlu1 %8727, %v12310_v42   ;;  %v1404_v58 = vpop.permute.xlu1 %1403  ;;  %v1653_v6 = vadd.f32 %v1589_v2, %v1264_v1 }
 0x1ea   : > { %v1587_v48 = vmul.f32 %v10099_v28, %v1404_v58  ;;  %v1805_v58 = vpop.permute.xlu0 %1804 }
 0x1ec   : > { %v1651_v43 = vadd.f32 %v1587_v48, %v1262_v27  ;;  %v10404_v27 = vld [vmem:[%s9807_s25 + $0x1e8] sm:$0xff] }
 0x1ed   : > { %8728 = vset.pattern.permute.xlu1 %v12301_v60  ;;  %v1408_v50 = vpop.permute.xlu1 %1407  ;;  %1547 = vperm.xlu0 %8745, %v10404_v27  }
 0x1ee   : > { %1467 = vperm.xlu1 %8728, %v10043_v15   ;;  %v2040_v24 = vadd.f32 %v1976_v61, %v1651_v43  ;;  %v1588_v40 = vmul.f32 %v10099_v28, %v1408_v50  ;;  %v1817_v48 = vpop.permute.xlu0 %1816  ;;  %v12313_v61 = vld [vmem:[#allocation33_spill] sm:$0xff] }
 0x1ef   : > { %v1197_v36 = vmul.f32 %v10079_v31, %v12313_v61 }
 0x1f0   : > { %v2104_v34 = vmax.f32 %v2040_v24, 0.0  ;;  %v1652_v39 = vadd.f32 %v1588_v40, %v1263_v46  ;;  %v1979_v24 = vmul.f32 %v10120_v57, %v1805_v58 }
 0x1f1   : > { %8747 = vset.pattern.permute.xlu0 %v12299_v19 }
 0x1f2   : > { %1471 = vperm.xlu1 %8728, %v7907_v16   ;;  %v1789_v52 = vpop.permute.xlu1 %1788  ;;  %1932 = vperm.xlu0 %8747, %v10263_v37   ;;  %v10413_v38 = vpop.permute.xlu0 %1824 }
 0x1f3   : > { %v1975_v15 = vmul.f32 %v10120_v57, %v1789_v52 }
 0x1f5   : > { %v2039_v62 = vadd.f32 %v1975_v15, %v1650_v21  ;;  %v1268_v21 = vadd.f32 %v10094_v0, %v1197_v36  ;;  %v1591_v15 = vmul.f32 %v10099_v28, %v10273_v17 }
 0x1f6   : > { %8729 = vset.pattern.permute.xlu1 %v12299_v19  ;;  %v1797_v13 = vpop.permute.xlu1 %1796  ;;  %1944 = vperm.xlu0 %8747, %v10271_v32   ;;  %v1982_v32 = vmul.f32 %v10120_v57, %v1817_v48 }
 0x1f7   : > { %v2103_v14 = vmax.f32 %v2039_v62, 0.0  ;;  %v1977_v22 = vmul.f32 %v10120_v57, %v1797_v13  ;;  %1852 = vperm.xlu1 %8729, %v12308_v12   ;;  %v10428_v62 = vpop.permute.xlu0 %1836 }
 0x1f9   : > { %v2155_v45 = vpack.c.bf16 %v2104_v34, %v2103_v14  ;;  %v2041_v53 = vadd.f32 %v1977_v22, %v1652_v39 }
 0x1fa   : > { %v1801_v33 = vpop.permute.xlu1 %1800 }
 0x1fb   : > { %v1978_v25 = vmul.f32 %v10120_v57, %v1801_v33  ;;  %1860 = vperm.xlu1 %8729, %v7907_v16   ;;  %8465 = vmatprep.mubr.msk.bf16.mxu0 %vm2214_vm0, %v2155_v45  ;;  %v2105_v41 = vmax.f32 %v2041_v53, 0.0  ;;  %v7911_v16 = vld [vmem:[%s9807_s25 + $0x170] sm:$0xff]  ;;  %v10436_v45 = vpop.permute.xlu0 %1848 }
 0x1fd   : > { %v2042_v23 = vadd.f32 %v1978_v25, %v1653_v6 }
 0x1ff   : > { %v2106_v8 = vmax.f32 %v2042_v23, 0.0  ;;  %1864 = vperm.xlu1 %8729, %v12310_v42   ;;  %v990_v10 = vpop.permute.xlu1 %989  ;;  %v1194_v42 = vmul.f32 %v10079_v31, %v12312_v59  ;;  %v10442_v58 = vpop.permute.xlu0 %1856  ;;  %v7915_v59 = vld [vmem:[%s9807_s25 + $0x190] sm:$0xff] }
 0x200   : > { %v1195_v52 = vmul.f32 %v10079_v31, %v990_v10 }
 0x201   : > { %v2156_v7 = vpack.c.bf16 %v2106_v8, %v2105_v41  ;;  %v1265_v49 = vadd.f32 %v10094_v0, %v1194_v42  ;;  %v8753_v41 = vld [vmem:[%s9807_s25 + $0x168] sm:$0xff] }
 0x202   : > { %v1266_v40 = vadd.f32 %v10094_v0, %v1195_v52 }
 0x203   : > { %8730 = vset.pattern.permute.xlu1 %v12300_v47  ;;  %8466 = vmatmul.mubr.msk.bf16.gmra.mrb[24].mxu0 %vm2214_vm0, %v2156_v7  ;;  %v995_v12 = vpop.permute.xlu1 %994  ;;  %v10449_v42 = vpop.permute.xlu0 %1868 }
 0x204   : > { %1069 = vperm.xlu1 %8730, %v12311_v63   ;;  %v1196_v2 = vmul.f32 %v10079_v31, %v995_v12  ;;  %v1655_v14 = vadd.f32 %v1591_v15, %v1266_v40  ;;  %v1984_v40 = vmul.f32 %v10120_v57, %v10413_v38 }
 0x206   : > { %v1267_v22 = vadd.f32 %v10094_v0, %v1196_v2 }
 0x208   : > { %1074 = vperm.xlu1 %8730, %v7911_v16   ;;  %v1416_v9 = vpop.permute.xlu1 %1415 }
 0x209   : > { %v1590_v43 = vmul.f32 %v10099_v28, %v1416_v9 }
 0x20b   : > { %v1654_v37 = vadd.f32 %v1590_v43, %v1265_v49  ;;  %v12314_v49 = vld [vmem:[#allocation34_spill] sm:$0xff] }
 0x20c   : > { %8731 = vset.pattern.permute.xlu1 %v12301_v60  ;;  %v1424_v50 = vpop.permute.xlu1 %1423  ;;  %v1199_v43 = vmul.f32 %v10079_v31, %v12314_v49 }
 0x20d   : > { %1479 = vperm.xlu1 %8731, %v10051_v18   ;;  %v2043_v46 = vadd.f32 %v1979_v24, %v1654_v37  ;;  %v1592_v1 = vmul.f32 %v10099_v28, %v1424_v50 }
 0x20f   : > { %v2107_v33 = vmax.f32 %v2043_v46, 0.0  ;;  %v1656_v6 = vadd.f32 %v1592_v1, %v1267_v22 }
 0x210   : > { %v1428_v51 = vpop.permute.xlu1 %1427 }
 0x211   : > { %1487 = vperm.xlu1 %8731, %v7911_v16   ;;  %v1593_v18 = vmul.f32 %v10099_v28, %v1428_v51  ;;  %v1270_v51 = vadd.f32 %v10094_v0, %v1199_v43 }
 0x213   : > { %v1657_v34 = vadd.f32 %v1593_v18, %v1268_v21  ;;  %v1594_v21 = vmul.f32 %v10099_v28, %v10283_v4 }
 0x215   : > { %1491 = vperm.xlu1 %8731, %v10064_v26   ;;  %v1809_v13 = vpop.permute.xlu1 %1808  ;;  %v2046_v25 = vadd.f32 %v1982_v32, %v1657_v34 }
 0x216   : > { %v1980_v17 = vmul.f32 %v10120_v57, %v1809_v13 }
 0x217   : > { %v2110_v7 = vmax.f32 %v2046_v25, 0.0 }
 0x218   : > { %v2044_v39 = vadd.f32 %v1980_v17, %v1655_v14  ;;  %v1597_v17 = vmul.f32 %v10099_v28, %v10300_v11 }
 0x219   : > { %8733 = vset.pattern.permute.xlu1 %v12299_v19  ;;  %v1813_v53 = vpop.permute.xlu1 %1812 }
 0x21a   : > { %v2108_v26 = vmax.f32 %v2044_v39, 0.0  ;;  %v1981_v23 = vmul.f32 %v10120_v57, %v1813_v53  ;;  %1872 = vperm.xlu1 %8733, %v8753_v41  }
 0x21c   : > { %v2157_v8 = vpack.c.bf16 %v2108_v26, %v2107_v33  ;;  %v2045_v10 = vadd.f32 %v1981_v23, %v1656_v6 }
 0x21e   : > { %v2109_v12 = vmax.f32 %v2045_v10, 0.0  ;;  %1876 = vperm.xlu1 %8733, %v7911_v16   ;;  %8469 = vmatprep.mubr.msk.bf16.mxu0 %vm2214_vm0, %v2157_v8  ;;  %v1005_v63 = vpop.permute.xlu1 %1004  ;;  %v10451_v16 = vpop.permute.xlu0 %1880 }
 0x21f   : > { %v1198_v36 = vmul.f32 %v10079_v31, %v1005_v63 }
 0x220   : > { %v2158_v9 = vpack.c.bf16 %v2110_v7, %v2109_v12 }
 0x221   : > { %v1269_v15 = vadd.f32 %v10094_v0, %v1198_v36 }
 0x222   : > { %8734 = vset.pattern.permute.xlu1 %v12300_v47  ;;  %8470 = vmatmul.mubr.msk.bf16.gmra.mrb[28].mxu0 %vm2214_vm0, %v2158_v9  ;;  %v1015_v48 = vpop.permute.xlu1 %1014  ;;  %v10461_v24 = vpop.permute.xlu0 %1888 }
 0x223   : > { %1084 = vperm.xlu1 %8734, %v10280_v56   ;;  %3465 = vmatprep.mubr.bf16.mxu0 %v12300_v47  ;;  %v1200_v2 = vmul.f32 %v10079_v31, %v1015_v48  ;;  %v1658_v13 = vadd.f32 %v1594_v21, %v1269_v15  ;;  %v10520_v15 = vld [vmem:[%s12221_s4] ss:$0 sm:$0xff] }
 0x225   : > { %v1271_v38 = vadd.f32 %v10094_v0, %v1200_v2 }
 0x226   : > { %v1020_v50 = vpop.permute.xlu1 %1019  ;;  %v10471_v34 = vpop.permute.xlu0 %1900 }
 0x227   : > { %1094 = vperm.xlu1 %8734, %v7915_v59   ;;  %v1201_v32 = vmul.f32 %v10079_v31, %v1020_v50 }
 0x229   : > { %v1272_v39 = vadd.f32 %v10094_v0, %v1201_v32  ;;  %v10528_v32 = vld [vmem:[%s12218_s1 + $0x2] ss:$0 sm:$0xff] }
 0x22a   : > { %v10481_v23 = vpop.permute.xlu0 %1912 }
 0x22b   : > { %1099 = vperm.xlu1 %8734, %v10291_v35   ;;  %v1436_v61 = vpop.permute.xlu1 %1435 }
 0x22c   : > { %v1595_v52 = vmul.f32 %v10099_v28, %v1436_v61  ;;  %v10506_v61 = vld [vmem:[%s12219_s2] ss:$0 sm:$0xff] }
 0x22e   : > { %v1659_v18 = vadd.f32 %v1595_v52, %v1270_v51  ;;  %v10486_v7 = vpop.permute.xlu0 %1920  ;;  %v10512_v52 = vld [vmem:[%s12218_s1 + $0x1] ss:$0 sm:$0xff] }
 0x22f   : > { %8735 = vset.pattern.permute.xlu1 %v12301_v60  ;;  %v1440_v37 = vpop.permute.xlu1 %1439 }
 0x230   : > { %1499 = vperm.xlu1 %8735, %v10073_v29   ;;  %v2048_v1 = vadd.f32 %v1984_v40, %v1659_v18  ;;  %v1596_v4 = vmul.f32 %v10099_v28, %v1440_v37  ;;  %v1661_v28 = vadd.f32 %v1597_v17, %v1272_v39  ;;  %v8757_v37 = vld [vmem:[%s9807_s25 + $0x1a0] sm:$0xff]  ;;  %v1599_v40 = vmul.f32 %v10512_v52, %v10310_v54 }
 0x232   : > { %v2112_v53 = vmax.f32 %v2048_v1, 0.0  ;;  %v1660_v6 = vadd.f32 %v1596_v4, %v1271_v38  ;;  %v1025_v9 = vpop.permute.xlu0 %1024 }
 0x234   : > { %1503 = vperm.xlu1 %8735, %v7915_v59   ;;  %v1821_v46 = vpop.permute.xlu1 %1820 }
 0x235   : > { %v1983_v29 = vmul.f32 %v10120_v57, %v1821_v46 }
 0x236   : > { %v1040_v50 = vpop.permute.xlu0 %1039 }
 0x237   : > { %v2047_v14 = vadd.f32 %v1983_v29, %v1658_v13  ;;  %v1987_v13 = vmul.f32 %v10528_v32, %v10428_v62  ;;  %v1990_v62 = vmul.f32 %v10528_v32, %v10436_v45 }
 0x238   : > { %8736 = vset.pattern.permute.xlu1 %v12299_v19  ;;  %v1829_v22 = vpop.permute.xlu1 %1828 }
 0x239   : > { %v1985_v31 = vmul.f32 %v10120_v57, %v1829_v22  ;;  %1884 = vperm.xlu1 %8736, %v10280_v56   ;;  %v2111_v33 = vmax.f32 %v2047_v14, 0.0 }
 0x23b   : > { %v2159_v25 = vpack.c.bf16 %v2112_v53, %v2111_v33  ;;  %v2049_v41 = vadd.f32 %v1985_v31, %v1660_v6 }
 0x23c   : > { %v1833_v26 = vpop.permute.xlu1 %1832 }
 0x23d   : > { %v1986_v11 = vmul.f32 %v10120_v57, %v1833_v26  ;;  %1892 = vperm.xlu1 %8736, %v7915_v59   ;;  %8473 = vmatprep.mubr.msk.bf16.mxu1 %vm2214_vm0, %v2159_v25  ;;  %v2113_v8 = vmax.f32 %v2049_v41, 0.0  ;;  %v10492_v57 = vld [vmem:[%s9807_s25 + $0x1b0] sm:$0xff] }
 0x23f   : > { %v2050_v0 = vadd.f32 %v1986_v11, %v1661_v28  ;;  %v8759_v28 = vld [vmem:[%s9807_s25 + $0x1b8] sm:$0xff] }
 0x241   : > { %v2114_v10 = vmax.f32 %v2050_v0, 0.0  ;;  %1896 = vperm.xlu1 %8736, %v10291_v35   ;;  %v1030_v56 = vpop.permute.xlu1 %1029  ;;  %v10498_v35 = vld [vmem:[%s12218_s1] ss:$0 sm:$0xff] }
 0x242   : > { %v1202_v59 = vmul.f32 %v10498_v35, %v1025_v9  ;;  %v1203_v49 = vmul.f32 %v10498_v35, %v1030_v56  ;;  %v1205_v21 = vmul.f32 %v10498_v35, %v1040_v50 }
 0x243   : > { %v2160_v12 = vpack.c.bf16 %v2114_v10, %v2113_v8 }
 0x244   : > { %v1273_v36 = vadd.f32 %v10506_v61, %v1202_v59  ;;  %v1274_v18 = vadd.f32 %v10506_v61, %v1203_v49  ;;  %v1276_v54 = vadd.f32 %v10506_v61, %v1205_v21 }
 0x245   : > { %8737 = vset.pattern.permute.xlu1 %v12300_v47  ;;  %8474 = vmatmul.mubr.msk.bf16.vlgmr.msra.gmra.mrb[0].mxu1 %vm2214_vm0, %v2160_v12  ;;  %v1035_v63 = vpop.permute.xlu1 %1034 }
 0x246   : > { %1109 = vperm.xlu1 %8737, %v10332_v5   ;;  %v1204_v22 = vmul.f32 %v10498_v35, %v1035_v63  ;;  %v1663_v53 = vadd.f32 %v1599_v40, %v1274_v18 }
 0x248   : > { %v1275_v12 = vadd.f32 %v10506_v61, %v1204_v22 }
 0x24a   : > { %1114 = vperm.xlu1 %8737, %v10492_v57   ;;  %v1448_v48 = vpop.permute.xlu1 %1447 }
 0x24b   : > { %v1598_v51 = vmul.f32 %v10512_v52, %v1448_v48 }
 0x24d   : > { %v1662_v29 = vadd.f32 %v1598_v51, %v1273_v36 }
 0x24e   : > { %8738 = vset.pattern.permute.xlu1 %v12301_v60  ;;  %v1456_v43 = vpop.permute.xlu1 %1455 }
 0x24f   : > { %1511 = vperm.xlu1 %8738, %v8757_v37   ;;  %v2051_v6 = vadd.f32 %v1987_v13, %v1662_v29  ;;  %v1600_v25 = vmul.f32 %v10512_v52, %v1456_v43 }
 0x251   : > { %v2115_v59 = vmax.f32 %v2051_v6, 0.0  ;;  %v1664_v50 = vadd.f32 %v1600_v25, %v1275_v12 }
 0x252   : > { %v8443_v2 = vpop.f32.mrb[0].mxu0  ;;  %v1460_v46 = vpop.permute.xlu1 %1459 }
 0x253   : > { %v2354_v1 = vadd.f32 %v8443_v2, %v10520_v15  ;;  %v2345_v4 = vpop.f32.mrb[1].mxu0  ;;  %1519 = vperm.xlu1 %8738, %v10492_v57   ;;  %v1601_v14 = vmul.f32 %v10512_v52, %v1460_v46 }
 0x254   : > { %v2346_v17 = vadd.f32 %v10520_v15, %v2345_v4  ;;  %v8444_v38 = vpop.f32.mrb[2].mxu0 }
 0x255   : > { %v2357_v39 = vadd.f32 %v8444_v38, %v10520_v15  ;;  %v2348_v31 = vpop.f32.mrb[3].mxu0  ;;  %v2602_v26 = vmax.f32 %v2354_v1, 0.0  ;;  %v1665_v0 = vadd.f32 %v1601_v14, %v1276_v54 }
 0x256   : > { %v2349_v33 = vadd.f32 %v10520_v15, %v2348_v31  ;;  %v2600_v8 = vmax.f32 %v2346_v17, 0.0 }
 0x257   : > { %v2603_v41 = vmax.f32 %v2357_v39, 0.0  ;;  %1523 = vperm.xlu1 %8738, %v8759_v28   ;;  %v1841_v11 = vpop.permute.xlu1 %1840  ;;  %v2054_v51 = vadd.f32 %v1990_v62, %v1665_v0  ;;  %v10574_v0 = vld [vmem:[%s9807_s25 + $0x1d0] sm:$0xff] }
 0x258   : > { %v2601_v10 = vmax.f32 %v2349_v33, 0.0  ;;  %v1988_v56 = vmul.f32 %v10528_v32, %v1841_v11 }
 0x259   : > { %v10546_v63 = vpack.c.bf16 %v2603_v41, %v2602_v26  ;;  %v2118_v14 = vmax.f32 %v2054_v51, 0.0 }
 0x25a   : > { %v10548_v45 = vpack.c.bf16 %v2601_v10, %v2600_v8  ;;  %v2052_v9 = vadd.f32 %v1988_v56, %v1663_v53  ;;  %v8447_v48 = vpop.f32.mrb[4].mxu0 }
 0x25b   : > { %v2370_v49 = vadd.f32 %v8447_v48, %v10520_v15  ;;  %v2361_v43 = vpop.f32.mrb[5].mxu0  ;;  %8739 = vset.pattern.permute.xlu1 %v12299_v19  ;;  %v1845_v36 = vpop.permute.xlu1 %1844 }
 0x25c   : > { %v2116_v37 = vmax.f32 %v2052_v9, 0.0  ;;  %v2362_v21 = vadd.f32 %v10520_v15, %v2361_v43  ;;  %v1989_v40 = vmul.f32 %v10528_v32, %v1845_v36  ;;  %v8448_v18 = vpop.f32.mrb[6].mxu0  ;;  %1904 = vperm.xlu1 %8739, %v10332_v5   ;;  %3466 = vmatmul.mubr.bf16.vlgmr.msra.gmra.mrb[32].mxu0 %v10548_v45  ;;  %v1050_v48 = vpop.permute.xlu0 %1049 }
 0x25d   : > { %v2373_v2 = vadd.f32 %v8448_v18, %v10520_v15  ;;  %v2364_v46 = vpop.f32.mrb[7].mxu0  ;;  %3475 = vmatprep.mubr.bf16.mxu0 %v12300_v47  ;;  %v2606_v4 = vmax.f32 %v2370_v49, 0.0  ;;  %v1207_v49 = vmul.f32 %v10498_v35, %v1050_v48  ;;  %v2696_v18 = vld [vmem:[#allocation4] sm:$0xff] }
 0x25e   : > { %v2161_v13 = vpack.c.bf16 %v2116_v37, %v2115_v59  ;;  %v2053_v29 = vadd.f32 %v1989_v40, %v1664_v50  ;;  %v2365_v1 = vadd.f32 %v10520_v15, %v2364_v46  ;;  %v2604_v17 = vmax.f32 %v2362_v21, 0.0 }
 0x25f   : > { %v2607_v54 = vmax.f32 %v2373_v2, 0.0  ;;  %v1278_v51 = vadd.f32 %v10506_v61, %v1207_v49  ;;  %v2700_v2 = vld [vmem:[#allocation4 + $0x20] sm:$0xff]  ;;  %v1992_v46 = vmul.f32 %v10528_v32, %v10442_v58 }
 0x260   : > { %v2117_v38 = vmax.f32 %v2053_v29, 0.0  ;;  %v2605_v22 = vmax.f32 %v2365_v1, 0.0  ;;  %1908 = vperm.xlu1 %8739, %v10492_v57   ;;  %8477 = vmatprep.mubr.msk.bf16.mxu1 %vm2214_vm0, %v2161_v13  ;;  %v1045_v5 = vpop.permute.xlu1 %1044 }
 0x261   : > { %v10561_v39 = vpack.c.bf16 %v2607_v54, %v2606_v4  ;;  %v1206_v36 = vmul.f32 %v10498_v35, %v1045_v5  ;;  %v8760_v4 = vld [vmem:[%s9807_s25 + $0x1c8] sm:$0xff]  ;;  %v1602_v5 = vmul.f32 %v10512_v52, %v10317_v55 }
 0x262   : > { %v2162_v31 = vpack.c.bf16 %v2118_v14, %v2117_v38  ;;  %v10563_v62 = vpack.c.bf16 %v2605_v22, %v2604_v17  ;;  %v8451_v33 = vpop.f32.mrb[8].mxu0  ;;  %v7970_v38 = vcombine.low %v2696_v18, %v2700_v2  ;;  %v7971_v22 = vcombine.high %v2696_v18, %v2700_v2  ;;  %v2704_v2 = vld [vmem:[#allocation4 + $0x40] sm:$0xff] }
 0x263   : > { %v2386_v53 = vadd.f32 %v8451_v33, %v10520_v15  ;;  %v2377_v6 = vpop.f32.mrb[9].mxu0  ;;  %v1277_v13 = vadd.f32 %v10506_v61, %v1206_v36 }
 0x264   : > { %v2378_v25 = vadd.f32 %v10520_v15, %v2377_v6  ;;  %v8452_v26 = vpop.f32.mrb[10].mxu0  ;;  %8740 = vset.pattern.permute.xlu1 %v12300_v47  ;;  %8478 = vmatmul.mubr.msk.bf16.gmra.mrb[4].mxu1 %vm2214_vm0, %v2162_v31  ;;  %v1055_v57 = vpop.permute.xlu1 %1054 }
 0x265   : > { %v2389_v41 = vadd.f32 %v8452_v26, %v10520_v15  ;;  %3476 = vmatmul.mubr.bf16.gmra.mrb[36].mxu0 %v10546_v63  ;;  %v2380_v28 = vpop.f32.mrb[11].mxu0  ;;  %1124 = vperm.xlu1 %8740, %v10367_v30   ;;  %v2610_v8 = vmax.f32 %v2386_v53, 0.0  ;;  %v1208_v58 = vmul.f32 %v10498_v35, %v1055_v57 }
 0x266   : > { %v2381_v11 = vadd.f32 %v10520_v15, %v2380_v28  ;;  %3485 = vmatprep.mubr.bf16.mxu0 %v12300_v47  ;;  %v2608_v56 = vmax.f32 %v2378_v25, 0.0  ;;  %3080 = vmatprep.subr.bf16.mxu1 %v7971_v22 }
 0x267   : > { %v2611_v10 = vmax.f32 %v2389_v41, 0.0  ;;  %v1666_v41 = vadd.f32 %v1602_v5, %v1277_v13  ;;  %3081 = vmatpush1.bf16.msra.mxu1 %v7970_v38  ;;  %v1279_v48 = vadd.f32 %v10506_v61, %v1208_v58  ;;  %v2712_v5 = vld [vmem:[#allocation4 + $0x80] sm:$0xff] }
 0x268   : > { %v2609_v12 = vmax.f32 %v2381_v11, 0.0  ;;  %v1060_v9 = vpop.permute.xlu1 %1059 }
 0x269   : > { %v10577_v59 = vpack.c.bf16 %v2611_v10, %v2610_v8  ;;  %1134 = vperm.xlu1 %8740, %v10574_v0   ;;  %v1209_v6 = vmul.f32 %v10498_v35, %v1060_v9 }
 0x26a   : > { %v10580_v50 = vpack.c.bf16 %v2609_v12, %v2608_v56 }
 0x26d   : > { %3486 = vmatmul.mubr.bf16.gmra.mrb[40].mxu0 %v10563_v62  ;;  %1139 = vperm.xlu1 %8740, %v10378_v20   ;;  %v1468_v43 = vpop.permute.xlu1 %1467 }
 0x26e   : > { %3495 = vmatprep.mubr.bf16.mxu0 %v12300_v47  ;;  %v1603_v37 = vmul.f32 %v10512_v52, %v1468_v43  ;;  %v1280_v43 = vadd.f32 %v10506_v61, %v1209_v6 }
 0x270   : > { %v1667_v54 = vadd.f32 %v1603_v37, %v1278_v51 }
 0x271   : > { %v8455_v21 = vpop.f32.mrb[12].mxu0  ;;  %8741 = vset.pattern.permute.xlu1 %v12301_v60  ;;  %v1472_v40 = vpop.permute.xlu1 %1471 }
 0x272   : > { %v2402_v29 = vadd.f32 %v8455_v21, %v10520_v15  ;;  %v2393_v1 = vpop.f32.mrb[13].mxu0  ;;  %1531 = vperm.xlu1 %8741, %v8760_v4   ;;  %v2056_v55 = vadd.f32 %v1992_v46, %v1667_v54  ;;  %v1604_v56 = vmul.f32 %v10512_v52, %v1472_v40  ;;  %v1605_v21 = vmul.f32 %v10512_v52, %v10320_v44  ;;  %v2708_v46 = vld [vmem:[#allocation4 + $0x60] sm:$0xff]  ;;  %v1065_v44 = vpop.permute.xlu0 %1064 }
 0x273   : > { %v2394_v14 = vadd.f32 %v10520_v15, %v2393_v1  ;;  %v8456_v17 = vpop.f32.mrb[14].mxu0  ;;  %v7979_v1 = vcombine.high %v2704_v2, %v2708_v46 }
 0x274   : > { %v2405_v31 = vadd.f32 %v8456_v17, %v10520_v15  ;;  %v2396_v33 = vpop.f32.mrb[15].mxu0  ;;  %v2614_v25 = vmax.f32 %v2402_v29, 0.0  ;;  %v2120_v36 = vmax.f32 %v2056_v55, 0.0  ;;  %v1668_v40 = vadd.f32 %v1604_v56, %v1279_v48 }
 0x275   : > { %v2397_v53 = vadd.f32 %v10520_v15, %v2396_v33  ;;  %3496 = vmatmul.mubr.bf16.gmra.mrb[44].mxu0 %v10561_v39  ;;  %v2612_v11 = vmax.f32 %v2394_v14, 0.0  ;;  %v7978_v29 = vcombine.low %v2704_v2, %v2708_v46  ;;  %v1669_v54 = vadd.f32 %v1605_v21, %v1280_v43  ;;  %3082 = vmatprep.subr.bf16.mxu1 %v7979_v1 }
 0x276   : > { %v2615_v26 = vmax.f32 %v2405_v31, 0.0  ;;  %1535 = vperm.xlu1 %8741, %v10574_v0   ;;  %v1853_v28 = vpop.permute.xlu1 %1852  ;;  %3505 = vmatprep.mubr.bf16.mxu0 %v12300_v47  ;;  %v2716_v31 = vld [vmem:[#allocation4 + $0xa0] sm:$0xff]  ;;  %v1607_v21 = vmul.f32 %v10512_v52, %v10328_v3 }
 0x277   : > { %v2613_v8 = vmax.f32 %v2397_v53, 0.0  ;;  %v1991_v57 = vmul.f32 %v10528_v32, %v1853_v28  ;;  %3083 = vmatpush1.bf16.msra.mxu1 %v7978_v29  ;;  %v7986_v33 = vcombine.low %v2712_v5, %v2716_v31  ;;  %v7987_v58 = vcombine.high %v2712_v5, %v2716_v31 }
 0x278   : > { %v10606_v10 = vpack.c.bf16 %v2615_v26, %v2614_v25  ;;  %v2720_v25 = vld [vmem:[#allocation4 + $0xc0] sm:$0xff] }
 0x279   : > { %v10609_v12 = vpack.c.bf16 %v2613_v8, %v2612_v11  ;;  %v2055_v9 = vadd.f32 %v1991_v57, %v1666_v41  ;;  %3084 = vmatprep.subr.bf16.mxu1 %v7987_v58  ;;  %v2724_v26 = vld [vmem:[#allocation4 + $0xe0] sm:$0xff]  ;;  %v1210_v8 = vmul.f32 %v10498_v35, %v1065_v44 }
 0x27a   : > { %8742 = vset.pattern.permute.xlu1 %v12299_v19  ;;  %v1861_v49 = vpop.permute.xlu1 %1860  ;;  %v7994_v41 = vcombine.low %v2720_v25, %v2724_v26  ;;  %v7995_v28 = vcombine.high %v2720_v25, %v2724_v26  ;;  %v8762_v25 = vld [vmem:[%s9807_s25 + $0x1f8] sm:$0xff] }
 0x27b   : > { %v2119_v51 = vmax.f32 %v2055_v9, 0.0  ;;  %v1993_v37 = vmul.f32 %v10528_v32, %v1861_v49  ;;  %1916 = vperm.xlu1 %8742, %v10367_v30   ;;  %3085 = vmatpush1.bf16.msra.mxu1 %v7986_v33  ;;  %v1281_v9 = vadd.f32 %v10506_v61, %v1210_v8  ;;  %v8761_v49 = vld [vmem:[%s9807_s25 + $0x1e0] sm:$0xff] }
 0x27c   : > { %3086 = vmatprep.subr.bf16.mxu1 %v7995_v28 }
 0x27d   : > { %v2163_v18 = vpack.c.bf16 %v2120_v36, %v2119_v51  ;;  %3506 = vmatmul.mubr.bf16.gmra.mrb[48].mxu0 %v10580_v50  ;;  %v2057_v4 = vadd.f32 %v1993_v37, %v1668_v40  ;;  %v2728_v51 = vld [vmem:[#allocation4 + $0x100] sm:$0xff] }
 0x27e   : > { %v1865_v13 = vpop.permute.xlu1 %1864  ;;  %3515 = vmatprep.mubr.bf16.mxu0 %v12300_v47  ;;  %v2732_v37 = vld [vmem:[#allocation4 + $0x120] sm:$0xff] }
 0x27f   : > { %v1994_v14 = vmul.f32 %v10528_v32, %v1865_v13  ;;  %1924 = vperm.xlu1 %8742, %v10574_v0   ;;  %8481 = vmatprep.mubr.msk.bf16.mxu1 %vm2214_vm0, %v2163_v18  ;;  %v2121_v17 = vmax.f32 %v2057_v4, 0.0  ;;  %v1080_v0 = vpop.permute.xlu0 %1079  ;;  %v8002_v2 = vcombine.low %v2728_v51, %v2732_v37  ;;  %v8003_v46 = vcombine.high %v2728_v51, %v2732_v37 }
 0x280   : > { %3087 = vmatpush1.bf16.msra.mxu1 %v7994_v41  ;;  %v1213_v43 = vmul.f32 %v10498_v35, %v1080_v0  ;;  %v1995_v13 = vmul.f32 %v10528_v32, %v10449_v42 }
 0x281   : > { %v2058_v30 = vadd.f32 %v1994_v14, %v1669_v54  ;;  %3088 = vmatprep.subr.bf16.mxu1 %v8003_v46 }
 0x282   : > { %v1284_v54 = vadd.f32 %v10506_v61, %v1213_v43 }
 0x283   : > { %v2122_v38 = vmax.f32 %v2058_v30, 0.0  ;;  %1928 = vperm.xlu1 %8742, %v10378_v20   ;;  %v1070_v22 = vpop.permute.xlu1 %1069  ;;  %v10630_v20 = vld [vmem:[%s9807_s25 + $0x1f0] sm:$0xff]  ;;  %v10632_v55 = vpop.permute.xlu0 %1089 }
 0x284   : > { %v1211_v57 = vmul.f32 %v10498_v35, %v1070_v22  ;;  %3089 = vmatpush1.bf16.msra.mxu1 %v8002_v2 }
 0x285   : > { %v2164_v53 = vpack.c.bf16 %v2122_v38, %v2121_v17  ;;  %3516 = vmatmul.mubr.bf16.gmra.mrb[52].mxu0 %v10577_v59  ;;  %v1998_v17 = vmul.f32 %v10528_v32, %v10451_v16 }
 0x286   : > { %3525 = vmatprep.mubr.bf16.mxu0 %v12300_v47  ;;  %v1282_v40 = vadd.f32 %v10506_v61, %v1211_v57 }
 0x287   : > { %8744 = vset.pattern.permute.xlu1 %v12300_v47  ;;  %8482 = vmatmul.mubr.msk.bf16.gmra.mrb[8].mxu1 %vm2214_vm0, %v2164_v53  ;;  %v1075_v6 = vpop.permute.xlu1 %1074  ;;  %v10644_v36 = vpop.permute.xlu0 %1104 }
 0x288   : > { %1149 = vperm.xlu1 %8744, %v10404_v27   ;;  %v1212_v38 = vmul.f32 %v10498_v35, %v1075_v6  ;;  %v1671_v31 = vadd.f32 %v1607_v21, %v1282_v40 }
 0x28a   : > { %v1283_v6 = vadd.f32 %v10506_v61, %v1212_v38 }
 0x28b   : > { %v10662_v22 = vpop.permute.xlu0 %1119 }
 0x28c   : > { %1154 = vperm.xlu1 %8744, %v10630_v20   ;;  %v1480_v11 = vpop.permute.xlu1 %1479 }
 0x28d   : > { %3526 = vmatmul.mubr.bf16.gmra.mrb[56].mxu0 %v10609_v12  ;;  %v1606_v48 = vmul.f32 %v10512_v52, %v1480_v11 }
 0x28e   : > { %3535 = vmatprep.mubr.bf16.mxu0 %v12300_v47 }
 0x28f   : > { %v1670_v29 = vadd.f32 %v1606_v48, %v1281_v9  ;;  %v2736_v48 = vld [vmem:[#allocation4 + $0x140] sm:$0xff] }
 0x290   : > { %8746 = vset.pattern.permute.xlu1 %v12301_v60  ;;  %v1488_v56 = vpop.permute.xlu1 %1487 }
 0x291   : > { %1543 = vperm.xlu1 %8746, %v8761_v49   ;;  %v2059_v33 = vadd.f32 %v1995_v13, %v1670_v29  ;;  %v1608_v58 = vmul.f32 %v10512_v52, %v1488_v56  ;;  %v2740_v49 = vld [vmem:[#allocation4 + $0x160] sm:$0xff] }
 0x292   : > { %v8010_v51 = vcombine.low %v2736_v48, %v2740_v49  ;;  %v8011_v37 = vcombine.high %v2736_v48, %v2740_v49 }
 0x293   : > { %v2123_v56 = vmax.f32 %v2059_v33, 0.0  ;;  %v1672_v21 = vadd.f32 %v1608_v58, %v1283_v6  ;;  %v1215_v33 = vmul.f32 %v10498_v35, %v10632_v55 }
 0x294   : > { %v8459_v18 = vpop.f32.mrb[16].mxu0  ;;  %v1492_v60 = vpop.permute.xlu1 %1491  ;;  %3090 = vmatprep.subr.bf16.mxu1 %v8011_v37 }
 0x295   : > { %v2418_v1 = vadd.f32 %v8459_v18, %v10520_v15  ;;  %3536 = vmatmul.mubr.bf16.gmra.mrb[60].mxu0 %v10606_v10  ;;  %v2409_v4 = vpop.f32.mrb[17].mxu0  ;;  %1551 = vperm.xlu1 %8746, %v10630_v20   ;;  %v1609_v3 = vmul.f32 %v10512_v52, %v1492_v60  ;;  %v10674_v18 = vpop.permute.xlu0 %1129 }
 0x296   : > { %v2410_v14 = vadd.f32 %v10520_v15, %v2409_v4  ;;  %v8460_v44 = vpop.f32.mrb[18].mxu0  ;;  %3545 = vmatprep.mubr.bf16.mxu0 %v12300_v47  ;;  %3091 = vmatpush1.bf16.msra.mxu1 %v8010_v51 }
 0x297   : > { %v2421_v42 = vadd.f32 %v8460_v44, %v10520_v15  ;;  %v2412_v30 = vpop.f32.mrb[19].mxu0  ;;  %v2618_v53 = vmax.f32 %v2418_v1, 0.0  ;;  %v1673_v41 = vadd.f32 %v1609_v3, %v1284_v54  ;;  %v2744_v3 = vld [vmem:[#allocation4 + $0x180] sm:$0xff] }
 0x298   : > { %v2413_v5 = vadd.f32 %v10520_v15, %v2412_v30  ;;  %v2616_v28 = vmax.f32 %v2410_v14, 0.0  ;;  %v2748_v14 = vld [vmem:[#allocation4 + $0x1a0] sm:$0xff] }
 0x299   : > { %v2619_v0 = vmax.f32 %v2421_v42, 0.0  ;;  %1555 = vperm.xlu1 %8746, %v8762_v25   ;;  %v1873_v26 = vpop.permute.xlu1 %1872  ;;  %v2062_v40 = vadd.f32 %v1998_v17, %v1673_v41  ;;  %v10682_v4 = vpop.permute.xlu0 %1144  ;;  %v8018_v44 = vcombine.low %v2744_v3, %v2748_v14  ;;  %v2756_v30 = vld [vmem:[#allocation4 + $0x1e0] sm:$0xff]  ;;  %v1286_v25 = vadd.f32 %v10506_v61, %v1215_v33  ;;  %v10694_v41 = vld [vmem:[#allocation4 + $0x10] sm:$0xff] }
 0x29a   : > { %v2617_v11 = vmax.f32 %v2413_v5, 0.0  ;;  %v1996_v16 = vmul.f32 %v10528_v32, %v1873_v26 }
 0x29b   : > { %v10668_v8 = vpack.c.bf16 %v2619_v0, %v2618_v53 }
 0x29c   : > { %v10671_v57 = vpack.c.bf16 %v2617_v11, %v2616_v28  ;;  %v2060_v9 = vadd.f32 %v1996_v16, %v1671_v31  ;;  %v10696_v28 = vld [vmem:[#allocation4 + $0x30] sm:$0xff]  ;;  %v2699_v11 = vld [vmem:[#allocation4 + $0x18] sm:$0xff] }
 0x29d   : > { %8748 = vset.pattern.permute.xlu1 %v12299_v19  ;;  %v1877_v43 = vpop.permute.xlu1 %1876  ;;  %v2126_v19 = vmax.f32 %v2062_v40, 0.0  ;;  %v10687_v5 = vpop.permute.xlu0 %1159  ;;  %v7974_v55 = vcombine.low %v10694_v41, %v10696_v28  ;;  %v7975_v49 = vcombine.high %v10694_v41, %v10696_v28 }
 0x29e   : > { %v2124_v60 = vmax.f32 %v2060_v9, 0.0  ;;  %v1997_v2 = vmul.f32 %v10528_v32, %v1877_v43  ;;  %3546 = vmatmul.mubr.bf16.gmra.mrb[64].mxu0 %v10671_v57  ;;  %1936 = vperm.xlu1 %8748, %v10404_v27   ;;  %v8019_v27 = vcombine.high %v2744_v3, %v2748_v14 }
 0x29f   : > { %3555 = vmatprep.mubr.bf16.mxu0 %v12300_v47 }
 0x2a0   : > { %v2165_v46 = vpack.c.bf16 %v2124_v60, %v2123_v56  ;;  %v2061_v13 = vadd.f32 %v1997_v2, %v1672_v21  ;;  %3092 = vmatprep.subr.bf16.mxu1 %v8019_v27  ;;  %v2703_v56 = vld [vmem:[#allocation4 + $0x38] sm:$0xff] }
 0x2a1   : > { %3093 = vmatpush1.bf16.msra.mxu1 %v8018_v44  ;;  %v1496_v0 = vpop.permute.xlu0 %1495  ;;  %v7976_v37 = vcombine.low %v2699_v11, %v2703_v56  ;;  %v7977_v2 = vcombine.high %v2699_v11, %v2703_v56 }
 0x2a2   : > { %v2125_v29 = vmax.f32 %v2061_v13, 0.0  ;;  %1940 = vperm.xlu1 %8748, %v10630_v20   ;;  %8485 = vmatprep.mubr.msk.bf16.mxu1 %vm2214_vm0, %v2165_v46  ;;  %v1085_v1 = vpop.permute.xlu1 %1084  ;;  %v2752_v20 = vld [vmem:[#allocation4 + $0x1c0] sm:$0xff]  ;;  %v1610_v6 = vmul.f32 %v10512_v52, %v1496_v0 }
 0x2a3   : > { %v8026_v17 = vcombine.low %v2752_v20, %v2756_v30  ;;  %v8027_v38 = vcombine.high %v2752_v20, %v2756_v30  ;;  %v1214_v58 = vmul.f32 %v10498_v35, %v1085_v1  ;;  %4139 = vmatprep.subr.bf16.mxu0 %v7977_v2 }
 0x2a4   : > { %v2166_v54 = vpack.c.bf16 %v2126_v19, %v2125_v29  ;;  %v2000_v19 = vmul.f32 %v10528_v32, %v10461_v24  ;;  %4140 = vmatpush1.bf16.msra.mxu0 %v7976_v37 }
 0x2a5   : > { %3094 = vmatprep.subr.bf16.mxu1 %v8027_v38  ;;  %v1285_v16 = vadd.f32 %v10506_v61, %v1214_v58  ;;  %v1508_v20 = vpop.permute.xlu0 %1507 }
 0x2a6   : > { %8486 = vmatmul.mubr.msk.bf16.gmra.mrb[12].mxu1 %vm2214_vm0, %v2166_v54  ;;  %3556 = vmatmul.mubr.bf16.gmra.mrb[68].mxu0 %v10668_v8  ;;  %v1095_v42 = vpop.permute.xlu1 %1094 }
 0x2a7   : > { %3565 = vmatprep.mubr.bf16.mxu0 %v12300_v47  ;;  %3095 = vmatpush1.bf16.msra.mxu1 %v8026_v17  ;;  %v1674_v29 = vadd.f32 %v1610_v6, %v1285_v16  ;;  %v1216_v54 = vmul.f32 %v10498_v35, %v1095_v42 }
 0x2a8   : > { %3786 = vmatprep.subr.bf16.mxu1 %v7975_v49 }
 0x2a9   : > { %v1287_v42 = vadd.f32 %v10506_v61, %v1216_v54 }
 0x2aa   : > { %v1100_v31 = vpop.permute.xlu1 %1099 }
 0x2ab   : > { %v1217_v3 = vmul.f32 %v10498_v35, %v1100_v31  ;;  %v1613_v31 = vmul.f32 %v10512_v52, %v1508_v20  ;;  %v2711_v20 = vld [vmem:[#allocation4 + $0x78] sm:$0xff] }
 0x2af   : > { %v1500_v53 = vpop.permute.xlu1 %1499 }
 0x2b0   : > { %v1611_v26 = vmul.f32 %v10512_v52, %v1500_v53 }
 0x2b2   : > { %v1675_v21 = vadd.f32 %v1611_v26, %v1286_v25  ;;  %v1288_v26 = vadd.f32 %v10506_v61, %v1217_v3  ;;  %v1516_v3 = vpop.permute.xlu0 %1515 }
 0x2b3   : > { %v8463_v9 = vpop.f32.mrb[20].mxu0  ;;  %v1504_v48 = vpop.permute.xlu1 %1503 }
 0x2b4   : > { %v2434_v43 = vadd.f32 %v8463_v9, %v10520_v15  ;;  %v2425_v51 = vpop.f32.mrb[21].mxu0  ;;  %v2064_v30 = vadd.f32 %v2000_v19, %v1675_v21  ;;  %v1612_v24 = vmul.f32 %v10512_v52, %v1504_v48  ;;  %v1677_v56 = vadd.f32 %v1613_v31, %v1288_v26 }
 0x2b5   : > { %v2426_v40 = vadd.f32 %v10520_v15, %v2425_v51  ;;  %v8464_v60 = vpop.f32.mrb[22].mxu0  ;;  %v1218_v19 = vmul.f32 %v10498_v35, %v10644_v36 }
 0x2b6   : > { %v2437_v46 = vadd.f32 %v8464_v60, %v10520_v15  ;;  %v2428_v13 = vpop.f32.mrb[23].mxu0  ;;  %v2622_v14 = vmax.f32 %v2434_v43, 0.0  ;;  %v2128_v11 = vmax.f32 %v2064_v30, 0.0  ;;  %v1676_v9 = vadd.f32 %v1612_v24, %v1287_v42 }
 0x2b7   : > { %v2429_v1 = vadd.f32 %v10520_v15, %v2428_v13  ;;  %v2620_v17 = vmax.f32 %v2426_v40, 0.0  ;;  %v1289_v54 = vadd.f32 %v10506_v61, %v1218_v19 }
 0x2b8   : > { %v2623_v44 = vmax.f32 %v2437_v46, 0.0  ;;  %v1885_v27 = vpop.permute.xlu1 %1884 }
 0x2b9   : > { %v2621_v38 = vmax.f32 %v2429_v1, 0.0  ;;  %v1999_v33 = vmul.f32 %v10528_v32, %v1885_v27  ;;  %v1221_v27 = vmul.f32 %v10498_v35, %v10662_v22 }
 0x2ba   : > { %v10713_v58 = vpack.c.bf16 %v2623_v44, %v2622_v14  ;;  %v2707_v44 = vld [vmem:[#allocation4 + $0x58] sm:$0xff] }
 0x2bb   : > { %v10716_v53 = vpack.c.bf16 %v2621_v38, %v2620_v17  ;;  %v2063_v0 = vadd.f32 %v1999_v33, %v1674_v29  ;;  %v7984_v30 = vcombine.low %v2707_v44, %v2711_v20  ;;  %v7985_v17 = vcombine.high %v2707_v44, %v2711_v20 }
 0x2bc   : > { %v1893_v25 = vpop.permute.xlu1 %1892  ;;  %v1615_v33 = vmul.f32 %v10512_v52, %v1516_v3 }
 0x2bd   : > { %v2127_v16 = vmax.f32 %v2063_v0, 0.0  ;;  %v2001_v6 = vmul.f32 %v10528_v32, %v1893_v25  ;;  %3566 = vmatmul.mubr.bf16.gmra.mrb[72].mxu0 %v10716_v53  ;;  %4141 = vmatprep.subr.bf16.mxu0 %v7985_v17  ;;  %v1292_v25 = vadd.f32 %v10506_v61, %v1221_v27 }
 0x2be   : > { %3575 = vmatprep.mubr.bf16.mxu0 %v12300_v47  ;;  %4142 = vmatpush1.bf16.msra.mxu0 %v7984_v30 }
 0x2bf   : > { %v2167_v48 = vpack.c.bf16 %v2128_v11, %v2127_v16  ;;  %v2065_v43 = vadd.f32 %v2001_v6, %v1676_v9  ;;  %v2003_v16 = vmul.f32 %v10528_v32, %v10471_v34 }
 0x2c0   : > { %v1897_v49 = vpop.permute.xlu1 %1896 }
 0x2c1   : > { %v2002_v51 = vmul.f32 %v10528_v32, %v1897_v49  ;;  %8489 = vmatprep.mubr.msk.bf16.mxu1 %vm2214_vm0, %v2167_v48  ;;  %v2129_v21 = vmax.f32 %v2065_v43, 0.0 }
 0x2c3   : > { %v2066_v37 = vadd.f32 %v2002_v51, %v1677_v56 }
 0x2c5   : > { %v2130_v40 = vmax.f32 %v2066_v37, 0.0  ;;  %3576 = vmatmul.mubr.bf16.gmra.mrb[76].mxu0 %v10713_v58  ;;  %v1110_v60 = vpop.permute.xlu1 %1109 }
 0x2c6   : > { %3585 = vmatprep.mubr.bf16.mxu0 %v12300_v47  ;;  %v1219_v29 = vmul.f32 %v10498_v35, %v1110_v60 }
 0x2c7   : > { %v2168_v2 = vpack.c.bf16 %v2130_v40, %v2129_v21 }
 0x2c8   : > { %v1290_v38 = vadd.f32 %v10506_v61, %v1219_v29  ;;  %v2006_v29 = vmul.f32 %v10528_v32, %v10481_v23 }
 0x2c9   : > { %8490 = vmatmul.mubr.msk.bf16.gmra.mrb[16].mxu1 %vm2214_vm0, %v2168_v2  ;;  %v1115_v46 = vpop.permute.xlu1 %1114 }
 0x2ca   : > { %v1679_v48 = vadd.f32 %v1615_v33, %v1290_v38  ;;  %v1220_v49 = vmul.f32 %v10498_v35, %v1115_v46 }
 0x2cc   : > { %v1291_v46 = vadd.f32 %v10506_v61, %v1220_v49 }
 0x2ce   : > { %v1512_v13 = vpop.permute.xlu1 %1511 }
 0x2cf   : > { %v1614_v14 = vmul.f32 %v10512_v52, %v1512_v13 }
 0x2d1   : > { %v1678_v0 = vadd.f32 %v1614_v14, %v1289_v54 }
 0x2d2   : > { %v1520_v1 = vpop.permute.xlu1 %1519 }
 0x2d3   : > { %v2067_v43 = vadd.f32 %v2003_v16, %v1678_v0  ;;  %v1616_v51 = vmul.f32 %v10512_v52, %v1520_v1  ;;  %v2715_v16 = vld [vmem:[#allocation4 + $0x98] sm:$0xff] }
 0x2d5   : > { %v2131_v14 = vmax.f32 %v2067_v43, 0.0  ;;  %v1680_v44 = vadd.f32 %v1616_v51, %v1291_v46 }
 0x2d6   : > { %v8467_v36 = vpop.f32.mrb[24].mxu0  ;;  %v1524_v24 = vpop.permute.xlu1 %1523 }
 0x2d7   : > { %v2450_v42 = vadd.f32 %v8467_v36, %v10520_v15  ;;  %v2441_v31 = vpop.f32.mrb[25].mxu0  ;;  %v1617_v26 = vmul.f32 %v10512_v52, %v1524_v24 }
 0x2d8   : > { %v2442_v22 = vadd.f32 %v10520_v15, %v2441_v31  ;;  %v8468_v11 = vpop.f32.mrb[26].mxu0  ;;  %v1223_v31 = vmul.f32 %v10498_v35, %v10674_v18 }
 0x2d9   : > { %v2453_v6 = vadd.f32 %v8468_v11, %v10520_v15  ;;  %v2444_v9 = vpop.f32.mrb[27].mxu0  ;;  %v2626_v37 = vmax.f32 %v2450_v42, 0.0  ;;  %v1681_v60 = vadd.f32 %v1617_v26, %v1292_v25 }
 0x2da   : > { %v2445_v56 = vadd.f32 %v10520_v15, %v2444_v9  ;;  %v2624_v2 = vmax.f32 %v2442_v22, 0.0  ;;  %v1294_v26 = vadd.f32 %v10506_v61, %v1223_v31  ;;  %v2719_v9 = vld [vmem:[#allocation4 + $0xb8] sm:$0xff] }
 0x2db   : > { %v2627_v21 = vmax.f32 %v2453_v6, 0.0  ;;  %v1905_v40 = vpop.permute.xlu1 %1904  ;;  %v2070_v27 = vadd.f32 %v2006_v29, %v1681_v60  ;;  %v1528_v6 = vpop.permute.xlu0 %1527  ;;  %v7993_v43 = vcombine.high %v2715_v16, %v2719_v9 }
 0x2dc   : > { %v2625_v13 = vmax.f32 %v2445_v56, 0.0  ;;  %v2004_v19 = vmul.f32 %v10528_v32, %v1905_v40  ;;  %v7992_v56 = vcombine.low %v2715_v16, %v2719_v9 }
 0x2dd   : > { %v10749_v34 = vpack.c.bf16 %v2627_v21, %v2626_v37  ;;  %v2134_v33 = vmax.f32 %v2070_v27, 0.0  ;;  %v1618_v21 = vmul.f32 %v10512_v52, %v1528_v6  ;;  %4143 = vmatprep.subr.bf16.mxu0 %v7993_v43 }
 0x2de   : > { %v10754_v54 = vpack.c.bf16 %v2625_v13, %v2624_v2  ;;  %v2068_v3 = vadd.f32 %v2004_v19, %v1679_v48  ;;  %v2008_v48 = vmul.f32 %v10528_v32, %v10486_v7  ;;  %4144 = vmatpush1.bf16.msra.mxu0 %v7992_v56 }
 0x2df   : > { %v1909_v1 = vpop.permute.xlu1 %1908 }
 0x2e0   : > { %v2132_v20 = vmax.f32 %v2068_v3, 0.0  ;;  %v2005_v30 = vmul.f32 %v10528_v32, %v1909_v1  ;;  %3586 = vmatmul.mubr.bf16.gmra.mrb[80].mxu0 %v10754_v54 }
 0x2e1   : > { %3595 = vmatprep.mubr.bf16.mxu0 %v12300_v47 }
 0x2e2   : > { %v2169_v17 = vpack.c.bf16 %v2132_v20, %v2131_v14  ;;  %v2069_v38 = vadd.f32 %v2005_v30, %v1680_v44  ;;  %v1540_v30 = vpop.permute.xlu0 %1539 }
 0x2e4   : > { %v2133_v23 = vmax.f32 %v2069_v38, 0.0  ;;  %8493 = vmatprep.mubr.msk.bf16.mxu1 %vm2214_vm0, %v2169_v17  ;;  %v1125_v36 = vpop.permute.xlu1 %1124 }
 0x2e5   : > { %v1222_v22 = vmul.f32 %v10498_v35, %v1125_v36 }
 0x2e6   : > { %v2170_v24 = vpack.c.bf16 %v2134_v33, %v2133_v23 }
 0x2e7   : > { %v1293_v18 = vadd.f32 %v10506_v61, %v1222_v22 }
 0x2e8   : > { %8494 = vmatmul.mubr.msk.bf16.gmra.mrb[20].mxu1 %vm2214_vm0, %v2170_v24  ;;  %3596 = vmatmul.mubr.bf16.gmra.mrb[84].mxu0 %v10749_v34  ;;  %v1135_v0 = vpop.permute.xlu1 %1134 }
 0x2e9   : > { %3605 = vmatprep.mubr.bf16.mxu0 %v12300_v47  ;;  %v1682_v3 = vadd.f32 %v1618_v21, %v1293_v18  ;;  %v1224_v14 = vmul.f32 %v10498_v35, %v1135_v0  ;;  %v1621_v0 = vmul.f32 %v10512_v52, %v1540_v30  ;;  %v1229_v30 = vmul.f32 %v10498_v35, %v10687_v5 }
 0x2ec   : > { %v1140_v42 = vpop.permute.xlu1 %1139 }
 0x2ed   : > { %v1225_v20 = vmul.f32 %v10498_v35, %v1140_v42 }
 0x2ef   : > { %v1296_v22 = vadd.f32 %v10506_v61, %v1225_v20 }
 0x2f1   : > { %v1532_v25 = vpop.permute.xlu1 %1531 }
 0x2f2   : > { %v1619_v11 = vmul.f32 %v10512_v52, %v1532_v25  ;;  %v1295_v25 = vadd.f32 %v10506_v61, %v1224_v14 }
 0x2f4   : > { %v1683_v49 = vadd.f32 %v1619_v11, %v1294_v26 }
 0x2f5   : > { %v8471_v51 = vpop.f32.mrb[28].mxu0  ;;  %v1536_v37 = vpop.permute.xlu1 %1535 }
 0x2f6   : > { %v2072_v40 = vadd.f32 %v2008_v48, %v1683_v49  ;;  %v2466_v60 = vadd.f32 %v8471_v51, %v10520_v15  ;;  %v2457_v2 = vpop.f32.mrb[29].mxu0  ;;  %v1620_v36 = vmul.f32 %v10512_v52, %v1536_v37  ;;  %v1685_v49 = vadd.f32 %v1621_v0, %v1296_v22 }
 0x2f7   : > { %v2458_v13 = vadd.f32 %v10520_v15, %v2457_v2  ;;  %v8472_v19 = vpop.f32.mrb[30].mxu0 }
 0x2f8   : > { %v2469_v7 = vadd.f32 %v8472_v19, %v10520_v15  ;;  %v2460_v29 = vpop.f32.mrb[31].mxu0  ;;  %v2630_v1 = vmax.f32 %v2466_v60, 0.0  ;;  %v2136_v42 = vmax.f32 %v2072_v40, 0.0  ;;  %v1684_v6 = vadd.f32 %v1620_v36, %v1295_v25  ;;  %v2723_v19 = vld [vmem:[#allocation4 + $0xd8] sm:$0xff] }
 0x2f9   : > { %v2461_v46 = vadd.f32 %v10520_v15, %v2460_v29  ;;  %v2628_v17 = vmax.f32 %v2458_v13, 0.0  ;;  %v1548_v13 = vpop.permute.xlu0 %1547  ;;  %v2727_v29 = vld [vmem:[#allocation4 + $0xf8] sm:$0xff] }
 0x2fa   : > { %v2631_v44 = vmax.f32 %v2469_v7, 0.0  ;;  %v1917_v27 = vpop.permute.xlu1 %1916  ;;  %v1226_v7 = vmul.f32 %v10498_v35, %v10682_v4  ;;  %v8000_v14 = vcombine.low %v2723_v19, %v2727_v29 }
 0x2fb   : > { %v2629_v38 = vmax.f32 %v2461_v46, 0.0  ;;  %v2007_v33 = vmul.f32 %v10528_v32, %v1917_v27 }
 0x2fc   : > { %v10779_v23 = vpack.c.bf16 %v2631_v44, %v2630_v1  ;;  %v8001_v1 = vcombine.high %v2723_v19, %v2727_v29  ;;  %v1297_v20 = vadd.f32 %v10506_v61, %v1226_v7 }
 0x2fd   : > { %v10782_v24 = vpack.c.bf16 %v2629_v38, %v2628_v17  ;;  %v2071_v31 = vadd.f32 %v2007_v33, %v1682_v3  ;;  %v1933_v27 = vpop.permute.xlu0 %1932 }
 0x2fe   : > { %v1925_v26 = vpop.permute.xlu1 %1924  ;;  %4145 = vmatprep.subr.bf16.mxu0 %v8001_v1  ;;  %v2011_v36 = vmul.f32 %v10528_v32, %v1933_v27 }
 0x2ff   : > { %v2135_v11 = vmax.f32 %v2071_v31, 0.0  ;;  %v2009_v16 = vmul.f32 %v10528_v32, %v1925_v26  ;;  %3606 = vmatmul.mubr.bf16.gmra.mrb[88].mxu0 %v10782_v24 }
 0x300   : > { %3615 = vmatprep.mubr.bf16.mxu0 %v12300_v47  ;;  %4146 = vmatpush1.bf16.msra.mxu0 %v8000_v14 }
 0x301   : > { %v2171_v9 = vpack.c.bf16 %v2136_v42, %v2135_v11  ;;  %v2073_v56 = vadd.f32 %v2009_v16, %v1684_v6  ;;  %v1945_v0 = vpop.permute.xlu0 %1944  ;;  %v8766_v16 = vld [vmem:[%s12218_s1] ss:$0 sm:$0xff] }
 0x302   : > { %v1929_v48 = vpop.permute.xlu1 %1928 }
 0x303   : > { %v2010_v43 = vmul.f32 %v10528_v32, %v1929_v48  ;;  %8497 = vmatprep.mubr.msk.bf16.mxu1 %vm2214_vm0, %v2171_v9  ;;  %v2137_v37 = vmax.f32 %v2073_v56, 0.0  ;;  %v8767_v9 = vld [vmem:[%s12218_s1 + $0x2] ss:$0 sm:$0xff] }
 0x304   : > { %v2014_v48 = vmul.f32 %v8767_v9, %v1945_v0 }
 0x305   : > { %v2074_v51 = vadd.f32 %v2010_v43, %v1685_v49 }
 0x307   : > { %v2138_v18 = vmax.f32 %v2074_v51, 0.0  ;;  %3616 = vmatmul.mubr.bf16.gmra.mrb[92].mxu0 %v10779_v23  ;;  %v1150_v21 = vpop.permute.xlu1 %1149 }
 0x308   : > { %3625 = vmatprep.mubr.bf16.mxu0 %v12300_v47  ;;  %v1227_v46 = vmul.f32 %v10498_v35, %v1150_v21  ;;  %v10811_v35 = vld [vmem:[%s12221_s4] ss:$0 sm:$0xff] }
 0x309   : > { %v2172_v40 = vpack.c.bf16 %v2138_v18, %v2137_v37 }
 0x30a   : > { %v1298_v17 = vadd.f32 %v10506_v61, %v1227_v46 }
 0x30b   : > { %8498 = vmatmul.mubr.msk.bf16.gmra.mrb[24].mxu1 %vm2214_vm0, %v2172_v40  ;;  %v1155_v60 = vpop.permute.xlu1 %1154 }
 0x30c   : > { %v1228_v6 = vmul.f32 %v8766_v16, %v1155_v60 }
 0x310   : > { %v1544_v2 = vpop.permute.xlu1 %1543 }
 0x311   : > { %v1622_v44 = vmul.f32 %v10512_v52, %v1544_v2  ;;  %v8763_v52 = vld [vmem:[%s12218_s1 + $0x1] ss:$0 sm:$0xff] }
 0x312   : > { %v1623_v26 = vmul.f32 %v8763_v52, %v1548_v13 }
 0x313   : > { %v1686_v33 = vadd.f32 %v1622_v44, %v1297_v20 }
 0x314   : > { %v1552_v3 = vpop.permute.xlu1 %1551  ;;  %v1687_v56 = vadd.f32 %v1623_v26, %v1298_v17 }
 0x315   : > { %v2075_v43 = vadd.f32 %v2011_v36, %v1686_v33  ;;  %v1624_v51 = vmul.f32 %v8763_v52, %v1552_v3  ;;  %v2706_v36 = vld [vmem:[#allocation4 + $0x50] sm:$0xff] }
 0x317   : > { %v2139_v14 = vmax.f32 %v2075_v43, 0.0 }
 0x318   : > { %v8475_v38 = vpop.f32.mrb[0].mxu1  ;;  %v1556_v4 = vpop.permute.xlu1 %1555 }
 0x319   : > { %v2482_v31 = vadd.f32 %v8475_v38, %v10520_v15  ;;  %v2473_v25 = vpop.f32.mrb[1].mxu1  ;;  %v1625_v22 = vmul.f32 %v8763_v52, %v1556_v4  ;;  %v8765_v15 = vld [vmem:[%s12219_s2] ss:$0 sm:$0xff]  ;;  %v2735_v52 = vld [vmem:[#allocation4 + $0x138] sm:$0xff] }
 0x31a   : > { %v2474_v61 = vadd.f32 %v10811_v35, %v2473_v25  ;;  %v8476_v5 = vpop.f32.mrb[2].mxu1  ;;  %v1300_v32 = vadd.f32 %v8765_v15, %v1229_v30  ;;  %v1299_v60 = vadd.f32 %v8765_v15, %v1228_v6  ;;  %v2731_v25 = vld [vmem:[#allocation4 + $0x118] sm:$0xff] }
 0x31b   : > { %v2485_v42 = vadd.f32 %v10811_v35, %v8476_v5  ;;  %v2476_v11 = vpop.f32.mrb[3].mxu1  ;;  %v2634_v37 = vmax.f32 %v2482_v31, 0.0  ;;  %v2710_v31 = vld [vmem:[#allocation4 + $0x70] sm:$0xff]  ;;  %v8009_v5 = vcombine.high %v2731_v25, %v2735_v52 }
 0x31c   : > { %v2477_v49 = vadd.f32 %v10811_v35, %v2476_v11  ;;  %v1689_v40 = vadd.f32 %v1625_v22, %v1300_v32  ;;  %v2632_v2 = vmax.f32 %v2474_v61, 0.0  ;;  %v1688_v44 = vadd.f32 %v1624_v51, %v1299_v60  ;;  %v2714_v32 = vld [vmem:[#allocation4 + $0x90] sm:$0xff] }
 0x31d   : > { %v2635_v18 = vmax.f32 %v2485_v42, 0.0  ;;  %v1937_v21 = vpop.permute.xlu1 %1936  ;;  %v7983_v22 = vcombine.high %v2706_v36, %v2710_v31  ;;  %v8008_v61 = vcombine.low %v2731_v25, %v2735_v52  ;;  %v2718_v42 = vld [vmem:[#allocation4 + $0xb0] sm:$0xff]  ;;  %4147 = vmatprep.subr.bf16.mxu0 %v8009_v5 }
 0x31e   : > { %v2633_v13 = vmax.f32 %v2477_v49, 0.0  ;;  %v2012_v19 = vmul.f32 %v8767_v9, %v1937_v21  ;;  %v2078_v27 = vadd.f32 %v2014_v48, %v1689_v40  ;;  %v7991_v48 = vcombine.high %v2714_v32, %v2718_v42  ;;  %v2722_v49 = vld [vmem:[#allocation4 + $0xd0] sm:$0xff] }
 0x31f   : > { %v10825_v7 = vpack.c.bf16 %v2635_v18, %v2634_v37  ;;  %4148 = vmatpush1.bf16.msra.mxu0 %v8008_v61  ;;  %v7990_v51 = vcombine.low %v2714_v32, %v2718_v42 }
 0x320   : > { %v10827_v29 = vpack.c.bf16 %v2633_v13, %v2632_v2  ;;  %v2076_v46 = vadd.f32 %v2012_v19, %v1687_v56  ;;  %v2142_v38 = vmax.f32 %v2078_v27, 0.0  ;;  %v2726_v56 = vld [vmem:[#allocation4 + $0xf0] sm:$0xff] }
 0x321   : > { %v1941_v1 = vpop.permute.xlu1 %1940  ;;  %v7999_v40 = vcombine.high %v2722_v49, %v2726_v56  ;;  %v2730_v13 = vld [vmem:[#allocation4 + $0x110] sm:$0xff] }
 0x322   : > { %v2140_v20 = vmax.f32 %v2076_v46, 0.0  ;;  %v2013_v30 = vmul.f32 %v8767_v9, %v1941_v1  ;;  %3626 = vmatmul.mubr.bf16.gmra.mrb[96].mxu0 %v10827_v29  ;;  %v7982_v9 = vcombine.low %v2706_v36, %v2710_v31  ;;  %v2734_v19 = vld [vmem:[#allocation4 + $0x130] sm:$0xff] }
 0x323   : > { %3635 = vmatprep.mubr.bf16.mxu0 %v12300_v47 }
 0x324   : > { %v2173_v3 = vpack.c.bf16 %v2140_v20, %v2139_v14  ;;  %v2077_v17 = vadd.f32 %v2013_v30, %v1688_v44  ;;  %v7998_v30 = vcombine.low %v2722_v49, %v2726_v56 }
 0x326   : > { %v2141_v4 = vmax.f32 %v2077_v17, 0.0  ;;  %8501 = vmatprep.mubr.msk.bf16.mxu1 %vm2214_vm0, %v2173_v3 }
 0x328   : > { %v2174_v33 = vpack.c.bf16 %v2142_v38, %v2141_v4  ;;  %v8007_v4 = vcombine.high %v2730_v13, %v2734_v19 }
 0x32a   : > { %8502 = vmatmul.mubr.msk.bf16.gmra.mrb[28].mxu1 %vm2214_vm0, %v2174_v33  ;;  %3636 = vmatmul.mubr.bf16.gmra.mrb[100].mxu0 %v10825_v7 }
 0x32b   : > { %3112 = vmatprep.mubr.bf16.mxu1 %v12300_v47  ;;  %3645 = vmatprep.mubr.bf16.mxu0 %v12300_v47 }
 0x32f   : > { %v3467_v0 = vpop.f32.mrb[32].mxu0 }
 0x330   : > { %v3469_v26 = vpop.f32.mrb[33].mxu0 }
 0x331   : > { %v3471_v15 = vpop.f32.mrb[34].mxu0 }
 0x332   : > { %v4566_v11 = vmax.f32 %v3467_v0, %v3471_v15  ;;  %3113 = vmatmul.mubr.bf16.vlgmr.msra.gmra.mrb[32].mxu1 %v10548_v45  ;;  %v3473_v16 = vpop.f32.mrb[35].mxu0  ;;  %v8006_v0 = vcombine.low %v2730_v13, %v2734_v19 }
 0x333   : > { %v4603_v6 = vmax.f32 %v3469_v26, %v3473_v16  ;;  %3787 = vmatpush1.bf16.msra.mxu1 %v7974_v55  ;;  %3122 = vmatprep.mubr.bf16.mxu1 %v12300_v47 }
 0x334   : > { %3788 = vmatprep.subr.bf16.mxu1 %v7983_v22 }
 0x337   : > { %v8479_v43 = vpop.f32.mrb[4].mxu1  ;;  %3789 = vmatpush1.bf16.msra.mxu1 %v7982_v9 }
 0x338   : > { %v2498_v37 = vadd.f32 %v10811_v35, %v8479_v43  ;;  %v3477_v18 = vpop.f32.mrb[36].mxu0  ;;  %v2489_v21 = vpop.f32.mrb[5].mxu1  ;;  %3790 = vmatprep.subr.bf16.mxu1 %v7991_v48 }
 0x339   : > { %v4567_v2 = vmax.f32 %v4566_v11, %v3477_v18  ;;  %v2490_v41 = vadd.f32 %v10811_v35, %v2489_v21  ;;  %v3479_v28 = vpop.f32.mrb[37].mxu0  ;;  %v8480_v55 = vpop.f32.mrb[6].mxu1  ;;  %v2739_v18 = vld [vmem:[#allocation4 + $0x158] sm:$0xff] }
 0x33a   : > { %v4604_v60 = vmax.f32 %v4603_v6, %v3479_v28  ;;  %v2501_v46 = vadd.f32 %v10811_v35, %v8480_v55  ;;  %v3481_v14 = vpop.f32.mrb[38].mxu0  ;;  %v2492_v1 = vpop.f32.mrb[7].mxu1  ;;  %3123 = vmatmul.mubr.bf16.gmra.mrb[36].mxu1 %v10546_v63  ;;  %v2638_v3 = vmax.f32 %v2498_v37, 0.0  ;;  %v2742_v37 = vld [vmem:[#allocation4 + $0x170] sm:$0xff] }
 0x33b   : > { %v4568_v44 = vmax.f32 %v4567_v2, %v3481_v14  ;;  %v2493_v27 = vadd.f32 %v10811_v35, %v2492_v1  ;;  %v3483_v20 = vpop.f32.mrb[39].mxu0  ;;  %3132 = vmatprep.mubr.bf16.mxu1 %v12300_v47  ;;  %3791 = vmatpush1.bf16.msra.mxu1 %v7990_v51  ;;  %v2636_v33 = vmax.f32 %v2490_v41, 0.0  ;;  %v2738_v51 = vld [vmem:[#allocation4 + $0x150] sm:$0xff]  ;;  %v2743_v2 = vld [vmem:[#allocation4 + $0x178] sm:$0xff] }
 0x33c   : > { %v2639_v17 = vmax.f32 %v2501_v46, 0.0  ;;  %v4605_v38 = vmax.f32 %v4604_v60, %v3483_v20  ;;  %3792 = vmatprep.subr.bf16.mxu1 %v7999_v40  ;;  %v8014_v21 = vcombine.low %v2738_v51, %v2742_v37  ;;  %v8015_v40 = vcombine.high %v2738_v51, %v2742_v37 }
 0x33d   : > { %v2637_v36 = vmax.f32 %v2493_v27, 0.0  ;;  %v8016_v41 = vcombine.low %v2739_v18, %v2743_v2  ;;  %v8017_v28 = vcombine.high %v2739_v18, %v2743_v2 }
 0x33e   : > { %v10847_v31 = vpack.c.bf16 %v2639_v17, %v2638_v3 }
 0x33f   : > { %v10849_v25 = vpack.c.bf16 %v2637_v36, %v2636_v33  ;;  %3793 = vmatpush1.bf16.msra.mxu1 %v7998_v30  ;;  %4149 = vmatprep.subr.bf16.mxu0 %v8017_v28 }
 0x340   : > { %v3487_v52 = vpop.f32.mrb[40].mxu0  ;;  %3794 = vmatprep.subr.bf16.mxu1 %v8007_v4  ;;  %4150 = vmatpush1.bf16.msra.mxu0 %v8016_v41 }
 0x341   : > { %v4569_v26 = vmax.f32 %v4568_v44, %v3487_v52  ;;  %v3489_v22 = vpop.f32.mrb[41].mxu0  ;;  %3646 = vmatmul.mubr.bf16.gmra.mrb[104].mxu0 %v10849_v25 }
 0x342   : > { %v4606_v61 = vmax.f32 %v4605_v38, %v3489_v22  ;;  %v3491_v5 = vpop.f32.mrb[42].mxu0  ;;  %3133 = vmatmul.mubr.bf16.gmra.mrb[40].mxu1 %v10563_v62  ;;  %3655 = vmatprep.mubr.bf16.mxu0 %v12300_v47 }
 0x343   : > { %v4570_v15 = vmax.f32 %v4569_v26, %v3491_v5  ;;  %v3493_v32 = vpop.f32.mrb[43].mxu0  ;;  %3142 = vmatprep.mubr.bf16.mxu1 %v12300_v47  ;;  %3795 = vmatpush1.bf16.msra.mxu1 %v8006_v0 }
 0x344   : > { %v4607_v42 = vmax.f32 %v4606_v61, %v3493_v32  ;;  %3796 = vmatprep.subr.bf16.mxu1 %v8015_v40 }
 0x347   : > { %3797 = vmatpush1.bf16.msra.mxu1 %v8014_v21 }
 0x348   : > { %v3497_v11 = vpop.f32.mrb[44].mxu0 }
 0x349   : > { %v4571_v16 = vmax.f32 %v4570_v15, %v3497_v11  ;;  %v3499_v6 = vpop.f32.mrb[45].mxu0  ;;  %3656 = vmatmul.mubr.bf16.gmra.mrb[108].mxu0 %v10847_v31 }
 0x34a   : > { %v4608_v9 = vmax.f32 %v4607_v42, %v3499_v6  ;;  %v3501_v48 = vpop.f32.mrb[46].mxu0  ;;  %3143 = vmatmul.mubr.bf16.gmra.mrb[44].mxu1 %v10561_v39  ;;  %3665 = vmatprep.mubr.bf16.mxu0 %v12300_v47 }
 0x34b   : > { %v4572_v49 = vmax.f32 %v4571_v16, %v3501_v48  ;;  %v3503_v56 = vpop.f32.mrb[47].mxu0  ;;  %3152 = vmatprep.mubr.bf16.mxu1 %v12300_v47 }
 0x34c   : > { %v4609_v43 = vmax.f32 %v4608_v9, %v3503_v56 }
 0x350   : > { %v3507_v55 = vpop.f32.mrb[48].mxu0 }
 0x351   : > { %v4573_v13 = vmax.f32 %v4572_v49, %v3507_v55  ;;  %v3509_v19 = vpop.f32.mrb[49].mxu0 }
 0x352   : > { %v4610_v60 = vmax.f32 %v4609_v43, %v3509_v19  ;;  %v3511_v46 = vpop.f32.mrb[50].mxu0  ;;  %3153 = vmatmul.mubr.bf16.gmra.mrb[48].mxu1 %v10580_v50 }
 0x353   : > { %v4574_v14 = vmax.f32 %v4573_v13, %v3511_v46  ;;  %v3513_v1 = vpop.f32.mrb[51].mxu0  ;;  %3162 = vmatprep.mubr.bf16.mxu1 %v12300_v47  ;;  %v2746_v46 = vld [vmem:[#allocation4 + $0x190] sm:$0xff] }
 0x354   : > { %v4611_v44 = vmax.f32 %v4610_v60, %v3513_v1  ;;  %v2747_v1 = vld [vmem:[#allocation4 + $0x198] sm:$0xff] }
 0x358   : > { %v3517_v27 = vpop.f32.mrb[52].mxu0 }
 0x359   : > { %v4575_v20 = vmax.f32 %v4574_v14, %v3517_v27  ;;  %v3519_v30 = vpop.f32.mrb[53].mxu0  ;;  %v2750_v14 = vld [vmem:[#allocation4 + $0x1b0] sm:$0xff] }
 0x35a   : > { %v4612_v3 = vmax.f32 %v4611_v44, %v3519_v30  ;;  %v3521_v17 = vpop.f32.mrb[54].mxu0  ;;  %v8483_v38 = vpop.f32.mrb[8].mxu1  ;;  %3163 = vmatmul.mubr.bf16.gmra.mrb[52].mxu1 %v10577_v59  ;;  %v8022_v27 = vcombine.low %v2746_v46, %v2750_v14  ;;  %v2751_v30 = vld [vmem:[#allocation4 + $0x1b8] sm:$0xff] }
 0x35b   : > { %v4576_v4 = vmax.f32 %v4575_v20, %v3521_v17  ;;  %v2514_v33 = vadd.f32 %v10811_v35, %v8483_v38  ;;  %v3523_v36 = vpop.f32.mrb[55].mxu0  ;;  %v2505_v0 = vpop.f32.mrb[9].mxu1  ;;  %3172 = vmatprep.mubr.bf16.mxu1 %v12300_v47  ;;  %v8023_v20 = vcombine.high %v2746_v46, %v2750_v14  ;;  %v8024_v38 = vcombine.low %v2747_v1, %v2751_v30  ;;  %v2754_v14 = vld [vmem:[#allocation4 + $0x1d0] sm:$0xff] }
 0x35c   : > { %v4613_v52 = vmax.f32 %v4612_v3, %v3523_v36  ;;  %v2506_v26 = vadd.f32 %v10811_v35, %v2505_v0  ;;  %v8484_v22 = vpop.f32.mrb[10].mxu1 }
 0x35d   : > { %v2517_v61 = vadd.f32 %v10811_v35, %v8484_v22  ;;  %v2508_v5 = vpop.f32.mrb[11].mxu1  ;;  %v2642_v32 = vmax.f32 %v2514_v33, 0.0  ;;  %3798 = vmatprep.subr.bf16.mxu1 %v8023_v20 }
 0x35e   : > { %v2509_v15 = vadd.f32 %v10811_v35, %v2508_v5  ;;  %v2640_v11 = vmax.f32 %v2506_v26, 0.0  ;;  %3799 = vmatpush1.bf16.msra.mxu1 %v8022_v27 }
 0x35f   : > { %v2643_v42 = vmax.f32 %v2517_v61, 0.0 }
 0x360   : > { %v2641_v16 = vmax.f32 %v2509_v15, 0.0  ;;  %v3527_v6 = vpop.f32.mrb[56].mxu0 }
 0x361   : > { %v10867_v9 = vpack.c.bf16 %v2643_v42, %v2642_v32  ;;  %v4577_v48 = vmax.f32 %v4576_v4, %v3527_v6  ;;  %v3529_v49 = vpop.f32.mrb[57].mxu0  ;;  %v8025_v4 = vcombine.high %v2747_v1, %v2751_v30  ;;  %v2758_v1 = vld [vmem:[#allocation4 + $0x1f0] sm:$0xff] }
 0x362   : > { %v10869_v56 = vpack.c.bf16 %v2641_v16, %v2640_v11  ;;  %v4614_v43 = vmax.f32 %v4613_v52, %v3529_v49  ;;  %v3531_v51 = vpop.f32.mrb[58].mxu0  ;;  %3173 = vmatmul.mubr.bf16.gmra.mrb[56].mxu1 %v10609_v12  ;;  %v8030_v30 = vcombine.low %v2754_v14, %v2758_v1 }
 0x363   : > { %v4578_v37 = vmax.f32 %v4577_v48, %v3531_v51  ;;  %v3533_v18 = vpop.f32.mrb[59].mxu0  ;;  %3182 = vmatprep.mubr.bf16.mxu1 %v12300_v47  ;;  %4151 = vmatprep.subr.bf16.mxu0 %v8025_v4 }
 0x364   : > { %v4615_v21 = vmax.f32 %v4614_v43, %v3533_v18  ;;  %3666 = vmatmul.mubr.bf16.gmra.mrb[112].mxu0 %v10869_v56 }
 0x365   : > { %3675 = vmatprep.mubr.bf16.mxu0 %v12300_v47  ;;  %4152 = vmatpush1.bf16.msra.mxu0 %v8024_v38 }
 0x368   : > { %v3537_v40 = vpop.f32.mrb[60].mxu0 }
 0x369   : > { %v4579_v2 = vmax.f32 %v4578_v37, %v3537_v40  ;;  %v3539_v41 = vpop.f32.mrb[61].mxu0 }
 0x36a   : > { %v4616_v28 = vmax.f32 %v4615_v21, %v3539_v41  ;;  %v3541_v55 = vpop.f32.mrb[62].mxu0  ;;  %3183 = vmatmul.mubr.bf16.gmra.mrb[60].mxu1 %v10606_v10 }
 0x36b   : > { %v4580_v13 = vmax.f32 %v4579_v2, %v3541_v55  ;;  %v3543_v19 = vpop.f32.mrb[63].mxu0  ;;  %3192 = vmatprep.mubr.bf16.mxu1 %v12300_v47 }
 0x36c   : > { %v4617_v60 = vmax.f32 %v4616_v28, %v3543_v19  ;;  %3676 = vmatmul.mubr.bf16.gmra.mrb[116].mxu0 %v10867_v9 }
 0x36d   : > { %3685 = vmatprep.mubr.bf16.mxu0 %v12300_v47 }
 0x371   : > { %v3547_v44 = vpop.f32.mrb[64].mxu0 }
 0x372   : > { %v4581_v3 = vmax.f32 %v4580_v13, %v3547_v44  ;;  %3193 = vmatmul.mubr.bf16.gmra.mrb[64].mxu1 %v10671_v57  ;;  %v3549_v17 = vpop.f32.mrb[65].mxu0  ;;  %v2755_v44 = vld [vmem:[#allocation4 + $0x1d8] sm:$0xff] }
 0x373   : > { %v4618_v33 = vmax.f32 %v4617_v60, %v3549_v17  ;;  %v3551_v36 = vpop.f32.mrb[66].mxu0  ;;  %3202 = vmatprep.mubr.bf16.mxu1 %v12300_v47  ;;  %v2759_v17 = vld [vmem:[#allocation4 + $0x1f8] sm:$0xff] }
 0x374   : > { %v4582_v0 = vmax.f32 %v4581_v3, %v3551_v36  ;;  %v3553_v52 = vpop.f32.mrb[67].mxu0  ;;  %v8031_v3 = vcombine.high %v2754_v14, %v2758_v1  ;;  %v8033_v36 = vcombine.high %v2755_v44, %v2759_v17 }
 0x375   : > { %v4619_v26 = vmax.f32 %v4618_v33, %v3553_v52  ;;  %v8032_v33 = vcombine.low %v2755_v44, %v2759_v17 }
 0x376   : > { %3800 = vmatprep.subr.bf16.mxu1 %v8031_v3  ;;  %4153 = vmatprep.subr.bf16.mxu0 %v8033_v36 }
 0x377   : > { %3801 = vmatpush1.bf16.msra.mxu1 %v8030_v30  ;;  %4154 = vmatpush1.bf16.msra.mxu0 %v8032_v33 }
 0x379   : > { %v8487_v22 = vpop.f32.mrb[12].mxu1  ;;  %v3557_v61 = vpop.f32.mrb[68].mxu0 }
 0x37a   : > { %v2530_v5 = vadd.f32 %v10811_v35, %v8487_v22  ;;  %v4583_v15 = vmax.f32 %v4582_v0, %v3557_v61  ;;  %v2521_v32 = vpop.f32.mrb[13].mxu1  ;;  %3203 = vmatmul.mubr.bf16.gmra.mrb[68].mxu1 %v10668_v8  ;;  %v3559_v42 = vpop.f32.mrb[69].mxu0 }
 0x37b   : > { %v2522_v11 = vadd.f32 %v10811_v35, %v2521_v32  ;;  %v4620_v16 = vmax.f32 %v4619_v26, %v3559_v42  ;;  %v8488_v6 = vpop.f32.mrb[14].mxu1  ;;  %v3561_v48 = vpop.f32.mrb[70].mxu0  ;;  %3212 = vmatprep.mubr.bf16.mxu1 %v12300_v47 }
 0x37c   : > { %v2533_v49 = vadd.f32 %v10811_v35, %v8488_v6  ;;  %v4584_v43 = vmax.f32 %v4583_v15, %v3561_v48  ;;  %v2524_v51 = vpop.f32.mrb[15].mxu1  ;;  %v3563_v37 = vpop.f32.mrb[71].mxu0  ;;  %v2646_v40 = vmax.f32 %v2530_v5, 0.0 }
 0x37d   : > { %v2525_v18 = vadd.f32 %v10811_v35, %v2524_v51  ;;  %v4621_v21 = vmax.f32 %v4620_v16, %v3563_v37  ;;  %v2644_v41 = vmax.f32 %v2522_v11, 0.0 }
 0x37e   : > { %v2647_v2 = vmax.f32 %v2533_v49, 0.0 }
 0x37f   : > { %v2645_v28 = vmax.f32 %v2525_v18, 0.0 }
 0x380   : > { %v10887_v55 = vpack.c.bf16 %v2647_v2, %v2646_v40 }
 0x381   : > { %v10889_v13 = vpack.c.bf16 %v2645_v28, %v2644_v41 }
 0x382   : > { %3213 = vmatmul.mubr.bf16.gmra.mrb[72].mxu1 %v10716_v53 }
 0x383   : > { %3686 = vmatmul.mubr.bf16.gmra.mrb[120].mxu0 %v10889_v13  ;;  %3222 = vmatprep.mubr.bf16.mxu1 %v12300_v47 }
 0x384   : > { %3695 = vmatprep.mubr.bf16.mxu0 %v12300_v47 }
 0x38a   : > { %3223 = vmatmul.mubr.bf16.gmra.mrb[76].mxu1 %v10713_v58 }
 0x38b   : > { %3696 = vmatmul.mubr.bf16.gmra.mrb[124].mxu0 %v10887_v55  ;;  %3232 = vmatprep.mubr.bf16.mxu1 %v12300_v47 }
 0x38c   : > { %3705 = vmatprep.mubr.bf16.mxu0 %v12300_v47 }
 0x390   : > { %v3567_v19 = vpop.f32.mrb[72].mxu0 }
 0x391   : > { %v4585_v60 = vmax.f32 %v4584_v43, %v3567_v19  ;;  %v3569_v46 = vpop.f32.mrb[73].mxu0 }
 0x392   : > { %v4622_v27 = vmax.f32 %v4621_v21, %v3569_v46  ;;  %3233 = vmatmul.mubr.bf16.gmra.mrb[80].mxu1 %v10754_v54  ;;  %v3571_v20 = vpop.f32.mrb[74].mxu0 }
 0x393   : > { %v4586_v38 = vmax.f32 %v4585_v60, %v3571_v20  ;;  %v3573_v4 = vpop.f32.mrb[75].mxu0  ;;  %3242 = vmatprep.mubr.bf16.mxu1 %v12300_v47 }
 0x394   : > { %v4623_v0 = vmax.f32 %v4622_v27, %v3573_v4 }
 0x398   : > { %v3577_v52 = vpop.f32.mrb[76].mxu0 }
 0x399   : > { %v4587_v26 = vmax.f32 %v4586_v38, %v3577_v52  ;;  %v3579_v22 = vpop.f32.mrb[77].mxu0 }
 0x39a   : > { %v4624_v61 = vmax.f32 %v4623_v0, %v3579_v22  ;;  %3243 = vmatmul.mubr.bf16.gmra.mrb[84].mxu1 %v10749_v34  ;;  %v3581_v5 = vpop.f32.mrb[78].mxu0 }
 0x39b   : > { %v4588_v15 = vmax.f32 %v4587_v26, %v3581_v5  ;;  %v3583_v32 = vpop.f32.mrb[79].mxu0  ;;  %3252 = vmatprep.mubr.bf16.mxu1 %v12300_v47 }
 0x39c   : > { %v4625_v42 = vmax.f32 %v4624_v61, %v3583_v32  ;;  %v8491_v11 = vpop.f32.mrb[16].mxu1 }
 0x39d   : > { %v2546_v16 = vadd.f32 %v10811_v35, %v8491_v11  ;;  %v2537_v6 = vpop.f32.mrb[17].mxu1 }
 0x39e   : > { %v2538_v48 = vadd.f32 %v10811_v35, %v2537_v6  ;;  %v8492_v49 = vpop.f32.mrb[18].mxu1 }
 0x39f   : > { %v2549_v43 = vadd.f32 %v10811_v35, %v8492_v49  ;;  %v2540_v51 = vpop.f32.mrb[19].mxu1  ;;  %v2650_v18 = vmax.f32 %v2546_v16, 0.0 }
 0x3a0   : > { %v2541_v37 = vadd.f32 %v10811_v35, %v2540_v51  ;;  %v2648_v40 = vmax.f32 %v2538_v48, 0.0 }
 0x3a1   : > { %v2651_v21 = vmax.f32 %v2549_v43, 0.0 }
 0x3a2   : > { %v2649_v2 = vmax.f32 %v2541_v37, 0.0  ;;  %3253 = vmatmul.mubr.bf16.gmra.mrb[88].mxu1 %v10782_v24 }
 0x3a3   : > { %v10908_v41 = vpack.c.bf16 %v2651_v21, %v2650_v18  ;;  %3262 = vmatprep.mubr.bf16.mxu1 %v12300_v47 }
 0x3a4   : > { %v10911_v28 = vpack.c.bf16 %v2649_v2, %v2648_v40 }
 0x3a6   : > { %3706 = vmatmul.mubr.bf16.gmra.mrb[128].mxu0 %v10911_v28 }
 0x3a7   : > { %3715 = vmatprep.mubr.bf16.mxu0 %v12300_v47 }
 0x3aa   : > { %3263 = vmatmul.mubr.bf16.gmra.mrb[92].mxu1 %v10779_v23 }
 0x3ab   : > { %3272 = vmatprep.mubr.bf16.mxu1 %v12300_v47 }
 0x3ae   : > { %3716 = vmatmul.mubr.bf16.gmra.mrb[132].mxu0 %v10908_v41 }
 0x3af   : > { %3725 = vmatprep.mubr.bf16.mxu0 %v12300_v47 }
 0x3b2   : > { %3273 = vmatmul.mubr.bf16.gmra.mrb[96].mxu1 %v10827_v29 }
 0x3b3   : > { %v3587_v19 = vpop.f32.mrb[80].mxu0  ;;  %3282 = vmatprep.mubr.bf16.mxu1 %v12300_v47 }
 0x3b4   : > { %v4589_v60 = vmax.f32 %v4588_v15, %v3587_v19  ;;  %v3589_v46 = vpop.f32.mrb[81].mxu0 }
 0x3b5   : > { %v4626_v14 = vmax.f32 %v4625_v42, %v3589_v46  ;;  %v3591_v1 = vpop.f32.mrb[82].mxu0 }
 0x3b6   : > { %v4590_v44 = vmax.f32 %v4589_v60, %v3591_v1  ;;  %v3593_v27 = vpop.f32.mrb[83].mxu0 }
 0x3b7   : > { %v4627_v20 = vmax.f32 %v4626_v14, %v3593_v27 }
 0x3ba   : > { %3283 = vmatmul.mubr.bf16.gmra.mrb[100].mxu1 %v10825_v7 }
 0x3bb   : > { %v8495_v30 = vpop.f32.mrb[20].mxu1  ;;  %v3597_v3 = vpop.f32.mrb[84].mxu0  ;;  %3292 = vmatprep.mubr.bf16.mxu1 %v12300_v47 }
 0x3bc   : > { %v2562_v17 = vadd.f32 %v10811_v35, %v8495_v30  ;;  %v4591_v38 = vmax.f32 %v4590_v44, %v3597_v3  ;;  %v2553_v4 = vpop.f32.mrb[21].mxu1  ;;  %v3599_v33 = vpop.f32.mrb[85].mxu0 }
 0x3bd   : > { %v2554_v36 = vadd.f32 %v10811_v35, %v2553_v4  ;;  %v4628_v0 = vmax.f32 %v4627_v20, %v3599_v33  ;;  %v8496_v52 = vpop.f32.mrb[22].mxu1  ;;  %v3601_v26 = vpop.f32.mrb[86].mxu0 }
 0x3be   : > { %v2565_v22 = vadd.f32 %v10811_v35, %v8496_v52  ;;  %v4592_v61 = vmax.f32 %v4591_v38, %v3601_v26  ;;  %v2556_v5 = vpop.f32.mrb[23].mxu1  ;;  %v3603_v15 = vpop.f32.mrb[87].mxu0  ;;  %v2654_v11 = vmax.f32 %v2562_v17, 0.0 }
 0x3bf   : > { %v2557_v32 = vadd.f32 %v10811_v35, %v2556_v5  ;;  %v4629_v42 = vmax.f32 %v4628_v0, %v3603_v15  ;;  %v2652_v6 = vmax.f32 %v2554_v36, 0.0 }
 0x3c0   : > { %v2655_v16 = vmax.f32 %v2565_v22, 0.0 }
 0x3c1   : > { %v2653_v48 = vmax.f32 %v2557_v32, 0.0 }
 0x3c2   : > { %v10927_v49 = vpack.c.bf16 %v2655_v16, %v2654_v11  ;;  %3293 = vmatmul.mubr.bf16.gmra.mrb[104].mxu1 %v10849_v25 }
 0x3c3   : > { %v10930_v43 = vpack.c.bf16 %v2653_v48, %v2652_v6  ;;  %3302 = vmatprep.mubr.bf16.mxu1 %v12300_v47 }
 0x3c5   : > { %3726 = vmatmul.mubr.bf16.gmra.mrb[136].mxu0 %v10930_v43 }
 0x3c6   : > { %3735 = vmatprep.mubr.bf16.mxu0 %v12300_v47 }
 0x3ca   : > { %3303 = vmatmul.mubr.bf16.gmra.mrb[108].mxu1 %v10847_v31 }
 0x3cb   : > { %3312 = vmatprep.mubr.bf16.mxu1 %v12300_v47 }
 0x3cd   : > { %3736 = vmatmul.mubr.bf16.gmra.mrb[140].mxu0 %v10927_v49 }
 0x3ce   : > { %3745 = vmatprep.mubr.bf16.mxu0 %v12300_v47 }
 0x3d2   : > { %3313 = vmatmul.mubr.bf16.gmra.mrb[112].mxu1 %v10869_v56  ;;  %v3607_v51 = vpop.f32.mrb[88].mxu0 }
 0x3d3   : > { %v4593_v37 = vmax.f32 %v4592_v61, %v3607_v51  ;;  %v3609_v18 = vpop.f32.mrb[89].mxu0  ;;  %3322 = vmatprep.mubr.bf16.mxu1 %v12300_v47 }
 0x3d4   : > { %v4630_v21 = vmax.f32 %v4629_v42, %v3609_v18  ;;  %v3611_v40 = vpop.f32.mrb[90].mxu0 }
 0x3d5   : > { %v4594_v2 = vmax.f32 %v4593_v37, %v3611_v40  ;;  %v3613_v19 = vpop.f32.mrb[91].mxu0 }
 0x3d6   : > { %v4631_v60 = vmax.f32 %v4630_v21, %v3613_v19 }
 0x3da   : > { %3323 = vmatmul.mubr.bf16.gmra.mrb[116].mxu1 %v10867_v9  ;;  %v3617_v46 = vpop.f32.mrb[92].mxu0 }
 0x3db   : > { %v4595_v14 = vmax.f32 %v4594_v2, %v3617_v46  ;;  %v3619_v1 = vpop.f32.mrb[93].mxu0  ;;  %3332 = vmatprep.mubr.bf16.mxu1 %v12300_v47 }
 0x3dc   : > { %v4632_v44 = vmax.f32 %v4631_v60, %v3619_v1  ;;  %v3621_v27 = vpop.f32.mrb[94].mxu0 }
 0x3dd   : > { %v10943_v20 = vmax.f32 %v4595_v14, %v3621_v27  ;;  %v3623_v30 = vpop.f32.mrb[95].mxu0 }
 0x3de   : > { %v10945_v3 = vmax.f32 %v4632_v44, %v3623_v30  ;;  %v8499_v17 = vpop.f32.mrb[24].mxu1 }
 0x3df   : > { %v2578_v38 = vadd.f32 %v10811_v35, %v8499_v17  ;;  %v2569_v4 = vpop.f32.mrb[25].mxu1 }
 0x3e0   : > { %v2570_v33 = vadd.f32 %v10811_v35, %v2569_v4  ;;  %v8500_v36 = vpop.f32.mrb[26].mxu1 }
 0x3e1   : > { %v2581_v0 = vadd.f32 %v10811_v35, %v8500_v36  ;;  %v2572_v52 = vpop.f32.mrb[27].mxu1  ;;  %v2658_v22 = vmax.f32 %v2578_v38, 0.0 }
 0x3e2   : > { %v2573_v26 = vadd.f32 %v10811_v35, %v2572_v52  ;;  %3333 = vmatmul.mubr.bf16.gmra.mrb[120].mxu1 %v10889_v13  ;;  %v2656_v5 = vmax.f32 %v2570_v33, 0.0 }
 0x3e3   : > { %v2659_v61 = vmax.f32 %v2581_v0, 0.0  ;;  %3342 = vmatprep.mubr.bf16.mxu1 %v12300_v47 }
 0x3e4   : > { %v2657_v15 = vmax.f32 %v2573_v26, 0.0 }
 0x3e5   : > { %v10953_v32 = vpack.c.bf16 %v2659_v61, %v2658_v22 }
 0x3e6   : > { %v10955_v42 = vpack.c.bf16 %v2657_v15, %v2656_v5 }
 0x3e8   : > { %3746 = vmatmul.mubr.bf16.gmra.mrb[144].mxu0 %v10955_v42 }
 0x3e9   : > { %3755 = vmatprep.mubr.bf16.mxu0 %v12300_v47 }
 0x3ea   : > { %3343 = vmatmul.mubr.bf16.gmra.mrb[124].mxu1 %v10887_v55 }
 0x3eb   : > { %3352 = vmatprep.mubr.bf16.mxu1 %v12300_v47 }
 0x3f0   : > { %3756 = vmatmul.mubr.bf16.gmra.mrb[148].mxu0 %v10953_v32 }
 0x3f1   : > { %3765 = vmatprep.mubr.bf16.mxu0 %v12300_v47 }
 0x3f2   : > { %3353 = vmatmul.mubr.bf16.gmra.mrb[128].mxu1 %v10911_v28 }
 0x3f3   : > { %3362 = vmatprep.mubr.bf16.mxu1 %v12300_v47 }
 0x3f5   : > { %v3627_v11 = vpop.f32.mrb[96].mxu0 }
 0x3f6   : > { %v3629_v16 = vpop.f32.mrb[97].mxu0 }
 0x3f7   : > { %v3631_v6 = vpop.f32.mrb[98].mxu0 }
 0x3f8   : > { %v4862_v48 = vmax.f32 %v3627_v11, %v3631_v6  ;;  %v3633_v51 = vpop.f32.mrb[99].mxu0 }
 0x3f9   : > { %v4899_v37 = vmax.f32 %v3629_v16, %v3633_v51 }
 0x3fa   : > { %3363 = vmatmul.mubr.bf16.gmra.mrb[132].mxu1 %v10908_v41 }
 0x3fb   : > { %3372 = vmatprep.mubr.bf16.mxu1 %v12300_v47 }
 0x3fd   : > { %v8503_v18 = vpop.f32.mrb[28].mxu1  ;;  %v3637_v21 = vpop.f32.mrb[100].mxu0 }
 0x3fe   : > { %v2594_v40 = vadd.f32 %v10811_v35, %v8503_v18  ;;  %v4863_v2 = vmax.f32 %v4862_v48, %v3637_v21  ;;  %v2585_v19 = vpop.f32.mrb[29].mxu1  ;;  %v3639_v60 = vpop.f32.mrb[101].mxu0 }
 0x3ff   : > { %v2586_v46 = vadd.f32 %v10811_v35, %v2585_v19  ;;  %v4900_v14 = vmax.f32 %v4899_v37, %v3639_v60  ;;  %v8504_v1 = vpop.f32.mrb[30].mxu1  ;;  %v3641_v44 = vpop.f32.mrb[102].mxu0 }
 0x400   : > { %v2597_v27 = vadd.f32 %v10811_v35, %v8504_v1  ;;  %v4864_v30 = vmax.f32 %v4863_v2, %v3641_v44  ;;  %v2588_v17 = vpop.f32.mrb[31].mxu1  ;;  %v3643_v38 = vpop.f32.mrb[103].mxu0  ;;  %v2662_v36 = vmax.f32 %v2594_v40, 0.0 }
 0x401   : > { %v2589_v4 = vadd.f32 %v10811_v35, %v2588_v17  ;;  %v4901_v33 = vmax.f32 %v4900_v14, %v3643_v38  ;;  %v2660_v52 = vmax.f32 %v2586_v46, 0.0 }
 0x402   : > { %v2663_v0 = vmax.f32 %v2597_v27, 0.0  ;;  %3373 = vmatmul.mubr.bf16.gmra.mrb[136].mxu1 %v10930_v43 }
 0x403   : > { %v2661_v26 = vmax.f32 %v2589_v4, 0.0  ;;  %3382 = vmatprep.mubr.bf16.mxu1 %v12300_v47 }
 0x404   : > { %v10973_v22 = vpack.c.bf16 %v2663_v0, %v2662_v36 }
 0x405   : > { %v10975_v61 = vpack.c.bf16 %v2661_v26, %v2660_v52  ;;  %v3114_v5 = vpop.f32.mrb[32].mxu1 }
 0x406   : > { %v3116_v15 = vpop.f32.mrb[33].mxu1 }
 0x407   : > { %v3118_v11 = vpop.f32.mrb[34].mxu1  ;;  %3766 = vmatmul.mubr.bf16.gmra.mrb[152].mxu0 %v10975_v61 }
 0x408   : > { %v4492_v16 = vmax.f32 %v3114_v5, %v3118_v11  ;;  %v3120_v35 = vpop.f32.mrb[35].mxu1  ;;  %3775 = vmatprep.mubr.bf16.mxu0 %v12300_v47 }
 0x409   : > { %v4529_v6 = vmax.f32 %v3116_v15, %v3120_v35 }
 0x40a   : > { %3383 = vmatmul.mubr.bf16.gmra.mrb[140].mxu1 %v10927_v49 }
 0x40b   : > { %3392 = vmatprep.mubr.bf16.mxu1 %v12300_v47 }
 0x40d   : > { %v3124_v48 = vpop.f32.mrb[36].mxu1 }
 0x40e   : > { %v4493_v51 = vmax.f32 %v4492_v16, %v3124_v48  ;;  %v3126_v37 = vpop.f32.mrb[37].mxu1 }
 0x40f   : > { %v4530_v18 = vmax.f32 %v4529_v6, %v3126_v37  ;;  %v3128_v21 = vpop.f32.mrb[38].mxu1  ;;  %3776 = vmatmul.mubr.bf16.gmra.mrb[156].mxu0 %v10973_v22 }
 0x410   : > { %v4494_v40 = vmax.f32 %v4493_v51, %v3128_v21  ;;  %v3130_v2 = vpop.f32.mrb[39].mxu1  ;;  %4171 = vmatprep.mubr.bf16.mxu0 %v12300_v47 }
 0x411   : > { %v4531_v19 = vmax.f32 %v4530_v18, %v3130_v2 }
 0x412   : > { %3393 = vmatmul.mubr.bf16.gmra.mrb[144].mxu1 %v10955_v42 }
 0x413   : > { %3402 = vmatprep.mubr.bf16.mxu1 %v12300_v47 }
 0x414   : > { %v3647_v60 = vpop.f32.mrb[104].mxu0 }
 0x415   : > { %v4865_v46 = vmax.f32 %v4864_v30, %v3647_v60  ;;  %v3134_v14 = vpop.f32.mrb[40].mxu1  ;;  %v3649_v1 = vpop.f32.mrb[105].mxu0 }
 0x416   : > { %v4495_v44 = vmax.f32 %v4494_v40, %v3134_v14  ;;  %v4902_v27 = vmax.f32 %v4901_v33, %v3649_v1  ;;  %v3136_v17 = vpop.f32.mrb[41].mxu1  ;;  %v3651_v38 = vpop.f32.mrb[106].mxu0 }
 0x417   : > { %v4532_v4 = vmax.f32 %v4531_v19, %v3136_v17  ;;  %v4866_v36 = vmax.f32 %v4865_v46, %v3651_v38  ;;  %v3138_v0 = vpop.f32.mrb[42].mxu1  ;;  %v3653_v52 = vpop.f32.mrb[107].mxu0  ;;  %4172 = vmatmul.mubr.bf16.vlgmr.msra.gmra.mrb[160].mxu0 %v10548_v45 }
 0x418   : > { %v4496_v26 = vmax.f32 %v4495_v44, %v3138_v0  ;;  %v4903_v5 = vmax.f32 %v4902_v27, %v3653_v52  ;;  %v3140_v15 = vpop.f32.mrb[43].mxu1  ;;  %4181 = vmatprep.mubr.bf16.mxu0 %v12300_v47 }
 0x419   : > { %v4533_v11 = vmax.f32 %v4532_v4, %v3140_v15 }
 0x41a   : > { %3403 = vmatmul.mubr.bf16.gmra.mrb[148].mxu1 %v10953_v32 }
 0x41b   : > { %3412 = vmatprep.mubr.bf16.mxu1 %v12300_v47 }
 0x41c   : > { %v3657_v30 = vpop.f32.mrb[108].mxu0 }
 0x41d   : > { %v4867_v33 = vmax.f32 %v4866_v36, %v3657_v30  ;;  %v3144_v16 = vpop.f32.mrb[44].mxu1  ;;  %v3659_v35 = vpop.f32.mrb[109].mxu0 }
 0x41e   : > { %v4497_v6 = vmax.f32 %v4496_v26, %v3144_v16  ;;  %v4904_v48 = vmax.f32 %v4903_v5, %v3659_v35  ;;  %v3146_v51 = vpop.f32.mrb[45].mxu1  ;;  %v3661_v37 = vpop.f32.mrb[110].mxu0 }
 0x41f   : > { %v4534_v18 = vmax.f32 %v4533_v11, %v3146_v51  ;;  %v4868_v21 = vmax.f32 %v4867_v33, %v3661_v37  ;;  %v3148_v40 = vpop.f32.mrb[46].mxu1  ;;  %v3663_v2 = vpop.f32.mrb[111].mxu0  ;;  %4182 = vmatmul.mubr.bf16.gmra.mrb[164].mxu0 %v10546_v63 }
 0x420   : > { %v4498_v19 = vmax.f32 %v4497_v6, %v3148_v40  ;;  %v4905_v60 = vmax.f32 %v4904_v48, %v3663_v2  ;;  %v3150_v46 = vpop.f32.mrb[47].mxu1  ;;  %4191 = vmatprep.mubr.bf16.mxu0 %v12300_v47 }
 0x421   : > { %v4535_v14 = vmax.f32 %v4534_v18, %v3150_v46 }
 0x422   : > { %3413 = vmatmul.mubr.bf16.gmra.mrb[152].mxu1 %v10975_v61 }
 0x423   : > { %3422 = vmatprep.mubr.bf16.mxu1 %v12300_v47 }
 0x425   : > { %v3154_v1 = vpop.f32.mrb[48].mxu1 }
 0x426   : > { %v4499_v44 = vmax.f32 %v4498_v19, %v3154_v1  ;;  %v3156_v27 = vpop.f32.mrb[49].mxu1 }
 0x427   : > { %v4536_v17 = vmax.f32 %v4535_v14, %v3156_v27  ;;  %v3158_v38 = vpop.f32.mrb[50].mxu1  ;;  %4192 = vmatmul.mubr.bf16.gmra.mrb[168].mxu0 %v10563_v62 }
 0x428   : > { %v4500_v4 = vmax.f32 %v4499_v44, %v3158_v38  ;;  %v3160_v36 = vpop.f32.mrb[51].mxu1  ;;  %4201 = vmatprep.mubr.bf16.mxu0 %v12300_v47 }
 0x429   : > { %v4537_v0 = vmax.f32 %v4536_v17, %v3160_v36 }
 0x42a   : > { %3423 = vmatmul.mubr.bf16.gmra.mrb[156].mxu1 %v10973_v22 }
 0x42b   : > { %3818 = vmatprep.mubr.bf16.mxu1 %v12300_v47 }
 0x42d   : > { %v3164_v52 = vpop.f32.mrb[52].mxu1 }
 0x42e   : > { %v4501_v26 = vmax.f32 %v4500_v4, %v3164_v52  ;;  %v3166_v5 = vpop.f32.mrb[53].mxu1 }
 0x42f   : > { %v4538_v15 = vmax.f32 %v4537_v0, %v3166_v5  ;;  %v3168_v11 = vpop.f32.mrb[54].mxu1  ;;  %4202 = vmatmul.mubr.bf16.gmra.mrb[172].mxu0 %v10561_v39 }
 0x430   : > { %v4502_v30 = vmax.f32 %v4501_v26, %v3168_v11  ;;  %v3170_v33 = vpop.f32.mrb[55].mxu1  ;;  %4211 = vmatprep.mubr.bf16.mxu0 %v12300_v47 }
 0x431   : > { %v4539_v16 = vmax.f32 %v4538_v15, %v3170_v33 }
 0x432   : > { %3819 = vmatmul.mubr.bf16.vlgmr.msra.gmra.mrb[160].mxu1 %v10548_v45 }
 0x433   : > { %3828 = vmatprep.mubr.bf16.mxu1 %v12300_v47 }
 0x435   : > { %v3174_v35 = vpop.f32.mrb[56].mxu1 }
 0x436   : > { %v4503_v6 = vmax.f32 %v4502_v30, %v3174_v35  ;;  %v3176_v48 = vpop.f32.mrb[57].mxu1 }
 0x437   : > { %v4540_v51 = vmax.f32 %v4539_v16, %v3176_v48  ;;  %v3178_v37 = vpop.f32.mrb[58].mxu1  ;;  %v3667_v18 = vpop.f32.mrb[112].mxu0  ;;  %4212 = vmatmul.mubr.bf16.gmra.mrb[176].mxu0 %v10580_v50 }
 0x438   : > { %v4504_v40 = vmax.f32 %v4503_v6, %v3178_v37  ;;  %v4869_v2 = vmax.f32 %v4868_v21, %v3667_v18  ;;  %v3180_v19 = vpop.f32.mrb[59].mxu1  ;;  %v3669_v46 = vpop.f32.mrb[113].mxu0  ;;  %4221 = vmatprep.mubr.bf16.mxu0 %v12300_v47 }
 0x439   : > { %v4541_v14 = vmax.f32 %v4540_v51, %v3180_v19  ;;  %v4906_v1 = vmax.f32 %v4905_v60, %v3669_v46  ;;  %v3671_v44 = vpop.f32.mrb[114].mxu0 }
 0x43a   : > { %v4870_v45 = vmax.f32 %v4869_v2, %v3671_v44  ;;  %v3673_v27 = vpop.f32.mrb[115].mxu0  ;;  %3829 = vmatmul.mubr.bf16.gmra.mrb[164].mxu1 %v10546_v63 }
 0x43b   : > { %v4907_v17 = vmax.f32 %v4906_v1, %v3673_v27  ;;  %3838 = vmatprep.mubr.bf16.mxu1 %v12300_v47 }
 0x43d   : > { %v3184_v38 = vpop.f32.mrb[60].mxu1 }
 0x43e   : > { %v4505_v4 = vmax.f32 %v4504_v40, %v3184_v38  ;;  %v3186_v36 = vpop.f32.mrb[61].mxu1 }
 0x43f   : > { %v4542_v0 = vmax.f32 %v4541_v14, %v3186_v36  ;;  %v3188_v52 = vpop.f32.mrb[62].mxu1  ;;  %v3677_v21 = vpop.f32.mrb[116].mxu0  ;;  %4222 = vmatmul.mubr.bf16.gmra.mrb[180].mxu0 %v10577_v59 }
 0x440   : > { %v4506_v26 = vmax.f32 %v4505_v4, %v3188_v52  ;;  %v4871_v5 = vmax.f32 %v4870_v45, %v3677_v21  ;;  %v3190_v15 = vpop.f32.mrb[63].mxu1  ;;  %v3679_v60 = vpop.f32.mrb[117].mxu0  ;;  %4231 = vmatprep.mubr.bf16.mxu0 %v12300_v47 }
 0x441   : > { %v4543_v11 = vmax.f32 %v4542_v0, %v3190_v15  ;;  %v4908_v30 = vmax.f32 %v4907_v17, %v3679_v60  ;;  %v3681_v63 = vpop.f32.mrb[118].mxu0 }
 0x442   : > { %v4872_v33 = vmax.f32 %v4871_v5, %v3681_v63  ;;  %v3683_v16 = vpop.f32.mrb[119].mxu0  ;;  %3839 = vmatmul.mubr.bf16.gmra.mrb[168].mxu1 %v10563_v62 }
 0x443   : > { %v4909_v35 = vmax.f32 %v4908_v30, %v3683_v16  ;;  %3848 = vmatprep.mubr.bf16.mxu1 %v12300_v47 }
 0x445   : > { %v3194_v6 = vpop.f32.mrb[64].mxu1 }
 0x446   : > { %v4507_v48 = vmax.f32 %v4506_v26, %v3194_v6  ;;  %v3196_v51 = vpop.f32.mrb[65].mxu1 }
 0x447   : > { %v4544_v37 = vmax.f32 %v4543_v11, %v3196_v51  ;;  %v3198_v18 = vpop.f32.mrb[66].mxu1  ;;  %4232 = vmatmul.mubr.bf16.gmra.mrb[184].mxu0 %v10609_v12 }
 0x448   : > { %v4508_v40 = vmax.f32 %v4507_v48, %v3198_v18  ;;  %v3200_v2 = vpop.f32.mrb[67].mxu1  ;;  %4241 = vmatprep.mubr.bf16.mxu0 %v12300_v47 }
 0x449   : > { %v4545_v19 = vmax.f32 %v4544_v37, %v3200_v2 }
 0x44a   : > { %3849 = vmatmul.mubr.bf16.gmra.mrb[172].mxu1 %v10561_v39 }
 0x44b   : > { %3858 = vmatprep.mubr.bf16.mxu1 %v12300_v47 }
 0x44d   : > { %v3204_v62 = vpop.f32.mrb[68].mxu1 }
 0x44e   : > { %v4509_v46 = vmax.f32 %v4508_v40, %v3204_v62  ;;  %v3206_v14 = vpop.f32.mrb[69].mxu1 }
 0x44f   : > { %v4546_v1 = vmax.f32 %v4545_v19, %v3206_v14  ;;  %v3208_v44 = vpop.f32.mrb[70].mxu1  ;;  %4242 = vmatmul.mubr.bf16.gmra.mrb[188].mxu0 %v10606_v10 }
 0x450   : > { %v4510_v45 = vmax.f32 %v4509_v46, %v3208_v44  ;;  %v3210_v27 = vpop.f32.mrb[71].mxu1  ;;  %4251 = vmatprep.mubr.bf16.mxu0 %v12300_v47 }
 0x451   : > { %v4547_v17 = vmax.f32 %v4546_v1, %v3210_v27 }
 0x452   : > { %3859 = vmatmul.mubr.bf16.gmra.mrb[176].mxu1 %v10580_v50 }
 0x453   : > { %3868 = vmatprep.mubr.bf16.mxu1 %v12300_v47 }
 0x455   : > { %v3214_v38 = vpop.f32.mrb[72].mxu1 }
 0x456   : > { %v4511_v39 = vmax.f32 %v4510_v45, %v3214_v38  ;;  %v3216_v4 = vpop.f32.mrb[73].mxu1  ;;  %v3687_v36 = vpop.f32.mrb[120].mxu0 }
 0x457   : > { %v4548_v0 = vmax.f32 %v4547_v17, %v3216_v4  ;;  %v4873_v52 = vmax.f32 %v4872_v33, %v3687_v36  ;;  %v3218_v21 = vpop.f32.mrb[74].mxu1  ;;  %v3689_v26 = vpop.f32.mrb[121].mxu0  ;;  %4252 = vmatmul.mubr.bf16.gmra.mrb[192].mxu0 %v10671_v57 }
 0x458   : > { %v4512_v5 = vmax.f32 %v4511_v39, %v3218_v21  ;;  %v4910_v15 = vmax.f32 %v4909_v35, %v3689_v26  ;;  %v3220_v60 = vpop.f32.mrb[75].mxu1  ;;  %v3691_v11 = vpop.f32.mrb[122].mxu0  ;;  %4261 = vmatprep.mubr.bf16.mxu0 %v12300_v47 }
 0x459   : > { %v4549_v30 = vmax.f32 %v4548_v0, %v3220_v60  ;;  %v4874_v50 = vmax.f32 %v4873_v52, %v3691_v11  ;;  %v3693_v63 = vpop.f32.mrb[123].mxu0 }
 0x45a   : > { %v4911_v16 = vmax.f32 %v4910_v15, %v3693_v63  ;;  %3869 = vmatmul.mubr.bf16.gmra.mrb[180].mxu1 %v10577_v59 }
 0x45b   : > { %3878 = vmatprep.mubr.bf16.mxu1 %v12300_v47 }
 0x45d   : > { %v3224_v6 = vpop.f32.mrb[76].mxu1 }
 0x45e   : > { %v4513_v33 = vmax.f32 %v4512_v5, %v3224_v6  ;;  %v3226_v48 = vpop.f32.mrb[77].mxu1  ;;  %v3697_v51 = vpop.f32.mrb[124].mxu0 }
 0x45f   : > { %v4550_v37 = vmax.f32 %v4549_v30, %v3226_v48  ;;  %v4875_v18 = vmax.f32 %v4874_v50, %v3697_v51  ;;  %v3228_v40 = vpop.f32.mrb[78].mxu1  ;;  %v3699_v35 = vpop.f32.mrb[125].mxu0  ;;  %4262 = vmatmul.mubr.bf16.gmra.mrb[196].mxu0 %v10668_v8 }
 0x460   : > { %v4514_v2 = vmax.f32 %v4513_v33, %v3228_v40  ;;  %v4912_v19 = vmax.f32 %v4911_v16, %v3699_v35  ;;  %v3230_v62 = vpop.f32.mrb[79].mxu1  ;;  %v3701_v46 = vpop.f32.mrb[126].mxu0  ;;  %4271 = vmatprep.mubr.bf16.mxu0 %v12300_v47 }
 0x461   : > { %v4551_v14 = vmax.f32 %v4550_v37, %v3230_v62  ;;  %v4876_v59 = vmax.f32 %v4875_v18, %v3701_v46  ;;  %v3703_v1 = vpop.f32.mrb[127].mxu0 }
 0x462   : > { %v4913_v44 = vmax.f32 %v4912_v19, %v3703_v1  ;;  %3879 = vmatmul.mubr.bf16.gmra.mrb[184].mxu1 %v10609_v12 }
 0x463   : > { %3888 = vmatprep.mubr.bf16.mxu1 %v12300_v47 }
 0x465   : > { %v3234_v45 = vpop.f32.mrb[80].mxu1 }
 0x466   : > { %v4515_v27 = vmax.f32 %v4514_v2, %v3234_v45  ;;  %v3236_v17 = vpop.f32.mrb[81].mxu1 }
 0x467   : > { %v4552_v38 = vmax.f32 %v4551_v14, %v3236_v17  ;;  %v3238_v39 = vpop.f32.mrb[82].mxu1  ;;  %4272 = vmatmul.mubr.bf16.gmra.mrb[200].mxu0 %v10716_v53 }
 0x468   : > { %v4516_v4 = vmax.f32 %v4515_v27, %v3238_v39  ;;  %v3240_v36 = vpop.f32.mrb[83].mxu1  ;;  %4281 = vmatprep.mubr.bf16.mxu0 %v12300_v47 }
 0x469   : > { %v4553_v0 = vmax.f32 %v4552_v38, %v3240_v36 }
 0x46a   : > { %3889 = vmatmul.mubr.bf16.gmra.mrb[188].mxu1 %v10606_v10 }
 0x46b   : > { %3898 = vmatprep.mubr.bf16.mxu1 %v12300_v47 }
 0x46d   : > { %v3244_v52 = vpop.f32.mrb[84].mxu1 }
 0x46e   : > { %v4517_v12 = vmax.f32 %v4516_v4, %v3244_v52  ;;  %v3246_v21 = vpop.f32.mrb[85].mxu1 }
 0x46f   : > { %v4554_v26 = vmax.f32 %v4553_v0, %v3246_v21  ;;  %v3248_v5 = vpop.f32.mrb[86].mxu1  ;;  %4282 = vmatmul.mubr.bf16.gmra.mrb[204].mxu0 %v10713_v58 }
 0x470   : > { %v4518_v15 = vmax.f32 %v4517_v12, %v3248_v5  ;;  %v3250_v60 = vpop.f32.mrb[87].mxu1  ;;  %4291 = vmatprep.mubr.bf16.mxu0 %v12300_v47 }
 0x471   : > { %v4555_v11 = vmax.f32 %v4554_v26, %v3250_v60 }
 0x472   : > { %3899 = vmatmul.mubr.bf16.gmra.mrb[192].mxu1 %v10671_v57 }
 0x473   : > { %3908 = vmatprep.mubr.bf16.mxu1 %v12300_v47 }
 0x475   : > { %v3254_v30 = vpop.f32.mrb[88].mxu1 }
 0x476   : > { %v4519_v10 = vmax.f32 %v4518_v15, %v3254_v30  ;;  %v3256_v50 = vpop.f32.mrb[89].mxu1 }
 0x477   : > { %v4556_v63 = vmax.f32 %v4555_v11, %v3256_v50  ;;  %v3258_v16 = vpop.f32.mrb[90].mxu1  ;;  %4292 = vmatmul.mubr.bf16.gmra.mrb[208].mxu0 %v10754_v54 }
 0x478   : > { %v4520_v6 = vmax.f32 %v4519_v10, %v3258_v16  ;;  %v3260_v33 = vpop.f32.mrb[91].mxu1  ;;  %4301 = vmatprep.mubr.bf16.mxu0 %v12300_v47 }
 0x479   : > { %v4557_v48 = vmax.f32 %v4556_v63, %v3260_v33  ;;  %v3707_v51 = vpop.f32.mrb[128].mxu0 }
 0x47a   : > { %v4877_v37 = vmax.f32 %v4876_v59, %v3707_v51  ;;  %v3709_v18 = vpop.f32.mrb[129].mxu0  ;;  %3909 = vmatmul.mubr.bf16.gmra.mrb[196].mxu1 %v10668_v8 }
 0x47b   : > { %v4914_v57 = vmax.f32 %v4913_v44, %v3709_v18  ;;  %v3711_v40 = vpop.f32.mrb[130].mxu0  ;;  %3918 = vmatprep.mubr.bf16.mxu1 %v12300_v47 }
 0x47c   : > { %v4878_v35 = vmax.f32 %v4877_v37, %v3711_v40  ;;  %v3713_v2 = vpop.f32.mrb[131].mxu0 }
 0x47d   : > { %v4915_v19 = vmax.f32 %v4914_v57, %v3713_v2  ;;  %v3264_v62 = vpop.f32.mrb[92].mxu1 }
 0x47e   : > { %v4521_v46 = vmax.f32 %v4520_v6, %v3264_v62  ;;  %v3266_v14 = vpop.f32.mrb[93].mxu1 }
 0x47f   : > { %v4558_v1 = vmax.f32 %v4557_v48, %v3266_v14  ;;  %v3268_v45 = vpop.f32.mrb[94].mxu1  ;;  %4302 = vmatmul.mubr.bf16.gmra.mrb[212].mxu0 %v10749_v34 }
 0x480   : > { %v11038_v27 = vmax.f32 %v4521_v46, %v3268_v45  ;;  %v3270_v59 = vpop.f32.mrb[95].mxu1  ;;  %4311 = vmatprep.mubr.bf16.mxu0 %v12300_v47 }
 0x481   : > { %v11041_v8 = vmax.f32 %v4558_v1, %v3270_v59  ;;  %v3717_v44 = vpop.f32.mrb[132].mxu0 }
 0x482   : > { %v4879_v17 = vmax.f32 %v4878_v35, %v3717_v44  ;;  %v3719_v38 = vpop.f32.mrb[133].mxu0  ;;  %3919 = vmatmul.mubr.bf16.gmra.mrb[200].mxu1 %v10716_v53 }
 0x483   : > { %v4916_v39 = vmax.f32 %v4915_v19, %v3719_v38  ;;  %v3721_v4 = vpop.f32.mrb[134].mxu0  ;;  %3928 = vmatprep.mubr.bf16.mxu1 %v12300_v47 }
 0x484   : > { %v4880_v36 = vmax.f32 %v4879_v17, %v3721_v4  ;;  %v3723_v0 = vpop.f32.mrb[135].mxu0 }
 0x485   : > { %v4917_v52 = vmax.f32 %v4916_v39, %v3723_v0  ;;  %v3274_v12 = vpop.f32.mrb[96].mxu1 }
 0x486   : > { %v3276_v21 = vpop.f32.mrb[97].mxu1 }
 0x487   : > { %v3278_v26 = vpop.f32.mrb[98].mxu1  ;;  %4312 = vmatmul.mubr.bf16.gmra.mrb[216].mxu0 %v10782_v24 }
 0x488   : > { %v4788_v5 = vmax.f32 %v3274_v12, %v3278_v26  ;;  %v3280_v15 = vpop.f32.mrb[99].mxu1  ;;  %4321 = vmatprep.mubr.bf16.mxu0 %v12300_v47 }
 0x489   : > { %v4825_v60 = vmax.f32 %v3276_v21, %v3280_v15 }
 0x48a   : > { %3929 = vmatmul.mubr.bf16.gmra.mrb[204].mxu1 %v10713_v58 }
 0x48b   : > { %3938 = vmatprep.mubr.bf16.mxu1 %v12300_v47 }
 0x48d   : > { %v3284_v53 = vpop.f32.mrb[100].mxu1 }
 0x48e   : > { %v4789_v11 = vmax.f32 %v4788_v5, %v3284_v53  ;;  %v3286_v30 = vpop.f32.mrb[101].mxu1 }
 0x48f   : > { %v4826_v10 = vmax.f32 %v4825_v60, %v3286_v30  ;;  %v3288_v50 = vpop.f32.mrb[102].mxu1  ;;  %4322 = vmatmul.mubr.bf16.gmra.mrb[220].mxu0 %v10779_v23 }
 0x490   : > { %v4790_v63 = vmax.f32 %v4789_v11, %v3288_v50  ;;  %v3290_v16 = vpop.f32.mrb[103].mxu1  ;;  %4331 = vmatprep.mubr.bf16.mxu0 %v12300_v47 }
 0x491   : > { %v4827_v6 = vmax.f32 %v4826_v10, %v3290_v16 }
 0x492   : > { %3939 = vmatmul.mubr.bf16.gmra.mrb[208].mxu1 %v10754_v54 }
 0x493   : > { %3948 = vmatprep.mubr.bf16.mxu1 %v12300_v47 }
 0x495   : > { %v3294_v33 = vpop.f32.mrb[104].mxu1 }
 0x496   : > { %v4791_v58 = vmax.f32 %v4790_v63, %v3294_v33  ;;  %v3296_v48 = vpop.f32.mrb[105].mxu1 }
 0x497   : > { %v4828_v51 = vmax.f32 %v4827_v6, %v3296_v48  ;;  %v3298_v37 = vpop.f32.mrb[106].mxu1  ;;  %4332 = vmatmul.mubr.bf16.gmra.mrb[224].mxu0 %v10827_v29 }
 0x498   : > { %v4792_v18 = vmax.f32 %v4791_v58, %v3298_v37  ;;  %v3300_v57 = vpop.f32.mrb[107].mxu1  ;;  %v3727_v40 = vpop.f32.mrb[136].mxu0  ;;  %4341 = vmatprep.mubr.bf16.mxu0 %v12300_v47 }
 0x499   : > { %v4829_v35 = vmax.f32 %v4828_v51, %v3300_v57  ;;  %v4881_v2 = vmax.f32 %v4880_v36, %v3727_v40  ;;  %v3729_v19 = vpop.f32.mrb[137].mxu0 }
 0x49a   : > { %v4918_v62 = vmax.f32 %v4917_v52, %v3729_v19  ;;  %v3731_v46 = vpop.f32.mrb[138].mxu0  ;;  %3949 = vmatmul.mubr.bf16.gmra.mrb[212].mxu1 %v10749_v34 }
 0x49b   : > { %v4882_v54 = vmax.f32 %v4881_v2, %v3731_v46  ;;  %v3733_v14 = vpop.f32.mrb[139].mxu0  ;;  %3958 = vmatprep.mubr.bf16.mxu1 %v12300_v47 }
 0x49c   : > { %v4919_v1 = vmax.f32 %v4918_v62, %v3733_v14 }
 0x49d   : > { %v3304_v45 = vpop.f32.mrb[108].mxu1 }
 0x49e   : > { %v4793_v59 = vmax.f32 %v4792_v18, %v3304_v45  ;;  %v3306_v44 = vpop.f32.mrb[109].mxu1 }
 0x49f   : > { %v4830_v17 = vmax.f32 %v4829_v35, %v3306_v44  ;;  %v3308_v38 = vpop.f32.mrb[110].mxu1  ;;  %4342 = vmatmul.mubr.bf16.gmra.mrb[228].mxu0 %v10825_v7 }
 0x4a0   : > { %v4794_v39 = vmax.f32 %v4793_v59, %v3308_v38  ;;  %v3310_v4 = vpop.f32.mrb[111].mxu1  ;;  %v3737_v36 = vpop.f32.mrb[140].mxu0  ;;  %4351 = vmatprep.mubr.bf16.mxu0 %v12300_v47 }
 0x4a1   : > { %v4831_v0 = vmax.f32 %v4830_v17, %v3310_v4  ;;  %v4883_v52 = vmax.f32 %v4882_v54, %v3737_v36  ;;  %v3739_v34 = vpop.f32.mrb[141].mxu0 }
 0x4a2   : > { %v4920_v12 = vmax.f32 %v4919_v1, %v3739_v34  ;;  %v3741_v21 = vpop.f32.mrb[142].mxu0  ;;  %3959 = vmatmul.mubr.bf16.gmra.mrb[216].mxu1 %v10782_v24 }
 0x4a3   : > { %v4884_v26 = vmax.f32 %v4883_v52, %v3741_v21  ;;  %v3743_v5 = vpop.f32.mrb[143].mxu0  ;;  %3968 = vmatprep.mubr.bf16.mxu1 %v12300_v47 }
 0x4a4   : > { %v4921_v15 = vmax.f32 %v4920_v12, %v3743_v5 }
 0x4a5   : > { %v3314_v60 = vpop.f32.mrb[112].mxu1 }
 0x4a6   : > { %v4795_v53 = vmax.f32 %v4794_v39, %v3314_v60  ;;  %v3316_v11 = vpop.f32.mrb[113].mxu1 }
 0x4a7   : > { %v4832_v30 = vmax.f32 %v4831_v0, %v3316_v11  ;;  %v3318_v10 = vpop.f32.mrb[114].mxu1  ;;  %4352 = vmatmul.mubr.bf16.gmra.mrb[232].mxu0 %v10849_v25 }
 0x4a8   : > { %v4796_v50 = vmax.f32 %v4795_v53, %v3318_v10  ;;  %v3320_v63 = vpop.f32.mrb[115].mxu1  ;;  %4361 = vmatprep.mubr.bf16.mxu0 %v12300_v47 }
 0x4a9   : > { %v4833_v16 = vmax.f32 %v4832_v30, %v3320_v63 }
 0x4aa   : > { %3969 = vmatmul.mubr.bf16.gmra.mrb[220].mxu1 %v10779_v23 }
 0x4ab   : > { %3978 = vmatprep.mubr.bf16.mxu1 %v12300_v47 }
 0x4ad   : > { %v3324_v24 = vpop.f32.mrb[116].mxu1 }
 0x4ae   : > { %v4797_v6 = vmax.f32 %v4796_v50, %v3324_v24  ;;  %v3326_v33 = vpop.f32.mrb[117].mxu1 }
 0x4af   : > { %v4834_v58 = vmax.f32 %v4833_v16, %v3326_v33  ;;  %v3328_v48 = vpop.f32.mrb[118].mxu1  ;;  %4362 = vmatmul.mubr.bf16.gmra.mrb[236].mxu0 %v10847_v31 }
 0x4b0   : > { %v4798_v51 = vmax.f32 %v4797_v6, %v3328_v48  ;;  %v3330_v37 = vpop.f32.mrb[119].mxu1  ;;  %4371 = vmatprep.mubr.bf16.mxu0 %v12300_v47 }
 0x4b1   : > { %v4835_v18 = vmax.f32 %v4834_v58, %v3330_v37 }
 0x4b2   : > { %3979 = vmatmul.mubr.bf16.gmra.mrb[224].mxu1 %v10827_v29 }
 0x4b3   : > { %3988 = vmatprep.mubr.bf16.mxu1 %v12300_v47 }
 0x4b5   : > { %v3334_v57 = vpop.f32.mrb[120].mxu1 }
 0x4b6   : > { %v4799_v23 = vmax.f32 %v4798_v51, %v3334_v57  ;;  %v3336_v40 = vpop.f32.mrb[121].mxu1 }
 0x4b7   : > { %v4836_v35 = vmax.f32 %v4835_v18, %v3336_v40  ;;  %v3338_v2 = vpop.f32.mrb[122].mxu1  ;;  %4372 = vmatmul.mubr.bf16.gmra.mrb[240].mxu0 %v10869_v56 }
 0x4b8   : > { %v4800_v19 = vmax.f32 %v4799_v23, %v3338_v2  ;;  %v3340_v62 = vpop.f32.mrb[123].mxu1  ;;  %4381 = vmatprep.mubr.bf16.mxu0 %v12300_v47 }
 0x4b9   : > { %v4837_v46 = vmax.f32 %v4836_v35, %v3340_v62 }
 0x4ba   : > { %3989 = vmatmul.mubr.bf16.gmra.mrb[228].mxu1 %v10825_v7 }
 0x4bb   : > { %v3747_v54 = vpop.f32.mrb[144].mxu0  ;;  %3998 = vmatprep.mubr.bf16.mxu1 %v12300_v47 }
 0x4bc   : > { %v4885_v29 = vmax.f32 %v4884_v26, %v3747_v54  ;;  %v3749_v14 = vpop.f32.mrb[145].mxu0 }
 0x4bd   : > { %v4922_v1 = vmax.f32 %v4921_v15, %v3749_v14  ;;  %v3344_v45 = vpop.f32.mrb[124].mxu1  ;;  %v3751_v59 = vpop.f32.mrb[146].mxu0 }
 0x4be   : > { %v4801_v44 = vmax.f32 %v4800_v19, %v3344_v45  ;;  %v4886_v17 = vmax.f32 %v4885_v29, %v3751_v59  ;;  %v3346_v38 = vpop.f32.mrb[125].mxu1  ;;  %v3753_v39 = vpop.f32.mrb[147].mxu0  ;;  %v4597_v59 = vrot.slane %v10943_v20, 4 }
 0x4bf   : > { %v4838_v4 = vmax.f32 %v4837_v46, %v3346_v38  ;;  %v4923_v36 = vmax.f32 %v4922_v1, %v3753_v39  ;;  %v3348_v0 = vpop.f32.mrb[126].mxu1  ;;  %4382 = vmatmul.mubr.bf16.gmra.mrb[244].mxu0 %v10867_v9  ;;  %v4634_v39 = vrot.slane %v10945_v3, 4 }
 0x4c0   : > { %v4802_v52 = vmax.f32 %v4801_v44, %v3348_v0  ;;  %v3350_v34 = vpop.f32.mrb[127].mxu1  ;;  %4391 = vmatprep.mubr.bf16.mxu0 %v12300_v47 }
 0x4c1   : > { %v4839_v7 = vmax.f32 %v4838_v4, %v3350_v34 }
 0x4c2   : > { %3999 = vmatmul.mubr.bf16.gmra.mrb[232].mxu1 %v10849_v25 }
 0x4c3   : > { %v3757_v12 = vpop.f32.mrb[148].mxu0  ;;  %4008 = vmatprep.mubr.bf16.mxu1 %v12300_v47 }
 0x4c4   : > { %v4887_v21 = vmax.f32 %v4886_v17, %v3757_v12  ;;  %v3759_v26 = vpop.f32.mrb[149].mxu0  ;;  %v4598_v12 = vmax.f32 %v10943_v20, %v4597_v59 }
 0x4c5   : > { %v4924_v5 = vmax.f32 %v4923_v36, %v3759_v26  ;;  %v3354_v15 = vpop.f32.mrb[128].mxu1  ;;  %v3761_v60 = vpop.f32.mrb[150].mxu0  ;;  %v4635_v26 = vmax.f32 %v10945_v3, %v4634_v39 }
 0x4c6   : > { %v4803_v53 = vmax.f32 %v4802_v52, %v3354_v15  ;;  %v4888_v11 = vmax.f32 %v4887_v21, %v3761_v60  ;;  %v3356_v30 = vpop.f32.mrb[129].mxu1  ;;  %v3763_v10 = vpop.f32.mrb[151].mxu0 }
 0x4c7   : > { %v4840_v50 = vmax.f32 %v4839_v7, %v3356_v30  ;;  %v4925_v63 = vmax.f32 %v4924_v5, %v3763_v10  ;;  %v3358_v16 = vpop.f32.mrb[130].mxu1  ;;  %4392 = vmatmul.mubr.bf16.gmra.mrb[248].mxu0 %v10889_v13  ;;  %v4599_v30 = vrot.slane %v4598_v12, 2 }
 0x4c8   : > { %v4804_v24 = vmax.f32 %v4803_v53, %v3358_v16  ;;  %v3360_v6 = vpop.f32.mrb[131].mxu1  ;;  %4401 = vmatprep.mubr.bf16.mxu0 %v12300_v47  ;;  %v4636_v16 = vrot.slane %v4635_v26, 2 }
 0x4c9   : > { %v4841_v25 = vmax.f32 %v4840_v50, %v3360_v6 }
 0x4ca   : > { %4009 = vmatmul.mubr.bf16.gmra.mrb[236].mxu1 %v10847_v31 }
 0x4cb   : > { %4018 = vmatprep.mubr.bf16.mxu1 %v12300_v47 }
 0x4cd   : > { %v3364_v33 = vpop.f32.mrb[132].mxu1 }
 0x4ce   : > { %v4805_v58 = vmax.f32 %v4804_v24, %v3364_v33  ;;  %v3366_v48 = vpop.f32.mrb[133].mxu1 }
 0x4cf   : > { %v4842_v51 = vmax.f32 %v4841_v25, %v3366_v48  ;;  %v3368_v37 = vpop.f32.mrb[134].mxu1  ;;  %4402 = vmatmul.mubr.bf16.gmra.mrb[252].mxu0 %v10887_v55 }
 0x4d0   : > { %v4806_v18 = vmax.f32 %v4805_v58, %v3368_v37  ;;  %v3370_v57 = vpop.f32.mrb[135].mxu1  ;;  %4411 = vmatprep.mubr.bf16.mxu0 %v12300_v47 }
 0x4d1   : > { %v4843_v23 = vmax.f32 %v4842_v51, %v3370_v57  ;;  %v4600_v51 = vmax.f32 %v4598_v12, %v4599_v30  ;;  %v4637_v57 = vmax.f32 %v4635_v26, %v4636_v16 }
 0x4d2   : > { %4019 = vmatmul.mubr.bf16.gmra.mrb[240].mxu1 %v10869_v56 }
 0x4d3   : > { %4028 = vmatprep.mubr.bf16.mxu1 %v12300_v47 }
 0x4d5   : > { %v3374_v40 = vpop.f32.mrb[136].mxu1 }
 0x4d6   : > { %v4807_v31 = vmax.f32 %v4806_v18, %v3374_v40  ;;  %v3376_v35 = vpop.f32.mrb[137].mxu1 }
 0x4d7   : > { %v4844_v2 = vmax.f32 %v4843_v23, %v3376_v35  ;;  %v3378_v19 = vpop.f32.mrb[138].mxu1  ;;  %4412 = vmatmul.mubr.bf16.gmra.mrb[0].mxu0 %v10911_v28 }
 0x4d8   : > { %v4808_v62 = vmax.f32 %v4807_v31, %v3378_v19  ;;  %v3380_v46 = vpop.f32.mrb[139].mxu1  ;;  %4421 = vmatprep.mubr.bf16.mxu0 %v12300_v47 }
 0x4d9   : > { %v4845_v54 = vmax.f32 %v4844_v2, %v3380_v46 }
 0x4da   : > { %v3767_v29 = vpop.f32.mrb[152].mxu0  ;;  %4029 = vmatmul.mubr.bf16.gmra.mrb[244].mxu1 %v10867_v9 }
 0x4db   : > { %v4889_v14 = vmax.f32 %v4888_v11, %v3767_v29  ;;  %v3769_v1 = vpop.f32.mrb[153].mxu0  ;;  %4038 = vmatprep.mubr.bf16.mxu1 %v12300_v47 }
 0x4dc   : > { %v4926_v56 = vmax.f32 %v4925_v63, %v3769_v1  ;;  %v3771_v45 = vpop.f32.mrb[154].mxu0  ;;  %v4638_v1 = vrot.slane %v4637_v57, 1 }
 0x4dd   : > { %v4890_v44 = vmax.f32 %v4889_v14, %v3771_v45  ;;  %v3384_v17 = vpop.f32.mrb[140].mxu1  ;;  %v3773_v38 = vpop.f32.mrb[155].mxu0 }
 0x4de   : > { %v4809_v4 = vmax.f32 %v4808_v62, %v3384_v17  ;;  %v4927_v36 = vmax.f32 %v4926_v56, %v3773_v38  ;;  %v3386_v0 = vpop.f32.mrb[141].mxu1  ;;  %v4601_v62 = vrot.slane %v4600_v51, 1 }
 0x4df   : > { %v4846_v52 = vmax.f32 %v4845_v54, %v3386_v0  ;;  %v3388_v34 = vpop.f32.mrb[142].mxu1  ;;  %4422 = vmatmul.mubr.bf16.gmra.mrb[4].mxu0 %v10908_v41 }
 0x4e0   : > { %v4810_v9 = vmax.f32 %v4809_v4, %v3388_v34  ;;  %v3390_v7 = vpop.f32.mrb[143].mxu1  ;;  %4431 = vmatprep.mubr.bf16.mxu0 %v12300_v47  ;;  %v4602_v0 = vmax.f32 %v4600_v51, %v4601_v62 }
 0x4e1   : > { %v4847_v21 = vmax.f32 %v4846_v52, %v3390_v7 }
 0x4e2   : > { %v3777_v5 = vpop.f32.mrb[156].mxu0  ;;  %4039 = vmatmul.mubr.bf16.gmra.mrb[248].mxu1 %v10889_v13 }
 0x4e3   : > { %v4891_v15 = vmax.f32 %v4890_v44, %v3777_v5  ;;  %v3779_v60 = vpop.f32.mrb[157].mxu0  ;;  %4048 = vmatprep.mubr.bf16.mxu1 %v12300_v47 }
 0x4e4   : > { %v4928_v53 = vmax.f32 %v4927_v36, %v3779_v60  ;;  %v3781_v11 = vpop.f32.mrb[158].mxu0 }
 0x4e5   : > { %v4892_v10 = vmax.f32 %v4891_v15, %v3781_v11  ;;  %v3394_v50 = vpop.f32.mrb[144].mxu1  ;;  %v3783_v63 = vpop.f32.mrb[159].mxu0 }
 0x4e6   : > { %v4811_v24 = vmax.f32 %v4810_v9, %v3394_v50  ;;  %v4929_v6 = vmax.f32 %v4928_v53, %v3783_v63  ;;  %v3396_v20 = vpop.f32.mrb[145].mxu1  ;;  %v4639_v9 = vmax.f32 %v4637_v57, %v4638_v1 }
 0x4e7   : > { %v4893_v25 = vrot.slane %v4892_v10, 4  ;;  %v4848_v33 = vmax.f32 %v4847_v21, %v3396_v20  ;;  %v3398_v3 = vpop.f32.mrb[146].mxu1  ;;  %4432 = vmatmul.mubr.bf16.gmra.mrb[8].mxu0 %v10930_v43 }
 0x4e8   : > { %v4930_v13 = vrot.slane %v4929_v6, 4  ;;  %v4812_v58 = vmax.f32 %v4811_v24, %v3398_v3  ;;  %v3400_v48 = vpop.f32.mrb[147].mxu1  ;;  %4441 = vmatprep.mubr.bf16.mxu0 %v12300_v47 }
 0x4e9   : > { %v4894_v37 = vmax.f32 %v4892_v10, %v4893_v25  ;;  %v4849_v18 = vmax.f32 %v4848_v33, %v3400_v48  ;;  %v4560_v33 = vrot.slane %v11041_v8, 4 }
 0x4ea   : > { %v4931_v23 = vmax.f32 %v4929_v6, %v4930_v13  ;;  %4049 = vmatmul.mubr.bf16.gmra.mrb[252].mxu1 %v10887_v55  ;;  %v4173_v40 = vpop.f32.mrb[160].mxu0  ;;  %v4523_v6 = vrot.slane %v11038_v27, 4 }
 0x4eb   : > { %v4895_v31 = vrot.slane %v4894_v37, 2  ;;  %v4175_v35 = vpop.f32.mrb[161].mxu0  ;;  %4058 = vmatprep.mubr.bf16.mxu1 %v12300_v47  ;;  %v4561_v57 = vmax.f32 %v11041_v8, %v4560_v33 }
 0x4ec   : > { %v4932_v2 = vrot.slane %v4931_v23, 2  ;;  %v4177_v19 = vpop.f32.mrb[162].mxu0  ;;  %v4524_v51 = vmax.f32 %v11038_v27, %v4523_v6 }
 0x4ed   : > { %v4896_v46 = vmax.f32 %v4894_v37, %v4895_v31  ;;  %v4714_v54 = vmax.f32 %v4173_v40, %v4177_v19  ;;  %v3404_v29 = vpop.f32.mrb[148].mxu1  ;;  %v4179_v14 = vpop.f32.mrb[163].mxu0  ;;  %v4562_v27 = vrot.slane %v4561_v57, 2 }
 0x4ee   : > { %v4933_v56 = vmax.f32 %v4931_v23, %v4932_v2  ;;  %v4813_v45 = vmax.f32 %v4812_v58, %v3404_v29  ;;  %v4751_v59 = vmax.f32 %v4175_v35, %v4179_v14  ;;  %v3406_v44 = vpop.f32.mrb[149].mxu1 }
 0x4ef   : > { %v4897_v17 = vrot.slane %v4896_v46, 1  ;;  %v4850_v38 = vmax.f32 %v4849_v18, %v3406_v44  ;;  %v3408_v55 = vpop.f32.mrb[150].mxu1  ;;  %4442 = vmatmul.mubr.bf16.gmra.mrb[12].mxu0 %v10927_v49 }
 0x4f0   : > { %v4934_v39 = vrot.slane %v4933_v56, 1  ;;  %v4814_v4 = vmax.f32 %v4813_v45, %v3408_v55  ;;  %v3410_v36 = vpop.f32.mrb[151].mxu1  ;;  %4451 = vmatprep.mubr.bf16.mxu0 %v12300_v47 }
 0x4f1   : > { %v4898_v52 = vmax.f32 %v4896_v46, %v4897_v17  ;;  %v4851_v34 = vmax.f32 %v4850_v38, %v3410_v36 }
 0x4f2   : > { %v4935_v7 = vmax.f32 %v4933_v56, %v4934_v39  ;;  %4059 = vmatmul.mubr.bf16.gmra.mrb[0].mxu1 %v10911_v28  ;;  %v4183_v12 = vpop.f32.mrb[164].mxu0  ;;  %v4563_v39 = vmax.f32 %v4561_v57, %v4562_v27 }
 0x4f3   : > { %v11105_v21 = vsel %vm5084_vm1, %v4602_v0, %v4898_v52  ;;  %v4715_v26 = vmax.f32 %v4714_v54, %v4183_v12  ;;  %v4185_v5 = vpop.f32.mrb[165].mxu0  ;;  %4068 = vmatprep.mubr.bf16.mxu1 %v12300_v47 }
 0x4f4   : > { %v11109_v15 = vsel %vm5084_vm1, %v4639_v9, %v4935_v7  ;;  %v4752_v60 = vmax.f32 %v4751_v59, %v4185_v5  ;;  %v4187_v53 = vpop.f32.mrb[166].mxu0 }
 0x4f5   : > { %v4716_v11 = vmax.f32 %v4715_v26, %v4187_v53  ;;  %v3414_v30 = vpop.f32.mrb[152].mxu1  ;;  %v4189_v10 = vpop.f32.mrb[167].mxu0 }
 0x4f6   : > { %v4815_v50 = vmax.f32 %v4814_v4, %v3414_v30  ;;  %v4753_v63 = vmax.f32 %v4752_v60, %v4189_v10  ;;  %v3416_v16 = vpop.f32.mrb[153].mxu1 }
 0x4f7   : > { %v4852_v28 = vmax.f32 %v4851_v34, %v3416_v16  ;;  %v3418_v24 = vpop.f32.mrb[154].mxu1  ;;  %4452 = vmatmul.mubr.bf16.gmra.mrb[16].mxu0 %v10955_v42 }
 0x4f8   : > { %v4816_v20 = vmax.f32 %v4815_v50, %v3418_v24  ;;  %v3420_v25 = vpop.f32.mrb[155].mxu1  ;;  %4461 = vmatprep.mubr.bf16.mxu0 %v12300_v47 }
 0x4f9   : > { %v4853_v3 = vmax.f32 %v4852_v28, %v3420_v25 }
 0x4fa   : > { %4069 = vmatmul.mubr.bf16.gmra.mrb[4].mxu1 %v10908_v41  ;;  %v4193_v13 = vpop.f32.mrb[168].mxu0  ;;  %v4525_v41 = vrot.slane %v4524_v51, 2 }
 0x4fb   : > { %v4717_v58 = vmax.f32 %v4716_v11, %v4193_v13  ;;  %v4195_v48 = vpop.f32.mrb[169].mxu0  ;;  %4078 = vmatprep.mubr.bf16.mxu1 %v12300_v47  ;;  %v4564_v11 = vrot.slane %v4563_v39, 1 }
 0x4fc   : > { %v4754_v37 = vmax.f32 %v4753_v63, %v4195_v48  ;;  %v4197_v18 = vpop.f32.mrb[170].mxu0  ;;  %v4526_v44 = vmax.f32 %v4524_v51, %v4525_v41 }
 0x4fd   : > { %v4718_v23 = vmax.f32 %v4717_v58, %v4197_v18  ;;  %v3424_v40 = vpop.f32.mrb[156].mxu1  ;;  %v4199_v31 = vpop.f32.mrb[171].mxu0 }
 0x4fe   : > { %v4817_v35 = vmax.f32 %v4816_v20, %v3424_v40  ;;  %v4755_v2 = vmax.f32 %v4754_v37, %v4199_v31  ;;  %v3426_v19 = vpop.f32.mrb[157].mxu1  ;;  %v4527_v26 = vrot.slane %v4526_v44, 1 }
 0x4ff   : > { %v4854_v62 = vmax.f32 %v4853_v3, %v3426_v19  ;;  %v3428_v46 = vpop.f32.mrb[158].mxu1  ;;  %4462 = vmatmul.mubr.bf16.gmra.mrb[20].mxu0 %v10953_v32  ;;  %v4565_v3 = vmax.f32 %v4563_v39, %v4564_v11 }
 0x500   : > { %v4818_v54 = vmax.f32 %v4817_v35, %v3428_v46  ;;  %v3430_v29 = vpop.f32.mrb[159].mxu1  ;;  %4471 = vmatprep.mubr.bf16.mxu0 %v12300_v47  ;;  %v4528_v6 = vmax.f32 %v4526_v44, %v4527_v26 }
 0x501   : > { %v4855_v14 = vmax.f32 %v4854_v62, %v3430_v29 }
 0x502   : > { %v4819_v1 = vrot.slane %v4818_v54, 4  ;;  %4079 = vmatmul.mubr.bf16.gmra.mrb[8].mxu1 %v10930_v43  ;;  %v4203_v8 = vpop.f32.mrb[172].mxu0 }
 0x503   : > { %v4856_v56 = vrot.slane %v4855_v14, 4  ;;  %v4719_v45 = vmax.f32 %v4718_v23, %v4203_v8  ;;  %v4205_v59 = vpop.f32.mrb[173].mxu0  ;;  %4088 = vmatprep.mubr.bf16.mxu1 %v12300_v47 }
 0x504   : > { %v4820_v17 = vmax.f32 %v4818_v54, %v4819_v1  ;;  %v4756_v38 = vmax.f32 %v4755_v2, %v4205_v59  ;;  %v4207_v55 = vpop.f32.mrb[174].mxu0 }
 0x505   : > { %v4857_v4 = vmax.f32 %v4855_v14, %v4856_v56  ;;  %v4720_v36 = vmax.f32 %v4719_v45, %v4207_v55  ;;  %v3820_v0 = vpop.f32.mrb[160].mxu1  ;;  %v4209_v52 = vpop.f32.mrb[175].mxu0 }
 0x506   : > { %v4821_v34 = vrot.slane %v4820_v17, 2  ;;  %v4757_v9 = vmax.f32 %v4756_v38, %v4209_v52  ;;  %v3822_v7 = vpop.f32.mrb[161].mxu1 }
 0x507   : > { %v4858_v12 = vrot.slane %v4857_v4, 2  ;;  %v3824_v43 = vpop.f32.mrb[162].mxu1  ;;  %4472 = vmatmul.mubr.bf16.gmra.mrb[24].mxu0 %v10975_v61 }
 0x508   : > { %v4822_v5 = vmax.f32 %v4820_v17, %v4821_v34  ;;  %v4640_v60 = vmax.f32 %v3820_v0, %v3824_v43  ;;  %v3826_v53 = vpop.f32.mrb[163].mxu1  ;;  %4481 = vmatprep.mubr.bf16.mxu0 %v12300_v47 }
 0x509   : > { %v4859_v30 = vmax.f32 %v4857_v4, %v4858_v12  ;;  %v4677_v10 = vmax.f32 %v3822_v7, %v3826_v53 }
 0x50a   : > { %v4823_v50 = vrot.slane %v4822_v5, 1  ;;  %4089 = vmatmul.mubr.bf16.gmra.mrb[12].mxu1 %v10927_v49  ;;  %v4213_v63 = vpop.f32.mrb[176].mxu0 }
 0x50b   : > { %v4860_v16 = vrot.slane %v4859_v30, 1  ;;  %v4721_v28 = vmax.f32 %v4720_v36, %v4213_v63  ;;  %v4215_v24 = vpop.f32.mrb[177].mxu0  ;;  %4098 = vmatprep.mubr.bf16.mxu1 %v12300_v47 }
 0x50c   : > { %v4824_v20 = vmax.f32 %v4822_v5, %v4823_v50  ;;  %v4758_v25 = vmax.f32 %v4757_v9, %v4215_v24  ;;  %v4217_v33 = vpop.f32.mrb[178].mxu0 }
 0x50d   : > { %v4861_v13 = vmax.f32 %v4859_v30, %v4860_v16  ;;  %v4722_v58 = vmax.f32 %v4721_v28, %v4217_v33  ;;  %v3830_v48 = vpop.f32.mrb[164].mxu1  ;;  %v4219_v51 = vpop.f32.mrb[179].mxu0 }
 0x50e   : > { %v11128_v37 = vsel %vm5084_vm1, %v4528_v6, %v4824_v20  ;;  %v4641_v18 = vmax.f32 %v4640_v60, %v3830_v48  ;;  %v4759_v49 = vmax.f32 %v4758_v25, %v4219_v51  ;;  %v3832_v57 = vpop.f32.mrb[165].mxu1 }
 0x50f   : > { %v11131_v23 = vsel %vm5084_vm1, %v4565_v3, %v4861_v13  ;;  %v4678_v40 = vmax.f32 %v4677_v10, %v3832_v57  ;;  %v3834_v31 = vpop.f32.mrb[166].mxu1  ;;  %4482 = vmatmul.mubr.bf16.gmra.mrb[28].mxu0 %v10973_v22 }
 0x510   : > { %v4642_v35 = vmax.f32 %v4641_v18, %v3834_v31  ;;  %v3836_v2 = vpop.f32.mrb[167].mxu1 }
 0x511   : > { %v4679_v19 = vmax.f32 %v4678_v40, %v3836_v2 }
 0x512   : > { %4099 = vmatmul.mubr.bf16.gmra.mrb[16].mxu1 %v10955_v42  ;;  %v4223_v62 = vpop.f32.mrb[180].mxu0 }
 0x513   : > { %v4723_v46 = vmax.f32 %v4722_v58, %v4223_v62  ;;  %v4225_v41 = vpop.f32.mrb[181].mxu0  ;;  %4108 = vmatprep.mubr.bf16.mxu1 %v12300_v47 }
 0x514   : > { %v4760_v54 = vmax.f32 %v4759_v49, %v4225_v41  ;;  %v4227_v29 = vpop.f32.mrb[182].mxu0 }
 0x515   : > { %v4724_v27 = vmax.f32 %v4723_v46, %v4227_v29  ;;  %v3840_v14 = vpop.f32.mrb[168].mxu1  ;;  %v4229_v1 = vpop.f32.mrb[183].mxu0 }
 0x516   : > { %v4643_v8 = vmax.f32 %v4642_v35, %v3840_v14  ;;  %v4761_v56 = vmax.f32 %v4760_v54, %v4229_v1  ;;  %v3842_v45 = vpop.f32.mrb[169].mxu1 }
 0x517   : > { %v4680_v59 = vmax.f32 %v4679_v19, %v3842_v45  ;;  %v3844_v44 = vpop.f32.mrb[170].mxu1 }
 0x518   : > { %v4644_v17 = vmax.f32 %v4643_v8, %v3844_v44  ;;  %v3846_v38 = vpop.f32.mrb[171].mxu1 }
 0x519   : > { %v4681_v55 = vmax.f32 %v4680_v59, %v3846_v38 }
 0x51a   : > { %4109 = vmatmul.mubr.bf16.gmra.mrb[20].mxu1 %v10953_v32  ;;  %v4233_v42 = vpop.f32.mrb[184].mxu0 }
 0x51b   : > { %v4725_v39 = vmax.f32 %v4724_v27, %v4233_v42  ;;  %v4235_v4 = vpop.f32.mrb[185].mxu0  ;;  %4118 = vmatprep.mubr.bf16.mxu1 %v12300_v47 }
 0x51c   : > { %v4762_v36 = vmax.f32 %v4761_v56, %v4235_v4  ;;  %v4237_v0 = vpop.f32.mrb[186].mxu0 }
 0x51d   : > { %v4726_v52 = vmax.f32 %v4725_v39, %v4237_v0  ;;  %v3850_v34 = vpop.f32.mrb[172].mxu1  ;;  %v4239_v9 = vpop.f32.mrb[187].mxu0 }
 0x51e   : > { %v4645_v7 = vmax.f32 %v4644_v17, %v3850_v34  ;;  %v4763_v12 = vmax.f32 %v4762_v36, %v4239_v9  ;;  %v3852_v43 = vpop.f32.mrb[173].mxu1 }
 0x51f   : > { %v4682_v26 = vmax.f32 %v4681_v55, %v3852_v43  ;;  %v3854_v5 = vpop.f32.mrb[174].mxu1 }
 0x520   : > { %v4646_v60 = vmax.f32 %v4645_v7, %v3854_v5  ;;  %v3856_v53 = vpop.f32.mrb[175].mxu1 }
 0x521   : > { %v4683_v11 = vmax.f32 %v4682_v26, %v3856_v53 }
 0x522   : > { %4119 = vmatmul.mubr.bf16.gmra.mrb[24].mxu1 %v10975_v61  ;;  %v4243_v32 = vpop.f32.mrb[188].mxu0 }
 0x523   : > { %v4727_v30 = vmax.f32 %v4726_v52, %v4243_v32  ;;  %v4245_v10 = vpop.f32.mrb[189].mxu0  ;;  %4128 = vmatprep.mubr.bf16.mxu1 %v12300_v47 }
 0x524   : > { %v4764_v50 = vmax.f32 %v4763_v12, %v4245_v10  ;;  %v4247_v63 = vpop.f32.mrb[190].mxu0 }
 0x525   : > { %v4728_v16 = vmax.f32 %v4727_v30, %v4247_v63  ;;  %v3860_v28 = vpop.f32.mrb[176].mxu1  ;;  %v4249_v24 = vpop.f32.mrb[191].mxu0 }
 0x526   : > { %v4647_v6 = vmax.f32 %v4646_v60, %v3860_v28  ;;  %v4765_v20 = vmax.f32 %v4764_v50, %v4249_v24  ;;  %v3862_v25 = vpop.f32.mrb[177].mxu1 }
 0x527   : > { %v4684_v33 = vmax.f32 %v4683_v11, %v3862_v25  ;;  %v3864_v3 = vpop.f32.mrb[178].mxu1 }
 0x528   : > { %v4648_v13 = vmax.f32 %v4647_v6, %v3864_v3  ;;  %v3866_v58 = vpop.f32.mrb[179].mxu1 }
 0x529   : > { %v4685_v48 = vmax.f32 %v4684_v33, %v3866_v58 }
 0x52a   : > { %4129 = vmatmul.mubr.bf16.gmra.mrb[28].mxu1 %v10973_v22  ;;  %v4253_v61 = vpop.f32.mrb[192].mxu0 }
 0x52b   : > { %v4729_v51 = vmax.f32 %v4728_v16, %v4253_v61  ;;  %v4255_v18 = vpop.f32.mrb[193].mxu0 }
 0x52c   : > { %v4766_v49 = vmax.f32 %v4765_v20, %v4255_v18  ;;  %v4257_v47 = vpop.f32.mrb[194].mxu0 }
 0x52d   : > { %v4730_v57 = vmax.f32 %v4729_v51, %v4257_v47  ;;  %v3870_v40 = vpop.f32.mrb[180].mxu1  ;;  %v4259_v31 = vpop.f32.mrb[195].mxu0 }
 0x52e   : > { %v4649_v35 = vmax.f32 %v4648_v13, %v3870_v40  ;;  %v4767_v2 = vmax.f32 %v4766_v49, %v4259_v31  ;;  %v3872_v19 = vpop.f32.mrb[181].mxu1 }
 0x52f   : > { %v4686_v62 = vmax.f32 %v4685_v48, %v3872_v19  ;;  %v3874_v46 = vpop.f32.mrb[182].mxu1 }
 0x530   : > { %v4650_v41 = vmax.f32 %v4649_v35, %v3874_v46  ;;  %v3876_v54 = vpop.f32.mrb[183].mxu1 }
 0x531   : > { %v4687_v29 = vmax.f32 %v4686_v62, %v3876_v54 }
 0x532   : > { %v4263_v27 = vpop.f32.mrb[196].mxu0 }
 0x533   : > { %v4731_v14 = vmax.f32 %v4730_v57, %v4263_v27  ;;  %v4265_v1 = vpop.f32.mrb[197].mxu0 }
 0x534   : > { %v4768_v22 = vmax.f32 %v4767_v2, %v4265_v1  ;;  %v4267_v8 = vpop.f32.mrb[198].mxu0 }
 0x535   : > { %v4732_v56 = vmax.f32 %v4731_v14, %v4267_v8  ;;  %v3880_v45 = vpop.f32.mrb[184].mxu1  ;;  %v4269_v59 = vpop.f32.mrb[199].mxu0 }
 0x536   : > { %v4651_v44 = vmax.f32 %v4650_v41, %v3880_v45  ;;  %v4769_v17 = vmax.f32 %v4768_v22, %v4269_v59  ;;  %v3882_v38 = vpop.f32.mrb[185].mxu1 }
 0x537   : > { %v4688_v55 = vmax.f32 %v4687_v29, %v3882_v38  ;;  %v3884_v42 = vpop.f32.mrb[186].mxu1 }
 0x538   : > { %v4652_v39 = vmax.f32 %v4651_v44, %v3884_v42  ;;  %v3886_v4 = vpop.f32.mrb[187].mxu1 }
 0x539   : > { %v4689_v36 = vmax.f32 %v4688_v55, %v3886_v4 }
 0x53a   : > { %v4273_v0 = vpop.f32.mrb[200].mxu0 }
 0x53b   : > { %v4733_v52 = vmax.f32 %v4732_v56, %v4273_v0  ;;  %v4275_v34 = vpop.f32.mrb[201].mxu0 }
 0x53c   : > { %v4770_v9 = vmax.f32 %v4769_v17, %v4275_v34  ;;  %v4277_v7 = vpop.f32.mrb[202].mxu0 }
 0x53d   : > { %v4734_v12 = vmax.f32 %v4733_v52, %v4277_v7  ;;  %v3890_v43 = vpop.f32.mrb[188].mxu1  ;;  %v4279_v26 = vpop.f32.mrb[203].mxu0 }
 0x53e   : > { %v4653_v5 = vmax.f32 %v4652_v39, %v3890_v43  ;;  %v4771_v60 = vmax.f32 %v4770_v9, %v4279_v26  ;;  %v3892_v53 = vpop.f32.mrb[189].mxu1 }
 0x53f   : > { %v4690_v11 = vmax.f32 %v4689_v36, %v3892_v53  ;;  %v3894_v32 = vpop.f32.mrb[190].mxu1 }
 0x540   : > { %v4654_v30 = vmax.f32 %v4653_v5, %v3894_v32  ;;  %v3896_v10 = vpop.f32.mrb[191].mxu1 }
 0x541   : > { %v4691_v50 = vmax.f32 %v4690_v11, %v3896_v10 }
 0x542   : > { %v4283_v63 = vpop.f32.mrb[204].mxu0 }
 0x543   : > { %v4735_v16 = vmax.f32 %v4734_v12, %v4283_v63  ;;  %v4285_v28 = vpop.f32.mrb[205].mxu0 }
 0x544   : > { %v4772_v24 = vmax.f32 %v4771_v60, %v4285_v28  ;;  %v4287_v6 = vpop.f32.mrb[206].mxu0 }
 0x545   : > { %v4736_v20 = vmax.f32 %v4735_v16, %v4287_v6  ;;  %v3900_v25 = vpop.f32.mrb[192].mxu1  ;;  %v4289_v33 = vpop.f32.mrb[207].mxu0 }
 0x546   : > { %v4655_v3 = vmax.f32 %v4654_v30, %v3900_v25  ;;  %v4773_v13 = vmax.f32 %v4772_v24, %v4289_v33  ;;  %v3902_v58 = vpop.f32.mrb[193].mxu1 }
 0x547   : > { %v4692_v48 = vmax.f32 %v4691_v50, %v3902_v58  ;;  %v3904_v61 = vpop.f32.mrb[194].mxu1 }
 0x548   : > { %v4656_v51 = vmax.f32 %v4655_v3, %v3904_v61  ;;  %v3906_v18 = vpop.f32.mrb[195].mxu1 }
 0x549   : > { %v4693_v49 = vmax.f32 %v4692_v48, %v3906_v18 }
 0x54a   : > { %v4293_v47 = vpop.f32.mrb[208].mxu0 }
 0x54b   : > { %v4737_v57 = vmax.f32 %v4736_v20, %v4293_v47  ;;  %v4295_v40 = vpop.f32.mrb[209].mxu0 }
 0x54c   : > { %v4774_v31 = vmax.f32 %v4773_v13, %v4295_v40  ;;  %v4297_v35 = vpop.f32.mrb[210].mxu0 }
 0x54d   : > { %v4738_v2 = vmax.f32 %v4737_v57, %v4297_v35  ;;  %v3910_v19 = vpop.f32.mrb[196].mxu1  ;;  %v4299_v62 = vpop.f32.mrb[211].mxu0 }
 0x54e   : > { %v4657_v46 = vmax.f32 %v4656_v51, %v3910_v19  ;;  %v4775_v41 = vmax.f32 %v4774_v31, %v4299_v62  ;;  %v3912_v54 = vpop.f32.mrb[197].mxu1 }
 0x54f   : > { %v4694_v29 = vmax.f32 %v4693_v49, %v3912_v54  ;;  %v3914_v27 = vpop.f32.mrb[198].mxu1 }
 0x550   : > { %v4658_v14 = vmax.f32 %v4657_v46, %v3914_v27  ;;  %v3916_v1 = vpop.f32.mrb[199].mxu1 }
 0x551   : > { %v4695_v22 = vmax.f32 %v4694_v29, %v3916_v1 }
 0x552   : > { %v4303_v8 = vpop.f32.mrb[212].mxu0 }
 0x553   : > { %v4739_v56 = vmax.f32 %v4738_v2, %v4303_v8  ;;  %v4305_v45 = vpop.f32.mrb[213].mxu0 }
 0x554   : > { %v4776_v59 = vmax.f32 %v4775_v41, %v4305_v45  ;;  %v4307_v44 = vpop.f32.mrb[214].mxu0 }
 0x555   : > { %v4740_v17 = vmax.f32 %v4739_v56, %v4307_v44  ;;  %v3920_v38 = vpop.f32.mrb[200].mxu1  ;;  %v4309_v55 = vpop.f32.mrb[215].mxu0 }
 0x556   : > { %v4659_v42 = vmax.f32 %v4658_v14, %v3920_v38  ;;  %v4777_v39 = vmax.f32 %v4776_v59, %v4309_v55  ;;  %v3922_v4 = vpop.f32.mrb[201].mxu1 }
 0x557   : > { %v4696_v36 = vmax.f32 %v4695_v22, %v3922_v4  ;;  %v3924_v0 = vpop.f32.mrb[202].mxu1 }
 0x558   : > { %v4660_v52 = vmax.f32 %v4659_v42, %v3924_v0  ;;  %v3926_v34 = vpop.f32.mrb[203].mxu1 }
 0x559   : > { %v4697_v9 = vmax.f32 %v4696_v36, %v3926_v34 }
 0x55a   : > { %v4313_v7 = vpop.f32.mrb[216].mxu0 }
 0x55b   : > { %v4741_v12 = vmax.f32 %v4740_v17, %v4313_v7  ;;  %v4315_v43 = vpop.f32.mrb[217].mxu0 }
 0x55c   : > { %v4778_v26 = vmax.f32 %v4777_v39, %v4315_v43  ;;  %v4317_v5 = vpop.f32.mrb[218].mxu0 }
 0x55d   : > { %v4742_v60 = vmax.f32 %v4741_v12, %v4317_v5  ;;  %v3930_v53 = vpop.f32.mrb[204].mxu1  ;;  %v4319_v11 = vpop.f32.mrb[219].mxu0 }
 0x55e   : > { %v4661_v32 = vmax.f32 %v4660_v52, %v3930_v53  ;;  %v4779_v30 = vmax.f32 %v4778_v26, %v4319_v11  ;;  %v3932_v10 = vpop.f32.mrb[205].mxu1 }
 0x55f   : > { %v4698_v50 = vmax.f32 %v4697_v9, %v3932_v10  ;;  %v3934_v63 = vpop.f32.mrb[206].mxu1 }
 0x560   : > { %v4662_v16 = vmax.f32 %v4661_v32, %v3934_v63  ;;  %v3936_v28 = vpop.f32.mrb[207].mxu1 }
 0x561   : > { %v4699_v24 = vmax.f32 %v4698_v50, %v3936_v28 }
 0x562   : > { %v4323_v6 = vpop.f32.mrb[220].mxu0 }
 0x563   : > { %v4743_v20 = vmax.f32 %v4742_v60, %v4323_v6  ;;  %v4325_v25 = vpop.f32.mrb[221].mxu0 }
 0x564   : > { %v4780_v33 = vmax.f32 %v4779_v30, %v4325_v25  ;;  %v4327_v3 = vpop.f32.mrb[222].mxu0 }
 0x565   : > { %v11141_v13 = vmax.f32 %v4743_v20, %v4327_v3  ;;  %v3940_v58 = vpop.f32.mrb[208].mxu1  ;;  %v4329_v48 = vpop.f32.mrb[223].mxu0 }
 0x566   : > { %v4663_v61 = vmax.f32 %v4662_v16, %v3940_v58  ;;  %v11143_v51 = vmax.f32 %v4780_v33, %v4329_v48  ;;  %v3942_v18 = vpop.f32.mrb[209].mxu1 }
 0x567   : > { %v4700_v49 = vmax.f32 %v4699_v24, %v3942_v18  ;;  %v3944_v47 = vpop.f32.mrb[210].mxu1 }
 0x568   : > { %v4664_v57 = vmax.f32 %v4663_v61, %v3944_v47  ;;  %v3946_v40 = vpop.f32.mrb[211].mxu1 }
 0x569   : > { %v4701_v31 = vmax.f32 %v4700_v49, %v3946_v40 }
 0x56a   : > { %v4333_v35 = vpop.f32.mrb[224].mxu0 }
 0x56b   : > { %v4335_v2 = vpop.f32.mrb[225].mxu0 }
 0x56c   : > { %v4337_v19 = vpop.f32.mrb[226].mxu0 }
 0x56d   : > { %v5010_v62 = vmax.f32 %v4333_v35, %v4337_v19  ;;  %v3950_v46 = vpop.f32.mrb[212].mxu1  ;;  %v4339_v41 = vpop.f32.mrb[227].mxu0 }
 0x56e   : > { %v4665_v54 = vmax.f32 %v4664_v57, %v3950_v46  ;;  %v5047_v29 = vmax.f32 %v4335_v2, %v4339_v41  ;;  %v3952_v27 = vpop.f32.mrb[213].mxu1 }
 0x56f   : > { %v4702_v14 = vmax.f32 %v4701_v31, %v3952_v27  ;;  %v3954_v1 = vpop.f32.mrb[214].mxu1 }
 0x570   : > { %v4666_v22 = vmax.f32 %v4665_v54, %v3954_v1  ;;  %v3956_v8 = vpop.f32.mrb[215].mxu1 }
 0x571   : > { %v4703_v56 = vmax.f32 %v4702_v14, %v3956_v8 }
 0x572   : > { %v4343_v45 = vpop.f32.mrb[228].mxu0 }
 0x573   : > { %v5011_v59 = vmax.f32 %v5010_v62, %v4343_v45  ;;  %v4345_v44 = vpop.f32.mrb[229].mxu0 }
 0x574   : > { %v5048_v17 = vmax.f32 %v5047_v29, %v4345_v44  ;;  %v4347_v38 = vpop.f32.mrb[230].mxu0 }
 0x575   : > { %v5012_v55 = vmax.f32 %v5011_v59, %v4347_v38  ;;  %v3960_v42 = vpop.f32.mrb[216].mxu1  ;;  %v4349_v39 = vpop.f32.mrb[231].mxu0 }
 0x576   : > { %v4667_v4 = vmax.f32 %v4666_v22, %v3960_v42  ;;  %v5049_v36 = vmax.f32 %v5048_v17, %v4349_v39  ;;  %v3962_v0 = vpop.f32.mrb[217].mxu1 }
 0x577   : > { %v4704_v52 = vmax.f32 %v4703_v56, %v3962_v0  ;;  %v3964_v34 = vpop.f32.mrb[218].mxu1 }
 0x578   : > { %v4668_v9 = vmax.f32 %v4667_v4, %v3964_v34  ;;  %v3966_v7 = vpop.f32.mrb[219].mxu1 }
 0x579   : > { %v4705_v12 = vmax.f32 %v4704_v52, %v3966_v7 }
 0x57a   : > { %v4353_v43 = vpop.f32.mrb[232].mxu0 }
 0x57b   : > { %v5013_v26 = vmax.f32 %v5012_v55, %v4353_v43  ;;  %v4355_v5 = vpop.f32.mrb[233].mxu0 }
 0x57c   : > { %v5050_v60 = vmax.f32 %v5049_v36, %v4355_v5  ;;  %v4357_v53 = vpop.f32.mrb[234].mxu0 }
 0x57d   : > { %v5014_v11 = vmax.f32 %v5013_v26, %v4357_v53  ;;  %v3970_v32 = vpop.f32.mrb[220].mxu1  ;;  %v4359_v30 = vpop.f32.mrb[235].mxu0 }
 0x57e   : > { %v4669_v10 = vmax.f32 %v4668_v9, %v3970_v32  ;;  %v5051_v50 = vmax.f32 %v5050_v60, %v4359_v30  ;;  %v3972_v63 = vpop.f32.mrb[221].mxu1 }
 0x57f   : > { %v4706_v16 = vmax.f32 %v4705_v12, %v3972_v63  ;;  %v3974_v28 = vpop.f32.mrb[222].mxu1 }
 0x580   : > { %v11145_v24 = vmax.f32 %v4669_v10, %v3974_v28  ;;  %v3976_v6 = vpop.f32.mrb[223].mxu1 }
 0x581   : > { %v11147_v20 = vmax.f32 %v4706_v16, %v3976_v6 }
 0x582   : > { %v4363_v25 = vpop.f32.mrb[236].mxu0 }
 0x583   : > { %v5015_v33 = vmax.f32 %v5014_v11, %v4363_v25  ;;  %v4365_v3 = vpop.f32.mrb[237].mxu0 }
 0x584   : > { %v5052_v58 = vmax.f32 %v5051_v50, %v4365_v3  ;;  %v4367_v48 = vpop.f32.mrb[238].mxu0 }
 0x585   : > { %v5016_v61 = vmax.f32 %v5015_v33, %v4367_v48  ;;  %v3980_v18 = vpop.f32.mrb[224].mxu1  ;;  %v4369_v49 = vpop.f32.mrb[239].mxu0 }
 0x586   : > { %v5053_v47 = vmax.f32 %v5052_v58, %v4369_v49  ;;  %v3982_v57 = vpop.f32.mrb[225].mxu1 }
 0x587   : > { %v3984_v40 = vpop.f32.mrb[226].mxu1 }
 0x588   : > { %v4936_v31 = vmax.f32 %v3980_v18, %v3984_v40  ;;  %v3986_v35 = vpop.f32.mrb[227].mxu1 }
 0x589   : > { %v4973_v2 = vmax.f32 %v3982_v57, %v3986_v35 }
 0x58a   : > { %v4373_v19 = vpop.f32.mrb[240].mxu0 }
 0x58b   : > { %v5017_v62 = vmax.f32 %v5016_v61, %v4373_v19  ;;  %v4375_v46 = vpop.f32.mrb[241].mxu0 }
 0x58c   : > { %v5054_v41 = vmax.f32 %v5053_v47, %v4375_v46  ;;  %v4377_v54 = vpop.f32.mrb[242].mxu0 }
 0x58d   : > { %v5018_v29 = vmax.f32 %v5017_v62, %v4377_v54  ;;  %v3990_v27 = vpop.f32.mrb[228].mxu1  ;;  %v4379_v14 = vpop.f32.mrb[243].mxu0 }
 0x58e   : > { %v4937_v1 = vmax.f32 %v4936_v31, %v3990_v27  ;;  %v5055_v22 = vmax.f32 %v5054_v41, %v4379_v14  ;;  %v3992_v8 = vpop.f32.mrb[229].mxu1 }
 0x58f   : > { %v4974_v56 = vmax.f32 %v4973_v2, %v3992_v8  ;;  %v3994_v45 = vpop.f32.mrb[230].mxu1 }
 0x590   : > { %v4938_v59 = vmax.f32 %v4937_v1, %v3994_v45  ;;  %v3996_v44 = vpop.f32.mrb[231].mxu1 }
 0x591   : > { %v4975_v17 = vmax.f32 %v4974_v56, %v3996_v44 }
 0x592   : > { %v4383_v38 = vpop.f32.mrb[244].mxu0 }
 0x593   : > { %v5019_v55 = vmax.f32 %v5018_v29, %v4383_v38  ;;  %v4385_v42 = vpop.f32.mrb[245].mxu0 }
 0x594   : > { %v5056_v39 = vmax.f32 %v5055_v22, %v4385_v42  ;;  %v4387_v4 = vpop.f32.mrb[246].mxu0 }
 0x595   : > { %v5020_v36 = vmax.f32 %v5019_v55, %v4387_v4  ;;  %v4000_v0 = vpop.f32.mrb[232].mxu1  ;;  %v4389_v52 = vpop.f32.mrb[247].mxu0 }
 0x596   : > { %v4939_v34 = vmax.f32 %v4938_v59, %v4000_v0  ;;  %v5057_v9 = vmax.f32 %v5056_v39, %v4389_v52  ;;  %v4002_v7 = vpop.f32.mrb[233].mxu1 }
 0x597   : > { %v4976_v12 = vmax.f32 %v4975_v17, %v4002_v7  ;;  %v4004_v43 = vpop.f32.mrb[234].mxu1 }
 0x598   : > { %v4940_v26 = vmax.f32 %v4939_v34, %v4004_v43  ;;  %v4006_v5 = vpop.f32.mrb[235].mxu1 }
 0x599   : > { %v4977_v60 = vmax.f32 %v4976_v12, %v4006_v5 }
 0x59a   : > { %v4393_v53 = vpop.f32.mrb[248].mxu0 }
 0x59b   : > { %v5021_v11 = vmax.f32 %v5020_v36, %v4393_v53  ;;  %v4395_v32 = vpop.f32.mrb[249].mxu0 }
 0x59c   : > { %v5058_v30 = vmax.f32 %v5057_v9, %v4395_v32  ;;  %v4397_v10 = vpop.f32.mrb[250].mxu0 }
 0x59d   : > { %v5022_v50 = vmax.f32 %v5021_v11, %v4397_v10  ;;  %v4010_v63 = vpop.f32.mrb[236].mxu1  ;;  %v4399_v16 = vpop.f32.mrb[251].mxu0 }
 0x59e   : > { %v4941_v28 = vmax.f32 %v4940_v26, %v4010_v63  ;;  %v5059_v6 = vmax.f32 %v5058_v30, %v4399_v16  ;;  %v4012_v25 = vpop.f32.mrb[237].mxu1 }
 0x59f   : > { %v4978_v33 = vmax.f32 %v4977_v60, %v4012_v25  ;;  %v4014_v3 = vpop.f32.mrb[238].mxu1 }
 0x5a0   : > { %v4942_v58 = vmax.f32 %v4941_v28, %v4014_v3  ;;  %v4016_v48 = vpop.f32.mrb[239].mxu1 }
 0x5a1   : > { %v4979_v61 = vmax.f32 %v4978_v33, %v4016_v48 }
 0x5a2   : > { %v4403_v18 = vpop.f32.mrb[252].mxu0 }
 0x5a3   : > { %v5023_v49 = vmax.f32 %v5022_v50, %v4403_v18  ;;  %v4405_v47 = vpop.f32.mrb[253].mxu0 }
 0x5a4   : > { %v5060_v57 = vmax.f32 %v5059_v6, %v4405_v47  ;;  %v4407_v40 = vpop.f32.mrb[254].mxu0 }
 0x5a5   : > { %v5024_v31 = vmax.f32 %v5023_v49, %v4407_v40  ;;  %v4020_v35 = vpop.f32.mrb[240].mxu1  ;;  %v4409_v2 = vpop.f32.mrb[255].mxu0 }
 0x5a6   : > { %v4943_v19 = vmax.f32 %v4942_v58, %v4020_v35  ;;  %v5061_v62 = vmax.f32 %v5060_v57, %v4409_v2  ;;  %v4022_v46 = vpop.f32.mrb[241].mxu1 }
 0x5a7   : > { %v4980_v41 = vmax.f32 %v4979_v61, %v4022_v46  ;;  %v4024_v54 = vpop.f32.mrb[242].mxu1 }
 0x5a8   : > { %v4944_v29 = vmax.f32 %v4943_v19, %v4024_v54  ;;  %v4026_v27 = vpop.f32.mrb[243].mxu1 }
 0x5a9   : > { %v4981_v14 = vmax.f32 %v4980_v41, %v4026_v27 }
 0x5aa   : > { %v4413_v1 = vpop.f32.mrb[0].mxu0 }
 0x5ab   : > { %v5025_v22 = vmax.f32 %v5024_v31, %v4413_v1  ;;  %v4415_v8 = vpop.f32.mrb[1].mxu0 }
 0x5ac   : > { %v5062_v56 = vmax.f32 %v5061_v62, %v4415_v8  ;;  %v4417_v45 = vpop.f32.mrb[2].mxu0 }
 0x5ad   : > { %v5026_v59 = vmax.f32 %v5025_v22, %v4417_v45  ;;  %v4030_v44 = vpop.f32.mrb[244].mxu1  ;;  %v4419_v17 = vpop.f32.mrb[3].mxu0 }
 0x5ae   : > { %v4945_v38 = vmax.f32 %v4944_v29, %v4030_v44  ;;  %v5063_v55 = vmax.f32 %v5062_v56, %v4419_v17  ;;  %v4032_v42 = vpop.f32.mrb[245].mxu1 }
 0x5af   : > { %v4982_v39 = vmax.f32 %v4981_v14, %v4032_v42  ;;  %v4034_v4 = vpop.f32.mrb[246].mxu1 }
 0x5b0   : > { %v4946_v36 = vmax.f32 %v4945_v38, %v4034_v4  ;;  %v4036_v0 = vpop.f32.mrb[247].mxu1 }
 0x5b1   : > { %v4983_v52 = vmax.f32 %v4982_v39, %v4036_v0 }
 0x5b2   : > { %v4423_v34 = vpop.f32.mrb[4].mxu0 }
 0x5b3   : > { %v5027_v9 = vmax.f32 %v5026_v59, %v4423_v34  ;;  %v4425_v7 = vpop.f32.mrb[5].mxu0 }
 0x5b4   : > { %v5064_v12 = vmax.f32 %v5063_v55, %v4425_v7  ;;  %v4427_v43 = vpop.f32.mrb[6].mxu0 }
 0x5b5   : > { %v5028_v26 = vmax.f32 %v5027_v9, %v4427_v43  ;;  %v4040_v5 = vpop.f32.mrb[248].mxu1  ;;  %v4429_v60 = vpop.f32.mrb[7].mxu0 }
 0x5b6   : > { %v4947_v53 = vmax.f32 %v4946_v36, %v4040_v5  ;;  %v5065_v11 = vmax.f32 %v5064_v12, %v4429_v60  ;;  %v4042_v32 = vpop.f32.mrb[249].mxu1 }
 0x5b7   : > { %v4984_v30 = vmax.f32 %v4983_v52, %v4042_v32  ;;  %v4044_v10 = vpop.f32.mrb[250].mxu1 }
 0x5b8   : > { %v4948_v50 = vmax.f32 %v4947_v53, %v4044_v10  ;;  %v4046_v63 = vpop.f32.mrb[251].mxu1 }
 0x5b9   : > { %v4985_v16 = vmax.f32 %v4984_v30, %v4046_v63 }
 0x5ba   : > { %v4433_v28 = vpop.f32.mrb[8].mxu0 }
 0x5bb   : > { %v5029_v6 = vmax.f32 %v5028_v26, %v4433_v28  ;;  %v4435_v25 = vpop.f32.mrb[9].mxu0 }
 0x5bc   : > { %v5066_v33 = vmax.f32 %v5065_v11, %v4435_v25  ;;  %v4437_v3 = vpop.f32.mrb[10].mxu0 }
 0x5bd   : > { %v5030_v58 = vmax.f32 %v5029_v6, %v4437_v3  ;;  %v4050_v48 = vpop.f32.mrb[252].mxu1  ;;  %v4439_v61 = vpop.f32.mrb[11].mxu0 }
 0x5be   : > { %v4949_v18 = vmax.f32 %v4948_v50, %v4050_v48  ;;  %v5067_v49 = vmax.f32 %v5066_v33, %v4439_v61  ;;  %v4052_v47 = vpop.f32.mrb[253].mxu1 }
 0x5bf   : > { %v4986_v57 = vmax.f32 %v4985_v16, %v4052_v47  ;;  %v4054_v40 = vpop.f32.mrb[254].mxu1 }
 0x5c0   : > { %v4950_v31 = vmax.f32 %v4949_v18, %v4054_v40  ;;  %v4056_v35 = vpop.f32.mrb[255].mxu1 }
 0x5c1   : > { %v4987_v2 = vmax.f32 %v4986_v57, %v4056_v35 }
 0x5c2   : > { %v4443_v19 = vpop.f32.mrb[12].mxu0 }
 0x5c3   : > { %v5031_v62 = vmax.f32 %v5030_v58, %v4443_v19  ;;  %v4445_v46 = vpop.f32.mrb[13].mxu0 }
 0x5c4   : > { %v5068_v41 = vmax.f32 %v5067_v49, %v4445_v46  ;;  %v4447_v54 = vpop.f32.mrb[14].mxu0 }
 0x5c5   : > { %v5032_v29 = vmax.f32 %v5031_v62, %v4447_v54  ;;  %v4060_v27 = vpop.f32.mrb[0].mxu1  ;;  %v4449_v14 = vpop.f32.mrb[15].mxu0  ;;  %v4782_v62 = vrot.slane %v11143_v51, 4 }
 0x5c6   : > { %v4951_v1 = vmax.f32 %v4950_v31, %v4060_v27  ;;  %v5069_v22 = vmax.f32 %v5068_v41, %v4449_v14  ;;  %v4062_v8 = vpop.f32.mrb[1].mxu1  ;;  %v4745_v31 = vrot.slane %v11141_v13, 4 }
 0x5c7   : > { %v4988_v56 = vmax.f32 %v4987_v2, %v4062_v8  ;;  %v4064_v45 = vpop.f32.mrb[2].mxu1 }
 0x5c8   : > { %v4952_v59 = vmax.f32 %v4951_v1, %v4064_v45  ;;  %v4066_v44 = vpop.f32.mrb[3].mxu1 }
 0x5c9   : > { %v4989_v17 = vmax.f32 %v4988_v56, %v4066_v44  ;;  %v4783_v56 = vmax.f32 %v11143_v51, %v4782_v62 }
 0x5ca   : > { %v4453_v38 = vpop.f32.mrb[16].mxu0 }
 0x5cb   : > { %v5033_v55 = vmax.f32 %v5032_v29, %v4453_v38  ;;  %v4455_v42 = vpop.f32.mrb[17].mxu0 }
 0x5cc   : > { %v5070_v39 = vmax.f32 %v5069_v22, %v4455_v42  ;;  %v4457_v4 = vpop.f32.mrb[18].mxu0  ;;  %v4746_v22 = vmax.f32 %v11141_v13, %v4745_v31 }
 0x5cd   : > { %v5034_v36 = vmax.f32 %v5033_v55, %v4457_v4  ;;  %v4070_v0 = vpop.f32.mrb[4].mxu1  ;;  %v4459_v52 = vpop.f32.mrb[19].mxu0 }
 0x5ce   : > { %v4953_v34 = vmax.f32 %v4952_v59, %v4070_v0  ;;  %v5071_v9 = vmax.f32 %v5070_v39, %v4459_v52  ;;  %v4072_v7 = vpop.f32.mrb[5].mxu1  ;;  %v4747_v55 = vrot.slane %v4746_v22, 2 }
 0x5cf   : > { %v4990_v12 = vmax.f32 %v4989_v17, %v4072_v7  ;;  %v4074_v43 = vpop.f32.mrb[6].mxu1 }
 0x5d0   : > { %v4954_v26 = vmax.f32 %v4953_v34, %v4074_v43  ;;  %v4076_v5 = vpop.f32.mrb[7].mxu1  ;;  %v4748_v51 = vmax.f32 %v4746_v22, %v4747_v55 }
 0x5d1   : > { %v4991_v60 = vmax.f32 %v4990_v12, %v4076_v5 }
 0x5d2   : > { %v4463_v53 = vpop.f32.mrb[20].mxu0 }
 0x5d3   : > { %v5035_v11 = vmax.f32 %v5034_v36, %v4463_v53  ;;  %v4465_v32 = vpop.f32.mrb[21].mxu0  ;;  %v4784_v36 = vrot.slane %v4783_v56, 2 }
 0x5d4   : > { %v5072_v30 = vmax.f32 %v5071_v9, %v4465_v32  ;;  %v4467_v10 = vpop.f32.mrb[22].mxu0 }
 0x5d5   : > { %v5036_v50 = vmax.f32 %v5035_v11, %v4467_v10  ;;  %v4080_v63 = vpop.f32.mrb[8].mxu1  ;;  %v4469_v16 = vpop.f32.mrb[23].mxu0  ;;  %v4785_v53 = vmax.f32 %v4783_v56, %v4784_v36  ;;  %v4749_v10 = vrot.slane %v4748_v51, 1 }
 0x5d6   : > { %v4955_v28 = vmax.f32 %v4954_v26, %v4080_v63  ;;  %v5073_v6 = vmax.f32 %v5072_v30, %v4469_v16  ;;  %v4082_v25 = vpop.f32.mrb[9].mxu1 }
 0x5d7   : > { %v4992_v33 = vmax.f32 %v4991_v60, %v4082_v25  ;;  %v4084_v3 = vpop.f32.mrb[10].mxu1  ;;  %v4786_v16 = vrot.slane %v4785_v53, 1 }
 0x5d8   : > { %v4956_v58 = vmax.f32 %v4955_v28, %v4084_v3  ;;  %v4086_v48 = vpop.f32.mrb[11].mxu1 }
 0x5d9   : > { %v4993_v61 = vmax.f32 %v4992_v33, %v4086_v48 }
 0x5da   : > { %v4473_v18 = vpop.f32.mrb[24].mxu0 }
 0x5db   : > { %v5037_v49 = vmax.f32 %v5036_v50, %v4473_v18  ;;  %v4475_v47 = vpop.f32.mrb[25].mxu0 }
 0x5dc   : > { %v5074_v57 = vmax.f32 %v5073_v6, %v4475_v47  ;;  %v4477_v40 = vpop.f32.mrb[26].mxu0 }
 0x5dd   : > { %v5038_v35 = vmax.f32 %v5037_v49, %v4477_v40  ;;  %v4090_v2 = vpop.f32.mrb[12].mxu1  ;;  %v4479_v19 = vpop.f32.mrb[27].mxu0  ;;  %v4750_v49 = vmax.f32 %v4748_v51, %v4749_v10  ;;  %v4787_v40 = vmax.f32 %v4785_v53, %v4786_v16 }
 0x5de   : > { %v4957_v46 = vmax.f32 %v4956_v58, %v4090_v2  ;;  %v5075_v41 = vmax.f32 %v5074_v57, %v4479_v19  ;;  %v4092_v54 = vpop.f32.mrb[13].mxu1 }
 0x5df   : > { %v4994_v29 = vmax.f32 %v4993_v61, %v4092_v54  ;;  %v4094_v27 = vpop.f32.mrb[14].mxu1 }
 0x5e0   : > { %v4958_v14 = vmax.f32 %v4957_v46, %v4094_v27  ;;  %v4096_v1 = vpop.f32.mrb[15].mxu1 }
 0x5e1   : > { %v4995_v8 = vmax.f32 %v4994_v29, %v4096_v1  ;;  %v4671_v29 = vrot.slane %v11145_v24, 4  ;;  %v4708_v1 = vrot.slane %v11147_v20, 4 }
 0x5e2   : > { %v4483_v45 = vpop.f32.mrb[28].mxu0 }
 0x5e3   : > { %v5039_v59 = vmax.f32 %v5038_v35, %v4483_v45  ;;  %v4485_v44 = vpop.f32.mrb[29].mxu0  ;;  %v4709_v56 = vmax.f32 %v11147_v20, %v4708_v1 }
 0x5e4   : > { %v5076_v17 = vmax.f32 %v5075_v41, %v4485_v44  ;;  %v4487_v38 = vpop.f32.mrb[30].mxu0 }
 0x5e5   : > { %v5040_v42 = vmax.f32 %v5039_v59, %v4487_v38  ;;  %v4100_v39 = vpop.f32.mrb[16].mxu1  ;;  %v4489_v4 = vpop.f32.mrb[31].mxu0 }
 0x5e6   : > { %v4959_v0 = vmax.f32 %v4958_v14, %v4100_v39  ;;  %v5077_v52 = vmax.f32 %v5076_v17, %v4489_v4  ;;  %v4102_v34 = vpop.f32.mrb[17].mxu1  ;;  %v4710_v4 = vrot.slane %v4709_v56, 2 }
 0x5e7   : > { %v5041_v9 = vrot.slane %v5040_v42, 4  ;;  %v4996_v7 = vmax.f32 %v4995_v8, %v4102_v34  ;;  %v4104_v12 = vpop.f32.mrb[18].mxu1  ;;  %v4672_v8 = vmax.f32 %v11145_v24, %v4671_v29 }
 0x5e8   : > { %v5078_v13 = vrot.slane %v5077_v52, 4  ;;  %v4960_v43 = vmax.f32 %v4959_v0, %v4104_v12  ;;  %v4106_v26 = vpop.f32.mrb[19].mxu1 }
 0x5e9   : > { %v5042_v5 = vmax.f32 %v5040_v42, %v5041_v9  ;;  %v4997_v60 = vmax.f32 %v4996_v7, %v4106_v26  ;;  %v4673_v55 = vrot.slane %v4672_v8, 2  ;;  %v4711_v7 = vmax.f32 %v4709_v56, %v4710_v4 }
 0x5ea   : > { %v5079_v11 = vmax.f32 %v5077_v52, %v5078_v13 }
 0x5eb   : > { %v5043_v32 = vrot.slane %v5042_v5, 2  ;;  %v4674_v34 = vmax.f32 %v4672_v8, %v4673_v55  ;;  %v4712_v26 = vrot.slane %v4711_v7, 1 }
 0x5ec   : > { %v5080_v30 = vrot.slane %v5079_v11, 2 }
 0x5ed   : > { %v5044_v50 = vmax.f32 %v5042_v5, %v5043_v32  ;;  %v4110_v63 = vpop.f32.mrb[20].mxu1  ;;  %v4675_v20 = vrot.slane %v4674_v34, 1  ;;  %v4713_v32 = vmax.f32 %v4711_v7, %v4712_v26 }
 0x5ee   : > { %v5081_v28 = vmax.f32 %v5079_v11, %v5080_v30  ;;  %v4961_v6 = vmax.f32 %v4960_v43, %v4110_v63  ;;  %v4112_v25 = vpop.f32.mrb[21].mxu1  ;;  %v9433_v63 = vmov (!%p8034_p7), -inf  }
 0x5ef   : > { %v5045_v33 = vrot.slane %v5044_v50, 1  ;;  %v4998_v3 = vmax.f32 %v4997_v60, %v4112_v25  ;;  %v4114_v58 = vpop.f32.mrb[22].mxu1  ;;  %v4676_v53 = vmax.f32 %v4674_v34, %v4675_v20  ;;  %5097 = vst [vmem:[#allocation2] sm:$0xff] (!%p8034_p7), %v9433_v63  ;;  %5098 = vst [vmem:[#allocation2 + $0x8] sm:$0xff] (!%p8034_p7), %v9433_v63 }
 0x5f0   : > { %v5082_v48 = vrot.slane %v5081_v28, 1  ;;  %v4962_v61 = vmax.f32 %v4961_v6, %v4114_v58  ;;  %v4116_v18 = vpop.f32.mrb[23].mxu1 }
 0x5f1   : > { %v5046_v47 = vmax.f32 %v5044_v50, %v5045_v33  ;;  %v4999_v57 = vmax.f32 %v4998_v3, %v4116_v18 }
 0x5f2   : > { %v5083_v31 = vmax.f32 %v5081_v28, %v5082_v48 }
 0x5f3   : > { %v11154_v35 = vsel %vm5084_vm1, %v4750_v49, %v5046_v47 }
 0x5f4   : > { %v11157_v2 = vsel %vm5084_vm1, %v4787_v40, %v5083_v31 }
 0x5f5   : > { %v4120_v19 = vpop.f32.mrb[24].mxu1 }
 0x5f6   : > { %v4963_v62 = vmax.f32 %v4962_v61, %v4120_v19  ;;  %v4122_v46 = vpop.f32.mrb[25].mxu1 }
 0x5f7   : > { %v5000_v41 = vmax.f32 %v4999_v57, %v4122_v46  ;;  %v4124_v54 = vpop.f32.mrb[26].mxu1 }
 0x5f8   : > { %v4964_v27 = vmax.f32 %v4963_v62, %v4124_v54  ;;  %v4126_v14 = vpop.f32.mrb[27].mxu1 }
 0x5f9   : > { %v5001_v22 = vmax.f32 %v5000_v41, %v4126_v14 }
 0x5fd   : > { %v4130_v45 = vpop.f32.mrb[28].mxu1 }
 0x5fe   : > { %v4965_v59 = vmax.f32 %v4964_v27, %v4130_v45  ;;  %v4132_v44 = vpop.f32.mrb[29].mxu1 }
 0x5ff   : > { %v5002_v17 = vmax.f32 %v5001_v22, %v4132_v44  ;;  %v4134_v38 = vpop.f32.mrb[30].mxu1 }
 0x600   : > { %v4966_v42 = vmax.f32 %v4965_v59, %v4134_v38  ;;  %v4136_v39 = vpop.f32.mrb[31].mxu1 }
 0x601   : > { %v5003_v36 = vmax.f32 %v5002_v17, %v4136_v39 }
 0x602   : > { %v4967_v0 = vrot.slane %v4966_v42, 4 }
 0x603   : > { %v5004_v52 = vrot.slane %v5003_v36, 4 }
 0x604   : > { %v4968_v9 = vmax.f32 %v4966_v42, %v4967_v0 }
 0x605   : > { %v5005_v12 = vmax.f32 %v5003_v36, %v5004_v52 }
 0x606   : > { %v4969_v24 = vrot.slane %v4968_v9, 2 }
 0x607   : > { %v5006_v13 = vrot.slane %v5005_v12, 2 }
 0x608   : > { %v4970_v43 = vmax.f32 %v4968_v9, %v4969_v24 }
 0x609   : > { %v5007_v51 = vmax.f32 %v5005_v12, %v5006_v13  ;;  %5096 = sbr.rel (%p8034_p7) target bundleno = 1552 (0x610), region = 122 }
 0x60a   : > { %v4971_v5 = vrot.slane %v4970_v43, 1 }
 0x60b   : > { %v5008_v60 = vrot.slane %v5007_v51, 1 }
 0x60c   : > { %v4972_v11 = vmax.f32 %v4970_v43, %v4971_v5 }
 0x60d   : > { %v5009_v30 = vmax.f32 %v5007_v51, %v5008_v60 }
 0x60e   : > { %v5089_v10 = vsel %vm5084_vm1, %v4676_v53, %v4972_v11 }
 0x60f   : > { %v5090_v50 = vsel %vm5084_vm1, %v4713_v32, %v5009_v30 }
 0x610 PF: > { %v5114_v16 = vlaneseq  ;;  %v9434_v28 = vmov 1983009808   ;;  %v5109_v25 = vcombine.low %v11128_v37, %v11131_v23  ;;  %v5110_v3 = vcombine.low %v11105_v21, %v11109_v15  ;;  %v5099_v23 = vld [vmem:[#allocation2] sm:$0xff]  ;;  %v5100_v40 = vld [vmem:[#allocation2 + $0x8] sm:$0xff]  ;;  %p8035_p12 = scmp.ne.s32.totalorder %s9406_s30, 1 }
 0x611   : > { %v5112_v6 = vunpack.c.l.s4 %v9434_v28  ;;  %v5126_v48 = vcombine.low %v5089_v10, %v5090_v50  ;;  %v5127_v61 = vcombine.low %v11154_v35, %v11157_v2  ;;  %s12315_s12 = sld [smem:[#allocation36_spill]] (!%p8035_p12)  ;;  %s12316_s25 = sld [smem:[#allocation35_spill]] (!%p8035_p12)  ;;  %vm7764_vm2 = vcmask (!%p8035_p12), 66560  }
 0x612   : > { %v11169_v33 = vshrl.u32 %v5114_v16, 7  ;;  %s12317_s22 = sld [smem:[#allocation37_spill]] (!%p8035_p12)  ;;  %s12318_s6 = sld [smem:[#allocation39_spill]] (!%p8035_p12) }
 0x613   : > { %v5113_v58 = vunpack.c.0.s8 %v5112_v6 }
 0x614   : > { %v11316_v16 = vsub.s32 (!%p8035_p12), 0, %v11169_v33  ;;  %v11322_v6 = vsub.s32 (!%p8035_p12), 1, %v11169_v33 }
 0x615   : > { %v11176_v18 = vsub.s32 %v5113_v58, %v11169_v33  ;;  %v5171_v58 = vsub.s32 (!%p8035_p12), 3, %v11169_v33 }
 0x617   : > { %v5117_v49 = vrot.slane %v5109_v25, %v11176_v18  ;;  %v5124_v47 = vrot.slane %v5110_v3, %v11176_v18  ;;  %v5134_v57 = vrot.slane %v5126_v48, %v11176_v18  ;;  %v5141_v37 = vrot.slane %v5127_v61, %v11176_v18  ;;  %5152 = sbr.rel (%p8035_p12) target bundleno = 2536 (0x9e8), region = 126  ;;  %v8768_v35 = vld [vmem:[%s12315_s12 + $0x4] ss:$16 sps:$4 sm:$0xff] (!%p8035_p12)   ;;  %v8772_v62 = vld [vmem:[%s12315_s12] ss:$16 sps:$4 sm:$0xff] (!%p8035_p12)  }
 0x618   : > { %v8770_v2 = vld [vmem:[%s12315_s12 + $0x204] ss:$16 sps:$4 sm:$0xff] (!%p8035_p12)   ;;  %6839 = vmatprep.subr.bf16.mxu1 (!%p8035_p12), %v8768_v35  ;;  %v8773_v46 = vld [vmem:[%s12315_s12 + $0x200] ss:$16 sps:$4 sm:$0xff] (!%p8035_p12)   ;;  %v5167_v25 = vsub.s32 (!%p8035_p12), 2, %v11169_v33 }
 0x619   : > { %v5125_v31 = vcombine.low %v5117_v49, %v5124_v47  ;;  %v5142_v21 = vcombine.low %v5134_v57, %v5141_v37  ;;  %6880 = vmatprep.subr.bf16.mxu0 (!%p8035_p12), %v8770_v2  ;;  %v8774_v41 = vld [vmem:[%s12315_s12 + $0x24] ss:$16 sps:$4 sm:$0xff] (!%p8035_p12)   ;;  %6840 = vmatpush1.bf16.msra.mxu1 (!%p8035_p12), %v8772_v62  ;;  %v8778_v29 = vld [vmem:[%s12315_s12 + $0x20] ss:$16 sps:$4 sm:$0xff] (!%p8035_p12)  }
 0x61a   : > { %6881 = vmatpush1.bf16.msra.mxu0 (!%p8035_p12), %v8773_v46  ;;  %v8776_v54 = vld [vmem:[%s12315_s12 + $0x224] ss:$16 sps:$4 sm:$0xff] (!%p8035_p12)   ;;  %6841 = vmatprep.subr.bf16.mxu1 (!%p8035_p12), %v8774_v41  ;;  %v8779_v27 = vld [vmem:[%s12315_s12 + $0x220] ss:$16 sps:$4 sm:$0xff] (!%p8035_p12)  }
 0x61b   : > { %v5145_v15 = vmax.f32 %v5099_v23, %v5125_v31  ;;  %v5146_v19 = vmax.f32 %v5100_v40, %v5142_v21  ;;  %6882 = vmatprep.subr.bf16.mxu0 (!%p8035_p12), %v8776_v54  ;;  %v8780_v14 = vld [vmem:[%s12315_s12 + $0x44] ss:$16 sps:$4 sm:$0xff] (!%p8035_p12)   ;;  %v8784_v22 = vld [vmem:[%s12315_s12 + $0x40] ss:$16 sps:$4 sm:$0xff] (!%p8035_p12)  }
 0x61c   : > { %v8782_v1 = vld [vmem:[%s12315_s12 + $0x244] ss:$16 sps:$4 sm:$0xff] (!%p8035_p12)   ;;  %v8785_v8 = vld [vmem:[%s12315_s12 + $0x240] ss:$16 sps:$4 sm:$0xff] (!%p8035_p12)  }
 0x61d   : > { %5147 = vst [vmem:[#allocation2] sm:$0xff] %v5145_v15  ;;  %5148 = vst [vmem:[#allocation2 + $0x8] sm:$0xff] %v5146_v19  ;;  %6842 = vmatpush1.bf16.msra.mxu1 (!%p8035_p12), %v8778_v29  ;;  %v8786_v56 = vld [vmem:[%s12315_s12 + $0x64] ss:$16 sps:$4 sm:$0xff] (!%p8035_p12)   ;;  %v8790_v59 = vld [vmem:[%s12315_s12 + $0x60] ss:$16 sps:$4 sm:$0xff] (!%p8035_p12)  }
 0x61e   : > { %6883 = vmatpush1.bf16.msra.mxu0 %v8779_v27  ;;  %6843 = vmatprep.subr.bf16.mxu1 %v8780_v14  ;;  %v8788_v45 = vld [vmem:[%s12315_s12 + $0x264] ss:$16 sps:$4 sm:$0xff]   ;;  %v8791_v44 = vld [vmem:[%s12315_s12 + $0x260] ss:$16 sps:$4 sm:$0xff]  }
 0x61f   : > { %6884 = vmatprep.subr.bf16.mxu0 %v8782_v1  ;;  %v8792_v17 = vld [vmem:[%s12315_s12 + $0x84] ss:$16 sps:$4 sm:$0xff]   ;;  %v8796_v55 = vld [vmem:[%s12315_s12 + $0x80] ss:$16 sps:$4 sm:$0xff]  }
 0x620   : > { %v8794_v38 = vld [vmem:[%s12315_s12 + $0x284] ss:$16 sps:$4 sm:$0xff]   ;;  %v8797_v42 = vld [vmem:[%s12315_s12 + $0x280] ss:$16 sps:$4 sm:$0xff]  }
 0x621   : > { %6844 = vmatpush1.bf16.msra.mxu1 %v8784_v22  ;;  %v8798_v39 = vld [vmem:[%s12315_s12 + $0xa4] ss:$16 sps:$4 sm:$0xff]   ;;  %v8802_v36 = vld [vmem:[%s12315_s12 + $0xa0] ss:$16 sps:$4 sm:$0xff]  }
 0x622   : > { %6885 = vmatpush1.bf16.msra.mxu0 %v8785_v8  ;;  %6845 = vmatprep.subr.bf16.mxu1 %v8786_v56  ;;  %v8800_v4 = vld [vmem:[%s12315_s12 + $0x2a4] ss:$16 sps:$4 sm:$0xff]   ;;  %v8803_v0 = vld [vmem:[%s12315_s12 + $0x2a0] ss:$16 sps:$4 sm:$0xff]  }
 0x623   : > { %6886 = vmatprep.subr.bf16.mxu0 %v8788_v45  ;;  %v8804_v52 = vld [vmem:[%s12315_s12 + $0xc4] ss:$16 sps:$4 sm:$0xff]   ;;  %v8808_v9 = vld [vmem:[%s12315_s12 + $0xc0] ss:$16 sps:$4 sm:$0xff]  }
 0x624   : > { %v8806_v34 = vld [vmem:[%s12315_s12 + $0x2c4] ss:$16 sps:$4 sm:$0xff]   ;;  %v8809_v7 = vld [vmem:[%s12315_s12 + $0x2c0] ss:$16 sps:$4 sm:$0xff]  }
 0x625   : > { %6846 = vmatpush1.bf16.msra.mxu1 %v8790_v59  ;;  %v8810_v12 = vld [vmem:[%s12315_s12 + $0xe4] ss:$16 sps:$4 sm:$0xff]   ;;  %v8814_v13 = vld [vmem:[%s12315_s12 + $0xe0] ss:$16 sps:$4 sm:$0xff]  }
 0x626   : > { %6887 = vmatpush1.bf16.msra.mxu0 %v8791_v44  ;;  %6847 = vmatprep.subr.bf16.mxu1 %v8792_v17  ;;  %v8812_v24 = vld [vmem:[%s12315_s12 + $0x2e4] ss:$16 sps:$4 sm:$0xff]   ;;  %v8815_v20 = vld [vmem:[%s12315_s12 + $0x2e0] ss:$16 sps:$4 sm:$0xff]  }
 0x627   : > { %6888 = vmatprep.subr.bf16.mxu0 %v8794_v38  ;;  %v8816_v43 = vld [vmem:[%s12315_s12 + $0x104] ss:$16 sps:$4 sm:$0xff]   ;;  %v8820_v51 = vld [vmem:[%s12315_s12 + $0x100] ss:$16 sps:$4 sm:$0xff]  }
 0x628   : > { %v8818_v26 = vld [vmem:[%s12315_s12 + $0x304] ss:$16 sps:$4 sm:$0xff]   ;;  %v8821_v5 = vld [vmem:[%s12315_s12 + $0x300] ss:$16 sps:$4 sm:$0xff]  }
 0x629   : > { %6848 = vmatpush1.bf16.msra.mxu1 %v8796_v55  ;;  %v8822_v60 = vld [vmem:[%s12315_s12 + $0x124] ss:$16 sps:$4 sm:$0xff]   ;;  %v8826_v11 = vld [vmem:[%s12315_s12 + $0x120] ss:$16 sps:$4 sm:$0xff]  }
 0x62a   : > { %6889 = vmatpush1.bf16.msra.mxu0 %v8797_v42  ;;  %6849 = vmatprep.subr.bf16.mxu1 %v8798_v39  ;;  %v8824_v53 = vld [vmem:[%s12315_s12 + $0x324] ss:$16 sps:$4 sm:$0xff]   ;;  %v8827_v32 = vld [vmem:[%s12315_s12 + $0x320] ss:$16 sps:$4 sm:$0xff]  }
 0x62b   : > { %6890 = vmatprep.subr.bf16.mxu0 %v8800_v4  ;;  %v8828_v30 = vld [vmem:[%s12315_s12 + $0x144] ss:$16 sps:$4 sm:$0xff]   ;;  %v8832_v50 = vld [vmem:[%s12315_s12 + $0x140] ss:$16 sps:$4 sm:$0xff]  }
 0x62c   : > { %v8830_v10 = vld [vmem:[%s12315_s12 + $0x344] ss:$16 sps:$4 sm:$0xff]   ;;  %v8833_v63 = vld [vmem:[%s12315_s12 + $0x340] ss:$16 sps:$4 sm:$0xff]  }
 0x62d   : > { %6850 = vmatpush1.bf16.msra.mxu1 %v8802_v36  ;;  %v8834_v28 = vld [vmem:[%s12315_s12 + $0x164] ss:$16 sps:$4 sm:$0xff]   ;;  %v8838_v61 = vld [vmem:[%s12315_s12 + $0x160] ss:$16 sps:$4 sm:$0xff]  }
 0x62e   : > { %6891 = vmatpush1.bf16.msra.mxu0 %v8803_v0  ;;  %6851 = vmatprep.subr.bf16.mxu1 %v8804_v52  ;;  %v8836_v3 = vld [vmem:[%s12315_s12 + $0x364] ss:$16 sps:$4 sm:$0xff]   ;;  %v8839_v49 = vld [vmem:[%s12315_s12 + $0x360] ss:$16 sps:$4 sm:$0xff]  }
 0x62f   : > { %6892 = vmatprep.subr.bf16.mxu0 %v8806_v34  ;;  %v11332_v48 = vld [vmem:[%s12316_s25] sm:$0xff]  ;;  %s12319_s25 = sld [smem:[#allocation38_spill]] }
 0x630   : > { %v5160_v47 = vrot.slane %v11332_v48, %v11316_v16  ;;  %v5164_v57 = vrot.slane %v11332_v48, %v11322_v6  ;;  %v5168_v37 = vrot.slane %v11332_v48, %v5167_v25  ;;  %v8840_v23 = vld [vmem:[%s12315_s12 + $0x184] ss:$16 sps:$4 sm:$0xff]   ;;  %v5172_v31 = vrot.slane %v11332_v48, %v5171_v58  ;;  %v8844_v19 = vld [vmem:[%s12315_s12 + $0x180] ss:$16 sps:$4 sm:$0xff]  }
 0x631   : > { %6852 = vmatpush1.bf16.msra.mxu1 %v8808_v9  ;;  %v8842_v40 = vld [vmem:[%s12315_s12 + $0x384] ss:$16 sps:$4 sm:$0xff]   ;;  %v8845_v35 = vld [vmem:[%s12315_s12 + $0x380] ss:$16 sps:$4 sm:$0xff]   ;;  %v8869_v9 = vld [vmem:[%s12315_s12 + $0xc] ss:$16 sps:$4 sm:$0xff]  }
 0x632   : > { %6893 = vmatpush1.bf16.msra.mxu0 %v8809_v7  ;;  %6853 = vmatprep.subr.bf16.mxu1 %v8810_v12  ;;  %v5189_v21 = vcombine.low %v5160_v47, %v5164_v57  ;;  %v5190_v15 = vcombine.low %v5168_v37, %v5172_v31  ;;  %v8846_v62 = vld [vmem:[%s12315_s12 + $0x1a4] ss:$16 sps:$4 sm:$0xff]   ;;  %v8850_v27 = vld [vmem:[%s12315_s12 + $0x1a0] ss:$16 sps:$4 sm:$0xff]  }
 0x633   : > { %6894 = vmatprep.subr.bf16.mxu0 %v8812_v24  ;;  %v8848_v46 = vld [vmem:[%s12315_s12 + $0x3a4] ss:$16 sps:$4 sm:$0xff]   ;;  %v8851_v14 = vld [vmem:[%s12315_s12 + $0x3a0] ss:$16 sps:$4 sm:$0xff]  }
 0x634   : > { %v5197_v2 = vrot.slane %v5189_v21, %v11176_v18  ;;  %v5204_v41 = vrot.slane %v5190_v15, %v11176_v18  ;;  %v5153_v54 = vld [vmem:[#allocation2] sm:$0xff]  ;;  %v8893_v21 = vld [vmem:[%s12315_s12 + $0x8c] ss:$16 sps:$4 sm:$0xff]  }
 0x635   : > { %6854 = vmatpush1.bf16.msra.mxu1 %v8814_v13  ;;  %v8852_v1 = vld [vmem:[%s12315_s12 + $0x1c4] ss:$16 sps:$4 sm:$0xff]   ;;  %v8856_v45 = vld [vmem:[%s12315_s12 + $0x1c0] ss:$16 sps:$4 sm:$0xff]  }
 0x636   : > { %6895 = vmatpush1.bf16.msra.mxu0 %v8815_v20  ;;  %6855 = vmatprep.subr.bf16.mxu1 %v8816_v43  ;;  %v5205_v29 = vcombine.low %v5197_v2, %v5204_v41  ;;  %v8854_v22 = vld [vmem:[%s12315_s12 + $0x3c4] ss:$16 sps:$4 sm:$0xff]   ;;  %v8857_v59 = vld [vmem:[%s12315_s12 + $0x3c0] ss:$16 sps:$4 sm:$0xff]   ;;  %v8867_v20 = vld [vmem:[%s12315_s12 + $0x8] ss:$16 sps:$4 sm:$0xff]  }
 0x637   : > { %6896 = vmatprep.subr.bf16.mxu0 %v8818_v26  ;;  %v8858_v44 = vld [vmem:[%s12315_s12 + $0x1e4] ss:$16 sps:$4 sm:$0xff]   ;;  %v8862_v4 = vld [vmem:[%s12315_s12 + $0x1e0] ss:$16 sps:$4 sm:$0xff]   ;;  %v8875_v26 = vld [vmem:[%s12315_s12 + $0x2c] ss:$16 sps:$4 sm:$0xff]  }
 0x638   : > { %v5225_v8 = vadd.f32 %v5205_v29, %v5153_v54  ;;  %v8860_v17 = vld [vmem:[%s12315_s12 + $0x3e4] ss:$16 sps:$4 sm:$0xff]   ;;  %v8863_v36 = vld [vmem:[%s12315_s12 + $0x3e0] ss:$16 sps:$4 sm:$0xff]   ;;  %v8891_v2 = vld [vmem:[%s12315_s12 + $0x88] ss:$16 sps:$4 sm:$0xff]  }
 0x639   : > { %6856 = vmatpush1.bf16.msra.mxu1 %v8820_v51  ;;  %v8866_v34 = vld [vmem:[%s12315_s12 + $0x404] ss:$16 sps:$4 sm:$0xff]   ;;  %v8864_v13 = vld [vmem:[%s12315_s12 + $0x400] ss:$16 sps:$4 sm:$0xff]   ;;  %v5175_v51 = vsub.s32 4, %v11169_v33 }
 0x63a   : > { %6897 = vmatpush1.bf16.msra.mxu0 %v8821_v5  ;;  %6857 = vmatprep.subr.bf16.mxu1 %v8822_v60  ;;  %v5227_v56 = vmax.f32 %v5225_v8, 0.0  ;;  %v8872_v43 = vld [vmem:[%s12315_s12 + $0x424] ss:$16 sps:$4 sm:$0xff]   ;;  %v5179_v5 = vsub.s32 5, %v11169_v33  ;;  %v5183_v60 = vsub.s32 6, %v11169_v33 }
 0x63b   : > { %6898 = vmatprep.subr.bf16.mxu0 %v8824_v53  ;;  %v5187_v53 = vsub.s32 7, %v11169_v33  ;;  %v8884_v47 = vld [vmem:[%s12315_s12 + $0x464] ss:$16 sps:$4 sm:$0xff]   ;;  %v8894_v54 = vld [vmem:[%s12315_s12 + $0x4a0] ss:$16 sps:$4 sm:$0xff]   ;;  %v7668_v33 = vld [vmem:[%s12318_s6 + $0x68] sm:$0xff] }
 0x63c   : > { %v5238_v38 = vrot.slane %v5227_v56, %v11176_v18  ;;  %v5231_v55 = vcombine.high %v5227_v56, %v5227_v56  ;;  %v8890_v31 = vld [vmem:[%s12315_s12 + $0x484] ss:$16 sps:$4 sm:$0xff]   ;;  %v8897_v29 = vld [vmem:[%s12315_s12 + $0xa8] ss:$16 sps:$4 sm:$0xff]  }
 0x63d   : > { %6858 = vmatpush1.bf16.msra.mxu1 %v8826_v11  ;;  %v8870_v11 = vld [vmem:[%s12315_s12 + $0x420] ss:$16 sps:$4 sm:$0xff]   ;;  %v8903_v56 = vld [vmem:[%s12315_s12 + $0xc8] ss:$16 sps:$4 sm:$0xff]  }
 0x63e   : > { %6899 = vmatpush1.bf16.msra.mxu0 %v8827_v32  ;;  %6859 = vmatprep.subr.bf16.mxu1 %v8828_v30  ;;  %v5246_v42 = vcombine.high %v5238_v38, %v5238_v38  ;;  %v5245_v39 = vrot.slane %v5231_v55, %v11176_v18  ;;  %v11408_v7 = vpack.c.bf16 %v5238_v38, %v5238_v38  ;;  %v8873_v32 = vld [vmem:[%s12315_s12 + $0x28] ss:$16 sps:$4 sm:$0xff]   ;;  %v8878_v30 = vld [vmem:[%s12315_s12 + $0x444] ss:$16 sps:$4 sm:$0xff]  }
 0x63f   : > { %6900 = vmatprep.subr.bf16.mxu0 %v8830_v10  ;;  %v8881_v10 = vld [vmem:[%s12315_s12 + $0x4c] ss:$16 sps:$4 sm:$0xff]   ;;  %v8909_v55 = vld [vmem:[%s12315_s12 + $0xe8] ss:$16 sps:$4 sm:$0xff]  }
 0x640   : > { %v5274_v0 = vpack.c.bf16 %v5246_v42, %v5246_v42  ;;  %v5247_v52 = vcombine.high %v5245_v39, %v5245_v39  ;;  %v11412_v24 = vpack.c.bf16 %v5245_v39, %v5245_v39  ;;  %v8914_v42 = vld [vmem:[%s12315_s12 + $0x504] ss:$16 sps:$4 sm:$0xff]   ;;  %v8917_v39 = vld [vmem:[%s12315_s12 + $0x10c] ss:$16 sps:$4 sm:$0xff]  }
 0x641   : > { %6860 = vmatpush1.bf16.msra.mxu1 %v8832_v50  ;;  %v5176_v50 = vrot.slane %v11332_v48, %v5175_v51  ;;  %v8924_v51 = vld [vmem:[%s12315_s12 + $0x540] ss:$16 sps:$4 sm:$0xff]  }
 0x642   : > { %6901 = vmatpush1.bf16.msra.mxu0 %v8833_v63  ;;  %6861 = vmatprep.subr.bf16.mxu1 %v8834_v28  ;;  %v11410_v12 = vpack.c.bf16 %v5247_v52, %v5247_v52  ;;  %v5180_v63 = vrot.slane %v11332_v48, %v5179_v5  ;;  %v5184_v28 = vrot.slane %v11332_v48, %v5183_v60  ;;  %v8915_v52 = vld [vmem:[%s12315_s12 + $0x108] ss:$16 sps:$4 sm:$0xff]   ;;  %v8932_v60 = vld [vmem:[%s12315_s12 + $0x564] ss:$16 sps:$4 sm:$0xff]  }
 0x643   : > { %6902 = vmatprep.subr.bf16.mxu0 %v8836_v3  ;;  %6871 = vmatprep.mubr.bf16.mxu1 %v5274_v0  ;;  %v5188_v3 = vrot.slane %v11332_v48, %v5187_v53  ;;  %v8887_v48 = vld [vmem:[%s12315_s12 + $0x6c] ss:$16 sps:$4 sm:$0xff]   ;;  %v8927_v5 = vld [vmem:[%s12315_s12 + $0x148] ss:$16 sps:$4 sm:$0xff]  }
 0x644   : > { %6912 = vmatprep.mubr.bf16.mxu0 %v11410_v12  ;;  %v5206_v57 = vcombine.low %v5176_v50, %v5180_v63  ;;  %v8935_v53 = vld [vmem:[%s12315_s12 + $0x16c] ss:$16 sps:$4 sm:$0xff]   ;;  %v8936_v50 = vld [vmem:[%s12315_s12 + $0x580] ss:$16 sps:$4 sm:$0xff]   ;;  %v8939_v63 = vld [vmem:[%s12315_s12 + $0x188] ss:$16 sps:$4 sm:$0xff]  }
 0x645   : > { %6862 = vmatpush1.bf16.msra.mxu1 %v8838_v61  ;;  %v8876_v61 = vld [vmem:[%s12315_s12 + $0x440] ss:$16 sps:$4 sm:$0xff]   ;;  %v5207_v37 = vcombine.low %v5184_v28, %v5188_v3  ;;  %v8944_v28 = vld [vmem:[%s12315_s12 + $0x5a4] ss:$16 sps:$4 sm:$0xff]   ;;  %v8947_v3 = vld [vmem:[%s12315_s12 + $0x1ac] ss:$16 sps:$4 sm:$0xff]  }
 0x646   : > { %6903 = vmatpush1.bf16.msra.mxu0 %v8839_v49  ;;  %6863 = vmatprep.subr.bf16.mxu1 %v8840_v23  ;;  %v8879_v49 = vld [vmem:[%s12315_s12 + $0x48] ss:$16 sps:$4 sm:$0xff]   ;;  %v8882_v23 = vld [vmem:[%s12315_s12 + $0x460] ss:$16 sps:$4 sm:$0xff]   ;;  %v5214_v15 = vrot.slane %v5206_v57, %v11176_v18 }
 0x647   : > { %6904 = vmatprep.subr.bf16.mxu0 %v8842_v40  ;;  %v8885_v40 = vld [vmem:[%s12315_s12 + $0x68] ss:$16 sps:$4 sm:$0xff]  }
 0x649   : > { %6864 = vmatpush1.bf16.msra.mxu1 %v8844_v19  ;;  %v5221_v19 = vrot.slane %v5207_v37, %v11176_v18  ;;  %v8948_v37 = vld [vmem:[%s12315_s12 + $0x5c0] ss:$16 sps:$4 sm:$0xff]  }
 0x64a   : > { %6905 = vmatpush1.bf16.msra.mxu0 %v8845_v35  ;;  %6865 = vmatprep.subr.bf16.mxu1 %v8846_v62  ;;  %v8888_v35 = vld [vmem:[%s12315_s12 + $0x480] ss:$16 sps:$4 sm:$0xff]   ;;  %v8896_v62 = vld [vmem:[%s12315_s12 + $0x4a4] ss:$16 sps:$4 sm:$0xff]  }
 0x64b   : > { %6906 = vmatprep.subr.bf16.mxu0 %v8848_v46  ;;  %v8899_v46 = vld [vmem:[%s12315_s12 + $0xac] ss:$16 sps:$4 sm:$0xff]   ;;  %v5222_v41 = vcombine.low %v5214_v15, %v5221_v19  ;;  %v8954_v15 = vld [vmem:[%s12315_s12 + $0x5e0] ss:$16 sps:$4 sm:$0xff]   ;;  %v8957_v19 = vld [vmem:[%s12315_s12 + $0x1e8] ss:$16 sps:$4 sm:$0xff]  }
 0x64d   : > { %6866 = vmatpush1.bf16.msra.mxu1 %v8850_v27  ;;  %v8902_v27 = vld [vmem:[%s12315_s12 + $0x4c4] ss:$16 sps:$4 sm:$0xff]  }
 0x64e   : > { %6907 = vmatpush1.bf16.msra.mxu0 %v8851_v14  ;;  %6867 = vmatprep.subr.bf16.mxu1 %v8852_v1  ;;  %v8905_v14 = vld [vmem:[%s12315_s12 + $0xcc] ss:$16 sps:$4 sm:$0xff]  }
 0x64f   : > { %6908 = vmatprep.subr.bf16.mxu0 %v8854_v22  ;;  %v5154_v1 = vld [vmem:[#allocation2 + $0x8] sm:$0xff]  ;;  %v8900_v22 = vld [vmem:[%s12315_s12 + $0x4c0] ss:$16 sps:$4 sm:$0xff]  }
 0x650   : > { %v5226_v8 = vadd.f32 %v5222_v41, %v5154_v1  ;;  %v8963_v41 = vld [vmem:[%s12315_s12 + $0x208] ss:$16 sps:$4 sm:$0xff]  }
 0x651   : > { %6868 = vmatpush1.bf16.msra.mxu1 %v8856_v45  ;;  %v8908_v45 = vld [vmem:[%s12315_s12 + $0x4e4] ss:$16 sps:$4 sm:$0xff]   ;;  %v8969_v1 = vld [vmem:[%s12315_s12 + $0x228] ss:$16 sps:$4 sm:$0xff]  }
 0x652   : > { %6909 = vmatpush1.bf16.msra.mxu0 %v8857_v59  ;;  %6869 = vmatprep.subr.bf16.mxu1 %v8858_v44  ;;  %v8911_v59 = vld [vmem:[%s12315_s12 + $0xec] ss:$16 sps:$4 sm:$0xff]   ;;  %v11511_v44 = vmax.f32 %v5226_v8, 0.0  ;;  %v8972_v8 = vld [vmem:[%s12315_s12 + $0x640] ss:$16 sps:$4 sm:$0xff]  }
 0x653   : > { %6910 = vmatprep.subr.bf16.mxu0 %v8860_v17  ;;  %v8906_v17 = vld [vmem:[%s12315_s12 + $0x4e0] ss:$16 sps:$4 sm:$0xff]  }
 0x654   : > { %v11518_v38 = vrot.slane %v11511_v44, %v11176_v18  ;;  %v5248_v57 = vcombine.high %v11511_v44, %v11511_v44  ;;  %v8981_v44 = vld [vmem:[%s12315_s12 + $0x268] ss:$16 sps:$4 sm:$0xff]  }
 0x655   : > { %6870 = vmatpush1.bf16.msra.mxu1 %v8862_v4 }
 0x656   : > { %6911 = vmatpush1.bf16.msra.mxu0 %v8863_v36  ;;  %7003 = vmatprep.subr.bf16.mxu1 %v8869_v9  ;;  %v5263_v4 = vcombine.high %v11518_v38, %v11518_v38  ;;  %v8912_v36 = vld [vmem:[%s12315_s12 + $0x500] ss:$16 sps:$4 sm:$0xff]   ;;  %v8923_v9 = vld [vmem:[%s12315_s12 + $0x12c] ss:$16 sps:$4 sm:$0xff]  }
 0x657   : > { %6921 = vmatprep.subr.bf16.mxu0 %v8866_v34  ;;  %v8920_v34 = vld [vmem:[%s12315_s12 + $0x524] ss:$16 sps:$4 sm:$0xff]  }
 0x658   : > { %6872 = vmatmul.mubr.bf16.vlgmr.msra.gmra.mrb[0].mxu1 %v11408_v7 }
 0x659   : > { %6913 = vmatmul.mubr.bf16.vlgmr.msra.gmra.mrb[0].mxu0 %v11412_v24  ;;  %7004 = vmatpush1.bf16.msra.mxu1 %v8867_v20  ;;  %v8921_v20 = vld [vmem:[%s12315_s12 + $0x128] ss:$16 sps:$4 sm:$0xff]  }
 0x65a   : > { %6922 = vmatpush1.bf16.msra.mxu0 %v8864_v13  ;;  %7005 = vmatprep.subr.bf16.mxu1 %v8875_v26  ;;  %v8918_v13 = vld [vmem:[%s12315_s12 + $0x520] ss:$16 sps:$4 sm:$0xff]   ;;  %v8929_v26 = vld [vmem:[%s12315_s12 + $0x14c] ss:$16 sps:$4 sm:$0xff]  }
 0x65b   : > { %6923 = vmatprep.subr.bf16.mxu0 %v8872_v43  ;;  %7035 = vmatprep.mubr.bf16.mxu1 %v5274_v0  ;;  %v11534_v0 = vpack.c.bf16 %v5263_v4, %v5263_v4  ;;  %v8926_v43 = vld [vmem:[%s12315_s12 + $0x544] ss:$16 sps:$4 sm:$0xff]   ;;  %v8995_v4 = vld [vmem:[%s12315_s12 + $0x2ac] ss:$16 sps:$4 sm:$0xff]  }
 0x65d   : > { %7006 = vmatpush1.bf16.msra.mxu1 %v8873_v32  ;;  %6953 = vmatprep.mubr.bf16.mxu0 %v11534_v0  ;;  %v8933_v32 = vld [vmem:[%s12315_s12 + $0x168] ss:$16 sps:$4 sm:$0xff]  }
 0x65e   : > { %6924 = vmatpush1.bf16.msra.mxu0 %v8870_v11  ;;  %7007 = vmatprep.subr.bf16.mxu1 %v8881_v10  ;;  %v8930_v11 = vld [vmem:[%s12315_s12 + $0x560] ss:$16 sps:$4 sm:$0xff]   ;;  %v8941_v10 = vld [vmem:[%s12315_s12 + $0x18c] ss:$16 sps:$4 sm:$0xff]  }
 0x65f   : > { %6925 = vmatprep.subr.bf16.mxu0 %v8878_v30  ;;  %v8938_v30 = vld [vmem:[%s12315_s12 + $0x584] ss:$16 sps:$4 sm:$0xff]  }
 0x661   : > { %7008 = vmatpush1.bf16.msra.mxu1 %v8879_v49  ;;  %v8945_v49 = vld [vmem:[%s12315_s12 + $0x1a8] ss:$16 sps:$4 sm:$0xff]  }
 0x662   : > { %6926 = vmatpush1.bf16.msra.mxu0 %v8876_v61  ;;  %7009 = vmatprep.subr.bf16.mxu1 %v8887_v48  ;;  %v8942_v61 = vld [vmem:[%s12315_s12 + $0x5a0] ss:$16 sps:$4 sm:$0xff]   ;;  %v8953_v48 = vld [vmem:[%s12315_s12 + $0x1cc] ss:$16 sps:$4 sm:$0xff]  }
 0x663   : > { %6927 = vmatprep.subr.bf16.mxu0 %v8884_v47  ;;  %v8950_v47 = vld [vmem:[%s12315_s12 + $0x5c4] ss:$16 sps:$4 sm:$0xff]  }
 0x665   : > { %7010 = vmatpush1.bf16.msra.mxu1 %v8885_v40  ;;  %v8956_v40 = vld [vmem:[%s12315_s12 + $0x5e4] ss:$16 sps:$4 sm:$0xff]  }
 0x666   : > { %6928 = vmatpush1.bf16.msra.mxu0 %v8882_v23  ;;  %7011 = vmatprep.subr.bf16.mxu1 %v8893_v21  ;;  %v8951_v23 = vld [vmem:[%s12315_s12 + $0x1c8] ss:$16 sps:$4 sm:$0xff]   ;;  %v11621_v21 = vrot.slane %v5248_v57, %v11176_v18  ;;  %v8965_v18 = vld [vmem:[%s12315_s12 + $0x20c] ss:$16 sps:$4 sm:$0xff]   ;;  %v9026_v57 = vld [vmem:[%s12315_s12 + $0x760] ss:$16 sps:$4 sm:$0xff]  }
 0x667   : > { %6929 = vmatprep.subr.bf16.mxu0 %v8890_v31  ;;  %v8959_v31 = vld [vmem:[%s12315_s12 + $0x1ec] ss:$16 sps:$4 sm:$0xff]  }
 0x669   : > { %7012 = vmatpush1.bf16.msra.mxu1 %v8891_v2  ;;  %v5264_v2 = vcombine.high %v11621_v21, %v11621_v21 }
 0x66a   : > { %6930 = vmatpush1.bf16.msra.mxu0 %v8888_v35  ;;  %7013 = vmatprep.subr.bf16.mxu1 %v8899_v46  ;;  %v8962_v35 = vld [vmem:[%s12315_s12 + $0x604] ss:$16 sps:$4 sm:$0xff]   ;;  %v11642_v46 = vpack.c.bf16 %v11518_v38, %v11518_v38  ;;  %v8989_v38 = vld [vmem:[%s12315_s12 + $0x28c] ss:$16 sps:$4 sm:$0xff]  }
 0x66b   : > { %6931 = vmatprep.subr.bf16.mxu0 %v8896_v62  ;;  %v8960_v62 = vld [vmem:[%s12315_s12 + $0x600] ss:$16 sps:$4 sm:$0xff]  }
 0x66d   : > { %7014 = vmatpush1.bf16.msra.mxu1 %v8897_v29  ;;  %v8971_v29 = vld [vmem:[%s12315_s12 + $0x22c] ss:$16 sps:$4 sm:$0xff]  }
 0x66e   : > { %6932 = vmatpush1.bf16.msra.mxu0 %v8894_v54  ;;  %7015 = vmatprep.subr.bf16.mxu1 %v8905_v14  ;;  %v8968_v54 = vld [vmem:[%s12315_s12 + $0x624] ss:$16 sps:$4 sm:$0xff]   ;;  %v8966_v14 = vld [vmem:[%s12315_s12 + $0x620] ss:$16 sps:$4 sm:$0xff]  }
 0x66f   : > { %6933 = vmatprep.subr.bf16.mxu0 %v8902_v27  ;;  %v11653_v27 = vpack.c.bf16 %v5264_v2, %v5264_v2  ;;  %v9041_v2 = vld [vmem:[%s12315_s12 + $0x3a8] ss:$16 sps:$4 sm:$0xff]  }
 0x671   : > { %7016 = vmatpush1.bf16.msra.mxu1 %v8903_v56  ;;  %v8975_v56 = vld [vmem:[%s12315_s12 + $0x248] ss:$16 sps:$4 sm:$0xff]  }
 0x672   : > { %6934 = vmatpush1.bf16.msra.mxu0 %v8900_v22  ;;  %7017 = vmatprep.subr.bf16.mxu1 %v8911_v59  ;;  %v8974_v22 = vld [vmem:[%s12315_s12 + $0x644] ss:$16 sps:$4 sm:$0xff]   ;;  %v8978_v59 = vld [vmem:[%s12315_s12 + $0x660] ss:$16 sps:$4 sm:$0xff]  }
 0x673   : > { %6935 = vmatprep.subr.bf16.mxu0 %v8908_v45  ;;  %v8980_v45 = vld [vmem:[%s12315_s12 + $0x664] ss:$16 sps:$4 sm:$0xff]  }
 0x675   : > { %7018 = vmatpush1.bf16.msra.mxu1 %v8909_v55  ;;  %v8984_v55 = vld [vmem:[%s12315_s12 + $0x680] ss:$16 sps:$4 sm:$0xff]  }
 0x676   : > { %6936 = vmatpush1.bf16.msra.mxu0 %v8906_v17  ;;  %7019 = vmatprep.subr.bf16.mxu1 %v8917_v39  ;;  %v8986_v17 = vld [vmem:[%s12315_s12 + $0x684] ss:$16 sps:$4 sm:$0xff]  }
 0x677   : > { %6937 = vmatprep.subr.bf16.mxu0 %v8914_v42  ;;  %v8987_v42 = vld [vmem:[%s12315_s12 + $0x288] ss:$16 sps:$4 sm:$0xff]   ;;  %v8992_v39 = vld [vmem:[%s12315_s12 + $0x6a4] ss:$16 sps:$4 sm:$0xff]  }
 0x679   : > { %7020 = vmatpush1.bf16.msra.mxu1 %v8915_v52  ;;  %v8993_v52 = vld [vmem:[%s12315_s12 + $0x2a8] ss:$16 sps:$4 sm:$0xff]  }
 0x67a   : > { %6938 = vmatpush1.bf16.msra.mxu0 %v8912_v36  ;;  %7021 = vmatprep.subr.bf16.mxu1 %v8923_v9  ;;  %v8990_v36 = vld [vmem:[%s12315_s12 + $0x6a0] ss:$16 sps:$4 sm:$0xff]   ;;  %v9001_v9 = vld [vmem:[%s12315_s12 + $0x2cc] ss:$16 sps:$4 sm:$0xff]  }
 0x67b   : > { %6939 = vmatprep.subr.bf16.mxu0 %v8920_v34  ;;  %v8998_v34 = vld [vmem:[%s12315_s12 + $0x6c4] ss:$16 sps:$4 sm:$0xff]  }
 0x67d   : > { %7022 = vmatpush1.bf16.msra.mxu1 %v8921_v20  ;;  %v8999_v20 = vld [vmem:[%s12315_s12 + $0x2c8] ss:$16 sps:$4 sm:$0xff]  }
 0x67e   : > { %6940 = vmatpush1.bf16.msra.mxu0 %v8918_v13  ;;  %7023 = vmatprep.subr.bf16.mxu1 %v8929_v26  ;;  %v8996_v13 = vld [vmem:[%s12315_s12 + $0x6c0] ss:$16 sps:$4 sm:$0xff]   ;;  %v9007_v26 = vld [vmem:[%s12315_s12 + $0x2ec] ss:$16 sps:$4 sm:$0xff]  }
 0x67f   : > { %6941 = vmatprep.subr.bf16.mxu0 %v8926_v43  ;;  %v9004_v43 = vld [vmem:[%s12315_s12 + $0x6e4] ss:$16 sps:$4 sm:$0xff]  }
 0x681   : > { %7024 = vmatpush1.bf16.msra.mxu1 %v8927_v5  ;;  %v9005_v5 = vld [vmem:[%s12315_s12 + $0x2e8] ss:$16 sps:$4 sm:$0xff]  }
 0x682   : > { %6942 = vmatpush1.bf16.msra.mxu0 %v8924_v51  ;;  %7025 = vmatprep.subr.bf16.mxu1 %v8935_v53  ;;  %v9002_v51 = vld [vmem:[%s12315_s12 + $0x6e0] ss:$16 sps:$4 sm:$0xff]   ;;  %v9013_v53 = vld [vmem:[%s12315_s12 + $0x30c] ss:$16 sps:$4 sm:$0xff]  }
 0x683   : > { %6943 = vmatprep.subr.bf16.mxu0 %v8932_v60  ;;  %v9010_v60 = vld [vmem:[%s12315_s12 + $0x704] ss:$16 sps:$4 sm:$0xff]  }
 0x685   : > { %7026 = vmatpush1.bf16.msra.mxu1 %v8933_v32  ;;  %v9011_v32 = vld [vmem:[%s12315_s12 + $0x308] ss:$16 sps:$4 sm:$0xff]  }
 0x686   : > { %6944 = vmatpush1.bf16.msra.mxu0 %v8930_v11  ;;  %7027 = vmatprep.subr.bf16.mxu1 %v8941_v10  ;;  %v9008_v11 = vld [vmem:[%s12315_s12 + $0x700] ss:$16 sps:$4 sm:$0xff]   ;;  %v9019_v10 = vld [vmem:[%s12315_s12 + $0x32c] ss:$16 sps:$4 sm:$0xff]  }
 0x687   : > { %6945 = vmatprep.subr.bf16.mxu0 %v8938_v30  ;;  %v9016_v30 = vld [vmem:[%s12315_s12 + $0x724] ss:$16 sps:$4 sm:$0xff]  }
 0x689   : > { %7028 = vmatpush1.bf16.msra.mxu1 %v8939_v63  ;;  %v9017_v63 = vld [vmem:[%s12315_s12 + $0x328] ss:$16 sps:$4 sm:$0xff]  }
 0x68a   : > { %6946 = vmatpush1.bf16.msra.mxu0 %v8936_v50  ;;  %7029 = vmatprep.subr.bf16.mxu1 %v8947_v3  ;;  %v9014_v50 = vld [vmem:[%s12315_s12 + $0x720] ss:$16 sps:$4 sm:$0xff]   ;;  %v9025_v3 = vld [vmem:[%s12315_s12 + $0x34c] ss:$16 sps:$4 sm:$0xff]  }
 0x68b   : > { %6947 = vmatprep.subr.bf16.mxu0 %v8944_v28  ;;  %v9022_v28 = vld [vmem:[%s12315_s12 + $0x744] ss:$16 sps:$4 sm:$0xff]  }
 0x68d   : > { %7030 = vmatpush1.bf16.msra.mxu1 %v8945_v49  ;;  %v9023_v49 = vld [vmem:[%s12315_s12 + $0x348] ss:$16 sps:$4 sm:$0xff]  }
 0x68e   : > { %6948 = vmatpush1.bf16.msra.mxu0 %v8942_v61  ;;  %7031 = vmatprep.subr.bf16.mxu1 %v8953_v48  ;;  %v9020_v61 = vld [vmem:[%s12315_s12 + $0x740] ss:$16 sps:$4 sm:$0xff]   ;;  %v9031_v48 = vld [vmem:[%s12315_s12 + $0x36c] ss:$16 sps:$4 sm:$0xff]  }
 0x68f   : > { %6949 = vmatprep.subr.bf16.mxu0 %v8950_v47  ;;  %v9028_v47 = vld [vmem:[%s12315_s12 + $0x764] ss:$16 sps:$4 sm:$0xff]  }
 0x691   : > { %7032 = vmatpush1.bf16.msra.mxu1 %v8951_v23  ;;  %v9034_v23 = vld [vmem:[%s12315_s12 + $0x784] ss:$16 sps:$4 sm:$0xff]  }
 0x692   : > { %6950 = vmatpush1.bf16.msra.mxu0 %v8948_v37  ;;  %7033 = vmatprep.subr.bf16.mxu1 %v8959_v31  ;;  %v9029_v37 = vld [vmem:[%s12315_s12 + $0x368] ss:$16 sps:$4 sm:$0xff]   ;;  %v9032_v31 = vld [vmem:[%s12315_s12 + $0x780] ss:$16 sps:$4 sm:$0xff]  }
 0x693   : > { %6951 = vmatprep.subr.bf16.mxu0 %v8956_v40  ;;  %v9037_v40 = vld [vmem:[%s12315_s12 + $0x38c] ss:$16 sps:$4 sm:$0xff]  }
 0x695   : > { %7034 = vmatpush1.bf16.msra.mxu1 %v8957_v19  ;;  %v9040_v19 = vld [vmem:[%s12315_s12 + $0x7a4] ss:$16 sps:$4 sm:$0xff]  }
 0x696   : > { %6952 = vmatpush1.bf16.msra.mxu0 %v8954_v15  ;;  %7044 = vmatprep.subr.bf16.mxu1 %v8965_v18  ;;  %v9035_v15 = vld [vmem:[%s12315_s12 + $0x388] ss:$16 sps:$4 sm:$0xff]   ;;  %v9038_v18 = vld [vmem:[%s12315_s12 + $0x7a0] ss:$16 sps:$4 sm:$0xff]  }
 0x697   : > { %6962 = vmatprep.subr.bf16.mxu0 %v8962_v35  ;;  %v9043_v35 = vld [vmem:[%s12315_s12 + $0x3ac] ss:$16 sps:$4 sm:$0xff]  }
 0x698   : > { %7036 = vmatmul.mubr.bf16.vlgmr.msra.gmra.mrb[4].mxu1 %v11408_v7  ;;  %v8977_v7 = vld [vmem:[%s12315_s12 + $0x24c] ss:$16 sps:$4 sm:$0xff]  }
 0x699   : > { %6954 = vmatmul.mubr.bf16.vlgmr.msra.gmra.mrb[0].mxu0 %v11642_v46  ;;  %7045 = vmatpush1.bf16.msra.mxu1 %v8963_v41  ;;  %v9049_v41 = vld [vmem:[%s12315_s12 + $0x3cc] ss:$16 sps:$4 sm:$0xff]  }
 0x69a   : > { %6963 = vmatpush1.bf16.msra.mxu0 %v8960_v62  ;;  %7046 = vmatprep.subr.bf16.mxu1 %v8971_v29  ;;  %v9046_v62 = vld [vmem:[%s12315_s12 + $0x7c4] ss:$16 sps:$4 sm:$0xff]   ;;  %v9047_v29 = vld [vmem:[%s12315_s12 + $0x3c8] ss:$16 sps:$4 sm:$0xff]  }
 0x69b   : > { %6964 = vmatprep.subr.bf16.mxu0 %v8968_v54  ;;  %6994 = vmatprep.mubr.bf16.mxu0 %v11653_v27  ;;  %v9044_v54 = vld [vmem:[%s12315_s12 + $0x7c0] ss:$16 sps:$4 sm:$0xff]  }
 0x69c   : > { %7076 = vmatprep.mubr.bf16.mxu1 %v11410_v12  ;;  %v8983_v12 = vld [vmem:[%s12315_s12 + $0x26c] ss:$16 sps:$4 sm:$0xff]  }
 0x69d   : > { %7047 = vmatpush1.bf16.msra.mxu1 %v8969_v1  ;;  %v9055_v1 = vld [vmem:[%s12315_s12 + $0x3ec] ss:$16 sps:$4 sm:$0xff]  }
 0x69e   : > { %6965 = vmatpush1.bf16.msra.mxu0 %v8966_v14  ;;  %7048 = vmatprep.subr.bf16.mxu1 %v8977_v7  ;;  %v9052_v14 = vld [vmem:[%s12315_s12 + $0x7e4] ss:$16 sps:$4 sm:$0xff]   ;;  %v9053_v7 = vld [vmem:[%s12315_s12 + $0x3e8] ss:$16 sps:$4 sm:$0xff]  }
 0x69f   : > { %6966 = vmatprep.subr.bf16.mxu0 %v8974_v22  ;;  %v9050_v22 = vld [vmem:[%s12315_s12 + $0x7e0] ss:$16 sps:$4 sm:$0xff]  }
 0x6a1   : > { %7049 = vmatpush1.bf16.msra.mxu1 %v8975_v56  ;;  %v9056_v56 = vld [vmem:[%s12315_s12 + $0x408] ss:$16 sps:$4 sm:$0xff]  }
 0x6a2   : > { %6967 = vmatpush1.bf16.msra.mxu0 %v8972_v8  ;;  %7050 = vmatprep.subr.bf16.mxu1 %v8983_v12  ;;  %v9058_v8 = vld [vmem:[%s12315_s12 + $0x40c] ss:$16 sps:$4 sm:$0xff]  }
 0x6a3   : > { %6968 = vmatprep.subr.bf16.mxu0 %v8980_v45  ;;  %v11841_v45 = vpack.c.bf16 %v11621_v21, %v11621_v21  ;;  %v9061_v12 = vld [vmem:[%s12315_s12 + $0x42c] ss:$16 sps:$4 sm:$0xff]  }
 0x6a4   : > { %v9157_v21 = vld [vmem:[#allocation7 + $0x14] ss:$8 sps:$4 sm:$0xff]  }
 0x6a5   : > { %7051 = vmatpush1.bf16.msra.mxu1 %v8981_v44  ;;  %v9154_v44 = vld [vmem:[#allocation7 + $0x4] ss:$8 sps:$4 sm:$0xff]  }
 0x6a6   : > { %6969 = vmatpush1.bf16.msra.mxu0 %v8978_v59  ;;  %7052 = vmatprep.subr.bf16.mxu1 %v8989_v38  ;;  %v9152_v59 = vld [vmem:[#allocation7] ss:$8 sps:$4 sm:$0xff]   ;;  %v9064_v38 = vld [vmem:[%s12315_s12 + $0x44c] ss:$16 sps:$4 sm:$0xff]  }
 0x6a7   : > { %6970 = vmatprep.subr.bf16.mxu0 %v8986_v17  ;;  %v9059_v17 = vld [vmem:[%s12315_s12 + $0x428] ss:$16 sps:$4 sm:$0xff]  }
 0x6a9   : > { %7053 = vmatpush1.bf16.msra.mxu1 %v8987_v42  ;;  %v9062_v42 = vld [vmem:[%s12315_s12 + $0x448] ss:$16 sps:$4 sm:$0xff]  }
 0x6aa   : > { %6971 = vmatpush1.bf16.msra.mxu0 %v8984_v55  ;;  %7054 = vmatprep.subr.bf16.mxu1 %v8995_v4  ;;  %v9155_v55 = vld [vmem:[#allocation7 + $0x10] ss:$8 sps:$4 sm:$0xff]   ;;  %v9163_v4 = vld [vmem:[#allocation7 + $0x34] ss:$8 sps:$4 sm:$0xff]  }
 0x6ab   : > { %6972 = vmatprep.subr.bf16.mxu0 %v8992_v39  ;;  %v9158_v39 = vld [vmem:[#allocation7 + $0x20] ss:$8 sps:$4 sm:$0xff]  }
 0x6ad   : > { %7055 = vmatpush1.bf16.msra.mxu1 %v8993_v52  ;;  %v9070_v52 = vld [vmem:[%s12315_s12 + $0x48c] ss:$16 sps:$4 sm:$0xff]  }
 0x6ae   : > { %6973 = vmatpush1.bf16.msra.mxu0 %v8990_v36  ;;  %7056 = vmatprep.subr.bf16.mxu1 %v9001_v9  ;;  %v9065_v36 = vld [vmem:[%s12315_s12 + $0x468] ss:$16 sps:$4 sm:$0xff]   ;;  %v9166_v9 = vld [vmem:[#allocation7 + $0x44] ss:$8 sps:$4 sm:$0xff]  }
 0x6af   : > { %6974 = vmatprep.subr.bf16.mxu0 %v8998_v34  ;;  %v9161_v34 = vld [vmem:[#allocation7 + $0x30] ss:$8 sps:$4 sm:$0xff]  }
 0x6b1   : > { %7057 = vmatpush1.bf16.msra.mxu1 %v8999_v20  ;;  %v9073_v20 = vld [vmem:[%s12315_s12 + $0x4ac] ss:$16 sps:$4 sm:$0xff]  }
 0x6b2   : > { %6975 = vmatpush1.bf16.msra.mxu0 %v8996_v13  ;;  %7058 = vmatprep.subr.bf16.mxu1 %v9007_v26  ;;  %v9068_v13 = vld [vmem:[%s12315_s12 + $0x488] ss:$16 sps:$4 sm:$0xff]   ;;  %v9169_v26 = vld [vmem:[#allocation7 + $0x54] ss:$8 sps:$4 sm:$0xff]  }
 0x6b3   : > { %6976 = vmatprep.subr.bf16.mxu0 %v9004_v43  ;;  %v9164_v43 = vld [vmem:[#allocation7 + $0x40] ss:$8 sps:$4 sm:$0xff]  }
 0x6b5   : > { %7059 = vmatpush1.bf16.msra.mxu1 %v9005_v5  ;;  %v9076_v5 = vld [vmem:[%s12315_s12 + $0x4cc] ss:$16 sps:$4 sm:$0xff]  }
 0x6b6   : > { %6977 = vmatpush1.bf16.msra.mxu0 %v9002_v51  ;;  %7060 = vmatprep.subr.bf16.mxu1 %v9013_v53  ;;  %v9071_v51 = vld [vmem:[%s12315_s12 + $0x4a8] ss:$16 sps:$4 sm:$0xff]   ;;  %v9172_v53 = vld [vmem:[#allocation7 + $0x64] ss:$8 sps:$4 sm:$0xff]  }
 0x6b7   : > { %6978 = vmatprep.subr.bf16.mxu0 %v9010_v60  ;;  %v9167_v60 = vld [vmem:[#allocation7 + $0x50] ss:$8 sps:$4 sm:$0xff]  }
 0x6b9   : > { %7061 = vmatpush1.bf16.msra.mxu1 %v9011_v32  ;;  %v9079_v32 = vld [vmem:[%s12315_s12 + $0x4ec] ss:$16 sps:$4 sm:$0xff]  }
 0x6ba   : > { %6979 = vmatpush1.bf16.msra.mxu0 %v9008_v11  ;;  %7062 = vmatprep.subr.bf16.mxu1 %v9019_v10  ;;  %v9074_v11 = vld [vmem:[%s12315_s12 + $0x4c8] ss:$16 sps:$4 sm:$0xff]   ;;  %v9175_v10 = vld [vmem:[#allocation7 + $0x74] ss:$8 sps:$4 sm:$0xff]  }
 0x6bb   : > { %6980 = vmatprep.subr.bf16.mxu0 %v9016_v30  ;;  %v9170_v30 = vld [vmem:[#allocation7 + $0x60] ss:$8 sps:$4 sm:$0xff]  }
 0x6bd   : > { %7063 = vmatpush1.bf16.msra.mxu1 %v9017_v63  ;;  %v9082_v63 = vld [vmem:[%s12315_s12 + $0x50c] ss:$16 sps:$4 sm:$0xff]  }
 0x6be   : > { %6981 = vmatpush1.bf16.msra.mxu0 %v9014_v50  ;;  %7064 = vmatprep.subr.bf16.mxu1 %v9025_v3  ;;  %v9077_v50 = vld [vmem:[%s12315_s12 + $0x4e8] ss:$16 sps:$4 sm:$0xff]   ;;  %v9178_v3 = vld [vmem:[#allocation7 + $0x84] ss:$8 sps:$4 sm:$0xff]  }
 0x6bf   : > { %6982 = vmatprep.subr.bf16.mxu0 %v9022_v28  ;;  %v9173_v28 = vld [vmem:[#allocation7 + $0x70] ss:$8 sps:$4 sm:$0xff]  }
 0x6c1   : > { %7065 = vmatpush1.bf16.msra.mxu1 %v9023_v49  ;;  %v9085_v49 = vld [vmem:[%s12315_s12 + $0x52c] ss:$16 sps:$4 sm:$0xff]  }
 0x6c2   : > { %6983 = vmatpush1.bf16.msra.mxu0 %v9020_v61  ;;  %7066 = vmatprep.subr.bf16.mxu1 %v9031_v48  ;;  %v9080_v61 = vld [vmem:[%s12315_s12 + $0x508] ss:$16 sps:$4 sm:$0xff]   ;;  %v9181_v48 = vld [vmem:[#allocation7 + $0x94] ss:$8 sps:$4 sm:$0xff]  }
 0x6c3   : > { %6984 = vmatprep.subr.bf16.mxu0 %v9028_v47  ;;  %v9176_v47 = vld [vmem:[#allocation7 + $0x80] ss:$8 sps:$4 sm:$0xff]  }
 0x6c5   : > { %7067 = vmatpush1.bf16.msra.mxu1 %v9029_v37  ;;  %v9088_v37 = vld [vmem:[%s12315_s12 + $0x54c] ss:$16 sps:$4 sm:$0xff]  }
 0x6c6   : > { %6985 = vmatpush1.bf16.msra.mxu0 %v9026_v57  ;;  %7068 = vmatprep.subr.bf16.mxu1 %v9037_v40  ;;  %v9083_v57 = vld [vmem:[%s12315_s12 + $0x528] ss:$16 sps:$4 sm:$0xff]   ;;  %v9184_v40 = vld [vmem:[#allocation7 + $0xa4] ss:$8 sps:$4 sm:$0xff]  }
 0x6c7   : > { %6986 = vmatprep.subr.bf16.mxu0 %v9034_v23  ;;  %v9179_v23 = vld [vmem:[#allocation7 + $0x90] ss:$8 sps:$4 sm:$0xff]  }
 0x6c9   : > { %7069 = vmatpush1.bf16.msra.mxu1 %v9035_v15  ;;  %v9091_v15 = vld [vmem:[%s12315_s12 + $0x56c] ss:$16 sps:$4 sm:$0xff]  }
 0x6ca   : > { %6987 = vmatpush1.bf16.msra.mxu0 %v9032_v31  ;;  %7070 = vmatprep.subr.bf16.mxu1 %v9043_v35  ;;  %v9086_v31 = vld [vmem:[%s12315_s12 + $0x548] ss:$16 sps:$4 sm:$0xff]   ;;  %v9187_v35 = vld [vmem:[#allocation7 + $0xb4] ss:$8 sps:$4 sm:$0xff]  }
 0x6cb   : > { %6988 = vmatprep.subr.bf16.mxu0 %v9040_v19  ;;  %v9182_v19 = vld [vmem:[#allocation7 + $0xa0] ss:$8 sps:$4 sm:$0xff]  }
 0x6cd   : > { %7071 = vmatpush1.bf16.msra.mxu1 %v9041_v2  ;;  %v9094_v2 = vld [vmem:[%s12315_s12 + $0x58c] ss:$16 sps:$4 sm:$0xff]  }
 0x6ce   : > { %6989 = vmatpush1.bf16.msra.mxu0 %v9038_v18  ;;  %7072 = vmatprep.subr.bf16.mxu1 %v9049_v41  ;;  %v9089_v18 = vld [vmem:[%s12315_s12 + $0x568] ss:$16 sps:$4 sm:$0xff]   ;;  %v9190_v41 = vld [vmem:[#allocation7 + $0xc4] ss:$8 sps:$4 sm:$0xff]  }
 0x6cf   : > { %6990 = vmatprep.subr.bf16.mxu0 %v9046_v62  ;;  %v9185_v62 = vld [vmem:[#allocation7 + $0xb0] ss:$8 sps:$4 sm:$0xff]  }
 0x6d1   : > { %7073 = vmatpush1.bf16.msra.mxu1 %v9047_v29  ;;  %v9097_v29 = vld [vmem:[%s12315_s12 + $0x5ac] ss:$16 sps:$4 sm:$0xff]  }
 0x6d2   : > { %6991 = vmatpush1.bf16.msra.mxu0 %v9044_v54  ;;  %7074 = vmatprep.subr.bf16.mxu1 %v9055_v1  ;;  %v9092_v54 = vld [vmem:[%s12315_s12 + $0x588] ss:$16 sps:$4 sm:$0xff]   ;;  %v9193_v1 = vld [vmem:[#allocation7 + $0xd4] ss:$8 sps:$4 sm:$0xff]  }
 0x6d3   : > { %6992 = vmatprep.subr.bf16.mxu0 %v9052_v14  ;;  %v9188_v14 = vld [vmem:[#allocation7 + $0xc0] ss:$8 sps:$4 sm:$0xff]  }
 0x6d5   : > { %7075 = vmatpush1.bf16.msra.mxu1 %v9053_v7  ;;  %v9100_v7 = vld [vmem:[%s12315_s12 + $0x5cc] ss:$16 sps:$4 sm:$0xff]  }
 0x6d6   : > { %6993 = vmatpush1.bf16.msra.mxu0 %v9050_v22  ;;  %7085 = vmatprep.subr.bf16.mxu1 %v9058_v8  ;;  %v9095_v22 = vld [vmem:[%s12315_s12 + $0x5a8] ss:$16 sps:$4 sm:$0xff]  }
 0x6d7   : > { %7571 = vmatprep.subr.bf16.mxu0 %v9154_v44  ;;  %v9191_v8 = vld [vmem:[#allocation7 + $0xd0] ss:$8 sps:$4 sm:$0xff]   ;;  %v9106_v44 = vld [vmem:[%s12315_s12 + $0x60c] ss:$16 sps:$4 sm:$0xff]  }
 0x6d8   : > { %7077 = vmatmul.mubr.bf16.vlgmr.msra.gmra.mrb[4].mxu1 %v11412_v24  ;;  %v9160_v24 = vld [vmem:[#allocation7 + $0x24] ss:$8 sps:$4 sm:$0xff]  }
 0x6d9   : > { %6995 = vmatmul.mubr.bf16.vlgmr.msra.gmra.mrb[0].mxu0 %v11841_v45  ;;  %7086 = vmatpush1.bf16.msra.mxu1 %v9056_v56  ;;  %v9098_v56 = vld [vmem:[%s12315_s12 + $0x5c8] ss:$16 sps:$4 sm:$0xff]  }
 0x6da   : > { %7117 = vmatprep.mubr.bf16.mxu1 %v11534_v0  ;;  %7087 = vmatprep.subr.bf16.mxu1 %v9061_v12  ;;  %v9067_v0 = vld [vmem:[%s12315_s12 + $0x46c] ss:$16 sps:$4 sm:$0xff]  }
 0x6db   : > { %7572 = vmatpush1.bf16.msra.mxu0 %v9152_v59  ;;  %v9103_v12 = vld [vmem:[%s12315_s12 + $0x5ec] ss:$16 sps:$4 sm:$0xff]   ;;  %v9101_v59 = vld [vmem:[%s12315_s12 + $0x5e8] ss:$16 sps:$4 sm:$0xff]  }
 0x6dc   : > { %7573 = vmatprep.subr.bf16.mxu0 %v9157_v21  ;;  %v9109_v21 = vld [vmem:[%s12315_s12 + $0x62c] ss:$16 sps:$4 sm:$0xff]  }
 0x6dd   : > { %7088 = vmatpush1.bf16.msra.mxu1 %v9059_v17  ;;  %v9104_v17 = vld [vmem:[%s12315_s12 + $0x608] ss:$16 sps:$4 sm:$0xff]  }
 0x6de   : > { %7089 = vmatprep.subr.bf16.mxu1 %v9064_v38  ;;  %v9107_v38 = vld [vmem:[%s12315_s12 + $0x628] ss:$16 sps:$4 sm:$0xff]  }
 0x6df   : > { %7574 = vmatpush1.bf16.msra.mxu0 %v9155_v55  ;;  %v9112_v55 = vld [vmem:[%s12315_s12 + $0x64c] ss:$16 sps:$4 sm:$0xff]  }
 0x6e0   : > { %7575 = vmatprep.subr.bf16.mxu0 %v9160_v24  ;;  %v9110_v24 = vld [vmem:[%s12315_s12 + $0x648] ss:$16 sps:$4 sm:$0xff]  }
 0x6e1   : > { %7090 = vmatpush1.bf16.msra.mxu1 %v9062_v42  ;;  %v9118_v42 = vld [vmem:[%s12315_s12 + $0x68c] ss:$16 sps:$4 sm:$0xff]  }
 0x6e2   : > { %7091 = vmatprep.subr.bf16.mxu1 %v9067_v0  ;;  %v9116_v0 = vld [vmem:[%s12315_s12 + $0x688] ss:$16 sps:$4 sm:$0xff]  }
 0x6e3   : > { %7576 = vmatpush1.bf16.msra.mxu0 %v9158_v39  ;;  %v9121_v39 = vld [vmem:[%s12315_s12 + $0x6ac] ss:$16 sps:$4 sm:$0xff]  }
 0x6e4   : > { %7577 = vmatprep.subr.bf16.mxu0 %v9163_v4  ;;  %v9119_v4 = vld [vmem:[%s12315_s12 + $0x6a8] ss:$16 sps:$4 sm:$0xff]  }
 0x6e5   : > { %7092 = vmatpush1.bf16.msra.mxu1 %v9065_v36  ;;  %v9124_v36 = vld [vmem:[%s12315_s12 + $0x6cc] ss:$16 sps:$4 sm:$0xff]  }
 0x6e6   : > { %7093 = vmatprep.subr.bf16.mxu1 %v9070_v52  ;;  %v9196_v52 = vld [vmem:[#allocation7 + $0xe4] ss:$8 sps:$4 sm:$0xff]  }
 0x6e7   : > { %7578 = vmatpush1.bf16.msra.mxu0 %v9161_v34 }
 0x6e8   : > { %7579 = vmatprep.subr.bf16.mxu0 %v9166_v9  ;;  %v9194_v9 = vld [vmem:[#allocation7 + $0xe0] ss:$8 sps:$4 sm:$0xff]  }
 0x6e9   : > { %7094 = vmatpush1.bf16.msra.mxu1 %v9068_v13 }
 0x6ea   : > { %7095 = vmatprep.subr.bf16.mxu1 %v9073_v20 }
 0x6eb   : > { %7580 = vmatpush1.bf16.msra.mxu0 %v9164_v43  ;;  %v9122_v43 = vld [vmem:[%s12315_s12 + $0x6c8] ss:$16 sps:$4 sm:$0xff]  }
 0x6ec   : > { %7581 = vmatprep.subr.bf16.mxu0 %v9169_v26 }
 0x6ed   : > { %7096 = vmatpush1.bf16.msra.mxu1 %v9071_v51  ;;  %v9127_v51 = vld [vmem:[%s12315_s12 + $0x6ec] ss:$16 sps:$4 sm:$0xff]  }
 0x6ee   : > { %7097 = vmatprep.subr.bf16.mxu1 %v9076_v5  ;;  %v9199_v5 = vld [vmem:[#allocation7 + $0xf4] ss:$8 sps:$4 sm:$0xff]  }
 0x6ef   : > { %7582 = vmatpush1.bf16.msra.mxu0 %v9167_v60  ;;  %v9197_v60 = vld [vmem:[#allocation7 + $0xf0] ss:$8 sps:$4 sm:$0xff]  }
 0x6f0   : > { %7583 = vmatprep.subr.bf16.mxu0 %v9172_v53  ;;  %v9125_v53 = vld [vmem:[%s12315_s12 + $0x6e8] ss:$16 sps:$4 sm:$0xff]  }
 0x6f1   : > { %7098 = vmatpush1.bf16.msra.mxu1 %v9074_v11  ;;  %v9130_v11 = vld [vmem:[%s12315_s12 + $0x70c] ss:$16 sps:$4 sm:$0xff]  }
 0x6f2   : > { %7099 = vmatprep.subr.bf16.mxu1 %v9079_v32  ;;  %v9202_v32 = vld [vmem:[#allocation7 + $0x104] ss:$8 sps:$4 sm:$0xff]  }
 0x6f3   : > { %7584 = vmatpush1.bf16.msra.mxu0 %v9170_v30  ;;  %v9128_v30 = vld [vmem:[%s12315_s12 + $0x708] ss:$16 sps:$4 sm:$0xff]  }
 0x6f4   : > { %7585 = vmatprep.subr.bf16.mxu0 %v9175_v10  ;;  %v9133_v10 = vld [vmem:[%s12315_s12 + $0x72c] ss:$16 sps:$4 sm:$0xff]  }
 0x6f5   : > { %7100 = vmatpush1.bf16.msra.mxu1 %v9077_v50  ;;  %v9131_v50 = vld [vmem:[%s12315_s12 + $0x728] ss:$16 sps:$4 sm:$0xff]  }
 0x6f6   : > { %7101 = vmatprep.subr.bf16.mxu1 %v9082_v63  ;;  %v9136_v63 = vld [vmem:[%s12315_s12 + $0x74c] ss:$16 sps:$4 sm:$0xff]  }
 0x6f7   : > { %7586 = vmatpush1.bf16.msra.mxu0 %v9173_v28  ;;  %v9134_v28 = vld [vmem:[%s12315_s12 + $0x748] ss:$16 sps:$4 sm:$0xff]  }
 0x6f8   : > { %7587 = vmatprep.subr.bf16.mxu0 %v9178_v3  ;;  %v9139_v3 = vld [vmem:[%s12315_s12 + $0x76c] ss:$16 sps:$4 sm:$0xff]  }
 0x6f9   : > { %7102 = vmatpush1.bf16.msra.mxu1 %v9080_v61  ;;  %v9137_v61 = vld [vmem:[%s12315_s12 + $0x768] ss:$16 sps:$4 sm:$0xff]  }
 0x6fa   : > { %7103 = vmatprep.subr.bf16.mxu1 %v9085_v49  ;;  %v9142_v49 = vld [vmem:[%s12315_s12 + $0x78c] ss:$16 sps:$4 sm:$0xff]  }
 0x6fb   : > { %7588 = vmatpush1.bf16.msra.mxu0 %v9176_v47  ;;  %v9140_v47 = vld [vmem:[%s12315_s12 + $0x788] ss:$16 sps:$4 sm:$0xff]  }
 0x6fc   : > { %7589 = vmatprep.subr.bf16.mxu0 %v9181_v48  ;;  %v9145_v48 = vld [vmem:[%s12315_s12 + $0x7ac] ss:$16 sps:$4 sm:$0xff]  }
 0x6fd   : > { %7104 = vmatpush1.bf16.msra.mxu1 %v9083_v57  ;;  %v9143_v57 = vld [vmem:[%s12315_s12 + $0x7a8] ss:$16 sps:$4 sm:$0xff]  }
 0x6fe   : > { %7105 = vmatprep.subr.bf16.mxu1 %v9088_v37  ;;  %v9148_v37 = vld [vmem:[%s12315_s12 + $0x7cc] ss:$16 sps:$4 sm:$0xff]  }
 0x6ff   : > { %7590 = vmatpush1.bf16.msra.mxu0 %v9179_v23  ;;  %v9146_v23 = vld [vmem:[%s12315_s12 + $0x7c8] ss:$16 sps:$4 sm:$0xff]  }
 0x700   : > { %7591 = vmatprep.subr.bf16.mxu0 %v9184_v40  ;;  %v9151_v40 = vld [vmem:[%s12315_s12 + $0x7ec] ss:$16 sps:$4 sm:$0xff]  }
 0x701   : > { %7106 = vmatpush1.bf16.msra.mxu1 %v9086_v31  ;;  %v9149_v31 = vld [vmem:[%s12315_s12 + $0x7e8] ss:$16 sps:$4 sm:$0xff]  }
 0x702   : > { %7107 = vmatprep.subr.bf16.mxu1 %v9091_v15  ;;  %v12038_v15 = vld [vmem:[%s12317_s22] sm:$0xf]  ;;  %s12320_s22 = sld [smem:[#allocation40_spill]] }
 0x703   : > { %7592 = vmatpush1.bf16.msra.mxu0 %v9182_v19  ;;  %v5542_v19 = vrot.slane %v12038_v15, %v11316_v16 }
 0x704   : > { %7593 = vmatprep.subr.bf16.mxu0 %v9187_v35  ;;  %v5546_v35 = vrot.slane %v12038_v15, %v11322_v6 }
 0x705   : > { %7108 = vmatpush1.bf16.msra.mxu1 %v9089_v18 }
 0x706   : > { %7109 = vmatprep.subr.bf16.mxu1 %v9094_v2 }
 0x707   : > { %7594 = vmatpush1.bf16.msra.mxu0 %v9185_v62 }
 0x708   : > { %7595 = vmatprep.subr.bf16.mxu0 %v9190_v41 }
 0x709   : > { %7110 = vmatpush1.bf16.msra.mxu1 %v9092_v54 }
 0x70a   : > { %7111 = vmatprep.subr.bf16.mxu1 %v9097_v29 }
 0x70b   : > { %7596 = vmatpush1.bf16.msra.mxu0 %v9188_v14 }
 0x70c   : > { %7597 = vmatprep.subr.bf16.mxu0 %v9193_v1 }
 0x70d   : > { %7112 = vmatpush1.bf16.msra.mxu1 %v9095_v22 }
 0x70e   : > { %7113 = vmatprep.subr.bf16.mxu1 %v9100_v7 }
 0x70f   : > { %7598 = vmatpush1.bf16.msra.mxu0 %v9191_v8  ;;  %v9200_v8 = vld [vmem:[#allocation7 + $0x100] ss:$8 sps:$4 sm:$0xff]  }
 0x710   : > { %7599 = vmatprep.subr.bf16.mxu0 %v9196_v52  ;;  %v7676_v52 = vld [vmem:[%s12318_s6 + $0xa8] sm:$0xff] }
 0x711   : > { %7114 = vmatpush1.bf16.msra.mxu1 %v9098_v56 }
 0x712   : > { %7115 = vmatprep.subr.bf16.mxu1 %v9103_v12  ;;  %v9205_v12 = vld [vmem:[#allocation7 + $0x114] ss:$8 sps:$4 sm:$0xff]  }
 0x713   : > { %7600 = vmatpush1.bf16.msra.mxu0 %v9194_v9  ;;  %v9206_v9 = vld [vmem:[#allocation7 + $0x120] ss:$8 sps:$4 sm:$0xff]  }
 0x714   : > { %7601 = vmatprep.subr.bf16.mxu0 %v9199_v5  ;;  %v7678_v5 = vld [vmem:[%s12318_s6 + $0xb8] sm:$0xff] }
 0x715   : > { %7116 = vmatpush1.bf16.msra.mxu1 %v9101_v59  ;;  %v9203_v59 = vld [vmem:[#allocation7 + $0x110] ss:$8 sps:$4 sm:$0xff]  }
 0x716   : > { %7126 = vmatprep.subr.bf16.mxu1 %v9106_v44  ;;  %v9208_v44 = vld [vmem:[#allocation7 + $0x124] ss:$8 sps:$4 sm:$0xff]  }
 0x717   : > { %7602 = vmatpush1.bf16.msra.mxu0 %v9197_v60 }
 0x718   : > { %7118 = vmatmul.mubr.bf16.vlgmr.msra.gmra.mrb[4].mxu1 %v11642_v46  ;;  %v9115_v46 = vld [vmem:[%s12315_s12 + $0x66c] ss:$16 sps:$4 sm:$0xff]   ;;  %7612 = vmatprep.subr.bf16.mxu0 %v9202_v32  ;;  %v7661_v32 = vld [vmem:[%s12318_s6 + $0x30] sm:$0xff] }
 0x719   : > { %7127 = vmatpush1.bf16.msra.mxu1 %v9104_v17  ;;  %7158 = vmatprep.mubr.bf16.mxu1 %v11653_v27  ;;  %v9113_v27 = vld [vmem:[%s12315_s12 + $0x668] ss:$16 sps:$4 sm:$0xff]   ;;  %v7671_v17 = vld [vmem:[%s12318_s6 + $0x80] sm:$0xff] }
 0x71a   : > { %7128 = vmatprep.subr.bf16.mxu1 %v9109_v21  ;;  %v7672_v21 = vld [vmem:[%s12318_s6 + $0x88] sm:$0xff] }
 0x71d   : > { %7129 = vmatpush1.bf16.msra.mxu1 %v9107_v38  ;;  %v7655_v38 = vld [vmem:[%s12318_s6] sm:$0xff] }
 0x71e   : > { %7130 = vmatprep.subr.bf16.mxu1 %v9112_v55  ;;  %v8505_v55 = vpack.c.bf16 %v7672_v21, %v7671_v17  ;;  %v9238_v17 = vld [vmem:[#allocation7 + $0x1c4] ss:$8 sps:$4 sm:$0xff]   ;;  %v9236_v21 = vld [vmem:[#allocation7 + $0x1c0] ss:$8 sps:$4 sm:$0xff]  }
 0x721   : > { %7131 = vmatpush1.bf16.msra.mxu1 %v9110_v24  ;;  %v7656_v24 = vld [vmem:[%s12318_s6 + $0x8] sm:$0xff] }
 0x722   : > { %7132 = vmatprep.subr.bf16.mxu1 %v9115_v46  ;;  %v7673_v46 = vld [vmem:[%s12318_s6 + $0x90] sm:$0xff] }
 0x725   : > { %7133 = vmatpush1.bf16.msra.mxu1 %v9113_v27  ;;  %v7674_v27 = vld [vmem:[%s12318_s6 + $0x98] sm:$0xff] }
 0x726   : > { %7134 = vmatprep.subr.bf16.mxu1 %v9118_v42  ;;  %v8507_v42 = vpack.c.bf16 %v7656_v24, %v7655_v38  ;;  %v9241_v38 = vld [vmem:[#allocation7 + $0x1d4] ss:$8 sps:$4 sm:$0xff]   ;;  %v9244_v24 = vld [vmem:[#allocation7 + $0x1e4] ss:$8 sps:$4 sm:$0xff]  }
 0x729   : > { %7135 = vmatpush1.bf16.msra.mxu1 %v9116_v0  ;;  %v8509_v0 = vpack.c.bf16 %v7674_v27, %v7673_v46  ;;  %v9242_v46 = vld [vmem:[#allocation7 + $0x1e0] ss:$8 sps:$4 sm:$0xff]   ;;  %v9247_v27 = vld [vmem:[#allocation7 + $0x1f4] ss:$8 sps:$4 sm:$0xff]  }
 0x72a   : > { %7136 = vmatprep.subr.bf16.mxu1 %v9121_v39  ;;  %v7657_v39 = vld [vmem:[%s12318_s6 + $0x10] sm:$0xff] }
 0x72b   : > { %v6873_v34 = vpop.f32.mrb[0].mxu1 }
 0x72c   : > { %v6875_v13 = vpop.f32.mrb[1].mxu1  ;;  %v6874_v18 = vadd.f32 %v6873_v34, %v5542_v19  ;;  %v7665_v19 = vld [vmem:[%s12318_s6 + $0x50] sm:$0xff] }
 0x72d   : > { %v6877_v20 = vpop.f32.mrb[2].mxu1  ;;  %7137 = vmatpush1.bf16.msra.mxu1 %v9119_v4  ;;  %v6876_v2 = vadd.f32 %v6875_v13, %v5546_v35  ;;  %v7658_v4 = vld [vmem:[%s12318_s6 + $0x18] sm:$0xff] }
 0x72e   : > { %v6878_v26 = vpop.f32.mrb[3].mxu1  ;;  %7138 = vmatprep.subr.bf16.mxu1 %v9124_v36  ;;  %v7675_v36 = vld [vmem:[%s12318_s6 + $0xa0] sm:$0xff]  ;;  %v8511_v34 = vpack.c.bf16 %v7658_v4, %v7657_v39  ;;  %v7666_v35 = vld [vmem:[%s12318_s6 + $0x58] sm:$0xff]  ;;  %v5554_v39 = vrot.slane %v12038_v15, %v5171_v58 }
 0x72f   : > { %v8513_v13 = vpack.c.bf16 %v7676_v52, %v7675_v36  ;;  %v7659_v20 = vld [vmem:[%s12318_s6 + $0x20] sm:$0xff] }
 0x730   : > { %v9211_v26 = vld [vmem:[#allocation7 + $0x134] ss:$8 sps:$4 sm:$0xff]  }
 0x731   : > { %7139 = vmatpush1.bf16.msra.mxu1 %v9122_v43  ;;  %v7660_v43 = vld [vmem:[%s12318_s6 + $0x28] sm:$0xff] }
 0x732   : > { %7140 = vmatprep.subr.bf16.mxu1 %v9127_v51  ;;  %v7677_v51 = vld [vmem:[%s12318_s6 + $0xb0] sm:$0xff]  ;;  %v8515_v60 = vpack.c.bf16 %v7660_v43, %v7659_v20 }
 0x735   : > { %7141 = vmatpush1.bf16.msra.mxu1 %v9125_v53  ;;  %v9209_v53 = vld [vmem:[#allocation7 + $0x130] ss:$8 sps:$4 sm:$0xff]  }
 0x736   : > { %7142 = vmatprep.subr.bf16.mxu1 %v9130_v11  ;;  %v8517_v11 = vpack.c.bf16 %v7678_v5, %v7677_v51  ;;  %v7686_v5 = vld [vmem:[%s12318_s6 + $0xf8] sm:$0xff] }
 0x739   : > { %7143 = vmatpush1.bf16.msra.mxu1 %v9128_v30  ;;  %v7662_v30 = vld [vmem:[%s12318_s6 + $0x38] sm:$0xff] }
 0x73a   : > { %7144 = vmatprep.subr.bf16.mxu1 %v9133_v10  ;;  %v9214_v10 = vld [vmem:[#allocation7 + $0x144] ss:$8 sps:$4 sm:$0xff]  }
 0x73d   : > { %7145 = vmatpush1.bf16.msra.mxu1 %v9131_v50  ;;  %v7679_v50 = vld [vmem:[%s12318_s6 + $0xc0] sm:$0xff] }
 0x73e   : > { %7146 = vmatprep.subr.bf16.mxu1 %v9136_v63  ;;  %v7680_v63 = vld [vmem:[%s12318_s6 + $0xc8] sm:$0xff] }
 0x741   : > { %7147 = vmatpush1.bf16.msra.mxu1 %v9134_v28  ;;  %v8519_v28 = vpack.c.bf16 %v7662_v30, %v7661_v32  ;;  %v7239_v30 = vld [vmem:[%s12319_s25] sm:$0x3] }
 0x742   : > { %7148 = vmatprep.subr.bf16.mxu1 %v9139_v3  ;;  %v9212_v3 = vld [vmem:[#allocation7 + $0x140] ss:$8 sps:$4 sm:$0xff]  }
 0x745   : > { %7149 = vmatpush1.bf16.msra.mxu1 %v9137_v61  ;;  %v8521_v61 = vpack.c.bf16 %v7680_v63, %v7679_v50  ;;  %v7248_v50 = vrot.slane %v7239_v30, %v11322_v6 }
 0x746   : > { %7150 = vmatprep.subr.bf16.mxu1 %v9142_v49  ;;  %v7663_v49 = vld [vmem:[%s12318_s6 + $0x40] sm:$0xff] }
 0x749   : > { %7151 = vmatpush1.bf16.msra.mxu1 %v9140_v47  ;;  %v7664_v47 = vld [vmem:[%s12318_s6 + $0x48] sm:$0xff] }
 0x74a   : > { %7152 = vmatprep.subr.bf16.mxu1 %v9145_v48  ;;  %v9217_v48 = vld [vmem:[#allocation7 + $0x154] ss:$8 sps:$4 sm:$0xff]  }
 0x74d   : > { %7153 = vmatpush1.bf16.msra.mxu1 %v9143_v57  ;;  %v7681_v57 = vld [vmem:[%s12318_s6 + $0xd0] sm:$0xff] }
 0x74e   : > { %7154 = vmatprep.subr.bf16.mxu1 %v9148_v37  ;;  %v7682_v37 = vld [vmem:[%s12318_s6 + $0xd8] sm:$0xff] }
 0x751   : > { %7155 = vmatpush1.bf16.msra.mxu1 %v9146_v23  ;;  %v8523_v23 = vpack.c.bf16 %v7664_v47, %v7663_v49 }
 0x752   : > { %7156 = vmatprep.subr.bf16.mxu1 %v9151_v40  ;;  %v9215_v40 = vld [vmem:[#allocation7 + $0x150] ss:$8 sps:$4 sm:$0xff]  }
 0x755   : > { %7157 = vmatpush1.bf16.msra.mxu1 %v9149_v31  ;;  %v8525_v31 = vpack.c.bf16 %v7682_v37, %v7681_v57 }
 0x756   : > { %8506 = vmatprep.subr.bf16.mxu1 %v8505_v55  ;;  %v9239_v55 = vld [vmem:[#allocation7 + $0x1d0] ss:$8 sps:$4 sm:$0xff]  }
 0x758   : > { %7159 = vmatmul.mubr.bf16.vlgmr.msra.gmra.mrb[4].mxu1 %v11841_v45 }
 0x759   : > { %8508 = vmatpush3.bf16.msra.mxu1 %v8507_v42  ;;  %v9245_v42 = vld [vmem:[#allocation7 + $0x1f0] ss:$8 sps:$4 sm:$0xff]  }
 0x75a   : > { %8510 = vmatprep.subr.bf16.mxu1 %v8509_v0  ;;  %v5550_v0 = vrot.slane %v12038_v15, %v5167_v25  ;;  %v7667_v25 = vld [vmem:[%s12318_s6 + $0x60] sm:$0xff]  ;;  %v7685_v15 = vld [vmem:[%s12318_s6 + $0xf0] sm:$0xff] }
 0x75b   : > { %v8531_v58 = vpack.c.bf16 %v7668_v33, %v7667_v25 }
 0x75d   : > { %8512 = vmatpush3.bf16.msra.mxu1 %v8511_v34 }
 0x75e   : > { %8514 = vmatprep.subr.bf16.mxu1 %v8513_v13 }
 0x761   : > { %8516 = vmatpush3.bf16.msra.mxu1 %v8515_v60  ;;  %v8533_v60 = vpack.c.bf16 %v7686_v5, %v7685_v15 }
 0x762   : > { %8518 = vmatprep.subr.bf16.mxu1 %v8517_v11  ;;  %v7670_v11 = vld [vmem:[%s12318_s6 + $0x78] sm:$0xff] }
 0x765   : > { %8520 = vmatpush3.bf16.msra.mxu1 %v8519_v28 }
 0x766   : > { %8522 = vmatprep.subr.bf16.mxu1 %v8521_v61 }
 0x769   : > { %8524 = vmatpush3.bf16.msra.mxu1 %v8523_v23  ;;  %v8356_v23 = vld [vmem:[%s12320_s22] ss:$0 sm:$0xff] }
 0x76a   : > { %8526 = vmatprep.subr.bf16.mxu1 %v8525_v31 }
 0x7ac   : > { %v6996_v62 = vpop.f32.mrb[0].mxu0 }
 0x7ad   : > { %v8546_v41 = vadd.f32 %v6996_v62, %v6874_v18  ;;  %v6998_v54 = vpop.f32.mrb[1].mxu0  ;;  %v9220_v18 = vld [vmem:[#allocation7 + $0x164] ss:$8 sps:$4 sm:$0xff]   ;;  %v7684_v62 = vld [vmem:[%s12318_s6 + $0xe8] sm:$0xff] }
 0x7ae   : > { %v8548_v29 = vadd.f32 %v6998_v54, %v6876_v2  ;;  %v7000_v14 = vpop.f32.mrb[2].mxu0  ;;  %v7683_v2 = vld [vmem:[%s12318_s6 + $0xe0] sm:$0xff]  ;;  %v9218_v54 = vld [vmem:[#allocation7 + $0x160] ss:$8 sps:$4 sm:$0xff]  }
 0x7af   : > { %v7167_v1 = vmax.f32 %v8546_v41, 0.0  ;;  %v7001_v45 = vpop.f32.mrb[3].mxu0  ;;  %v8527_v41 = vpack.c.bf16 %v7666_v35, %v7665_v19  ;;  %v9223_v14 = vld [vmem:[#allocation7 + $0x174] ss:$8 sps:$4 sm:$0xff]  }
 0x7b0   : > { %v7168_v22 = vmax.f32 %v8548_v29, 0.0  ;;  %v8529_v29 = vpack.c.bf16 %v7684_v62, %v7683_v2  ;;  %v9226_v45 = vld [vmem:[#allocation7 + $0x184] ss:$8 sps:$4 sm:$0xff]  }
 0x7b1   : > { %v7171_v56 = vpack.c.bf16 %v7167_v1, %v7167_v1  ;;  %8528 = vmatpush3.bf16.msra.mxu1 %v8527_v41  ;;  %v9221_v1 = vld [vmem:[#allocation7 + $0x170] ss:$8 sps:$4 sm:$0xff]  }
 0x7b2   : > { %v7172_v7 = vpack.c.bf16 %v7168_v22, %v7168_v22  ;;  %8530 = vmatprep.subr.bf16.mxu1 %v8529_v29  ;;  %v9224_v22 = vld [vmem:[#allocation7 + $0x180] ss:$8 sps:$4 sm:$0xff]  }
 0x7b4   : > { %7603 = vmatprep.mubr.bf16.mxu0 %v7172_v7  ;;  %v9229_v7 = vld [vmem:[#allocation7 + $0x194] ss:$8 sps:$4 sm:$0xff]  }
 0x7b5   : > { %7604 = vmatmul.mubr.bf16.vlgmr.msra.gmra.mrb[4].mxu0 %v7171_v56  ;;  %v9232_v56 = vld [vmem:[#allocation7 + $0x1a4] ss:$8 sps:$4 sm:$0xff]   ;;  %8532 = vmatpush3.bf16.msra.mxu1 %v8531_v58 }
 0x7b6   : > { %7613 = vmatpush1.bf16.msra.mxu0 %v9200_v8  ;;  %v9227_v8 = vld [vmem:[#allocation7 + $0x190] ss:$8 sps:$4 sm:$0xff]   ;;  %8534 = vmatprep.subr.bf16.mxu1 %v8533_v60 }
 0x7b7   : > { %7614 = vmatprep.subr.bf16.mxu0 %v9205_v12  ;;  %v9230_v12 = vld [vmem:[#allocation7 + $0x1a0] ss:$8 sps:$4 sm:$0xff]  }
 0x7ba   : > { %7615 = vmatpush1.bf16.msra.mxu0 %v9203_v59  ;;  %v9235_v59 = vld [vmem:[#allocation7 + $0x1b4] ss:$8 sps:$4 sm:$0xff]  }
 0x7bb   : > { %7616 = vmatprep.subr.bf16.mxu0 %v9208_v44  ;;  %v9233_v44 = vld [vmem:[#allocation7 + $0x1b0] ss:$8 sps:$4 sm:$0xff]  }
 0x7be   : > { %7617 = vmatpush1.bf16.msra.mxu0 %v9206_v9 }
 0x7bf   : > { %7618 = vmatprep.subr.bf16.mxu0 %v9211_v26 }
 0x7c2   : > { %7619 = vmatpush1.bf16.msra.mxu0 %v9209_v53  ;;  %v7669_v53 = vld [vmem:[%s12318_s6 + $0x70] sm:$0xff] }
 0x7c3   : > { %7620 = vmatprep.subr.bf16.mxu0 %v9214_v10  ;;  %v8535_v32 = vpack.c.bf16 %v7670_v11, %v7669_v53  ;;  %v7244_v10 = vrot.slane %v7239_v30, %v11316_v16 }
 0x7c5   : > { %8536 = vmatpush3.bf16.msra.mxu1 %v8535_v32 }
 0x7c6   : > { %7621 = vmatpush1.bf16.msra.mxu0 %v9212_v3 }
 0x7c7   : > { %7622 = vmatprep.subr.bf16.mxu0 %v9217_v48 }
 0x7ca   : > { %7623 = vmatpush1.bf16.msra.mxu0 %v9215_v40 }
 0x7cb   : > { %7624 = vmatprep.subr.bf16.mxu0 %v9220_v18 }
 0x7ce   : > { %7625 = vmatpush1.bf16.msra.mxu0 %v9218_v54 }
 0x7cf   : > { %7626 = vmatprep.subr.bf16.mxu0 %v9223_v14 }
 0x7d2   : > { %7627 = vmatpush1.bf16.msra.mxu0 %v9221_v1 }
 0x7d3   : > { %7628 = vmatprep.subr.bf16.mxu0 %v9226_v45 }
 0x7d6   : > { %7629 = vmatpush1.bf16.msra.mxu0 %v9224_v22 }
 0x7d7   : > { %7630 = vmatprep.subr.bf16.mxu0 %v9229_v7 }
 0x7da   : > { %7631 = vmatpush1.bf16.msra.mxu0 %v9227_v8 }
 0x7db   : > { %7632 = vmatprep.subr.bf16.mxu0 %v9232_v56 }
 0x7de   : > { %7633 = vmatpush1.bf16.msra.mxu0 %v9230_v12 }
 0x7df   : > { %7634 = vmatprep.subr.bf16.mxu0 %v9235_v59 }
 0x7e2   : > { %7635 = vmatpush1.bf16.msra.mxu0 %v9233_v44 }
 0x7e3   : > { %7636 = vmatprep.subr.bf16.mxu0 %v9238_v17 }
 0x7e6   : > { %7637 = vmatpush1.bf16.msra.mxu0 %v9236_v21 }
 0x7e7   : > { %7638 = vmatprep.subr.bf16.mxu0 %v9241_v38 }
 0x7ea   : > { %7639 = vmatpush1.bf16.msra.mxu0 %v9239_v55 }
 0x7eb   : > { %7640 = vmatprep.subr.bf16.mxu0 %v9244_v24 }
 0x7ee   : > { %7641 = vmatpush1.bf16.msra.mxu0 %v9242_v46 }
 0x7ef   : > { %7642 = vmatprep.subr.bf16.mxu0 %v9247_v27 }
 0x7f2   : > { %7643 = vmatpush1.bf16.msra.mxu0 %v9245_v42 }
 0x82b   : > { %v7160_v4 = vpop.f32.mrb[4].mxu1 }
 0x82c   : > { %v8549_v36 = vadd.f32 %v7160_v4, %v5550_v0  ;;  %v7162_v52 = vpop.f32.mrb[5].mxu1 }
 0x82d   : > { %v8550_v34 = vadd.f32 %v7162_v52, %v5554_v39  ;;  %v7164_v9 = vpop.f32.mrb[6].mxu1 }
 0x82e   : > { %v7169_v13 = vmax.f32 %v8549_v36, 0.0  ;;  %v7165_v20 = vpop.f32.mrb[7].mxu1 }
 0x82f   : > { %v7170_v43 = vmax.f32 %v8550_v34, 0.0 }
 0x830   : > { %v7173_v51 = vpack.c.bf16 %v7169_v13, %v7169_v13 }
 0x831   : > { %v7174_v26 = vpack.c.bf16 %v7170_v43, %v7170_v43 }
 0x833   : > { %7644 = vmatprep.mubr.bf16.mxu0 %v7174_v26 }
 0x834   : > { %7645 = vmatmul.mubr.bf16.vlgmr.msra.gmra.mrb[4].mxu0 %v7173_v51 }
 0x907   : > { %v7646_v63 = vpop.f32.mrb[4].mxu0 }
 0x908   : > { %v8551_v28 = vadd.f32 %v7646_v63, %v7244_v10  ;;  %v7648_v3 = vpop.f32.mrb[5].mxu0 }
 0x909   : > { %v8552_v61 = vadd.f32 %v7648_v3, %v7248_v50  ;;  %v7650_v49 = vpop.f32.mrb[6].mxu0 }
 0x90a   : > { %v7651_v47 = vpop.f32.mrb[7].mxu0  ;;  %v7653_v57 = vmax.f32 %v8551_v28, 0.0 }
 0x90b   : > { %v7654_v48 = vmax.f32 %v8552_v61, 0.0 }
 0x90d   : > { %7758 = vmatprep.mubr.f32.mxu1 %v7654_v48 }
 0x90e   : > { %7759 = vmatmul.mubr.f32.vlgmr.msra.gmra.mrb[8].mxu1 %v7653_v57 }
 0x9e1   : > { %v8430_v37 = vpop.f32.mrb[8].mxu1 }
 0x9e2   : > { %v8431_v40 = vpop.f32.mrb[9].mxu1 }
 0x9e3   : > { %v8432_v16 = vadd.f32 %v8431_v40, %v8430_v37 }
 0x9e5   : > { %v7761_v6 = vadd.f32 %v8432_v16, %v8356_v23 }
 0x9e7   : > { %7765 = vst.msk [vmem:[%s772_s10] sm:$0x3] %vm7764_vm2, %v7761_v6 }
 0x9e8 PF: > { %s12321_s30 = sld [smem:[#allocation15_spill]]  ;;  %s12322_s7 = sld [smem:[#allocation18_spill]] }
 0x9e9   : > { %s12323_s8 = sld [smem:[#allocation41_spill]]  ;;  %s7780_s23 = sshll.u32 %s772_s10, 4  ;;  %s7781_s23 = int_to_ptr.vmem [resolvable:$true] %s7780_s23 }
 0x9ea   : > { %s7767_s13 = scalar_lea.sflag [#allocation6], %s770_s19  ;;  %s9304_s18 = scalar_lea.vmem %s7781_s23, 32 }
 0x9eb   : > { %p9305_p1 = scmp.ne.s32.totalorder %s7781_s23, %s9304_s18  ;;  %s9435_s25 = smov [#allocation9]  }
 0x9ec   : > { %s9308_s20 = sshll.u32 %s9435_s25, 4  ;;  %s9309_s20 = int_to_ptr.vmem [resolvable:$false] %s9308_s20 }
 0x9ed   : > { %s9310_s24 = scalar_lea.vmem %s9309_s20, 64  ;;  %p9311_p11 = scmp.lt.s32.totalorder %s7781_s23, %s9309_s20 }
 0x9ee   : > { %s8358_s28 = sshll.u32 %s12321_s30, 5  ;;  %p12324_p2 = scmp.ne.s32.totalorder %s12322_s7, 0 }
 0x9ef   : > { %s12160_s27 = scalar_lea.hbm %s12323_s8, %s8358_s28  ;;  %p9312_p13 = scmp.lt.s32.totalorder %s9310_s24, %s9304_s18 }
 0x9f0   : > { %p9306_p9 = pnand %p9305_p1, %p12324_p2 }
 0x9f1   : > { %p9313_p0 = por %p9312_p13, %p9311_p11 }
 0x9f2   : > { %p9307_p10 = pneg %p9306_p9 }
 0x9f4   : > { %p9314_p4 = pnand %p9313_p0, %p9307_p10 }
 0x9f6   : > { %9317 = shalt.err (!%p9314_p4)
}
 0x9f7   : > { %s9318_s19 = scalar_lea.hbm %s12160_s27, 32  ;;  %s9322_s22 = scalar_lea.hbm %s12323_s8, 64 }
 0x9f8   : > { %p9319_p6 = scmp.ne.s32.totalorder %s12160_s27, %s9318_s19  ;;  %p9323_p3 = scmp.lt.u32.totalorder %s12160_s27, %s12323_s8 }
 0x9f9   : > { %p9324_p7 = scmp.lt.u32.totalorder %s9322_s22, %s9318_s19  ;;  %p9326_p1 = scmp.lt.u32.totalorder %s9318_s19, %s12160_s27 }
 0x9fa   : > { %p9320_p8 = pnand %p9319_p6, %p12324_p2 }
 0x9fb   : > { %p9325_p12 = por %p9324_p7, %p9323_p3 }
 0x9fc   : > { %p9321_p5 = pneg %p9320_p8 }
 0x9fd   : > { %p9327_p9 = por %p9326_p1, %p9325_p12 }
 0x9ff   : > { %p9328_p10 = pnand %p9327_p9, %p9321_p5 }
 0xa01   : > { %9331 = shalt.err (!%p9328_p10)
}
 0xa02   : > { %8585 = dma.vmem_to_hbm [thread:$0]  (%p12324_p2), %s7781_s23, 32, %s12160_s27, %s7767_s13  }
 0xa03 PF: > { %s12325_s11 = sld [smem:[#allocation13_spill]]  ;;  %s12326_s21 = sld [smem:[#allocation19_spill]] }
 0xa04   : > { %p8602_p11 = scmp.ge.s32.totalorder %s9422_s17, 2 }
 0xa09   : > { %s7792_s18 = sand.u32 1, %s12325_s11   ;;  %p12327_p13 = scmp.ne.s32.totalorder %s12326_s21, 0 }
 0xa0a   : > { %s7793_s25 = scalar_lea.sflag [#allocation6], %s7792_s18 }
 0xa0b   : > { %p8595_p0 = pnand %p8602_p11, %p12327_p13 }
 0xa0d   : > { %9381 = dma.done.wait (!%p8595_p0), %s7793_s25, 32  }
 0xa0e   : > { %9383 = vsyncadd (!%p8595_p0), %s7793_s25, 4294967264  ;;  %s28_s17 = sadd.s32 1, %s9422_s17   ;;  %s12328_s20 = sld [smem:[#allocation14_spill]] }
 0xa0f   : > { %p25_p4 = scmp.ge.s32.totalorder %s28_s17, 6   ;;  %s12329_s27 = sld [smem:[#allocation20_spill]] }
 0xa10   : > { %s12330_s7 = sld [smem:[#allocation21_spill]]  ;;  %s12331_s23 = sld [smem:[#allocation16_spill]] }
 0xa11   : > { %s12332_s13 = sld [smem:[#allocation17_spill]]  ;;  %s12333_s25 = smov %s9390_s26 }
 0xa12   : > { %s12335_s28 = smov %s9402_s29  ;;  %s12337_s30 = smov %s9414_s15 }
 0xa13   : > { %s12338_s14 = smov %s9418_s16  ;;  %27 = sbr.rel (!%p25_p4) target bundleno = 16 (0x10), region = 168 }
 0xa14   : > { %s12334_s26 = smov %s12328_s20 }
 0xa16   : > { %s12336_s29 = smov %s12330_s7  ;;  %s12339_s15 = smov %s12331_s23 }
 0xa17   : > { %s12340_s16 = smov %s12332_s13 }
 0xa1a   :  { %7798 = vsyncpa [#allocation5], 1 }
 0xa1b   :  { %7800 = vsyncpa [#allocation5 + $0x1], 1 }
 0xa1c   :  { %7801 = vsyncpa [#allocation8], 1 }
 0xa1d   :  { %7802 = vsyncpa [#allocation6], 1 }
 0xa1e   :  { %7804 = vsyncpa [#allocation6 + $0x1], 1 }

</bundles_post_ra>
